<compile_context>
chip_gen: v6e
topology: v6e:2x2x1
jax: 0.10.0
libtpu: 0.0.40
codegen_flags: <defaults>
</compile_context>

<pallas_src>
import functools

import jax
import jax.numpy as jnp
from jax.experimental import pallas as pl
from jax.experimental.pallas import tpu as pltpu


# ----------------------------------------------------------------------------
# Single fused kernel: all InvertedResidual blocks + mean/var head
# ----------------------------------------------------------------------------
def _encoder_kernel(x_ref, *refs, geoms, z_dim):
    nb = len(geoms)
    block_refs = [refs[6 * b: 6 * b + 6] for b in range(nb)]
    w_head_ref = refs[6 * nb]
    b_head_ref = refs[6 * nb + 1]
    o_ref = refs[6 * nb + 2]
    hpad_refs = refs[6 * nb + 3:]

    cur = x_ref[0]              # (H0*W0, c0) f32 pixel rows, row stride = W0
    rs = geoms[0]["Wi"]         # row stride of `cur`'s pixel-row layout
    for b in range(nb):
        g = geoms[b]
        Hi, Wi, Wp, L, k = g["Hi"], g["Wi"], g["Wp"], g["L"], g["k"]
        hidden = g["hidden"]
        w1, b1, w2, b2, w3, b3 = block_refs[b]
        hpad = hpad_refs[b]

        # ---- 1x1 expand conv (+ folded BN) + ReLU6 ------------------------
        # (for b > 0, `cur` carries a few junk rows; they are computed but
        #  never copied into the padded scratch, so they never affect output)
        h = jnp.dot(cur, w1[...], preferred_element_type=jnp.float32)
        h = jnp.clip(h + b1[...], 0.0, 6.0)

        # ---- stage interior rows into a zero-padded VMEM scratch ----------
        hpad[...] = jnp.zeros_like(hpad)          # pad=2 border stays zero
        for iy in range(Hi):
            hpad[pl.ds((iy + 2) * Wp + 2, Wi), :] = h[iy * rs: iy * rs + Wi, :]

        # ---- grouped 5x5 stride-2 conv (+ folded BN) + ReLU6 --------------
        # tap (ky,kx) for all output pixels is one stride-2 row window:
        #   rows 2*(oy*Wp + ox) + ky*Wp + kx  ->  pl.ds(ky*Wp + kx, L, stride=2)
        acc = jnp.zeros((L, hidden), jnp.float32)
        for ky in range(k):
            for kx in range(k):
                win = hpad[pl.ds(ky * Wp + kx, L, stride=2), :]
                acc = acc + jnp.dot(win, w2[ky * k + kx],
                                    preferred_element_type=jnp.float32)
        gact = jnp.clip(acc + b2[...], 0.0, 6.0)

        # ---- 1x1 project conv (+ folded BN) + ReLU6 -----------------------
        y = jnp.dot(gact, w3[...], preferred_element_type=jnp.float32)
        cur = jnp.clip(y + b3[...], 0.0, 6.0)     # (L, cout), junk rows ride along
        rs = Wp                                    # next block's pixel-row stride

    # ---- fused dense_encmean / dense_encvar head ---------------------------
    # out[j] = sum_{row r, channel c} cur[r, c] * w_head[c, r, j]; junk rows
    # have zero weight, so flatten / junk-drop happen implicitly.
    L_last, c_last = cur.shape
    acc_h = jnp.zeros((L_last, 2 * z_dim), jnp.float32)
    for c in range(c_last):
        acc_h = acc_h + cur[:, c:c + 1] * w_head_ref[c]
    out = jnp.sum(acc_h, axis=0, keepdims=True) + b_head_ref[...]
    col = jax.lax.broadcasted_iota(jnp.int32, out.shape, 1)
    o_ref[0] = jnp.where(col >= z_dim, jnp.maximum(out, 0.0), out)


# ----------------------------------------------------------------------------
# Wrapper: one pallas_call for the whole forward pass
# ----------------------------------------------------------------------------
def _const_index_map(ndim):
    zeros = (0,) * ndim
    return lambda n: zeros


def encoder_forward(params, x_nchw):
    # nn.Dropout(0.01): identity in eval mode.
    N, C, H, W = x_nchw.shape
    geoms = params["geoms"]
    z_dim = params["z_dim"]

    x = jnp.transpose(x_nchw, (0, 2, 3, 1)).reshape(N, H * W, C).astype(jnp.float32)

    inputs = [x]
    in_specs = [pl.BlockSpec((1, H * W, C), lambda n: (n, 0, 0))]
    for blk in params["blocks"]:
        for name in ("w1", "b1", "w2", "b2", "w3", "b3"):
            arr = blk[name]
            inputs.append(arr)
            in_specs.append(pl.BlockSpec(arr.shape, _const_index_map(arr.ndim)))
    inputs += [params["w_head"], params["b_head"]]
    in_specs += [pl.BlockSpec(params["w_head"].shape, _const_index_map(3)),
                 pl.BlockSpec(params["b_head"].shape, _const_index_map(2))]

    scratch_shapes = [
        pltpu.VMEM((g["Hp"] * g["Wp"], g["hidden"]), jnp.float32) for g in geoms
    ]

    out = pl.pallas_call(
        functools.partial(_encoder_kernel, geoms=geoms, z_dim=z_dim),
        out_shape=jax.ShapeDtypeStruct((N, 1, 2 * z_dim), jnp.float32),
        grid=(N,),
        in_specs=in_specs,
        out_specs=pl.BlockSpec((1, 1, 2 * z_dim), lambda n: (n, 0, 0)),
        scratch_shapes=scratch_shapes,
        compiler_params=pltpu.CompilerParams(
            dimension_semantics=("parallel",),
            vmem_limit_bytes=32 * 1024 * 1024,
        ),
    )(*inputs)

    out = out[:, 0, :]
    return out[:, :z_dim], out[:, z_dim:]


# ----------------------------------------------------------------------------
# Deterministic parameter construction (synthetic, PyTorch-shaped, BN folded)
# ----------------------------------------------------------------------------
def _bn_fold(key, c, eps=1e-5):
    k1, k2, k3, k4 = jax.random.split(key, 4)
    gamma = 1.0 + 0.1 * jax.random.normal(k1, (c,), jnp.float32)
    beta = 0.1 * jax.random.normal(k2, (c,), jnp.float32)
    run_mean = 0.1 * jax.random.normal(k3, (c,), jnp.float32)
    run_var = jnp.abs(1.0 + 0.1 * jax.random.normal(k4, (c,), jnp.float32))
    scale = gamma / jnp.sqrt(run_var + eps)
    shift = beta - run_mean * scale
    return scale, shift


def _block_geom(Hi, Wi, cin, cout, expand, k):
    hidden = cin * expand
    Hp, Wp = Hi + 4, Wi + 4                    # pad = 2 on each side
    Ho, Wo = Hi // 2, Wi // 2                  # stride-2 output
    L = (Ho - 1) * Wp + Wo                     # conv-output rows incl. junk
    return dict(Hi=Hi, Wi=Wi, Hp=Hp, Wp=Wp, Ho=Ho, Wo=Wo, L=L,
                hidden=hidden, cin=cin, cout=cout, k=k)


def _init_block(key, cin, cout, ksize=5, expand=6):
    """InvertedResidual(cin, cout, kernel_size=5, stride=2, padding=2, expand_ratio=6)."""
    hidden = cin * expand
    cpg = hidden // cin                        # channels per group (groups = cin)
    keys = jax.random.split(key, 6)
    # 1x1 expand conv: PyTorch [hidden, cin, 1, 1] -> matmul [cin, hidden]
    w1 = jax.random.normal(keys[0], (cin, hidden), jnp.float32) / jnp.sqrt(cin)
    s1, b1 = _bn_fold(keys[1], hidden)
    w1 = w1 * s1[None, :]
    # grouped 5x5 conv: PyTorch [hidden, cpg, k, k] -> per-tap block-diag [k*k, hidden, hidden]
    w2_pt = jax.random.normal(keys[2], (hidden, cpg, ksize, ksize), jnp.float32)
    w2_pt = w2_pt / jnp.sqrt(cpg * ksize * ksize)
    s2, b2 = _bn_fold(keys[3], hidden)
    w2 = jnp.zeros((ksize * ksize, hidden, hidden), jnp.float32)
    for grp in range(cin):
        blk = w2_pt[grp * cpg:(grp + 1) * cpg]                  # [out_g, in_g, k, k]
        blk = jnp.transpose(blk, (2, 3, 1, 0)).reshape(ksize * ksize, cpg, cpg)
        w2 = w2.at[:, grp * cpg:(grp + 1) * cpg, grp * cpg:(grp + 1) * cpg].set(blk)
    w2 = w2 * s2[None, None, :]
    # 1x1 project conv: PyTorch [cout, hidden, 1, 1] -> [hidden, cout]
    w3 = jax.random.normal(keys[4], (hidden, cout), jnp.float32) / jnp.sqrt(hidden)
    s3, b3 = _bn_fold(keys[5], cout)
    w3 = w3 * s3[None, :]
    return dict(w1=w1, b1=b1.reshape(1, hidden),
                w2=w2, b2=b2.reshape(1, hidden),
                w3=w3, b3=b3.reshape(1, cout))


def init_encoder(key, z_dim, image_size, channels, expand=6, ksize=5):
    n_blocks = len(channels) - 1
    keys = jax.random.split(key, n_blocks + 4)
    geoms, blocks = [], []
    Hi = Wi = image_size
    for i in range(n_blocks):
        cin, cout = channels[i], channels[i + 1]
        g = _block_geom(Hi, Wi, cin, cout, expand, ksize)
        geoms.append(g)
        blocks.append(_init_block(keys[i], cin, cout, ksize, expand))
        Hi, Wi = g["Ho"], g["Wo"]
    fs = image_size // (2 ** n_blocks)
    cl = channels[-1]
    feature_dim = cl * fs * fs
    # PyTorch-shaped heads: Linear(feature_dim, z), features in (c, h, w) order.
    w_mean = jax.random.normal(keys[-4], (feature_dim, z_dim), jnp.float32) / jnp.sqrt(feature_dim)
    b_mean = 0.1 * jax.random.normal(keys[-3], (z_dim,), jnp.float32)
    w_var = jax.random.normal(keys[-2], (feature_dim, z_dim), jnp.float32) / jnp.sqrt(feature_dim)
    b_var = 0.1 * jax.random.normal(keys[-1], (z_dim,), jnp.float32)
    # Re-pack into the kernel's conv-output row layout, zero on junk rows:
    #   w_head[c, oy*Wp_last + ox, :] = [w_mean | w_var][(c, oy, ox), :]
    gl = geoms[-1]
    w_both = jnp.concatenate(
        [w_mean.reshape(cl, fs, fs, z_dim), w_var.reshape(cl, fs, fs, z_dim)],
        axis=-1)                                               # [c, oy, ox, 2z]
    w_head = jnp.zeros((cl, gl["L"], 2 * z_dim), jnp.float32)
    for oy in range(gl["Ho"]):
        w_head = w_head.at[:, oy * gl["Wp"]: oy * gl["Wp"] + gl["Wo"], :].set(
            w_both[:, oy, :, :])
    b_head = jnp.concatenate([b_mean, b_var]).reshape(1, 2 * z_dim)
    return dict(blocks=blocks, geoms=geoms, w_head=w_head, b_head=b_head, z_dim=z_dim)


# ----------------------------------------------------------------------------
if __name__ == "__main__":
    z_dim = 8
    image_size = 16
    channels = [4, 8, 8]   # two InvertedResidual blocks, feature map 16 -> 8 -> 4
    batch = 2

    key = jax.random.PRNGKey(0)
    pkey, xkey = jax.random.split(key)
    params = init_encoder(pkey, z_dim, image_size, channels)
    x = jax.random.normal(xkey, (batch, channels[0], image_size, image_size), jnp.float32)

    fwd = jax.jit(lambda inp: encoder_forward(params, inp))
    mean, std = fwd(x)
    jax.block_until_ready((mean, std))

    assert mean.shape == (batch, z_dim), mean.shape
    assert std.shape == (batch, z_dim), std.shape
    assert bool(jnp.all(jnp.isfinite(mean))) and bool(jnp.all(jnp.isfinite(std)))
    assert bool(jnp.all(std >= 0.0))   # std = relu(dense_encvar(x))
    print("KERNEL_OK")
</pallas_src>

<mosaic_0001>
module attributes {stable_mosaic.version = 11 : i64} {
  func.func @_encoder_kernel(%arg0: i32, %arg1: memref<1x256x4xf32, #tpu.memory_space<vmem>>, %arg2: memref<4x24xf32, #tpu.memory_space<vmem>>, %arg3: memref<1x24xf32, #tpu.memory_space<vmem>>, %arg4: memref<25x24x24xf32, #tpu.memory_space<vmem>>, %arg5: memref<1x24xf32, #tpu.memory_space<vmem>>, %arg6: memref<24x8xf32, #tpu.memory_space<vmem>>, %arg7: memref<1x8xf32, #tpu.memory_space<vmem>>, %arg8: memref<8x48xf32, #tpu.memory_space<vmem>>, %arg9: memref<1x48xf32, #tpu.memory_space<vmem>>, %arg10: memref<25x48x48xf32, #tpu.memory_space<vmem>>, %arg11: memref<1x48xf32, #tpu.memory_space<vmem>>, %arg12: memref<48x8xf32, #tpu.memory_space<vmem>>, %arg13: memref<1x8xf32, #tpu.memory_space<vmem>>, %arg14: memref<8x40x16xf32, #tpu.memory_space<vmem>>, %arg15: memref<1x16xf32, #tpu.memory_space<vmem>>, %arg16: memref<1x1x16xf32, #tpu.memory_space<vmem>>, %arg17: memref<400x24xf32, #tpu.memory_space<vmem>>, %arg18: memref<144x48xf32, #tpu.memory_space<vmem>>) attributes {dimension_semantics = [#tpu.dimension_semantics<parallel>], iteration_bounds = array<i64: 2>, scalar_prefetch = 0 : i64, scratch_operands = 2 : i64, tpu.core_type = #tpu.core_type<tc>, window_params = [{transform_indices = @transform_0, window_bounds = array<i64: 1, 256, 4>}, {pipeline_mode = #tpu.pipeline_mode<synchronous>, transform_indices = @transform_1, window_bounds = array<i64: 4, 24>}, {pipeline_mode = #tpu.pipeline_mode<synchronous>, transform_indices = @transform_2, window_bounds = array<i64: 1, 24>}, {pipeline_mode = #tpu.pipeline_mode<synchronous>, transform_indices = @transform_3, window_bounds = array<i64: 25, 24, 24>}, {pipeline_mode = #tpu.pipeline_mode<synchronous>, transform_indices = @transform_4, window_bounds = array<i64: 1, 24>}, {pipeline_mode = #tpu.pipeline_mode<synchronous>, transform_indices = @transform_5, window_bounds = array<i64: 24, 8>}, {pipeline_mode = #tpu.pipeline_mode<synchronous>, transform_indices = @transform_6, window_bounds = array<i64: 1, 8>}, {pipeline_mode = #tpu.pipeline_mode<synchronous>, transform_indices = @transform_7, window_bounds = array<i64: 8, 48>}, {pipeline_mode = #tpu.pipeline_mode<synchronous>, transform_indices = @transform_8, window_bounds = array<i64: 1, 48>}, {pipeline_mode = #tpu.pipeline_mode<synchronous>, transform_indices = @transform_9, window_bounds = array<i64: 25, 48, 48>}, {pipeline_mode = #tpu.pipeline_mode<synchronous>, transform_indices = @transform_10, window_bounds = array<i64: 1, 48>}, {pipeline_mode = #tpu.pipeline_mode<synchronous>, transform_indices = @transform_11, window_bounds = array<i64: 48, 8>}, {pipeline_mode = #tpu.pipeline_mode<synchronous>, transform_indices = @transform_12, window_bounds = array<i64: 1, 8>}, {pipeline_mode = #tpu.pipeline_mode<synchronous>, transform_indices = @transform_13, window_bounds = array<i64: 8, 40, 16>}, {pipeline_mode = #tpu.pipeline_mode<synchronous>, transform_indices = @transform_14, window_bounds = array<i64: 1, 16>}, {transform_indices = @transform_15, window_bounds = array<i64: 1, 1, 16>}]} {
    %c0 = arith.constant 0 : index
    %c0_0 = arith.constant 0 : index
    %c0_1 = arith.constant 0 : index
    %0 = vector.load %arg1[%c0, %c0_0, %c0_1] : memref<1x256x4xf32, #tpu.memory_space<vmem>>, vector<1x256x4xf32>
    %1 = vector.shape_cast %0 : vector<1x256x4xf32> to vector<256x4xf32>
    %c0_2 = arith.constant 0 : index
    %c0_3 = arith.constant 0 : index
    %2 = vector.load %arg2[%c0_2, %c0_3] : memref<4x24xf32, #tpu.memory_space<vmem>>, vector<4x24xf32>
    %cst = arith.constant dense<0.000000e+00> : vector<256x24xf32>
    %3 = tpu.matmul %1, %2, %cst {dimension_numbers = #tpu.dot_dimension_numbers<[1], [0], [0], [1], [0, 0, 1, 1], [], []>} : vector<256x4xf32>, vector<4x24xf32>, vector<256x24xf32> -> vector<256x24xf32>
    %c0_4 = arith.constant 0 : index
    %c0_5 = arith.constant 0 : index
    %4 = vector.load %arg3[%c0_4, %c0_5] : memref<1x24xf32, #tpu.memory_space<vmem>>, vector<1x24xf32>
    %5 = vector.broadcast %4 : vector<1x24xf32> to vector<256x24xf32>
    %6 = arith.addf %3, %5 : vector<256x24xf32>
    %cst_6 = arith.constant 0.000000e+00 : f32
    %cst_7 = arith.constant 6.000000e+00 : f32
    %7 = vector.broadcast %cst_6 : f32 to vector<256x24xf32>
    %8 = arith.maximumf %7, %6 : vector<256x24xf32>
    %9 = vector.broadcast %cst_7 : f32 to vector<256x24xf32>
    %10 = arith.minimumf %9, %8 : vector<256x24xf32>
    %cst_8 = arith.constant 0.000000e+00 : f32
    %11 = vector.broadcast %cst_8 : f32 to vector<400x24xf32>
    %c0_9 = arith.constant 0 : index
    %c0_10 = arith.constant 0 : index
    %12 = vector.load %arg17[%c0_9, %c0_10] : memref<400x24xf32, #tpu.memory_space<vmem>>, vector<400x24xf32>
    tpu.vector_store %arg17[%c0_9, %c0_10], %11 {strides = array<i32>} : memref<400x24xf32, #tpu.memory_space<vmem>>, vector<400x24xf32>,
    %13 = vector.extract_strided_slice %10 {offsets = [0, 0], sizes = [16, 24], strides = [1, 1]} : vector<256x24xf32> to vector<16x24xf32>
    %c42 = arith.constant 42 : index
    %c0_11 = arith.constant 0 : index
    %14 = vector.load %arg17[%c42, %c0_11] : memref<400x24xf32, #tpu.memory_space<vmem>>, vector<16x24xf32>
    tpu.vector_store %arg17[%c42, %c0_11], %13 {strides = array<i32>} : memref<400x24xf32, #tpu.memory_space<vmem>>, vector<16x24xf32>,
    %15 = vector.extract_strided_slice %10 {offsets = [16, 0], sizes = [16, 24], strides = [1, 1]} : vector<256x24xf32> to vector<16x24xf32>
    %c62 = arith.constant 62 : index
    %c0_12 = arith.constant 0 : index
    %16 = vector.load %arg17[%c62, %c0_12] : memref<400x24xf32, #tpu.memory_space<vmem>>, vector<16x24xf32>
    tpu.vector_store %arg17[%c62, %c0_12], %15 {strides = array<i32>} : memref<400x24xf32, #tpu.memory_space<vmem>>, vector<16x24xf32>,
    %17 = vector.extract_strided_slice %10 {offsets = [32, 0], sizes = [16, 24], strides = [1, 1]} : vector<256x24xf32> to vector<16x24xf32>
    %c82 = arith.constant 82 : index
    %c0_13 = arith.constant 0 : index
    %18 = vector.load %arg17[%c82, %c0_13] : memref<400x24xf32, #tpu.memory_space<vmem>>, vector<16x24xf32>
    tpu.vector_store %arg17[%c82, %c0_13], %17 {strides = array<i32>} : memref<400x24xf32, #tpu.memory_space<vmem>>, vector<16x24xf32>,
    %19 = vector.extract_strided_slice %10 {offsets = [48, 0], sizes = [16, 24], strides = [1, 1]} : vector<256x24xf32> to vector<16x24xf32>
    %c102 = arith.constant 102 : index
    %c0_14 = arith.constant 0 : index
    %20 = vector.load %arg17[%c102, %c0_14] : memref<400x24xf32, #tpu.memory_space<vmem>>, vector<16x24xf32>
    tpu.vector_store %arg17[%c102, %c0_14], %19 {strides = array<i32>} : memref<400x24xf32, #tpu.memory_space<vmem>>, vector<16x24xf32>,
    %21 = vector.extract_strided_slice %10 {offsets = [64, 0], sizes = [16, 24], strides = [1, 1]} : vector<256x24xf32> to vector<16x24xf32>
    %c122 = arith.constant 122 : index
    %c0_15 = arith.constant 0 : index
    %22 = vector.load %arg17[%c122, %c0_15] : memref<400x24xf32, #tpu.memory_space<vmem>>, vector<16x24xf32>
    tpu.vector_store %arg17[%c122, %c0_15], %21 {strides = array<i32>} : memref<400x24xf32, #tpu.memory_space<vmem>>, vector<16x24xf32>,
    %23 = vector.extract_strided_slice %10 {offsets = [80, 0], sizes = [16, 24], strides = [1, 1]} : vector<256x24xf32> to vector<16x24xf32>
    %c142 = arith.constant 142 : index
    %c0_16 = arith.constant 0 : index
    %24 = vector.load %arg17[%c142, %c0_16] : memref<400x24xf32, #tpu.memory_space<vmem>>, vector<16x24xf32>
    tpu.vector_store %arg17[%c142, %c0_16], %23 {strides = array<i32>} : memref<400x24xf32, #tpu.memory_space<vmem>>, vector<16x24xf32>,
    %25 = vector.extract_strided_slice %10 {offsets = [96, 0], sizes = [16, 24], strides = [1, 1]} : vector<256x24xf32> to vector<16x24xf32>
    %c162 = arith.constant 162 : index
    %c0_17 = arith.constant 0 : index
    %26 = vector.load %arg17[%c162, %c0_17] : memref<400x24xf32, #tpu.memory_space<vmem>>, vector<16x24xf32>
    tpu.vector_store %arg17[%c162, %c0_17], %25 {strides = array<i32>} : memref<400x24xf32, #tpu.memory_space<vmem>>, vector<16x24xf32>,
    %27 = vector.extract_strided_slice %10 {offsets = [112, 0], sizes = [16, 24], strides = [1, 1]} : vector<256x24xf32> to vector<16x24xf32>
    %c182 = arith.constant 182 : index
    %c0_18 = arith.constant 0 : index
    %28 = vector.load %arg17[%c182, %c0_18] : memref<400x24xf32, #tpu.memory_space<vmem>>, vector<16x24xf32>
    tpu.vector_store %arg17[%c182, %c0_18], %27 {strides = array<i32>} : memref<400x24xf32, #tpu.memory_space<vmem>>, vector<16x24xf32>,
    %29 = vector.extract_strided_slice %10 {offsets = [128, 0], sizes = [16, 24], strides = [1, 1]} : vector<256x24xf32> to vector<16x24xf32>
    %c202 = arith.constant 202 : index
    %c0_19 = arith.constant 0 : index
    %30 = vector.load %arg17[%c202, %c0_19] : memref<400x24xf32, #tpu.memory_space<vmem>>, vector<16x24xf32>
    tpu.vector_store %arg17[%c202, %c0_19], %29 {strides = array<i32>} : memref<400x24xf32, #tpu.memory_space<vmem>>, vector<16x24xf32>,
    %31 = vector.extract_strided_slice %10 {offsets = [144, 0], sizes = [16, 24], strides = [1, 1]} : vector<256x24xf32> to vector<16x24xf32>
    %c222 = arith.constant 222 : index
    %c0_20 = arith.constant 0 : index
    %32 = vector.load %arg17[%c222, %c0_20] : memref<400x24xf32, #tpu.memory_space<vmem>>, vector<16x24xf32>
    tpu.vector_store %arg17[%c222, %c0_20], %31 {strides = array<i32>} : memref<400x24xf32, #tpu.memory_space<vmem>>, vector<16x24xf32>,
    %33 = vector.extract_strided_slice %10 {offsets = [160, 0], sizes = [16, 24], strides = [1, 1]} : vector<256x24xf32> to vector<16x24xf32>
    %c242 = arith.constant 242 : index
    %c0_21 = arith.constant 0 : index
    %34 = vector.load %arg17[%c242, %c0_21] : memref<400x24xf32, #tpu.memory_space<vmem>>, vector<16x24xf32>
    tpu.vector_store %arg17[%c242, %c0_21], %33 {strides = array<i32>} : memref<400x24xf32, #tpu.memory_space<vmem>>, vector<16x24xf32>,
    %35 = vector.extract_strided_slice %10 {offsets = [176, 0], sizes = [16, 24], strides = [1, 1]} : vector<256x24xf32> to vector<16x24xf32>
    %c262 = arith.constant 262 : index
    %c0_22 = arith.constant 0 : index
    %36 = vector.load %arg17[%c262, %c0_22] : memref<400x24xf32, #tpu.memory_space<vmem>>, vector<16x24xf32>
    tpu.vector_store %arg17[%c262, %c0_22], %35 {strides = array<i32>} : memref<400x24xf32, #tpu.memory_space<vmem>>, vector<16x24xf32>,
    %37 = vector.extract_strided_slice %10 {offsets = [192, 0], sizes = [16, 24], strides = [1, 1]} : vector<256x24xf32> to vector<16x24xf32>
    %c282 = arith.constant 282 : index
    %c0_23 = arith.constant 0 : index
    %38 = vector.load %arg17[%c282, %c0_23] : memref<400x24xf32, #tpu.memory_space<vmem>>, vector<16x24xf32>
    tpu.vector_store %arg17[%c282, %c0_23], %37 {strides = array<i32>} : memref<400x24xf32, #tpu.memory_space<vmem>>, vector<16x24xf32>,
    %39 = vector.extract_strided_slice %10 {offsets = [208, 0], sizes = [16, 24], strides = [1, 1]} : vector<256x24xf32> to vector<16x24xf32>
    %c302 = arith.constant 302 : index
    %c0_24 = arith.constant 0 : index
    %40 = vector.load %arg17[%c302, %c0_24] : memref<400x24xf32, #tpu.memory_space<vmem>>, vector<16x24xf32>
    tpu.vector_store %arg17[%c302, %c0_24], %39 {strides = array<i32>} : memref<400x24xf32, #tpu.memory_space<vmem>>, vector<16x24xf32>,
    %41 = vector.extract_strided_slice %10 {offsets = [224, 0], sizes = [16, 24], strides = [1, 1]} : vector<256x24xf32> to vector<16x24xf32>
    %c322 = arith.constant 322 : index
    %c0_25 = arith.constant 0 : index
    %42 = vector.load %arg17[%c322, %c0_25] : memref<400x24xf32, #tpu.memory_space<vmem>>, vector<16x24xf32>
    tpu.vector_store %arg17[%c322, %c0_25], %41 {strides = array<i32>} : memref<400x24xf32, #tpu.memory_space<vmem>>, vector<16x24xf32>,
    %43 = vector.extract_strided_slice %10 {offsets = [240, 0], sizes = [16, 24], strides = [1, 1]} : vector<256x24xf32> to vector<16x24xf32>
    %c342 = arith.constant 342 : index
    %c0_26 = arith.constant 0 : index
    %44 = vector.load %arg17[%c342, %c0_26] : memref<400x24xf32, #tpu.memory_space<vmem>>, vector<16x24xf32>
    tpu.vector_store %arg17[%c342, %c0_26], %43 {strides = array<i32>} : memref<400x24xf32, #tpu.memory_space<vmem>>, vector<16x24xf32>,
    %cst_27 = arith.constant 0.000000e+00 : f32
    %45 = vector.broadcast %cst_27 : f32 to vector<148x24xf32>
    %c0_28 = arith.constant 0 : index
    %c0_29 = arith.constant 0 : index
    %46 = tpu.strided_load %arg17[%c0_28, %c0_29] {strides = array<i32: 2, 1>} : memref<400x24xf32, #tpu.memory_space<vmem>>, vector<148x24xf32>
    %c0_30 = arith.constant 0 : index
    %c0_31 = arith.constant 0 : index
    %c0_32 = arith.constant 0 : index
    %47 = vector.load %arg4[%c0_30, %c0_31, %c0_32] : memref<25x24x24xf32, #tpu.memory_space<vmem>>, vector<1x24x24xf32>
    %48 = vector.shape_cast %47 : vector<1x24x24xf32> to vector<24x24xf32>
    %cst_33 = arith.constant dense<0.000000e+00> : vector<148x24xf32>
    %49 = tpu.matmul %46, %48, %cst_33 {dimension_numbers = #tpu.dot_dimension_numbers<[1], [0], [0], [1], [0, 0, 1, 1], [], []>} : vector<148x24xf32>, vector<24x24xf32>, vector<148x24xf32> -> vector<148x24xf32>
    %50 = arith.addf %45, %49 : vector<148x24xf32>
    %c1 = arith.constant 1 : index
    %c0_34 = arith.constant 0 : index
    %51 = tpu.strided_load %arg17[%c1, %c0_34] {strides = array<i32: 2, 1>} : memref<400x24xf32, #tpu.memory_space<vmem>>, vector<148x24xf32>
    %c1_35 = arith.constant 1 : index
    %c0_36 = arith.constant 0 : index
    %c0_37 = arith.constant 0 : index
    %52 = vector.load %arg4[%c1_35, %c0_36, %c0_37] : memref<25x24x24xf32, #tpu.memory_space<vmem>>, vector<1x24x24xf32>
    %53 = vector.shape_cast %52 : vector<1x24x24xf32> to vector<24x24xf32>
    %cst_38 = arith.constant dense<0.000000e+00> : vector<148x24xf32>
    %54 = tpu.matmul %51, %53, %cst_38 {dimension_numbers = #tpu.dot_dimension_numbers<[1], [0], [0], [1], [0, 0, 1, 1], [], []>} : vector<148x24xf32>, vector<24x24xf32>, vector<148x24xf32> -> vector<148x24xf32>
    %55 = arith.addf %50, %54 : vector<148x24xf32>
    %c2 = arith.constant 2 : index
    %c0_39 = arith.constant 0 : index
    %56 = tpu.strided_load %arg17[%c2, %c0_39] {strides = array<i32: 2, 1>} : memref<400x24xf32, #tpu.memory_space<vmem>>, vector<148x24xf32>
    %c2_40 = arith.constant 2 : index
    %c0_41 = arith.constant 0 : index
    %c0_42 = arith.constant 0 : index
    %57 = vector.load %arg4[%c2_40, %c0_41, %c0_42] : memref<25x24x24xf32, #tpu.memory_space<vmem>>, vector<1x24x24xf32>
    %58 = vector.shape_cast %57 : vector<1x24x24xf32> to vector<24x24xf32>
    %cst_43 = arith.constant dense<0.000000e+00> : vector<148x24xf32>
    %59 = tpu.matmul %56, %58, %cst_43 {dimension_numbers = #tpu.dot_dimension_numbers<[1], [0], [0], [1], [0, 0, 1, 1], [], []>} : vector<148x24xf32>, vector<24x24xf32>, vector<148x24xf32> -> vector<148x24xf32>
    %60 = arith.addf %55, %59 : vector<148x24xf32>
    %c3 = arith.constant 3 : index
    %c0_44 = arith.constant 0 : index
    %61 = tpu.strided_load %arg17[%c3, %c0_44] {strides = array<i32: 2, 1>} : memref<400x24xf32, #tpu.memory_space<vmem>>, vector<148x24xf32>
    %c3_45 = arith.constant 3 : index
    %c0_46 = arith.constant 0 : index
    %c0_47 = arith.constant 0 : index
    %62 = vector.load %arg4[%c3_45, %c0_46, %c0_47] : memref<25x24x24xf32, #tpu.memory_space<vmem>>, vector<1x24x24xf32>
    %63 = vector.shape_cast %62 : vector<1x24x24xf32> to vector<24x24xf32>
    %cst_48 = arith.constant dense<0.000000e+00> : vector<148x24xf32>
    %64 = tpu.matmul %61, %63, %cst_48 {dimension_numbers = #tpu.dot_dimension_numbers<[1], [0], [0], [1], [0, 0, 1, 1], [], []>} : vector<148x24xf32>, vector<24x24xf32>, vector<148x24xf32> -> vector<148x24xf32>
    %65 = arith.addf %60, %64 : vector<148x24xf32>
    %c4 = arith.constant 4 : index
    %c0_49 = arith.constant 0 : index
    %66 = tpu.strided_load %arg17[%c4, %c0_49] {strides = array<i32: 2, 1>} : memref<400x24xf32, #tpu.memory_space<vmem>>, vector<148x24xf32>
    %c4_50 = arith.constant 4 : index
    %c0_51 = arith.constant 0 : index
    %c0_52 = arith.constant 0 : index
    %67 = vector.load %arg4[%c4_50, %c0_51, %c0_52] : memref<25x24x24xf32, #tpu.memory_space<vmem>>, vector<1x24x24xf32>
    %68 = vector.shape_cast %67 : vector<1x24x24xf32> to vector<24x24xf32>
    %cst_53 = arith.constant dense<0.000000e+00> : vector<148x24xf32>
    %69 = tpu.matmul %66, %68, %cst_53 {dimension_numbers = #tpu.dot_dimension_numbers<[1], [0], [0], [1], [0, 0, 1, 1], [], []>} : vector<148x24xf32>, vector<24x24xf32>, vector<148x24xf32> -> vector<148x24xf32>
    %70 = arith.addf %65, %69 : vector<148x24xf32>
    %c20 = arith.constant 20 : index
    %c0_54 = arith.constant 0 : index
    %71 = tpu.strided_load %arg17[%c20, %c0_54] {strides = array<i32: 2, 1>} : memref<400x24xf32, #tpu.memory_space<vmem>>, vector<148x24xf32>
    %c5 = arith.constant 5 : index
    %c0_55 = arith.constant 0 : index
    %c0_56 = arith.constant 0 : index
    %72 = vector.load %arg4[%c5, %c0_55, %c0_56] : memref<25x24x24xf32, #tpu.memory_space<vmem>>, vector<1x24x24xf32>
    %73 = vector.shape_cast %72 : vector<1x24x24xf32> to vector<24x24xf32>
    %cst_57 = arith.constant dense<0.000000e+00> : vector<148x24xf32>
    %74 = tpu.matmul %71, %73, %cst_57 {dimension_numbers = #tpu.dot_dimension_numbers<[1], [0], [0], [1], [0, 0, 1, 1], [], []>} : vector<148x24xf32>, vector<24x24xf32>, vector<148x24xf32> -> vector<148x24xf32>
    %75 = arith.addf %70, %74 : vector<148x24xf32>
    %c21 = arith.constant 21 : index
    %c0_58 = arith.constant 0 : index
    %76 = tpu.strided_load %arg17[%c21, %c0_58] {strides = array<i32: 2, 1>} : memref<400x24xf32, #tpu.memory_space<vmem>>, vector<148x24xf32>
    %c6 = arith.constant 6 : index
    %c0_59 = arith.constant 0 : index
    %c0_60 = arith.constant 0 : index
    %77 = vector.load %arg4[%c6, %c0_59, %c0_60] : memref<25x24x24xf32, #tpu.memory_space<vmem>>, vector<1x24x24xf32>
    %78 = vector.shape_cast %77 : vector<1x24x24xf32> to vector<24x24xf32>
    %cst_61 = arith.constant dense<0.000000e+00> : vector<148x24xf32>
    %79 = tpu.matmul %76, %78, %cst_61 {dimension_numbers = #tpu.dot_dimension_numbers<[1], [0], [0], [1], [0, 0, 1, 1], [], []>} : vector<148x24xf32>, vector<24x24xf32>, vector<148x24xf32> -> vector<148x24xf32>
    %80 = arith.addf %75, %79 : vector<148x24xf32>
    %c22 = arith.constant 22 : index
    %c0_62 = arith.constant 0 : index
    %81 = tpu.strided_load %arg17[%c22, %c0_62] {strides = array<i32: 2, 1>} : memref<400x24xf32, #tpu.memory_space<vmem>>, vector<148x24xf32>
    %c7 = arith.constant 7 : index
    %c0_63 = arith.constant 0 : index
    %c0_64 = arith.constant 0 : index
    %82 = vector.load %arg4[%c7, %c0_63, %c0_64] : memref<25x24x24xf32, #tpu.memory_space<vmem>>, vector<1x24x24xf32>
    %83 = vector.shape_cast %82 : vector<1x24x24xf32> to vector<24x24xf32>
    %cst_65 = arith.constant dense<0.000000e+00> : vector<148x24xf32>
    %84 = tpu.matmul %81, %83, %cst_65 {dimension_numbers = #tpu.dot_dimension_numbers<[1], [0], [0], [1], [0, 0, 1, 1], [], []>} : vector<148x24xf32>, vector<24x24xf32>, vector<148x24xf32> -> vector<148x24xf32>
    %85 = arith.addf %80, %84 : vector<148x24xf32>
    %c23 = arith.constant 23 : index
    %c0_66 = arith.constant 0 : index
    %86 = tpu.strided_load %arg17[%c23, %c0_66] {strides = array<i32: 2, 1>} : memref<400x24xf32, #tpu.memory_space<vmem>>, vector<148x24xf32>
    %c8 = arith.constant 8 : index
    %c0_67 = arith.constant 0 : index
    %c0_68 = arith.constant 0 : index
    %87 = vector.load %arg4[%c8, %c0_67, %c0_68] : memref<25x24x24xf32, #tpu.memory_space<vmem>>, vector<1x24x24xf32>
    %88 = vector.shape_cast %87 : vector<1x24x24xf32> to vector<24x24xf32>
    %cst_69 = arith.constant dense<0.000000e+00> : vector<148x24xf32>
    %89 = tpu.matmul %86, %88, %cst_69 {dimension_numbers = #tpu.dot_dimension_numbers<[1], [0], [0], [1], [0, 0, 1, 1], [], []>} : vector<148x24xf32>, vector<24x24xf32>, vector<148x24xf32> -> vector<148x24xf32>
    %90 = arith.addf %85, %89 : vector<148x24xf32>
    %c24 = arith.constant 24 : index
    %c0_70 = arith.constant 0 : index
    %91 = tpu.strided_load %arg17[%c24, %c0_70] {strides = array<i32: 2, 1>} : memref<400x24xf32, #tpu.memory_space<vmem>>, vector<148x24xf32>
    %c9 = arith.constant 9 : index
    %c0_71 = arith.constant 0 : index
    %c0_72 = arith.constant 0 : index
    %92 = vector.load %arg4[%c9, %c0_71, %c0_72] : memref<25x24x24xf32, #tpu.memory_space<vmem>>, vector<1x24x24xf32>
    %93 = vector.shape_cast %92 : vector<1x24x24xf32> to vector<24x24xf32>
    %cst_73 = arith.constant dense<0.000000e+00> : vector<148x24xf32>
    %94 = tpu.matmul %91, %93, %cst_73 {dimension_numbers = #tpu.dot_dimension_numbers<[1], [0], [0], [1], [0, 0, 1, 1], [], []>} : vector<148x24xf32>, vector<24x24xf32>, vector<148x24xf32> -> vector<148x24xf32>
    %95 = arith.addf %90, %94 : vector<148x24xf32>
    %c40 = arith.constant 40 : index
    %c0_74 = arith.constant 0 : index
    %96 = tpu.strided_load %arg17[%c40, %c0_74] {strides = array<i32: 2, 1>} : memref<400x24xf32, #tpu.memory_space<vmem>>, vector<148x24xf32>
    %c10 = arith.constant 10 : index
    %c0_75 = arith.constant 0 : index
    %c0_76 = arith.constant 0 : index
    %97 = vector.load %arg4[%c10, %c0_75, %c0_76] : memref<25x24x24xf32, #tpu.memory_space<vmem>>, vector<1x24x24xf32>
    %98 = vector.shape_cast %97 : vector<1x24x24xf32> to vector<24x24xf32>
    %cst_77 = arith.constant dense<0.000000e+00> : vector<148x24xf32>
    %99 = tpu.matmul %96, %98, %cst_77 {dimension_numbers = #tpu.dot_dimension_numbers<[1], [0], [0], [1], [0, 0, 1, 1], [], []>} : vector<148x24xf32>, vector<24x24xf32>, vector<148x24xf32> -> vector<148x24xf32>
    %100 = arith.addf %95, %99 : vector<148x24xf32>
    %c41 = arith.constant 41 : index
    %c0_78 = arith.constant 0 : index
    %101 = tpu.strided_load %arg17[%c41, %c0_78] {strides = array<i32: 2, 1>} : memref<400x24xf32, #tpu.memory_space<vmem>>, vector<148x24xf32>
    %c11 = arith.constant 11 : index
    %c0_79 = arith.constant 0 : index
    %c0_80 = arith.constant 0 : index
    %102 = vector.load %arg4[%c11, %c0_79, %c0_80] : memref<25x24x24xf32, #tpu.memory_space<vmem>>, vector<1x24x24xf32>
    %103 = vector.shape_cast %102 : vector<1x24x24xf32> to vector<24x24xf32>
    %cst_81 = arith.constant dense<0.000000e+00> : vector<148x24xf32>
    %104 = tpu.matmul %101, %103, %cst_81 {dimension_numbers = #tpu.dot_dimension_numbers<[1], [0], [0], [1], [0, 0, 1, 1], [], []>} : vector<148x24xf32>, vector<24x24xf32>, vector<148x24xf32> -> vector<148x24xf32>
    %105 = arith.addf %100, %104 : vector<148x24xf32>
    %c42_82 = arith.constant 42 : index
    %c0_83 = arith.constant 0 : index
    %106 = tpu.strided_load %arg17[%c42_82, %c0_83] {strides = array<i32: 2, 1>} : memref<400x24xf32, #tpu.memory_space<vmem>>, vector<148x24xf32>
    %c12 = arith.constant 12 : index
    %c0_84 = arith.constant 0 : index
    %c0_85 = arith.constant 0 : index
    %107 = vector.load %arg4[%c12, %c0_84, %c0_85] : memref<25x24x24xf32, #tpu.memory_space<vmem>>, vector<1x24x24xf32>
    %108 = vector.shape_cast %107 : vector<1x24x24xf32> to vector<24x24xf32>
    %cst_86 = arith.constant dense<0.000000e+00> : vector<148x24xf32>
    %109 = tpu.matmul %106, %108, %cst_86 {dimension_numbers = #tpu.dot_dimension_numbers<[1], [0], [0], [1], [0, 0, 1, 1], [], []>} : vector<148x24xf32>, vector<24x24xf32>, vector<148x24xf32> -> vector<148x24xf32>
    %110 = arith.addf %105, %109 : vector<148x24xf32>
    %c43 = arith.constant 43 : index
    %c0_87 = arith.constant 0 : index
    %111 = tpu.strided_load %arg17[%c43, %c0_87] {strides = array<i32: 2, 1>} : memref<400x24xf32, #tpu.memory_space<vmem>>, vector<148x24xf32>
    %c13 = arith.constant 13 : index
    %c0_88 = arith.constant 0 : index
    %c0_89 = arith.constant 0 : index
    %112 = vector.load %arg4[%c13, %c0_88, %c0_89] : memref<25x24x24xf32, #tpu.memory_space<vmem>>, vector<1x24x24xf32>
    %113 = vector.shape_cast %112 : vector<1x24x24xf32> to vector<24x24xf32>
    %cst_90 = arith.constant dense<0.000000e+00> : vector<148x24xf32>
    %114 = tpu.matmul %111, %113, %cst_90 {dimension_numbers = #tpu.dot_dimension_numbers<[1], [0], [0], [1], [0, 0, 1, 1], [], []>} : vector<148x24xf32>, vector<24x24xf32>, vector<148x24xf32> -> vector<148x24xf32>
    %115 = arith.addf %110, %114 : vector<148x24xf32>
    %c44 = arith.constant 44 : index
    %c0_91 = arith.constant 0 : index
    %116 = tpu.strided_load %arg17[%c44, %c0_91] {strides = array<i32: 2, 1>} : memref<400x24xf32, #tpu.memory_space<vmem>>, vector<148x24xf32>
    %c14 = arith.constant 14 : index
    %c0_92 = arith.constant 0 : index
    %c0_93 = arith.constant 0 : index
    %117 = vector.load %arg4[%c14, %c0_92, %c0_93] : memref<25x24x24xf32, #tpu.memory_space<vmem>>, vector<1x24x24xf32>
    %118 = vector.shape_cast %117 : vector<1x24x24xf32> to vector<24x24xf32>
    %cst_94 = arith.constant dense<0.000000e+00> : vector<148x24xf32>
    %119 = tpu.matmul %116, %118, %cst_94 {dimension_numbers = #tpu.dot_dimension_numbers<[1], [0], [0], [1], [0, 0, 1, 1], [], []>} : vector<148x24xf32>, vector<24x24xf32>, vector<148x24xf32> -> vector<148x24xf32>
    %120 = arith.addf %115, %119 : vector<148x24xf32>
    %c60 = arith.constant 60 : index
    %c0_95 = arith.constant 0 : index
    %121 = tpu.strided_load %arg17[%c60, %c0_95] {strides = array<i32: 2, 1>} : memref<400x24xf32, #tpu.memory_space<vmem>>, vector<148x24xf32>
    %c15 = arith.constant 15 : index
    %c0_96 = arith.constant 0 : index
    %c0_97 = arith.constant 0 : index
    %122 = vector.load %arg4[%c15, %c0_96, %c0_97] : memref<25x24x24xf32, #tpu.memory_space<vmem>>, vector<1x24x24xf32>
    %123 = vector.shape_cast %122 : vector<1x24x24xf32> to vector<24x24xf32>
    %cst_98 = arith.constant dense<0.000000e+00> : vector<148x24xf32>
    %124 = tpu.matmul %121, %123, %cst_98 {dimension_numbers = #tpu.dot_dimension_numbers<[1], [0], [0], [1], [0, 0, 1, 1], [], []>} : vector<148x24xf32>, vector<24x24xf32>, vector<148x24xf32> -> vector<148x24xf32>
    %125 = arith.addf %120, %124 : vector<148x24xf32>
    %c61 = arith.constant 61 : index
    %c0_99 = arith.constant 0 : index
    %126 = tpu.strided_load %arg17[%c61, %c0_99] {strides = array<i32: 2, 1>} : memref<400x24xf32, #tpu.memory_space<vmem>>, vector<148x24xf32>
    %c16 = arith.constant 16 : index
    %c0_100 = arith.constant 0 : index
    %c0_101 = arith.constant 0 : index
    %127 = vector.load %arg4[%c16, %c0_100, %c0_101] : memref<25x24x24xf32, #tpu.memory_space<vmem>>, vector<1x24x24xf32>
    %128 = vector.shape_cast %127 : vector<1x24x24xf32> to vector<24x24xf32>
    %cst_102 = arith.constant dense<0.000000e+00> : vector<148x24xf32>
    %129 = tpu.matmul %126, %128, %cst_102 {dimension_numbers = #tpu.dot_dimension_numbers<[1], [0], [0], [1], [0, 0, 1, 1], [], []>} : vector<148x24xf32>, vector<24x24xf32>, vector<148x24xf32> -> vector<148x24xf32>
    %130 = arith.addf %125, %129 : vector<148x24xf32>
    %c62_103 = arith.constant 62 : index
    %c0_104 = arith.constant 0 : index
    %131 = tpu.strided_load %arg17[%c62_103, %c0_104] {strides = array<i32: 2, 1>} : memref<400x24xf32, #tpu.memory_space<vmem>>, vector<148x24xf32>
    %c17 = arith.constant 17 : index
    %c0_105 = arith.constant 0 : index
    %c0_106 = arith.constant 0 : index
    %132 = vector.load %arg4[%c17, %c0_105, %c0_106] : memref<25x24x24xf32, #tpu.memory_space<vmem>>, vector<1x24x24xf32>
    %133 = vector.shape_cast %132 : vector<1x24x24xf32> to vector<24x24xf32>
    %cst_107 = arith.constant dense<0.000000e+00> : vector<148x24xf32>
    %134 = tpu.matmul %131, %133, %cst_107 {dimension_numbers = #tpu.dot_dimension_numbers<[1], [0], [0], [1], [0, 0, 1, 1], [], []>} : vector<148x24xf32>, vector<24x24xf32>, vector<148x24xf32> -> vector<148x24xf32>
    %135 = arith.addf %130, %134 : vector<148x24xf32>
    %c63 = arith.constant 63 : index
    %c0_108 = arith.constant 0 : index
    %136 = tpu.strided_load %arg17[%c63, %c0_108] {strides = array<i32: 2, 1>} : memref<400x24xf32, #tpu.memory_space<vmem>>, vector<148x24xf32>
    %c18 = arith.constant 18 : index
    %c0_109 = arith.constant 0 : index
    %c0_110 = arith.constant 0 : index
    %137 = vector.load %arg4[%c18, %c0_109, %c0_110] : memref<25x24x24xf32, #tpu.memory_space<vmem>>, vector<1x24x24xf32>
    %138 = vector.shape_cast %137 : vector<1x24x24xf32> to vector<24x24xf32>
    %cst_111 = arith.constant dense<0.000000e+00> : vector<148x24xf32>
    %139 = tpu.matmul %136, %138, %cst_111 {dimension_numbers = #tpu.dot_dimension_numbers<[1], [0], [0], [1], [0, 0, 1, 1], [], []>} : vector<148x24xf32>, vector<24x24xf32>, vector<148x24xf32> -> vector<148x24xf32>
    %140 = arith.addf %135, %139 : vector<148x24xf32>
    %c64 = arith.constant 64 : index
    %c0_112 = arith.constant 0 : index
    %141 = tpu.strided_load %arg17[%c64, %c0_112] {strides = array<i32: 2, 1>} : memref<400x24xf32, #tpu.memory_space<vmem>>, vector<148x24xf32>
    %c19 = arith.constant 19 : index
    %c0_113 = arith.constant 0 : index
    %c0_114 = arith.constant 0 : index
    %142 = vector.load %arg4[%c19, %c0_113, %c0_114] : memref<25x24x24xf32, #tpu.memory_space<vmem>>, vector<1x24x24xf32>
    %143 = vector.shape_cast %142 : vector<1x24x24xf32> to vector<24x24xf32>
    %cst_115 = arith.constant dense<0.000000e+00> : vector<148x24xf32>
    %144 = tpu.matmul %141, %143, %cst_115 {dimension_numbers = #tpu.dot_dimension_numbers<[1], [0], [0], [1], [0, 0, 1, 1], [], []>} : vector<148x24xf32>, vector<24x24xf32>, vector<148x24xf32> -> vector<148x24xf32>
    %145 = arith.addf %140, %144 : vector<148x24xf32>
    %c80 = arith.constant 80 : index
    %c0_116 = arith.constant 0 : index
    %146 = tpu.strided_load %arg17[%c80, %c0_116] {strides = array<i32: 2, 1>} : memref<400x24xf32, #tpu.memory_space<vmem>>, vector<148x24xf32>
    %c20_117 = arith.constant 20 : index
    %c0_118 = arith.constant 0 : index
    %c0_119 = arith.constant 0 : index
    %147 = vector.load %arg4[%c20_117, %c0_118, %c0_119] : memref<25x24x24xf32, #tpu.memory_space<vmem>>, vector<1x24x24xf32>
    %148 = vector.shape_cast %147 : vector<1x24x24xf32> to vector<24x24xf32>
    %cst_120 = arith.constant dense<0.000000e+00> : vector<148x24xf32>
    %149 = tpu.matmul %146, %148, %cst_120 {dimension_numbers = #tpu.dot_dimension_numbers<[1], [0], [0], [1], [0, 0, 1, 1], [], []>} : vector<148x24xf32>, vector<24x24xf32>, vector<148x24xf32> -> vector<148x24xf32>
    %150 = arith.addf %145, %149 : vector<148x24xf32>
    %c81 = arith.constant 81 : index
    %c0_121 = arith.constant 0 : index
    %151 = tpu.strided_load %arg17[%c81, %c0_121] {strides = array<i32: 2, 1>} : memref<400x24xf32, #tpu.memory_space<vmem>>, vector<148x24xf32>
    %c21_122 = arith.constant 21 : index
    %c0_123 = arith.constant 0 : index
    %c0_124 = arith.constant 0 : index
    %152 = vector.load %arg4[%c21_122, %c0_123, %c0_124] : memref<25x24x24xf32, #tpu.memory_space<vmem>>, vector<1x24x24xf32>
    %153 = vector.shape_cast %152 : vector<1x24x24xf32> to vector<24x24xf32>
    %cst_125 = arith.constant dense<0.000000e+00> : vector<148x24xf32>
    %154 = tpu.matmul %151, %153, %cst_125 {dimension_numbers = #tpu.dot_dimension_numbers<[1], [0], [0], [1], [0, 0, 1, 1], [], []>} : vector<148x24xf32>, vector<24x24xf32>, vector<148x24xf32> -> vector<148x24xf32>
    %155 = arith.addf %150, %154 : vector<148x24xf32>
    %c82_126 = arith.constant 82 : index
    %c0_127 = arith.constant 0 : index
    %156 = tpu.strided_load %arg17[%c82_126, %c0_127] {strides = array<i32: 2, 1>} : memref<400x24xf32, #tpu.memory_space<vmem>>, vector<148x24xf32>
    %c22_128 = arith.constant 22 : index
    %c0_129 = arith.constant 0 : index
    %c0_130 = arith.constant 0 : index
    %157 = vector.load %arg4[%c22_128, %c0_129, %c0_130] : memref<25x24x24xf32, #tpu.memory_space<vmem>>, vector<1x24x24xf32>
    %158 = vector.shape_cast %157 : vector<1x24x24xf32> to vector<24x24xf32>
    %cst_131 = arith.constant dense<0.000000e+00> : vector<148x24xf32>
    %159 = tpu.matmul %156, %158, %cst_131 {dimension_numbers = #tpu.dot_dimension_numbers<[1], [0], [0], [1], [0, 0, 1, 1], [], []>} : vector<148x24xf32>, vector<24x24xf32>, vector<148x24xf32> -> vector<148x24xf32>
    %160 = arith.addf %155, %159 : vector<148x24xf32>
    %c83 = arith.constant 83 : index
    %c0_132 = arith.constant 0 : index
    %161 = tpu.strided_load %arg17[%c83, %c0_132] {strides = array<i32: 2, 1>} : memref<400x24xf32, #tpu.memory_space<vmem>>, vector<148x24xf32>
    %c23_133 = arith.constant 23 : index
    %c0_134 = arith.constant 0 : index
    %c0_135 = arith.constant 0 : index
    %162 = vector.load %arg4[%c23_133, %c0_134, %c0_135] : memref<25x24x24xf32, #tpu.memory_space<vmem>>, vector<1x24x24xf32>
    %163 = vector.shape_cast %162 : vector<1x24x24xf32> to vector<24x24xf32>
    %cst_136 = arith.constant dense<0.000000e+00> : vector<148x24xf32>
    %164 = tpu.matmul %161, %163, %cst_136 {dimension_numbers = #tpu.dot_dimension_numbers<[1], [0], [0], [1], [0, 0, 1, 1], [], []>} : vector<148x24xf32>, vector<24x24xf32>, vector<148x24xf32> -> vector<148x24xf32>
    %165 = arith.addf %160, %164 : vector<148x24xf32>
    %c84 = arith.constant 84 : index
    %c0_137 = arith.constant 0 : index
    %166 = tpu.strided_load %arg17[%c84, %c0_137] {strides = array<i32: 2, 1>} : memref<400x24xf32, #tpu.memory_space<vmem>>, vector<148x24xf32>
    %c24_138 = arith.constant 24 : index
    %c0_139 = arith.constant 0 : index
    %c0_140 = arith.constant 0 : index
    %167 = vector.load %arg4[%c24_138, %c0_139, %c0_140] : memref<25x24x24xf32, #tpu.memory_space<vmem>>, vector<1x24x24xf32>
    %168 = vector.shape_cast %167 : vector<1x24x24xf32> to vector<24x24xf32>
    %cst_141 = arith.constant dense<0.000000e+00> : vector<148x24xf32>
    %169 = tpu.matmul %166, %168, %cst_141 {dimension_numbers = #tpu.dot_dimension_numbers<[1], [0], [0], [1], [0, 0, 1, 1], [], []>} : vector<148x24xf32>, vector<24x24xf32>, vector<148x24xf32> -> vector<148x24xf32>
    %170 = arith.addf %165, %169 : vector<148x24xf32>
    %c0_142 = arith.constant 0 : index
    %c0_143 = arith.constant 0 : index
    %171 = vector.load %arg5[%c0_142, %c0_143] : memref<1x24xf32, #tpu.memory_space<vmem>>, vector<1x24xf32>
    %172 = vector.broadcast %171 : vector<1x24xf32> to vector<148x24xf32>
    %173 = arith.addf %170, %172 : vector<148x24xf32>
    %cst_144 = arith.constant 0.000000e+00 : f32
    %cst_145 = arith.constant 6.000000e+00 : f32
    %174 = vector.broadcast %cst_144 : f32 to vector<148x24xf32>
    %175 = arith.maximumf %174, %173 : vector<148x24xf32>
    %176 = vector.broadcast %cst_145 : f32 to vector<148x24xf32>
    %177 = arith.minimumf %176, %175 : vector<148x24xf32>
    %c0_146 = arith.constant 0 : index
    %c0_147 = arith.constant 0 : index
    %178 = vector.load %arg6[%c0_146, %c0_147] : memref<24x8xf32, #tpu.memory_space<vmem>>, vector<24x8xf32>
    %cst_148 = arith.constant dense<0.000000e+00> : vector<148x8xf32>
    %179 = tpu.matmul %177, %178, %cst_148 {dimension_numbers = #tpu.dot_dimension_numbers<[1], [0], [0], [1], [0, 0, 1, 1], [], []>} : vector<148x24xf32>, vector<24x8xf32>, vector<148x8xf32> -> vector<148x8xf32>
    %c0_149 = arith.constant 0 : index
    %c0_150 = arith.constant 0 : index
    %180 = vector.load %arg7[%c0_149, %c0_150] : memref<1x8xf32, #tpu.memory_space<vmem>>, vector<1x8xf32>
    %181 = vector.broadcast %180 : vector<1x8xf32> to vector<148x8xf32>
    %182 = arith.addf %179, %181 : vector<148x8xf32>
    %cst_151 = arith.constant 0.000000e+00 : f32
    %cst_152 = arith.constant 6.000000e+00 : f32
    %183 = vector.broadcast %cst_151 : f32 to vector<148x8xf32>
    %184 = arith.maximumf %183, %182 : vector<148x8xf32>
    %185 = vector.broadcast %cst_152 : f32 to vector<148x8xf32>
    %186 = arith.minimumf %185, %184 : vector<148x8xf32>
    %c0_153 = arith.constant 0 : index
    %c0_154 = arith.constant 0 : index
    %187 = vector.load %arg8[%c0_153, %c0_154] : memref<8x48xf32, #tpu.memory_space<vmem>>, vector<8x48xf32>
    %cst_155 = arith.constant dense<0.000000e+00> : vector<148x48xf32>
    %188 = tpu.matmul %186, %187, %cst_155 {dimension_numbers = #tpu.dot_dimension_numbers<[1], [0], [0], [1], [0, 0, 1, 1], [], []>} : vector<148x8xf32>, vector<8x48xf32>, vector<148x48xf32> -> vector<148x48xf32>
    %c0_156 = arith.constant 0 : index
    %c0_157 = arith.constant 0 : index
    %189 = vector.load %arg9[%c0_156, %c0_157] : memref<1x48xf32, #tpu.memory_space<vmem>>, vector<1x48xf32>
    %190 = vector.broadcast %189 : vector<1x48xf32> to vector<148x48xf32>
    %191 = arith.addf %188, %190 : vector<148x48xf32>
    %cst_158 = arith.constant 0.000000e+00 : f32
    %cst_159 = arith.constant 6.000000e+00 : f32
    %192 = vector.broadcast %cst_158 : f32 to vector<148x48xf32>
    %193 = arith.maximumf %192, %191 : vector<148x48xf32>
    %194 = vector.broadcast %cst_159 : f32 to vector<148x48xf32>
    %195 = arith.minimumf %194, %193 : vector<148x48xf32>
    %cst_160 = arith.constant 0.000000e+00 : f32
    %196 = vector.broadcast %cst_160 : f32 to vector<144x48xf32>
    %c0_161 = arith.constant 0 : index
    %c0_162 = arith.constant 0 : index
    %197 = vector.load %arg18[%c0_161, %c0_162] : memref<144x48xf32, #tpu.memory_space<vmem>>, vector<144x48xf32>
    tpu.vector_store %arg18[%c0_161, %c0_162], %196 {strides = array<i32>} : memref<144x48xf32, #tpu.memory_space<vmem>>, vector<144x48xf32>,
    %198 = vector.extract_strided_slice %195 {offsets = [0, 0], sizes = [8, 48], strides = [1, 1]} : vector<148x48xf32> to vector<8x48xf32>
    %c26 = arith.constant 26 : index
    %c0_163 = arith.constant 0 : index
    %199 = vector.load %arg18[%c26, %c0_163] : memref<144x48xf32, #tpu.memory_space<vmem>>, vector<8x48xf32>
    tpu.vector_store %arg18[%c26, %c0_163], %198 {strides = array<i32>} : memref<144x48xf32, #tpu.memory_space<vmem>>, vector<8x48xf32>,
    %200 = vector.extract_strided_slice %195 {offsets = [20, 0], sizes = [8, 48], strides = [1, 1]} : vector<148x48xf32> to vector<8x48xf32>
    %c38 = arith.constant 38 : index
    %c0_164 = arith.constant 0 : index
    %201 = vector.load %arg18[%c38, %c0_164] : memref<144x48xf32, #tpu.memory_space<vmem>>, vector<8x48xf32>
    tpu.vector_store %arg18[%c38, %c0_164], %200 {strides = array<i32>} : memref<144x48xf32, #tpu.memory_space<vmem>>, vector<8x48xf32>,
    %202 = vector.extract_strided_slice %195 {offsets = [40, 0], sizes = [8, 48], strides = [1, 1]} : vector<148x48xf32> to vector<8x48xf32>
    %c50 = arith.constant 50 : index
    %c0_165 = arith.constant 0 : index
    %203 = vector.load %arg18[%c50, %c0_165] : memref<144x48xf32, #tpu.memory_space<vmem>>, vector<8x48xf32>
    tpu.vector_store %arg18[%c50, %c0_165], %202 {strides = array<i32>} : memref<144x48xf32, #tpu.memory_space<vmem>>, vector<8x48xf32>,
    %204 = vector.extract_strided_slice %195 {offsets = [60, 0], sizes = [8, 48], strides = [1, 1]} : vector<148x48xf32> to vector<8x48xf32>
    %c62_166 = arith.constant 62 : index
    %c0_167 = arith.constant 0 : index
    %205 = vector.load %arg18[%c62_166, %c0_167] : memref<144x48xf32, #tpu.memory_space<vmem>>, vector<8x48xf32>
    tpu.vector_store %arg18[%c62_166, %c0_167], %204 {strides = array<i32>} : memref<144x48xf32, #tpu.memory_space<vmem>>, vector<8x48xf32>,
    %206 = vector.extract_strided_slice %195 {offsets = [80, 0], sizes = [8, 48], strides = [1, 1]} : vector<148x48xf32> to vector<8x48xf32>
    %c74 = arith.constant 74 : index
    %c0_168 = arith.constant 0 : index
    %207 = vector.load %arg18[%c74, %c0_168] : memref<144x48xf32, #tpu.memory_space<vmem>>, vector<8x48xf32>
    tpu.vector_store %arg18[%c74, %c0_168], %206 {strides = array<i32>} : memref<144x48xf32, #tpu.memory_space<vmem>>, vector<8x48xf32>,
    %208 = vector.extract_strided_slice %195 {offsets = [100, 0], sizes = [8, 48], strides = [1, 1]} : vector<148x48xf32> to vector<8x48xf32>
    %c86 = arith.constant 86 : index
    %c0_169 = arith.constant 0 : index
    %209 = vector.load %arg18[%c86, %c0_169] : memref<144x48xf32, #tpu.memory_space<vmem>>, vector<8x48xf32>
    tpu.vector_store %arg18[%c86, %c0_169], %208 {strides = array<i32>} : memref<144x48xf32, #tpu.memory_space<vmem>>, vector<8x48xf32>,
    %210 = vector.extract_strided_slice %195 {offsets = [120, 0], sizes = [8, 48], strides = [1, 1]} : vector<148x48xf32> to vector<8x48xf32>
    %c98 = arith.constant 98 : index
    %c0_170 = arith.constant 0 : index
    %211 = vector.load %arg18[%c98, %c0_170] : memref<144x48xf32, #tpu.memory_space<vmem>>, vector<8x48xf32>
    tpu.vector_store %arg18[%c98, %c0_170], %210 {strides = array<i32>} : memref<144x48xf32, #tpu.memory_space<vmem>>, vector<8x48xf32>,
    %212 = vector.extract_strided_slice %195 {offsets = [140, 0], sizes = [8, 48], strides = [1, 1]} : vector<148x48xf32> to vector<8x48xf32>
    %c110 = arith.constant 110 : index
    %c0_171 = arith.constant 0 : index
    %213 = vector.load %arg18[%c110, %c0_171] : memref<144x48xf32, #tpu.memory_space<vmem>>, vector<8x48xf32>
    tpu.vector_store %arg18[%c110, %c0_171], %212 {strides = array<i32>} : memref<144x48xf32, #tpu.memory_space<vmem>>, vector<8x48xf32>,
    %cst_172 = arith.constant 0.000000e+00 : f32
    %214 = vector.broadcast %cst_172 : f32 to vector<40x48xf32>
    %c0_173 = arith.constant 0 : index
    %c0_174 = arith.constant 0 : index
    %215 = tpu.strided_load %arg18[%c0_173, %c0_174] {strides = array<i32: 2, 1>} : memref<144x48xf32, #tpu.memory_space<vmem>>, vector<40x48xf32>
    %c0_175 = arith.constant 0 : index
    %c0_176 = arith.constant 0 : index
    %c0_177 = arith.constant 0 : index
    %216 = vector.load %arg10[%c0_175, %c0_176, %c0_177] : memref<25x48x48xf32, #tpu.memory_space<vmem>>, vector<1x48x48xf32>
    %217 = vector.shape_cast %216 : vector<1x48x48xf32> to vector<48x48xf32>
    %cst_178 = arith.constant dense<0.000000e+00> : vector<40x48xf32>
    %218 = tpu.matmul %215, %217, %cst_178 {dimension_numbers = #tpu.dot_dimension_numbers<[1], [0], [0], [1], [0, 0, 1, 1], [], []>} : vector<40x48xf32>, vector<48x48xf32>, vector<40x48xf32> -> vector<40x48xf32>
    %219 = arith.addf %214, %218 : vector<40x48xf32>
    %c1_179 = arith.constant 1 : index
    %c0_180 = arith.constant 0 : index
    %220 = tpu.strided_load %arg18[%c1_179, %c0_180] {strides = array<i32: 2, 1>} : memref<144x48xf32, #tpu.memory_space<vmem>>, vector<40x48xf32>
    %c1_181 = arith.constant 1 : index
    %c0_182 = arith.constant 0 : index
    %c0_183 = arith.constant 0 : index
    %221 = vector.load %arg10[%c1_181, %c0_182, %c0_183] : memref<25x48x48xf32, #tpu.memory_space<vmem>>, vector<1x48x48xf32>
    %222 = vector.shape_cast %221 : vector<1x48x48xf32> to vector<48x48xf32>
    %cst_184 = arith.constant dense<0.000000e+00> : vector<40x48xf32>
    %223 = tpu.matmul %220, %222, %cst_184 {dimension_numbers = #tpu.dot_dimension_numbers<[1], [0], [0], [1], [0, 0, 1, 1], [], []>} : vector<40x48xf32>, vector<48x48xf32>, vector<40x48xf32> -> vector<40x48xf32>
    %224 = arith.addf %219, %223 : vector<40x48xf32>
    %c2_185 = arith.constant 2 : index
    %c0_186 = arith.constant 0 : index
    %225 = tpu.strided_load %arg18[%c2_185, %c0_186] {strides = array<i32: 2, 1>} : memref<144x48xf32, #tpu.memory_space<vmem>>, vector<40x48xf32>
    %c2_187 = arith.constant 2 : index
    %c0_188 = arith.constant 0 : index
    %c0_189 = arith.constant 0 : index
    %226 = vector.load %arg10[%c2_187, %c0_188, %c0_189] : memref<25x48x48xf32, #tpu.memory_space<vmem>>, vector<1x48x48xf32>
    %227 = vector.shape_cast %226 : vector<1x48x48xf32> to vector<48x48xf32>
    %cst_190 = arith.constant dense<0.000000e+00> : vector<40x48xf32>
    %228 = tpu.matmul %225, %227, %cst_190 {dimension_numbers = #tpu.dot_dimension_numbers<[1], [0], [0], [1], [0, 0, 1, 1], [], []>} : vector<40x48xf32>, vector<48x48xf32>, vector<40x48xf32> -> vector<40x48xf32>
    %229 = arith.addf %224, %228 : vector<40x48xf32>
    %c3_191 = arith.constant 3 : index
    %c0_192 = arith.constant 0 : index
    %230 = tpu.strided_load %arg18[%c3_191, %c0_192] {strides = array<i32: 2, 1>} : memref<144x48xf32, #tpu.memory_space<vmem>>, vector<40x48xf32>
    %c3_193 = arith.constant 3 : index
    %c0_194 = arith.constant 0 : index
    %c0_195 = arith.constant 0 : index
    %231 = vector.load %arg10[%c3_193, %c0_194, %c0_195] : memref<25x48x48xf32, #tpu.memory_space<vmem>>, vector<1x48x48xf32>
    %232 = vector.shape_cast %231 : vector<1x48x48xf32> to vector<48x48xf32>
    %cst_196 = arith.constant dense<0.000000e+00> : vector<40x48xf32>
    %233 = tpu.matmul %230, %232, %cst_196 {dimension_numbers = #tpu.dot_dimension_numbers<[1], [0], [0], [1], [0, 0, 1, 1], [], []>} : vector<40x48xf32>, vector<48x48xf32>, vector<40x48xf32> -> vector<40x48xf32>
    %234 = arith.addf %229, %233 : vector<40x48xf32>
    %c4_197 = arith.constant 4 : index
    %c0_198 = arith.constant 0 : index
    %235 = tpu.strided_load %arg18[%c4_197, %c0_198] {strides = array<i32: 2, 1>} : memref<144x48xf32, #tpu.memory_space<vmem>>, vector<40x48xf32>
    %c4_199 = arith.constant 4 : index
    %c0_200 = arith.constant 0 : index
    %c0_201 = arith.constant 0 : index
    %236 = vector.load %arg10[%c4_199, %c0_200, %c0_201] : memref<25x48x48xf32, #tpu.memory_space<vmem>>, vector<1x48x48xf32>
    %237 = vector.shape_cast %236 : vector<1x48x48xf32> to vector<48x48xf32>
    %cst_202 = arith.constant dense<0.000000e+00> : vector<40x48xf32>
    %238 = tpu.matmul %235, %237, %cst_202 {dimension_numbers = #tpu.dot_dimension_numbers<[1], [0], [0], [1], [0, 0, 1, 1], [], []>} : vector<40x48xf32>, vector<48x48xf32>, vector<40x48xf32> -> vector<40x48xf32>
    %239 = arith.addf %234, %238 : vector<40x48xf32>
    %c12_203 = arith.constant 12 : index
    %c0_204 = arith.constant 0 : index
    %240 = tpu.strided_load %arg18[%c12_203, %c0_204] {strides = array<i32: 2, 1>} : memref<144x48xf32, #tpu.memory_space<vmem>>, vector<40x48xf32>
    %c5_205 = arith.constant 5 : index
    %c0_206 = arith.constant 0 : index
    %c0_207 = arith.constant 0 : index
    %241 = vector.load %arg10[%c5_205, %c0_206, %c0_207] : memref<25x48x48xf32, #tpu.memory_space<vmem>>, vector<1x48x48xf32>
    %242 = vector.shape_cast %241 : vector<1x48x48xf32> to vector<48x48xf32>
    %cst_208 = arith.constant dense<0.000000e+00> : vector<40x48xf32>
    %243 = tpu.matmul %240, %242, %cst_208 {dimension_numbers = #tpu.dot_dimension_numbers<[1], [0], [0], [1], [0, 0, 1, 1], [], []>} : vector<40x48xf32>, vector<48x48xf32>, vector<40x48xf32> -> vector<40x48xf32>
    %244 = arith.addf %239, %243 : vector<40x48xf32>
    %c13_209 = arith.constant 13 : index
    %c0_210 = arith.constant 0 : index
    %245 = tpu.strided_load %arg18[%c13_209, %c0_210] {strides = array<i32: 2, 1>} : memref<144x48xf32, #tpu.memory_space<vmem>>, vector<40x48xf32>
    %c6_211 = arith.constant 6 : index
    %c0_212 = arith.constant 0 : index
    %c0_213 = arith.constant 0 : index
    %246 = vector.load %arg10[%c6_211, %c0_212, %c0_213] : memref<25x48x48xf32, #tpu.memory_space<vmem>>, vector<1x48x48xf32>
    %247 = vector.shape_cast %246 : vector<1x48x48xf32> to vector<48x48xf32>
    %cst_214 = arith.constant dense<0.000000e+00> : vector<40x48xf32>
    %248 = tpu.matmul %245, %247, %cst_214 {dimension_numbers = #tpu.dot_dimension_numbers<[1], [0], [0], [1], [0, 0, 1, 1], [], []>} : vector<40x48xf32>, vector<48x48xf32>, vector<40x48xf32> -> vector<40x48xf32>
    %249 = arith.addf %244, %248 : vector<40x48xf32>
    %c14_215 = arith.constant 14 : index
    %c0_216 = arith.constant 0 : index
    %250 = tpu.strided_load %arg18[%c14_215, %c0_216] {strides = array<i32: 2, 1>} : memref<144x48xf32, #tpu.memory_space<vmem>>, vector<40x48xf32>
    %c7_217 = arith.constant 7 : index
    %c0_218 = arith.constant 0 : index
    %c0_219 = arith.constant 0 : index
    %251 = vector.load %arg10[%c7_217, %c0_218, %c0_219] : memref<25x48x48xf32, #tpu.memory_space<vmem>>, vector<1x48x48xf32>
    %252 = vector.shape_cast %251 : vector<1x48x48xf32> to vector<48x48xf32>
    %cst_220 = arith.constant dense<0.000000e+00> : vector<40x48xf32>
    %253 = tpu.matmul %250, %252, %cst_220 {dimension_numbers = #tpu.dot_dimension_numbers<[1], [0], [0], [1], [0, 0, 1, 1], [], []>} : vector<40x48xf32>, vector<48x48xf32>, vector<40x48xf32> -> vector<40x48xf32>
    %254 = arith.addf %249, %253 : vector<40x48xf32>
    %c15_221 = arith.constant 15 : index
    %c0_222 = arith.constant 0 : index
    %255 = tpu.strided_load %arg18[%c15_221, %c0_222] {strides = array<i32: 2, 1>} : memref<144x48xf32, #tpu.memory_space<vmem>>, vector<40x48xf32>
    %c8_223 = arith.constant 8 : index
    %c0_224 = arith.constant 0 : index
    %c0_225 = arith.constant 0 : index
    %256 = vector.load %arg10[%c8_223, %c0_224, %c0_225] : memref<25x48x48xf32, #tpu.memory_space<vmem>>, vector<1x48x48xf32>
    %257 = vector.shape_cast %256 : vector<1x48x48xf32> to vector<48x48xf32>
    %cst_226 = arith.constant dense<0.000000e+00> : vector<40x48xf32>
    %258 = tpu.matmul %255, %257, %cst_226 {dimension_numbers = #tpu.dot_dimension_numbers<[1], [0], [0], [1], [0, 0, 1, 1], [], []>} : vector<40x48xf32>, vector<48x48xf32>, vector<40x48xf32> -> vector<40x48xf32>
    %259 = arith.addf %254, %258 : vector<40x48xf32>
    %c16_227 = arith.constant 16 : index
    %c0_228 = arith.constant 0 : index
    %260 = tpu.strided_load %arg18[%c16_227, %c0_228] {strides = array<i32: 2, 1>} : memref<144x48xf32, #tpu.memory_space<vmem>>, vector<40x48xf32>
    %c9_229 = arith.constant 9 : index
    %c0_230 = arith.constant 0 : index
    %c0_231 = arith.constant 0 : index
    %261 = vector.load %arg10[%c9_229, %c0_230, %c0_231] : memref<25x48x48xf32, #tpu.memory_space<vmem>>, vector<1x48x48xf32>
    %262 = vector.shape_cast %261 : vector<1x48x48xf32> to vector<48x48xf32>
    %cst_232 = arith.constant dense<0.000000e+00> : vector<40x48xf32>
    %263 = tpu.matmul %260, %262, %cst_232 {dimension_numbers = #tpu.dot_dimension_numbers<[1], [0], [0], [1], [0, 0, 1, 1], [], []>} : vector<40x48xf32>, vector<48x48xf32>, vector<40x48xf32> -> vector<40x48xf32>
    %264 = arith.addf %259, %263 : vector<40x48xf32>
    %c24_233 = arith.constant 24 : index
    %c0_234 = arith.constant 0 : index
    %265 = tpu.strided_load %arg18[%c24_233, %c0_234] {strides = array<i32: 2, 1>} : memref<144x48xf32, #tpu.memory_space<vmem>>, vector<40x48xf32>
    %c10_235 = arith.constant 10 : index
    %c0_236 = arith.constant 0 : index
    %c0_237 = arith.constant 0 : index
    %266 = vector.load %arg10[%c10_235, %c0_236, %c0_237] : memref<25x48x48xf32, #tpu.memory_space<vmem>>, vector<1x48x48xf32>
    %267 = vector.shape_cast %266 : vector<1x48x48xf32> to vector<48x48xf32>
    %cst_238 = arith.constant dense<0.000000e+00> : vector<40x48xf32>
    %268 = tpu.matmul %265, %267, %cst_238 {dimension_numbers = #tpu.dot_dimension_numbers<[1], [0], [0], [1], [0, 0, 1, 1], [], []>} : vector<40x48xf32>, vector<48x48xf32>, vector<40x48xf32> -> vector<40x48xf32>
    %269 = arith.addf %264, %268 : vector<40x48xf32>
    %c25 = arith.constant 25 : index
    %c0_239 = arith.constant 0 : index
    %270 = tpu.strided_load %arg18[%c25, %c0_239] {strides = array<i32: 2, 1>} : memref<144x48xf32, #tpu.memory_space<vmem>>, vector<40x48xf32>
    %c11_240 = arith.constant 11 : index
    %c0_241 = arith.constant 0 : index
    %c0_242 = arith.constant 0 : index
    %271 = vector.load %arg10[%c11_240, %c0_241, %c0_242] : memref<25x48x48xf32, #tpu.memory_space<vmem>>, vector<1x48x48xf32>
    %272 = vector.shape_cast %271 : vector<1x48x48xf32> to vector<48x48xf32>
    %cst_243 = arith.constant dense<0.000000e+00> : vector<40x48xf32>
    %273 = tpu.matmul %270, %272, %cst_243 {dimension_numbers = #tpu.dot_dimension_numbers<[1], [0], [0], [1], [0, 0, 1, 1], [], []>} : vector<40x48xf32>, vector<48x48xf32>, vector<40x48xf32> -> vector<40x48xf32>
    %274 = arith.addf %269, %273 : vector<40x48xf32>
    %c26_244 = arith.constant 26 : index
    %c0_245 = arith.constant 0 : index
    %275 = tpu.strided_load %arg18[%c26_244, %c0_245] {strides = array<i32: 2, 1>} : memref<144x48xf32, #tpu.memory_space<vmem>>, vector<40x48xf32>
    %c12_246 = arith.constant 12 : index
    %c0_247 = arith.constant 0 : index
    %c0_248 = arith.constant 0 : index
    %276 = vector.load %arg10[%c12_246, %c0_247, %c0_248] : memref<25x48x48xf32, #tpu.memory_space<vmem>>, vector<1x48x48xf32>
    %277 = vector.shape_cast %276 : vector<1x48x48xf32> to vector<48x48xf32>
    %cst_249 = arith.constant dense<0.000000e+00> : vector<40x48xf32>
    %278 = tpu.matmul %275, %277, %cst_249 {dimension_numbers = #tpu.dot_dimension_numbers<[1], [0], [0], [1], [0, 0, 1, 1], [], []>} : vector<40x48xf32>, vector<48x48xf32>, vector<40x48xf32> -> vector<40x48xf32>
    %279 = arith.addf %274, %278 : vector<40x48xf32>
    %c27 = arith.constant 27 : index
    %c0_250 = arith.constant 0 : index
    %280 = tpu.strided_load %arg18[%c27, %c0_250] {strides = array<i32: 2, 1>} : memref<144x48xf32, #tpu.memory_space<vmem>>, vector<40x48xf32>
    %c13_251 = arith.constant 13 : index
    %c0_252 = arith.constant 0 : index
    %c0_253 = arith.constant 0 : index
    %281 = vector.load %arg10[%c13_251, %c0_252, %c0_253] : memref<25x48x48xf32, #tpu.memory_space<vmem>>, vector<1x48x48xf32>
    %282 = vector.shape_cast %281 : vector<1x48x48xf32> to vector<48x48xf32>
    %cst_254 = arith.constant dense<0.000000e+00> : vector<40x48xf32>
    %283 = tpu.matmul %280, %282, %cst_254 {dimension_numbers = #tpu.dot_dimension_numbers<[1], [0], [0], [1], [0, 0, 1, 1], [], []>} : vector<40x48xf32>, vector<48x48xf32>, vector<40x48xf32> -> vector<40x48xf32>
    %284 = arith.addf %279, %283 : vector<40x48xf32>
    %c28 = arith.constant 28 : index
    %c0_255 = arith.constant 0 : index
    %285 = tpu.strided_load %arg18[%c28, %c0_255] {strides = array<i32: 2, 1>} : memref<144x48xf32, #tpu.memory_space<vmem>>, vector<40x48xf32>
    %c14_256 = arith.constant 14 : index
    %c0_257 = arith.constant 0 : index
    %c0_258 = arith.constant 0 : index
    %286 = vector.load %arg10[%c14_256, %c0_257, %c0_258] : memref<25x48x48xf32, #tpu.memory_space<vmem>>, vector<1x48x48xf32>
    %287 = vector.shape_cast %286 : vector<1x48x48xf32> to vector<48x48xf32>
    %cst_259 = arith.constant dense<0.000000e+00> : vector<40x48xf32>
    %288 = tpu.matmul %285, %287, %cst_259 {dimension_numbers = #tpu.dot_dimension_numbers<[1], [0], [0], [1], [0, 0, 1, 1], [], []>} : vector<40x48xf32>, vector<48x48xf32>, vector<40x48xf32> -> vector<40x48xf32>
    %289 = arith.addf %284, %288 : vector<40x48xf32>
    %c36 = arith.constant 36 : index
    %c0_260 = arith.constant 0 : index
    %290 = tpu.strided_load %arg18[%c36, %c0_260] {strides = array<i32: 2, 1>} : memref<144x48xf32, #tpu.memory_space<vmem>>, vector<40x48xf32>
    %c15_261 = arith.constant 15 : index
    %c0_262 = arith.constant 0 : index
    %c0_263 = arith.constant 0 : index
    %291 = vector.load %arg10[%c15_261, %c0_262, %c0_263] : memref<25x48x48xf32, #tpu.memory_space<vmem>>, vector<1x48x48xf32>
    %292 = vector.shape_cast %291 : vector<1x48x48xf32> to vector<48x48xf32>
    %cst_264 = arith.constant dense<0.000000e+00> : vector<40x48xf32>
    %293 = tpu.matmul %290, %292, %cst_264 {dimension_numbers = #tpu.dot_dimension_numbers<[1], [0], [0], [1], [0, 0, 1, 1], [], []>} : vector<40x48xf32>, vector<48x48xf32>, vector<40x48xf32> -> vector<40x48xf32>
    %294 = arith.addf %289, %293 : vector<40x48xf32>
    %c37 = arith.constant 37 : index
    %c0_265 = arith.constant 0 : index
    %295 = tpu.strided_load %arg18[%c37, %c0_265] {strides = array<i32: 2, 1>} : memref<144x48xf32, #tpu.memory_space<vmem>>, vector<40x48xf32>
    %c16_266 = arith.constant 16 : index
    %c0_267 = arith.constant 0 : index
    %c0_268 = arith.constant 0 : index
    %296 = vector.load %arg10[%c16_266, %c0_267, %c0_268] : memref<25x48x48xf32, #tpu.memory_space<vmem>>, vector<1x48x48xf32>
    %297 = vector.shape_cast %296 : vector<1x48x48xf32> to vector<48x48xf32>
    %cst_269 = arith.constant dense<0.000000e+00> : vector<40x48xf32>
    %298 = tpu.matmul %295, %297, %cst_269 {dimension_numbers = #tpu.dot_dimension_numbers<[1], [0], [0], [1], [0, 0, 1, 1], [], []>} : vector<40x48xf32>, vector<48x48xf32>, vector<40x48xf32> -> vector<40x48xf32>
    %299 = arith.addf %294, %298 : vector<40x48xf32>
    %c38_270 = arith.constant 38 : index
    %c0_271 = arith.constant 0 : index
    %300 = tpu.strided_load %arg18[%c38_270, %c0_271] {strides = array<i32: 2, 1>} : memref<144x48xf32, #tpu.memory_space<vmem>>, vector<40x48xf32>
    %c17_272 = arith.constant 17 : index
    %c0_273 = arith.constant 0 : index
    %c0_274 = arith.constant 0 : index
    %301 = vector.load %arg10[%c17_272, %c0_273, %c0_274] : memref<25x48x48xf32, #tpu.memory_space<vmem>>, vector<1x48x48xf32>
    %302 = vector.shape_cast %301 : vector<1x48x48xf32> to vector<48x48xf32>
    %cst_275 = arith.constant dense<0.000000e+00> : vector<40x48xf32>
    %303 = tpu.matmul %300, %302, %cst_275 {dimension_numbers = #tpu.dot_dimension_numbers<[1], [0], [0], [1], [0, 0, 1, 1], [], []>} : vector<40x48xf32>, vector<48x48xf32>, vector<40x48xf32> -> vector<40x48xf32>
    %304 = arith.addf %299, %303 : vector<40x48xf32>
    %c39 = arith.constant 39 : index
    %c0_276 = arith.constant 0 : index
    %305 = tpu.strided_load %arg18[%c39, %c0_276] {strides = array<i32: 2, 1>} : memref<144x48xf32, #tpu.memory_space<vmem>>, vector<40x48xf32>
    %c18_277 = arith.constant 18 : index
    %c0_278 = arith.constant 0 : index
    %c0_279 = arith.constant 0 : index
    %306 = vector.load %arg10[%c18_277, %c0_278, %c0_279] : memref<25x48x48xf32, #tpu.memory_space<vmem>>, vector<1x48x48xf32>
    %307 = vector.shape_cast %306 : vector<1x48x48xf32> to vector<48x48xf32>
    %cst_280 = arith.constant dense<0.000000e+00> : vector<40x48xf32>
    %308 = tpu.matmul %305, %307, %cst_280 {dimension_numbers = #tpu.dot_dimension_numbers<[1], [0], [0], [1], [0, 0, 1, 1], [], []>} : vector<40x48xf32>, vector<48x48xf32>, vector<40x48xf32> -> vector<40x48xf32>
    %309 = arith.addf %304, %308 : vector<40x48xf32>
    %c40_281 = arith.constant 40 : index
    %c0_282 = arith.constant 0 : index
    %310 = tpu.strided_load %arg18[%c40_281, %c0_282] {strides = array<i32: 2, 1>} : memref<144x48xf32, #tpu.memory_space<vmem>>, vector<40x48xf32>
    %c19_283 = arith.constant 19 : index
    %c0_284 = arith.constant 0 : index
    %c0_285 = arith.constant 0 : index
    %311 = vector.load %arg10[%c19_283, %c0_284, %c0_285] : memref<25x48x48xf32, #tpu.memory_space<vmem>>, vector<1x48x48xf32>
    %312 = vector.shape_cast %311 : vector<1x48x48xf32> to vector<48x48xf32>
    %cst_286 = arith.constant dense<0.000000e+00> : vector<40x48xf32>
    %313 = tpu.matmul %310, %312, %cst_286 {dimension_numbers = #tpu.dot_dimension_numbers<[1], [0], [0], [1], [0, 0, 1, 1], [], []>} : vector<40x48xf32>, vector<48x48xf32>, vector<40x48xf32> -> vector<40x48xf32>
    %314 = arith.addf %309, %313 : vector<40x48xf32>
    %c48 = arith.constant 48 : index
    %c0_287 = arith.constant 0 : index
    %315 = tpu.strided_load %arg18[%c48, %c0_287] {strides = array<i32: 2, 1>} : memref<144x48xf32, #tpu.memory_space<vmem>>, vector<40x48xf32>
    %c20_288 = arith.constant 20 : index
    %c0_289 = arith.constant 0 : index
    %c0_290 = arith.constant 0 : index
    %316 = vector.load %arg10[%c20_288, %c0_289, %c0_290] : memref<25x48x48xf32, #tpu.memory_space<vmem>>, vector<1x48x48xf32>
    %317 = vector.shape_cast %316 : vector<1x48x48xf32> to vector<48x48xf32>
    %cst_291 = arith.constant dense<0.000000e+00> : vector<40x48xf32>
    %318 = tpu.matmul %315, %317, %cst_291 {dimension_numbers = #tpu.dot_dimension_numbers<[1], [0], [0], [1], [0, 0, 1, 1], [], []>} : vector<40x48xf32>, vector<48x48xf32>, vector<40x48xf32> -> vector<40x48xf32>
    %319 = arith.addf %314, %318 : vector<40x48xf32>
    %c49 = arith.constant 49 : index
    %c0_292 = arith.constant 0 : index
    %320 = tpu.strided_load %arg18[%c49, %c0_292] {strides = array<i32: 2, 1>} : memref<144x48xf32, #tpu.memory_space<vmem>>, vector<40x48xf32>
    %c21_293 = arith.constant 21 : index
    %c0_294 = arith.constant 0 : index
    %c0_295 = arith.constant 0 : index
    %321 = vector.load %arg10[%c21_293, %c0_294, %c0_295] : memref<25x48x48xf32, #tpu.memory_space<vmem>>, vector<1x48x48xf32>
    %322 = vector.shape_cast %321 : vector<1x48x48xf32> to vector<48x48xf32>
    %cst_296 = arith.constant dense<0.000000e+00> : vector<40x48xf32>
    %323 = tpu.matmul %320, %322, %cst_296 {dimension_numbers = #tpu.dot_dimension_numbers<[1], [0], [0], [1], [0, 0, 1, 1], [], []>} : vector<40x48xf32>, vector<48x48xf32>, vector<40x48xf32> -> vector<40x48xf32>
    %324 = arith.addf %319, %323 : vector<40x48xf32>
    %c50_297 = arith.constant 50 : index
    %c0_298 = arith.constant 0 : index
    %325 = tpu.strided_load %arg18[%c50_297, %c0_298] {strides = array<i32: 2, 1>} : memref<144x48xf32, #tpu.memory_space<vmem>>, vector<40x48xf32>
    %c22_299 = arith.constant 22 : index
    %c0_300 = arith.constant 0 : index
    %c0_301 = arith.constant 0 : index
    %326 = vector.load %arg10[%c22_299, %c0_300, %c0_301] : memref<25x48x48xf32, #tpu.memory_space<vmem>>, vector<1x48x48xf32>
    %327 = vector.shape_cast %326 : vector<1x48x48xf32> to vector<48x48xf32>
    %cst_302 = arith.constant dense<0.000000e+00> : vector<40x48xf32>
    %328 = tpu.matmul %325, %327, %cst_302 {dimension_numbers = #tpu.dot_dimension_numbers<[1], [0], [0], [1], [0, 0, 1, 1], [], []>} : vector<40x48xf32>, vector<48x48xf32>, vector<40x48xf32> -> vector<40x48xf32>
    %329 = arith.addf %324, %328 : vector<40x48xf32>
    %c51 = arith.constant 51 : index
    %c0_303 = arith.constant 0 : index
    %330 = tpu.strided_load %arg18[%c51, %c0_303] {strides = array<i32: 2, 1>} : memref<144x48xf32, #tpu.memory_space<vmem>>, vector<40x48xf32>
    %c23_304 = arith.constant 23 : index
    %c0_305 = arith.constant 0 : index
    %c0_306 = arith.constant 0 : index
    %331 = vector.load %arg10[%c23_304, %c0_305, %c0_306] : memref<25x48x48xf32, #tpu.memory_space<vmem>>, vector<1x48x48xf32>
    %332 = vector.shape_cast %331 : vector<1x48x48xf32> to vector<48x48xf32>
    %cst_307 = arith.constant dense<0.000000e+00> : vector<40x48xf32>
    %333 = tpu.matmul %330, %332, %cst_307 {dimension_numbers = #tpu.dot_dimension_numbers<[1], [0], [0], [1], [0, 0, 1, 1], [], []>} : vector<40x48xf32>, vector<48x48xf32>, vector<40x48xf32> -> vector<40x48xf32>
    %334 = arith.addf %329, %333 : vector<40x48xf32>
    %c52 = arith.constant 52 : index
    %c0_308 = arith.constant 0 : index
    %335 = tpu.strided_load %arg18[%c52, %c0_308] {strides = array<i32: 2, 1>} : memref<144x48xf32, #tpu.memory_space<vmem>>, vector<40x48xf32>
    %c24_309 = arith.constant 24 : index
    %c0_310 = arith.constant 0 : index
    %c0_311 = arith.constant 0 : index
    %336 = vector.load %arg10[%c24_309, %c0_310, %c0_311] : memref<25x48x48xf32, #tpu.memory_space<vmem>>, vector<1x48x48xf32>
    %337 = vector.shape_cast %336 : vector<1x48x48xf32> to vector<48x48xf32>
    %cst_312 = arith.constant dense<0.000000e+00> : vector<40x48xf32>
    %338 = tpu.matmul %335, %337, %cst_312 {dimension_numbers = #tpu.dot_dimension_numbers<[1], [0], [0], [1], [0, 0, 1, 1], [], []>} : vector<40x48xf32>, vector<48x48xf32>, vector<40x48xf32> -> vector<40x48xf32>
    %339 = arith.addf %334, %338 : vector<40x48xf32>
    %c0_313 = arith.constant 0 : index
    %c0_314 = arith.constant 0 : index
    %340 = vector.load %arg11[%c0_313, %c0_314] : memref<1x48xf32, #tpu.memory_space<vmem>>, vector<1x48xf32>
    %341 = vector.broadcast %340 : vector<1x48xf32> to vector<40x48xf32>
    %342 = arith.addf %339, %341 : vector<40x48xf32>
    %cst_315 = arith.constant 0.000000e+00 : f32
    %cst_316 = arith.constant 6.000000e+00 : f32
    %343 = vector.broadcast %cst_315 : f32 to vector<40x48xf32>
    %344 = arith.maximumf %343, %342 : vector<40x48xf32>
    %345 = vector.broadcast %cst_316 : f32 to vector<40x48xf32>
    %346 = arith.minimumf %345, %344 : vector<40x48xf32>
    %c0_317 = arith.constant 0 : index
    %c0_318 = arith.constant 0 : index
    %347 = vector.load %arg12[%c0_317, %c0_318] : memref<48x8xf32, #tpu.memory_space<vmem>>, vector<48x8xf32>
    %cst_319 = arith.constant dense<0.000000e+00> : vector<40x8xf32>
    %348 = tpu.matmul %346, %347, %cst_319 {dimension_numbers = #tpu.dot_dimension_numbers<[1], [0], [0], [1], [0, 0, 1, 1], [], []>} : vector<40x48xf32>, vector<48x8xf32>, vector<40x8xf32> -> vector<40x8xf32>
    %c0_320 = arith.constant 0 : index
    %c0_321 = arith.constant 0 : index
    %349 = vector.load %arg13[%c0_320, %c0_321] : memref<1x8xf32, #tpu.memory_space<vmem>>, vector<1x8xf32>
    %350 = vector.broadcast %349 : vector<1x8xf32> to vector<40x8xf32>
    %351 = arith.addf %348, %350 : vector<40x8xf32>
    %cst_322 = arith.constant 0.000000e+00 : f32
    %cst_323 = arith.constant 6.000000e+00 : f32
    %352 = vector.broadcast %cst_322 : f32 to vector<40x8xf32>
    %353 = arith.maximumf %352, %351 : vector<40x8xf32>
    %354 = vector.broadcast %cst_323 : f32 to vector<40x8xf32>
    %355 = arith.minimumf %354, %353 : vector<40x8xf32>
    %cst_324 = arith.constant 0.000000e+00 : f32
    %356 = vector.broadcast %cst_324 : f32 to vector<40x16xf32>
    %357 = vector.extract_strided_slice %355 {offsets = [0, 0], sizes = [40, 1], strides = [1, 1]} : vector<40x8xf32> to vector<40x1xf32>
    %c0_325 = arith.constant 0 : index
    %c0_326 = arith.constant 0 : index
    %c0_327 = arith.constant 0 : index
    %358 = vector.load %arg14[%c0_325, %c0_326, %c0_327] : memref<8x40x16xf32, #tpu.memory_space<vmem>>, vector<1x40x16xf32>
    %359 = vector.shape_cast %358 : vector<1x40x16xf32> to vector<40x16xf32>
    %360 = vector.broadcast %357 : vector<40x1xf32> to vector<40x16xf32>
    %361 = arith.mulf %360, %359 : vector<40x16xf32>
    %362 = arith.addf %356, %361 : vector<40x16xf32>
    %363 = vector.extract_strided_slice %355 {offsets = [0, 1], sizes = [40, 1], strides = [1, 1]} : vector<40x8xf32> to vector<40x1xf32>
    %c1_328 = arith.constant 1 : index
    %c0_329 = arith.constant 0 : index
    %c0_330 = arith.constant 0 : index
    %364 = vector.load %arg14[%c1_328, %c0_329, %c0_330] : memref<8x40x16xf32, #tpu.memory_space<vmem>>, vector<1x40x16xf32>
    %365 = vector.shape_cast %364 : vector<1x40x16xf32> to vector<40x16xf32>
    %366 = vector.broadcast %363 : vector<40x1xf32> to vector<40x16xf32>
    %367 = arith.mulf %366, %365 : vector<40x16xf32>
    %368 = arith.addf %362, %367 : vector<40x16xf32>
    %369 = vector.extract_strided_slice %355 {offsets = [0, 2], sizes = [40, 1], strides = [1, 1]} : vector<40x8xf32> to vector<40x1xf32>
    %c2_331 = arith.constant 2 : index
    %c0_332 = arith.constant 0 : index
    %c0_333 = arith.constant 0 : index
    %370 = vector.load %arg14[%c2_331, %c0_332, %c0_333] : memref<8x40x16xf32, #tpu.memory_space<vmem>>, vector<1x40x16xf32>
    %371 = vector.shape_cast %370 : vector<1x40x16xf32> to vector<40x16xf32>
    %372 = vector.broadcast %369 : vector<40x1xf32> to vector<40x16xf32>
    %373 = arith.mulf %372, %371 : vector<40x16xf32>
    %374 = arith.addf %368, %373 : vector<40x16xf32>
    %375 = vector.extract_strided_slice %355 {offsets = [0, 3], sizes = [40, 1], strides = [1, 1]} : vector<40x8xf32> to vector<40x1xf32>
    %c3_334 = arith.constant 3 : index
    %c0_335 = arith.constant 0 : index
    %c0_336 = arith.constant 0 : index
    %376 = vector.load %arg14[%c3_334, %c0_335, %c0_336] : memref<8x40x16xf32, #tpu.memory_space<vmem>>, vector<1x40x16xf32>
    %377 = vector.shape_cast %376 : vector<1x40x16xf32> to vector<40x16xf32>
    %378 = vector.broadcast %375 : vector<40x1xf32> to vector<40x16xf32>
    %379 = arith.mulf %378, %377 : vector<40x16xf32>
    %380 = arith.addf %374, %379 : vector<40x16xf32>
    %381 = vector.extract_strided_slice %355 {offsets = [0, 4], sizes = [40, 1], strides = [1, 1]} : vector<40x8xf32> to vector<40x1xf32>
    %c4_337 = arith.constant 4 : index
    %c0_338 = arith.constant 0 : index
    %c0_339 = arith.constant 0 : index
    %382 = vector.load %arg14[%c4_337, %c0_338, %c0_339] : memref<8x40x16xf32, #tpu.memory_space<vmem>>, vector<1x40x16xf32>
    %383 = vector.shape_cast %382 : vector<1x40x16xf32> to vector<40x16xf32>
    %384 = vector.broadcast %381 : vector<40x1xf32> to vector<40x16xf32>
    %385 = arith.mulf %384, %383 : vector<40x16xf32>
    %386 = arith.addf %380, %385 : vector<40x16xf32>
    %387 = vector.extract_strided_slice %355 {offsets = [0, 5], sizes = [40, 1], strides = [1, 1]} : vector<40x8xf32> to vector<40x1xf32>
    %c5_340 = arith.constant 5 : index
    %c0_341 = arith.constant 0 : index
    %c0_342 = arith.constant 0 : index
    %388 = vector.load %arg14[%c5_340, %c0_341, %c0_342] : memref<8x40x16xf32, #tpu.memory_space<vmem>>, vector<1x40x16xf32>
    %389 = vector.shape_cast %388 : vector<1x40x16xf32> to vector<40x16xf32>
    %390 = vector.broadcast %387 : vector<40x1xf32> to vector<40x16xf32>
    %391 = arith.mulf %390, %389 : vector<40x16xf32>
    %392 = arith.addf %386, %391 : vector<40x16xf32>
    %393 = vector.extract_strided_slice %355 {offsets = [0, 6], sizes = [40, 1], strides = [1, 1]} : vector<40x8xf32> to vector<40x1xf32>
    %c6_343 = arith.constant 6 : index
    %c0_344 = arith.constant 0 : index
    %c0_345 = arith.constant 0 : index
    %394 = vector.load %arg14[%c6_343, %c0_344, %c0_345] : memref<8x40x16xf32, #tpu.memory_space<vmem>>, vector<1x40x16xf32>
    %395 = vector.shape_cast %394 : vector<1x40x16xf32> to vector<40x16xf32>
    %396 = vector.broadcast %393 : vector<40x1xf32> to vector<40x16xf32>
    %397 = arith.mulf %396, %395 : vector<40x16xf32>
    %398 = arith.addf %392, %397 : vector<40x16xf32>
    %399 = vector.extract_strided_slice %355 {offsets = [0, 7], sizes = [40, 1], strides = [1, 1]} : vector<40x8xf32> to vector<40x1xf32>
    %c7_346 = arith.constant 7 : index
    %c0_347 = arith.constant 0 : index
    %c0_348 = arith.constant 0 : index
    %400 = vector.load %arg14[%c7_346, %c0_347, %c0_348] : memref<8x40x16xf32, #tpu.memory_space<vmem>>, vector<1x40x16xf32>
    %401 = vector.shape_cast %400 : vector<1x40x16xf32> to vector<40x16xf32>
    %402 = vector.broadcast %399 : vector<40x1xf32> to vector<40x16xf32>
    %403 = arith.mulf %402, %401 : vector<40x16xf32>
    %404 = arith.addf %398, %403 : vector<40x16xf32>
    %cst_349 = arith.constant dense<0.000000e+00> : vector<16xf32>
    %405 = vector.multi_reduction <add>, %404, %cst_349 [0] : vector<40x16xf32> to vector<16xf32>
    %406 = vector.shape_cast %405 : vector<16xf32> to vector<1x16xf32>
    %c0_350 = arith.constant 0 : index
    %c0_351 = arith.constant 0 : index
    %407 = vector.load %arg15[%c0_350, %c0_351] : memref<1x16xf32, #tpu.memory_space<vmem>>, vector<1x16xf32>
    %408 = arith.addf %406, %407 : vector<1x16xf32>
    %409 = tpu.iota {dimensions = array<i32: 1>} : vector<1x16xi32>
    %c8_i32 = arith.constant 8 : i32
    %410 = vector.broadcast %c8_i32 : i32 to vector<1x16xi32>
    %411 = arith.cmpi sge, %409, %410 : vector<1x16xi32>
    %cst_352 = arith.constant 0.000000e+00 : f32
    %412 = vector.broadcast %cst_352 : f32 to vector<1x16xf32>
    %413 = arith.maximumf %408, %412 : vector<1x16xf32>
    %414 = arith.select %411, %413, %408 : vector<1x16xi1>, vector<1x16xf32>
    %c0_353 = arith.constant 0 : index
    %c0_354 = arith.constant 0 : index
    %c0_355 = arith.constant 0 : index
    %415 = vector.load %arg16[%c0_353, %c0_354, %c0_355] : memref<1x1x16xf32, #tpu.memory_space<vmem>>, vector<1x1x16xf32>
    %416 = vector.shape_cast %415 : vector<1x1x16xf32> to vector<1x16xf32>
    %417 = vector.shape_cast %414 : vector<1x16xf32> to vector<1x1x16xf32>
    tpu.vector_store %arg16[%c0_353, %c0_354, %c0_355], %417 {strides = array<i32>} : memref<1x1x16xf32, #tpu.memory_space<vmem>>, vector<1x1x16xf32>,
    return
  }
  func.func @transform_0(%arg0: i32) -> (i32, i32, i32) {
    %c0_i32 = arith.constant 0 : i32
    %c0_i32_0 = arith.constant 0 : i32
    %c0_i32_1 = arith.constant 0 : i32
    return %arg0, %c0_i32, %c0_i32_0 : i32, i32, i32
  }
  func.func @transform_1(%arg0: i32) -> (i32, i32) {
    %c0_i32 = arith.constant 0 : i32
    %c0_i32_0 = arith.constant 0 : i32
    %c0_i32_1 = arith.constant 0 : i32
    return %c0_i32, %c0_i32_0 : i32, i32
  }
  func.func @transform_2(%arg0: i32) -> (i32, i32) {
    %c0_i32 = arith.constant 0 : i32
    %c0_i32_0 = arith.constant 0 : i32
    %c0_i32_1 = arith.constant 0 : i32
    return %c0_i32, %c0_i32_0 : i32, i32
  }
  func.func @transform_3(%arg0: i32) -> (i32, i32, i32) {
    %c0_i32 = arith.constant 0 : i32
    %c0_i32_0 = arith.constant 0 : i32
    %c0_i32_1 = arith.constant 0 : i32
    %c0_i32_2 = arith.constant 0 : i32
    return %c0_i32, %c0_i32_0, %c0_i32_1 : i32, i32, i32
  }
  func.func @transform_4(%arg0: i32) -> (i32, i32) {
    %c0_i32 = arith.constant 0 : i32
    %c0_i32_0 = arith.constant 0 : i32
    %c0_i32_1 = arith.constant 0 : i32
    return %c0_i32, %c0_i32_0 : i32, i32
  }
  func.func @transform_5(%arg0: i32) -> (i32, i32) {
    %c0_i32 = arith.constant 0 : i32
    %c0_i32_0 = arith.constant 0 : i32
    %c0_i32_1 = arith.constant 0 : i32
    return %c0_i32, %c0_i32_0 : i32, i32
  }
  func.func @transform_6(%arg0: i32) -> (i32, i32) {
    %c0_i32 = arith.constant 0 : i32
    %c0_i32_0 = arith.constant 0 : i32
    %c0_i32_1 = arith.constant 0 : i32
    return %c0_i32, %c0_i32_0 : i32, i32
  }
  func.func @transform_7(%arg0: i32) -> (i32, i32) {
    %c0_i32 = arith.constant 0 : i32
    %c0_i32_0 = arith.constant 0 : i32
    %c0_i32_1 = arith.constant 0 : i32
    return %c0_i32, %c0_i32_0 : i32, i32
  }
  func.func @transform_8(%arg0: i32) -> (i32, i32) {
    %c0_i32 = arith.constant 0 : i32
    %c0_i32_0 = arith.constant 0 : i32
    %c0_i32_1 = arith.constant 0 : i32
    return %c0_i32, %c0_i32_0 : i32, i32
  }
  func.func @transform_9(%arg0: i32) -> (i32, i32, i32) {
    %c0_i32 = arith.constant 0 : i32
    %c0_i32_0 = arith.constant 0 : i32
    %c0_i32_1 = arith.constant 0 : i32
    %c0_i32_2 = arith.constant 0 : i32
    return %c0_i32, %c0_i32_0, %c0_i32_1 : i32, i32, i32
  }
  func.func @transform_10(%arg0: i32) -> (i32, i32) {
    %c0_i32 = arith.constant 0 : i32
    %c0_i32_0 = arith.constant 0 : i32
    %c0_i32_1 = arith.constant 0 : i32
    return %c0_i32, %c0_i32_0 : i32, i32
  }
  func.func @transform_11(%arg0: i32) -> (i32, i32) {
    %c0_i32 = arith.constant 0 : i32
    %c0_i32_0 = arith.constant 0 : i32
    %c0_i32_1 = arith.constant 0 : i32
    return %c0_i32, %c0_i32_0 : i32, i32
  }
  func.func @transform_12(%arg0: i32) -> (i32, i32) {
    %c0_i32 = arith.constant 0 : i32
    %c0_i32_0 = arith.constant 0 : i32
    %c0_i32_1 = arith.constant 0 : i32
    return %c0_i32, %c0_i32_0 : i32, i32
  }
  func.func @transform_13(%arg0: i32) -> (i32, i32, i32) {
    %c0_i32 = arith.constant 0 : i32
    %c0_i32_0 = arith.constant 0 : i32
    %c0_i32_1 = arith.constant 0 : i32
    %c0_i32_2 = arith.constant 0 : i32
    return %c0_i32, %c0_i32_0, %c0_i32_1 : i32, i32, i32
  }
  func.func @transform_14(%arg0: i32) -> (i32, i32) {
    %c0_i32 = arith.constant 0 : i32
    %c0_i32_0 = arith.constant 0 : i32
    %c0_i32_1 = arith.constant 0 : i32
    return %c0_i32, %c0_i32_0 : i32, i32
  }
  func.func @transform_15(%arg0: i32) -> (i32, i32, i32) {
    %c0_i32 = arith.constant 0 : i32
    %c0_i32_0 = arith.constant 0 : i32
    %c0_i32_1 = arith.constant 0 : i32
    return %arg0, %c0_i32, %c0_i32_0 : i32, i32, i32
  }
}

</mosaic_0001>

<bundles_post_ra>
// kernel: _lambda_.1
= control target key start
LH: loop header
LB: loop body
LE: loop exit
PB: predicated region body
PF: predicated region fallthrough
CT: control target
= control target key end

     0   :  { %s20612_s0 = inlined_call_operand.vmem [shape: f32[2,256,4], index: 0, kind: input, shape index: {}]   ;;  %s20613_s1 = inlined_call_operand.hbm [shape: f32[4,24], index: 1, kind: input, shape index: {}]   ;;  %s20614_s2 = inlined_call_operand.hbm [shape: f32[1,24], index: 2, kind: input, shape index: {}]   ;;  %s20615_s3 = inlined_call_operand.vmem [shape: f32[25,24,24], index: 3, kind: input, shape index: {}]   ;;  %s20616_s4 = inlined_call_operand.hbm [shape: f32[1,24], index: 4, kind: input, shape index: {}]   ;;  %s20617_s5 = inlined_call_operand.hbm [shape: f32[24,8], index: 5, kind: input, shape index: {}]   ;;  %s20618_s6 = inlined_call_operand.hbm [shape: f32[1,8], index: 6, kind: input, shape index: {}]   ;;  %s20619_s7 = inlined_call_operand.vmem [shape: f32[8,48], index: 7, kind: input, shape index: {}]   ;;  %s20620_s8 = inlined_call_operand.hbm [shape: f32[1,48], index: 8, kind: input, shape index: {}]   ;;  %s20621_s9 = inlined_call_operand.hbm [shape: f32[25,48,48], index: 9, kind: input, shape index: {}]   ;;  %s20622_s10 = inlined_call_operand.hbm [shape: f32[1,48], index: 10, kind: input, shape index: {}]   ;;  %s20623_s11 = inlined_call_operand.vmem [shape: f32[48,8], index: 11, kind: input, shape index: {}]   ;;  %s20624_s12 = inlined_call_operand.vmem [shape: f32[1,8], index: 12, kind: input, shape index: {}]   ;;  %s20625_s13 = inlined_call_operand.hbm [shape: f32[8,40,16], index: 13, kind: input, shape index: {}]   ;;  %s20626_s14 = inlined_call_operand.vmem [shape: f32[1,16], index: 14, kind: input, shape index: {}]   ;;  %s20627_s15 = inlined_call_operand.vmem [shape: f32[2,1,16], index: 15, kind: output, shape index: {}]  }
   0x1   :  { %20632 = sst [smem:[#allocation23_spill]] %s20614_s2 }
   0x2   :  { %20 = vsyncpa [#allocation5], 0 }
   0x3   :  { %21 = vsyncpa [#allocation7], 0 }
   0x4   :  { %22 = vsyncpa [#allocation10], 0 }
   0x5   :  { %23 = vsyncpa [#allocation13], 0 }
   0x6   :  { %24 = vsyncpa [#allocation16], 0  ;;  %s16893_s18 = smov 0  }
   0x7 LB: > { %s16792_s19 = smov [#allocation6]   ;;  %s16899_s21 = sadd.s32 4294967295, %s16790_s18   ;;  %s16790_s18 = sphi %s16893_s18, %s30_s18  }
   0x8   : > { %s405_s20 = sshll.u32 %s16792_s19, 4  ;;  %p12233_p0 = scmp.ge.s32.totalorder %s16790_s18, 1  ;;  %s406_s20 = int_to_ptr.vmem [resolvable:$true] %s405_s20 }
   0x9   : > { %p381_p1 = scmp.lt.s32.totalorder %s16790_s18, 3  ;;  %p20630_p2 = scmp.eq.s32.totalorder %s16899_s21, 0 }
   0xa   : > { %s16793_s23 = smov [#allocation9]   ;;  %s16794_s26 = smov [#allocation12]  }
   0xb   : > { %p16904_p3 = pnand %p12233_p0, %p381_p1  ;;  %s429_s24 = sshll.u32 %s16793_s23, 4  ;;  %s16910_s24 = int_to_ptr.vmem [resolvable:$true] %s429_s24 }
   0xc   : > { %s457_s27 = sshll.u32 %s16794_s26, 4  ;;  %s16795_s28 = smov [#allocation15]   ;;  %s16918_s27 = int_to_ptr.vmem [resolvable:$true] %s457_s27 }
   0xd   : > { %s20633_s22 = scalar_select %p16904_p3, 1, 0 }
   0xe   : > { %p16415_p4 = pneg %p16904_p3  ;;  %s16920_s29 = sshll.u32 %s16795_s28, 4  ;;  %s482_s29 = int_to_ptr.vmem [resolvable:$true] %s16920_s29 }
   0xf   : > { %s16541_s16 = scalar_lea.vmem %s406_s20, 16  ;;  %s16548_s17 = scalar_lea.vmem %s406_s20, 32 }
  0x10   : > { %p16914_p5 = pnand %p20630_p2, %p16415_p4  ;;  %p16542_p7 = scmp.ne.s32.totalorder %s406_s20, %s16541_s16 }
  0x11   : > { %p16549_p10 = scmp.lt.s32.totalorder %s406_s20, %s406_s20  ;;  %p16550_p11 = scmp.lt.s32.totalorder %s16548_s17, %s16541_s16 }
  0x12   : > { %p16924_p6 = pneg %p16914_p5 }
  0x13   : > { %p16551_p12 = por %p16550_p11, %p16549_p10 }
  0x14   : > { %p16544_p8 = pnand %p16542_p7, %p16924_p6 }
  0x16   : > { %p16545_p9 = pneg %p16544_p8 }
  0x18   : > { %p16552_p13 = pnand %p16551_p12, %p16545_p9 }
  0x1a   : > { %16555 = shalt.err (!%p16552_p13)
}
  0x1b   : > { %s20636_s2 = sld [smem:[#allocation23_spill]]  ;;  %s16567_s26 = scalar_lea.vmem %s16910_s24, 384 }
  0x1c   : > { %p16568_p0 = scmp.ne.s32.totalorder %s16910_s24, %s16567_s26  ;;  %p16575_p7 = scmp.lt.s32.totalorder %s16910_s24, %s16910_s24 }
  0x1d   : > { %p16576_p8 = scmp.lt.s32.totalorder %s16567_s26, %s16567_s26 }
  0x1e   : > { %p16570_p1 = pnand %p16568_p0, %p16924_p6 }
  0x1f   : > { %p16577_p9 = por %p16576_p8, %p16575_p7 }
  0x20   : > { %p16571_p4 = pneg %p16570_p1 }
  0x21   : > { %16421 = dma.hbm_to_vmem [thread:$0]  (!%p16914_p5), %s20636_s2, 16, %s406_s20, [#allocation7]  }
  0x22   : > { %p16578_p10 = pnand %p16577_p9, %p16571_p4 }
  0x24   : > { %16581 = shalt.err (!%p16578_p10)
}
  0x25   : > { %s20628_s28 = smov 128   ;;  %s16797_s20 = smov 8  }
  0x26   : > { %16427 = dma.hbm_to_vmem [thread:$0]  (!%p16914_p5), %s20617_s5, 384, %s16910_s24, [#allocation10], %s20628_s28, %s20628_s28, %s16797_s20  }
  0x27   : > { %s16593_s19 = scalar_lea.vmem %s16918_s27, 16  ;;  %s16600_s23 = scalar_lea.vmem %s16918_s27, 32 }
  0x28   : > { %p16594_p11 = scmp.ne.s32.totalorder %s16918_s27, %s16593_s19  ;;  %p16601_p0 = scmp.lt.s32.totalorder %s16918_s27, %s16918_s27 }
  0x29   : > { %p16602_p1 = scmp.lt.s32.totalorder %s16600_s23, %s16593_s19 }
  0x2a   : > { %p16596_p12 = pnand %p16594_p11, %p16924_p6 }
  0x2b   : > { %p16603_p4 = por %p16602_p1, %p16601_p0 }
  0x2c   : > { %p16597_p13 = pneg %p16596_p12 }
  0x2e   : > { %p16604_p7 = pnand %p16603_p4, %p16597_p13 }
  0x30   : > { %16607 = shalt.err (!%p16604_p7)
}
  0x31   : > { %16433 = dma.hbm_to_vmem [thread:$0]  (!%p16914_p5), %s20620_s8, 16, %s16918_s27, [#allocation13]  }
  0x32   : > { %s16619_s24 = scalar_lea.vmem %s482_s29, 16  ;;  %s16626_s16 = scalar_lea.vmem %s482_s29, 32 }
  0x33   : > { %p16620_p8 = scmp.ne.s32.totalorder %s482_s29, %s16619_s24  ;;  %p16627_p11 = scmp.lt.s32.totalorder %s482_s29, %s482_s29 }
  0x34   : > { %p16628_p12 = scmp.lt.s32.totalorder %s16626_s16, %s16619_s24 }
  0x35   : > { %p16622_p9 = pnand %p16620_p8, %p16924_p6 }
  0x36   : > { %p16629_p13 = por %p16628_p12, %p16627_p11 }
  0x37   : > { %p16623_p10 = pneg %p16622_p9 }
  0x39   : > { %p16630_p0 = pnand %p16629_p13, %p16623_p10 }
  0x3b   : > { %16633 = shalt.err (!%p16630_p0)
}
  0x3c   : > { %16439 = dma.hbm_to_vmem [thread:$0]  (!%p16914_p5), %s20622_s10, 16, %s482_s29, [#allocation16]  }
  0x3d   : > { %s16798_s2 = smov [#allocation4]   ;;  %s16799_s23 = smov [#allocation8]  }
  0x3e   : > { %s394_s27 = sshll.u32 %s16798_s2, 4  ;;  %s419_s26 = sshll.u32 %s16799_s23, 4  ;;  %s395_s27 = int_to_ptr.vmem [resolvable:$true] %s394_s27  ;;  %s420_s26 = int_to_ptr.vmem [resolvable:$true] %s419_s26 }
  0x3f   : > { %s16645_s28 = scalar_lea.vmem %s395_s27, 64  ;;  %p16653_p8 = scmp.lt.s32.totalorder %s395_s27, %s395_s27 }
  0x40   : > { %p16646_p1 = scmp.ne.s32.totalorder %s395_s27, %s16645_s28  ;;  %p16654_p9 = scmp.lt.s32.totalorder %s16645_s28, %s16645_s28 }
  0x42   : > { %p16648_p4 = pnand %p16646_p1, %p16924_p6  ;;  %p16655_p10 = por %p16654_p9, %p16653_p8 }
  0x44   : > { %p16649_p7 = pneg %p16648_p4 }
  0x46   : > { %p16656_p11 = pnand %p16655_p10, %p16649_p7 }
  0x48   : > { %16659 = shalt.err (!%p16656_p11)
}
  0x49   : > { %16418 = dma.hbm_to_vmem [thread:$0]  (!%p16914_p5), %s20613_s1, 64, %s395_s27, [#allocation5]  }
  0x4a   : > { %s16671_s29 = scalar_lea.vmem %s420_s26, 16  ;;  %s16678_s17 = scalar_lea.vmem %s420_s26, 32 }
  0x4b   : > { %p16672_p12 = scmp.ne.s32.totalorder %s420_s26, %s16671_s29  ;;  %p16679_p1 = scmp.lt.s32.totalorder %s420_s26, %s420_s26 }
  0x4c   : > { %p16680_p4 = scmp.lt.s32.totalorder %s16678_s17, %s16671_s29 }
  0x4d   : > { %p16674_p13 = pnand %p16672_p12, %p16924_p6 }
  0x4e   : > { %p16681_p2 = por %p16680_p4, %p16679_p1 }
  0x4f   : > { %p16675_p0 = pneg %p16674_p13 }
  0x51   : > { %p16682_p8 = pnand %p16681_p2, %p16675_p0 }
  0x53   : > { %16685 = shalt.err (!%p16682_p8)
}
  0x54   : > { %16424 = dma.hbm_to_vmem [thread:$0]  (!%p16914_p5), %s20616_s4, 16, %s420_s26, [#allocation7]  }
  0x55   : > { %s16800_s2 = smov [#allocation11]   ;;  %s16801_s23 = smov [#allocation14]  }
  0x56   : > { %s443_s27 = sshll.u32 %s16800_s2, 4  ;;  %s467_s24 = sshll.u32 %s16801_s23, 4  ;;  %s444_s27 = int_to_ptr.vmem [resolvable:$true] %s443_s27  ;;  %s468_s24 = int_to_ptr.vmem [resolvable:$true] %s467_s24 }
  0x57   : > { %s16697_s16 = scalar_lea.vmem %s444_s27, 16  ;;  %s16704_s29 = scalar_lea.vmem %s444_s27, 32 }
  0x58   : > { %p16698_p7 = scmp.ne.s32.totalorder %s444_s27, %s16697_s16  ;;  %p16705_p2 = scmp.lt.s32.totalorder %s444_s27, %s444_s27 }
  0x59   : > { %p16706_p11 = scmp.lt.s32.totalorder %s16704_s29, %s16697_s16 }
  0x5a   : > { %p16700_p9 = pnand %p16698_p7, %p16924_p6 }
  0x5b   : > { %p16707_p12 = por %p16706_p11, %p16705_p2 }
  0x5c   : > { %p16701_p10 = pneg %p16700_p9 }
  0x5e   : > { %p16708_p13 = pnand %p16707_p12, %p16701_p10 }
  0x60   : > { %16711 = shalt.err (!%p16708_p13)
}
  0x61   : > { %16430 = dma.hbm_to_vmem [thread:$0]  (!%p16914_p5), %s20618_s6, 16, %s444_s27, [#allocation10]  }
  0x62   : > { %s16723_s28 = scalar_lea.vmem %s468_s24, 19200  ;;  %p16731_p8 = scmp.lt.s32.totalorder %s468_s24, %s468_s24 }
  0x63   : > { %p16724_p0 = scmp.ne.s32.totalorder %s468_s24, %s16723_s28  ;;  %p16732_p7 = scmp.lt.s32.totalorder %s16723_s28, %s16723_s28 }
  0x65   : > { %p16726_p1 = pnand %p16724_p0, %p16924_p6  ;;  %p16733_p9 = por %p16732_p7, %p16731_p8 }
  0x67   : > { %p16727_p4 = pneg %p16726_p1 }
  0x69   : > { %p16734_p3 = pnand %p16733_p9, %p16727_p4 }
  0x6b   : > { %16737 = shalt.err (!%p16734_p3)
}
  0x6c   : > { %s20637_s19 = smov 128   ;;  %s16802_s27 = smov [#allocation17]  }
  0x6d   : > { %16436 = dma.hbm_to_vmem [thread:$0]  (!%p16914_p5), %s20621_s9, 19200, %s468_s24, [#allocation13], %s20637_s19, %s20637_s19, %s16797_s20  }
  0x6e   : > { %s497_s16 = sshll.u32 %s16802_s27, 4  ;;  %s498_s16 = int_to_ptr.vmem [resolvable:$true] %s497_s16 }
  0x6f   : > { %s16749_s29 = scalar_lea.vmem %s498_s16, 5120  ;;  %p16757_p12 = scmp.lt.s32.totalorder %s498_s16, %s498_s16 }
  0x70   : > { %p16750_p10 = scmp.ne.s32.totalorder %s498_s16, %s16749_s29  ;;  %p16758_p3 = scmp.lt.s32.totalorder %s16749_s29, %s16749_s29 }
  0x72   : > { %p16752_p2 = pnand %p16750_p10, %p16924_p6  ;;  %p16759_p13 = por %p16758_p3, %p16757_p12 }
  0x74   : > { %p16753_p11 = pneg %p16752_p2 }
  0x76   : > { %p16760_p0 = pnand %p16759_p13, %p16753_p11 }
  0x78   : > { %16763 = shalt.err (!%p16760_p0)
}
  0x79   : > { %16442 = dma.hbm_to_vmem [thread:$0]  (!%p16914_p5), %s20625_s13, 5120, %s498_s16, [#allocation16], %s20637_s19, %s20637_s19, %s16797_s20  }
  0x7a   : > { %p20638_p1 = scmp.ne.s32.totalorder %s20633_s22, 0 }
  0x7b   : > { %p20639_p6 = scmp.eq.s32.totalorder (!%p20638_p1), %s16899_s21, 0 }
  0x7c   : > { %524 = sbr.rel (%p20638_p1) target bundleno = 2817 (0xb01), region = 80 }
  0x81   : > { %16769 = dma.done.wait (%p20639_p6), [#allocation5], 64   ;;  %p20640_p4 = pmov %p20639_p6 }
  0x83   : > { %16771 = vsyncadd (%p20640_p4), [#allocation5], 4294967232  ;;  %p20641_p8 = pmov %p20640_p4 }
  0x84   : > { %p20642_p7 = pmov %p20640_p4 }
  0x85   : > { %16773 = dma.done.wait (%p20641_p8), [#allocation7], 32  }
  0x86   : > { %16775 = vsyncadd (%p20642_p7), [#allocation7], 4294967264  ;;  %p20643_p9 = pmov %p20640_p4 }
  0x87   : > { %p20644_p5 = pmov %p20640_p4 }
  0x88   : > { %16777 = dma.done.wait (%p20643_p9), [#allocation10], 400  }
  0x89   : > { %16779 = vsyncadd (%p20644_p5), [#allocation10], 4294966896  ;;  %p20645_p10 = pmov %p20640_p4 }
  0x8a   : > { %p20646_p2 = pmov %p20640_p4 }
  0x8b   : > { %16781 = dma.done.wait (%p20645_p10), [#allocation13], 19216  }
  0x8c   : > { %16783 = vsyncadd (%p20646_p2), [#allocation13], 4294948080  ;;  %p20647_p11 = pmov %p20646_p2 }
  0x8d   : > { %p20648_p12 = pmov %p20646_p2 }
  0x8e   : > { %16785 = dma.done.wait (%p20647_p11), [#allocation16], 5136  }
  0x8f   : > { %16787 = vsyncadd (%p20648_p12), [#allocation16], 4294962160  ;;  %vm1040_vm0 = vcmask 195584   ;;  %vm8461_vm1 = vcmask 392192   ;;  %v16803_v0 = vmov 0.0   ;;  %p602_p3 = scmp.lt.s32.totalorder %s16899_s21, 1 }
  0x90   : > { %1041 = vst.msk [vmem:[#allocation2] sm:$0xff] %vm1040_vm0, %v16803_v0  ;;  %1042 = vst.msk [vmem:[#allocation2 + $0x8] sm:$0xff] %vm1040_vm0, %v16803_v0  ;;  %16373 = vmatprep.subr.mxu1 %v16803_v0  ;;  %vm747_vm2 = vcmask 1043456   ;;  %vm650_vm3 = vcmask 31744   ;;  %v642_v1 = vld [vmem:[#allocation4] sm:$0xf] }
  0x91   : > { %1043 = vst.msk [vmem:[#allocation2 + $0x10] sm:$0xff] %vm1040_vm0, %v16803_v0  ;;  %1044 = vst.msk [vmem:[#allocation2 + $0x18] sm:$0xff] %vm1040_vm0, %v16803_v0  ;;  %s20650_s21 = smov (!%p602_p3, %s16899_s21), 1  ;;  %13924 = vmatprep.subr.msk.mxu0 %vm747_vm2, %v642_v1  ;;  %v12292_v9 = vld [vmem:[%s20615_s3 + $0x28] sm:$0xff]  ;;  %v12291_v10 = vld [vmem:[%s20615_s3 + $0x20] sm:$0xff]  ;;  %vm16804_vm4 = vmmov 0  }
  0x92   : > { %1045 = vst.msk [vmem:[#allocation2 + $0x20] sm:$0xff] %vm1040_vm0, %v16803_v0  ;;  %1046 = vst.msk [vmem:[#allocation2 + $0x28] sm:$0xff] %vm1040_vm0, %v16803_v0  ;;  %s13012_s22 = sshll.u32 %s20650_s21, 8  ;;  %13925 = vmatpush3.msk.msra.mxu0 %vm747_vm2, %v642_v1  ;;  %16376 = vmatpush3.msra.mxu1 %v12292_v9  ;;  %v12290_v36 = vld [vmem:[%s20615_s3 + $0x18] sm:$0xff]  ;;  %v1162_v38 = vld [vmem:[%s20615_s3 + $0x10] sm:$0xff]  ;;  %vm8226_vm5 = vcmask 64512   ;;  %s609_s19 = scalar_lea.vmem %s20627_s15, %s20650_s21 }
  0x93   : > { %1047 = vst.msk [vmem:[#allocation2 + $0x30] sm:$0xff] %vm1040_vm0, %v16803_v0  ;;  %1048 = vst.msk [vmem:[#allocation2 + $0x38] sm:$0xff] %vm1040_vm0, %v16803_v0  ;;  %s17173_s20 = scalar_lea.vmem %s20612_s0, %s13012_s22  ;;  %13974 = vmatprep.subr.mxu0 %v16803_v0  ;;  %16374 = vmatprep.subr.mxu1 %v16803_v0  ;;  %v1161_v40 = vld [vmem:[%s20615_s3 + $0x8] sm:$0xff]  ;;  %v1160_v41 = vld [vmem:[%s20615_s3] sm:$0xff]  ;;  %vm8481_vm6 = vcmask 392196   ;;  %vm8483_vm7 = vcmask 388096  }
  0x94   : > { %1049 = vst.msk [vmem:[#allocation2 + $0x40] sm:$0xff] %vm1040_vm0, %v16803_v0  ;;  %1050 = vst.msk [vmem:[#allocation2 + $0x48] sm:$0xff] %vm1040_vm0, %v16803_v0  ;;  %v610_v2 = vld [vmem:[%s17173_s20] sm:$0xff]  ;;  %v611_v3 = vld [vmem:[%s17173_s20 + $0x8] sm:$0xff]  ;;  %16377 = vmatpush3.msra.mxu1 %v12291_v10  ;;  %13986 = vmatprep.mubr.msk.f32.mxu1 %vm16804_vm4, %v16803_v0  ;;  %vm12071_vm8 = vcmask 130048   ;;  %vm12094_vm10 = vcmask 122880  }
  0x95   : > { %1051 = vst.msk [vmem:[#allocation2 + $0x50] sm:$0xff] %vm1040_vm0, %v16803_v0  ;;  %1052 = vst.msk [vmem:[#allocation2 + $0x58] sm:$0xff] %vm1040_vm0, %v16803_v0  ;;  %13926 = vmatprep.mubr.msk.f32.mxu0 %vm650_vm3, %v610_v2  ;;  %v612_v4 = vld [vmem:[%s17173_s20 + $0x10] sm:$0xff]  ;;  %v613_v5 = vld [vmem:[%s17173_s20 + $0x18] sm:$0xff]  ;;  %16375 = vmatprep.subr.mxu1 %v16803_v0 }
  0x96   : > { %1053 = vst.msk [vmem:[#allocation2 + $0x60] sm:$0xff] %vm1040_vm0, %v16803_v0  ;;  %1054 = vst.msk [vmem:[#allocation2 + $0x68] sm:$0xff] %vm1040_vm0, %v16803_v0  ;;  %13927 = vmatmul.mubr.msk.f32.vlgmr.msra.gmra.mxu0 %vm650_vm3, %v611_v3  ;;  %v614_v6 = vld [vmem:[%s17173_s20 + $0x20] sm:$0xff]  ;;  %v615_v7 = vld [vmem:[%s17173_s20 + $0x28] sm:$0xff]  ;;  %16378 = vmatpush3.msra.mxu1 %v12290_v36 }
  0x97   : > { %1055 = vst.msk [vmem:[#allocation2 + $0x70] sm:$0xff] %vm1040_vm0, %v16803_v0  ;;  %1056 = vst.msk [vmem:[#allocation2 + $0x78] sm:$0xff] %vm1040_vm0, %v16803_v0  ;;  %13929 = vmatprep.mubr.msk.f32.mxu0 %vm650_vm3, %v612_v4  ;;  %v616_v8 = vld [vmem:[%s17173_s20 + $0x30] sm:$0xff]  ;;  %v617_v11 = vld [vmem:[%s17173_s20 + $0x38] sm:$0xff]  ;;  %13975 = vmatpush3.msra.mxu0 %v12292_v9 }
  0x98   : > { %1057 = vst.msk [vmem:[#allocation2 + $0x80] sm:$0xff] %vm1040_vm0, %v16803_v0  ;;  %1058 = vst.msk [vmem:[#allocation2 + $0x88] sm:$0xff] %vm1040_vm0, %v16803_v0  ;;  %v618_v12 = vld [vmem:[%s17173_s20 + $0x40] sm:$0xff]  ;;  %13976 = vmatprep.subr.mxu0 %v16803_v0  ;;  %v619_v13 = vld [vmem:[%s17173_s20 + $0x48] sm:$0xff]  ;;  %14100 = vmatprep.subr.mxu1 %v16803_v0 }
  0x99   : > { %1059 = vst.msk [vmem:[#allocation2 + $0x90] sm:$0xff] %vm1040_vm0, %v16803_v0  ;;  %1060 = vst.msk [vmem:[#allocation2 + $0x98] sm:$0xff] %vm1040_vm0, %v16803_v0  ;;  %13977 = vmatpush3.msra.mxu0 %v12291_v10  ;;  %v620_v14 = vld [vmem:[%s17173_s20 + $0x50] sm:$0xff]  ;;  %v621_v15 = vld [vmem:[%s17173_s20 + $0x58] sm:$0xff] }
  0x9a   : > { %1061 = vst.msk [vmem:[#allocation2 + $0xa0] sm:$0xff] %vm1040_vm0, %v16803_v0  ;;  %1062 = vst.msk [vmem:[#allocation2 + $0xa8] sm:$0xff] %vm1040_vm0, %v16803_v0  ;;  %13930 = vmatmul.mubr.msk.f32.gmra.mxu0 %vm650_vm3, %v613_v5  ;;  %13978 = vmatprep.subr.mxu0 %v16803_v0  ;;  %v622_v16 = vld [vmem:[%s17173_s20 + $0x60] sm:$0xff]  ;;  %v623_v17 = vld [vmem:[%s17173_s20 + $0x68] sm:$0xff] }
  0x9b   : > { %1063 = vst.msk [vmem:[#allocation2 + $0xb0] sm:$0xff] %vm1040_vm0, %v16803_v0  ;;  %1064 = vst.msk [vmem:[#allocation2 + $0xb8] sm:$0xff] %vm1040_vm0, %v16803_v0  ;;  %13932 = vmatprep.mubr.msk.f32.mxu0 %vm650_vm3, %v614_v6  ;;  %v624_v18 = vld [vmem:[%s17173_s20 + $0x70] sm:$0xff]  ;;  %v625_v19 = vld [vmem:[%s17173_s20 + $0x78] sm:$0xff]  ;;  %13979 = vmatpush3.msra.mxu0 %v12290_v36 }
  0x9c   : > { %1065 = vst.msk [vmem:[#allocation2 + $0xc0] sm:$0xff] %vm1040_vm0, %v16803_v0  ;;  %1066 = vst.msk [vmem:[#allocation2 + $0xc8] sm:$0xff] %vm1040_vm0, %v16803_v0  ;;  %v626_v20 = vld [vmem:[%s17173_s20 + $0x80] sm:$0xff]  ;;  %v627_v21 = vld [vmem:[%s17173_s20 + $0x88] sm:$0xff]  ;;  %14037 = vmatprep.subr.mxu0 %v16803_v0 }
  0x9d   : > { %1067 = vst.msk [vmem:[#allocation2 + $0xd0] sm:$0xff] %vm1040_vm0, %v16803_v0  ;;  %1068 = vst.msk [vmem:[#allocation2 + $0xd8] sm:$0xff] %vm1040_vm0, %v16803_v0  ;;  %v628_v22 = vld [vmem:[%s17173_s20 + $0x90] sm:$0xff]  ;;  %v629_v23 = vld [vmem:[%s17173_s20 + $0x98] sm:$0xff] }
  0x9e   : > { %1069 = vst.msk [vmem:[#allocation2 + $0xe0] sm:$0xff] %vm1040_vm0, %v16803_v0  ;;  %1070 = vst.msk [vmem:[#allocation2 + $0xe8] sm:$0xff] %vm1040_vm0, %v16803_v0  ;;  %13933 = vmatmul.mubr.msk.f32.gmra.mxu0 %vm650_vm3, %v615_v7  ;;  %v630_v24 = vld [vmem:[%s17173_s20 + $0xa0] sm:$0xff]  ;;  %v631_v25 = vld [vmem:[%s17173_s20 + $0xa8] sm:$0xff] }
  0x9f   : > { %1071 = vst.msk [vmem:[#allocation2 + $0xf0] sm:$0xff] %vm1040_vm0, %v16803_v0  ;;  %1072 = vst.msk [vmem:[#allocation2 + $0xf8] sm:$0xff] %vm1040_vm0, %v16803_v0  ;;  %13935 = vmatprep.mubr.msk.f32.mxu0 %vm650_vm3, %v616_v8  ;;  %v632_v26 = vld [vmem:[%s17173_s20 + $0xb0] sm:$0xff]  ;;  %v633_v27 = vld [vmem:[%s17173_s20 + $0xb8] sm:$0xff] }
  0xa0   : > { %1073 = vst.msk [vmem:[#allocation2 + $0x100] sm:$0xff] %vm1040_vm0, %v16803_v0  ;;  %1074 = vst.msk [vmem:[#allocation2 + $0x108] sm:$0xff] %vm1040_vm0, %v16803_v0  ;;  %v634_v28 = vld [vmem:[%s17173_s20 + $0xc0] sm:$0xff]  ;;  %v635_v29 = vld [vmem:[%s17173_s20 + $0xc8] sm:$0xff] }
  0xa1   : > { %1075 = vst.msk [vmem:[#allocation2 + $0x110] sm:$0xff] %vm1040_vm0, %v16803_v0  ;;  %1076 = vst.msk [vmem:[#allocation2 + $0x118] sm:$0xff] %vm1040_vm0, %v16803_v0  ;;  %v636_v30 = vld [vmem:[%s17173_s20 + $0xd0] sm:$0xff]  ;;  %v637_v31 = vld [vmem:[%s17173_s20 + $0xd8] sm:$0xff] }
  0xa2   : > { %1077 = vst.msk [vmem:[#allocation2 + $0x120] sm:$0xff] %vm1040_vm0, %v16803_v0  ;;  %1078 = vst.msk [vmem:[#allocation2 + $0x128] sm:$0xff] %vm1040_vm0, %v16803_v0  ;;  %13936 = vmatmul.mubr.msk.f32.gmra.mxu0 %vm650_vm3, %v617_v11  ;;  %v638_v32 = vld [vmem:[%s17173_s20 + $0xe0] sm:$0xff]  ;;  %v639_v33 = vld [vmem:[%s17173_s20 + $0xe8] sm:$0xff] }
  0xa3   : > { %1079 = vst.msk [vmem:[#allocation2 + $0x130] sm:$0xff] %vm1040_vm0, %v16803_v0  ;;  %1080 = vst.msk [vmem:[#allocation2 + $0x138] sm:$0xff] %vm1040_vm0, %v16803_v0  ;;  %13938 = vmatprep.mubr.msk.f32.mxu0 %vm650_vm3, %v618_v12  ;;  %v640_v34 = vld [vmem:[%s17173_s20 + $0xf0] sm:$0xff]  ;;  %v641_v35 = vld [vmem:[%s17173_s20 + $0xf8] sm:$0xff] }
  0xa4   : > { %1081 = vst.msk [vmem:[#allocation2 + $0x140] sm:$0xff] %vm1040_vm0, %v16803_v0  ;;  %1082 = vst.msk [vmem:[#allocation2 + $0x148] sm:$0xff] %vm1040_vm0, %v16803_v0  ;;  %v1164_v37 = vld [vmem:[#allocation2 + $0x1] ss:$2 sm:$0xff]  ;;  %v1166_v39 = vld [vmem:[#allocation2 + $0x11] ss:$2 sm:$0xff] }
  0xa5   : > { %1083 = vst.msk [vmem:[#allocation2 + $0x150] sm:$0xff] %vm1040_vm0, %v16803_v0  ;;  %1084 = vst.msk [vmem:[#allocation2 + $0x158] sm:$0xff] %vm1040_vm0, %v16803_v0  ;;  %v1123_v42 = vld [vmem:[#allocation2] ss:$2 sm:$0xff]  ;;  %v1125_v43 = vld [vmem:[#allocation2 + $0x10] ss:$2 sm:$0xff] }
  0xa6   : > { %1085 = vst.msk [vmem:[#allocation2 + $0x160] sm:$0xff] %vm1040_vm0, %v16803_v0  ;;  %1086 = vst.msk [vmem:[#allocation2 + $0x168] sm:$0xff] %vm1040_vm0, %v16803_v0  ;;  %13939 = vmatmul.mubr.msk.f32.gmra.mxu0 %vm650_vm3, %v619_v13  ;;  %v12355_v44 = vld [vmem:[%s20615_s3 + $0x58] sm:$0xff]  ;;  %v12354_v45 = vld [vmem:[%s20615_s3 + $0x50] sm:$0xff] }
  0xa7   : > { %1087 = vst.msk [vmem:[#allocation2 + $0x170] sm:$0xff] %vm1040_vm0, %v16803_v0  ;;  %1088 = vst.msk [vmem:[#allocation2 + $0x178] sm:$0xff] %vm1040_vm0, %v16803_v0  ;;  %13941 = vmatprep.mubr.msk.f32.mxu0 %vm650_vm3, %v620_v14  ;;  %v12353_v46 = vld [vmem:[%s20615_s3 + $0x48] sm:$0xff]  ;;  %v17295_v47 = vld [vmem:[#allocation6] ss:$0 sm:$0xff] }
  0xa8   : > { %8462 = vst.msk [vmem:[#allocation3] sm:$0xff] %vm8461_vm1, %v16803_v0  ;;  %8463 = vst.msk [vmem:[#allocation3 + $0x8] sm:$0xff] %vm8461_vm1, %v16803_v0  ;;  %v12333_v14 = vld [vmem:[%s20615_s3 + $0x40] sm:$0xff] }
  0xa9   : > { %8464 = vst.msk [vmem:[#allocation3 + $0x10] sm:$0xff] %vm8461_vm1, %v16803_v0  ;;  %8465 = vst.msk [vmem:[#allocation3 + $0x18] sm:$0xff] %vm8461_vm1, %v16803_v0 }
  0xaa   : > { %8466 = vst.msk [vmem:[#allocation3 + $0x20] sm:$0xff] %vm8461_vm1, %v16803_v0  ;;  %8467 = vst.msk [vmem:[#allocation3 + $0x28] sm:$0xff] %vm8461_vm1, %v16803_v0  ;;  %13942 = vmatmul.mubr.msk.f32.gmra.mxu0 %vm650_vm3, %v621_v15 }
  0xab   : > { %8468 = vst.msk [vmem:[#allocation3 + $0x30] sm:$0xff] %vm8461_vm1, %v16803_v0  ;;  %8469 = vst.msk [vmem:[#allocation3 + $0x38] sm:$0xff] %vm8461_vm1, %v16803_v0  ;;  %13944 = vmatprep.mubr.msk.f32.mxu0 %vm650_vm3, %v622_v16 }
  0xac   : > { %8470 = vst.msk [vmem:[#allocation3 + $0x40] sm:$0xff] %vm8461_vm1, %v16803_v0  ;;  %8471 = vst.msk [vmem:[#allocation3 + $0x48] sm:$0xff] %vm8461_vm1, %v16803_v0 }
  0xad   : > { %8472 = vst.msk [vmem:[#allocation3 + $0x50] sm:$0xff] %vm8461_vm1, %v16803_v0  ;;  %8473 = vst.msk [vmem:[#allocation3 + $0x58] sm:$0xff] %vm8461_vm1, %v16803_v0 }
  0xae   : > { %8474 = vst.msk [vmem:[#allocation3 + $0x60] sm:$0xff] %vm8461_vm1, %v16803_v0  ;;  %8475 = vst.msk [vmem:[#allocation3 + $0x68] sm:$0xff] %vm8461_vm1, %v16803_v0  ;;  %13945 = vmatmul.mubr.msk.f32.gmra.mxu0 %vm650_vm3, %v623_v17 }
  0xaf   : > { %8476 = vst.msk [vmem:[#allocation3 + $0x70] sm:$0xff] %vm8461_vm1, %v16803_v0  ;;  %8477 = vst.msk [vmem:[#allocation3 + $0x78] sm:$0xff] %vm8461_vm1, %v16803_v0  ;;  %13947 = vmatprep.mubr.msk.f32.mxu0 %vm650_vm3, %v624_v18 }
  0xb0   : > { %8478 = vst.msk [vmem:[#allocation3 + $0x80] sm:$0xff] %vm8461_vm1, %v16803_v0 }
  0xb2   : > { %13948 = vmatmul.mubr.msk.f32.gmra.mxu0 %vm650_vm3, %v625_v19 }
  0xb3   : > { %13950 = vmatprep.mubr.msk.f32.mxu0 %vm650_vm3, %v626_v20 }
  0xb6   : > { %13951 = vmatmul.mubr.msk.f32.gmra.mxu0 %vm650_vm3, %v627_v21  ;;  %v12332_v21 = vld [vmem:[%s20615_s3 + $0x38] sm:$0xff] }
  0xb7   : > { %13953 = vmatprep.mubr.msk.f32.mxu0 %vm650_vm3, %v628_v22 }
  0xba   : > { %13954 = vmatmul.mubr.msk.f32.gmra.mxu0 %vm650_vm3, %v629_v23 }
  0xbb   : > { %13956 = vmatprep.mubr.msk.f32.mxu0 %vm650_vm3, %v630_v24 }
  0xbe   : > { %13957 = vmatmul.mubr.msk.f32.gmra.mxu0 %vm650_vm3, %v631_v25 }
  0xbf   : > { %13959 = vmatprep.mubr.msk.f32.mxu0 %vm650_vm3, %v632_v26 }
  0xc2   : > { %13960 = vmatmul.mubr.msk.f32.gmra.mxu0 %vm650_vm3, %v633_v27 }
  0xc3   : > { %13962 = vmatprep.mubr.msk.f32.mxu0 %vm650_vm3, %v634_v28 }
  0xc6   : > { %13963 = vmatmul.mubr.msk.f32.gmra.mxu0 %vm650_vm3, %v635_v29 }
  0xc7   : > { %13965 = vmatprep.mubr.msk.f32.mxu0 %vm650_vm3, %v636_v30 }
  0xca   : > { %13966 = vmatmul.mubr.msk.f32.gmra.mxu0 %vm650_vm3, %v637_v31 }
  0xcb   : > { %13968 = vmatprep.mubr.msk.f32.mxu0 %vm650_vm3, %v638_v32  ;;  %v12331_v32 = vld [vmem:[%s20615_s3 + $0x30] sm:$0xff] }
  0xce   : > { %13969 = vmatmul.mubr.msk.f32.gmra.mxu0 %vm650_vm3, %v639_v33 }
  0xcf   : > { %13971 = vmatprep.mubr.msk.f32.mxu0 %vm650_vm3, %v640_v34 }
  0xd2   : > { %13972 = vmatmul.mubr.msk.f32.gmra.mxu0 %vm650_vm3, %v641_v35 }
  0xd3   : > { %13980 = vmatprep.mubr.msk.f32.mxu0 %vm16804_vm4, %v16803_v0 }
  0xd6   : > { %13981 = vmatmul.mubr.msk.f32.vlgmr.msra.gmra.mxu0 %vm1040_vm0, %v1164_v37 }
  0xd7   : > { %13983 = vmatprep.mubr.msk.f32.mxu0 %vm16804_vm4, %v16803_v0  ;;  %14038 = vmatpush3.msra.mxu0 %v1162_v38 }
  0xd8   : > { %14039 = vmatprep.subr.mxu0 %v16803_v0 }
  0xd9   : > { %14040 = vmatpush3.msra.mxu0 %v1161_v40 }
  0xda   : > { %13984 = vmatmul.mubr.msk.f32.gmra.mxu0 %vm1040_vm0, %v1166_v39  ;;  %14041 = vmatprep.subr.mxu0 %v16803_v0 }
  0xdb   : > { %14043 = vmatprep.mubr.msk.f32.mxu0 %vm16804_vm4, %v16803_v0  ;;  %14042 = vmatpush3.msra.mxu0 %v1160_v41 }
  0xdc   : > { %14163 = vmatprep.subr.mxu0 %v16803_v0 }
  0xde   : > { %14044 = vmatmul.mubr.msk.f32.vlgmr.msra.gmra.mxu0 %vm1040_vm0, %v1123_v42 }
  0xdf   : > { %14046 = vmatprep.mubr.msk.f32.mxu0 %vm16804_vm4, %v16803_v0  ;;  %14164 = vmatpush3.msra.mxu0 %v12355_v44 }
  0xe0   : > { %14165 = vmatprep.subr.mxu0 %v16803_v0 }
  0xe1   : > { %14166 = vmatpush3.msra.mxu0 %v12354_v45 }
  0xe2   : > { %14047 = vmatmul.mubr.msk.f32.gmra.mxu0 %vm1040_vm0, %v1125_v43  ;;  %14167 = vmatprep.subr.mxu0 %v16803_v0 }
  0xe3   : > { %14049 = vmatprep.mubr.msk.f32.mxu0 %vm16804_vm4, %v16803_v0  ;;  %14168 = vmatpush3.msra.mxu0 %v12353_v46 }
  0xe4   : > { %14289 = vmatprep.subr.mxu0 %v16803_v0 }
 0x156   : > { %v13928_v48 = vpop.f32.mrf.mxu0 }
 0x157   : > { %v823_v49 = vadd.f32 %v13928_v48, %v17295_v47 }
 0x158   : > { %v817_v50 = vpop.f32.mrf.mxu0 }
 0x159   : > { %v977_v51 = vmax.f32 %v823_v49, 0.0  ;;  %v818_v52 = vadd.f32 %v17295_v47, %v817_v50 }
 0x15a   : > { %v13931_v53 = vpop.f32.mrf.mxu0 }
 0x15b   : > { %v1009_v54 = vmin.f32 %v977_v51, 6.0  ;;  %v976_v55 = vmax.f32 %v818_v52, 0.0  ;;  %v833_v56 = vadd.f32 %v13931_v53, %v17295_v47 }
 0x15c   : > { %v827_v57 = vpop.f32.mrf.mxu0 }
 0x15d   : > { %1092 = vst.msk [vmem:[#allocation2 + $0x32] sm:$0xff] %vm1040_vm0, %v1009_v54  ;;  %v1008_v58 = vmin.f32 %v976_v55, 6.0  ;;  %v979_v59 = vmax.f32 %v833_v56, 0.0  ;;  %v828_v60 = vadd.f32 %v17295_v47, %v827_v57 }
 0x15e   : > { %v13934_v61 = vpop.f32.mrf.mxu0 }
 0x15f   : > { %1091 = vst.msk [vmem:[#allocation2 + $0x2a] sm:$0xff] %vm1040_vm0, %v1008_v58  ;;  %v1011_v62 = vmin.f32 %v979_v59, 6.0  ;;  %v978_v63 = vmax.f32 %v828_v60, 0.0  ;;  %v843_v1 = vadd.f32 %v13934_v61, %v17295_v47 }
 0x160   : > { %v837_v2 = vpop.f32.mrf.mxu0 }
 0x161   : > { %1094 = vst.msk [vmem:[#allocation2 + $0x46] sm:$0xff] %vm1040_vm0, %v1011_v62  ;;  %v1010_v3 = vmin.f32 %v978_v63, 6.0  ;;  %v981_v4 = vmax.f32 %v843_v1, 0.0  ;;  %v838_v5 = vadd.f32 %v17295_v47, %v837_v2 }
 0x162   : > { %v13937_v6 = vpop.f32.mrf.mxu0 }
 0x163   : > { %1093 = vst.msk [vmem:[#allocation2 + $0x3e] sm:$0xff] %vm1040_vm0, %v1010_v3  ;;  %v1013_v7 = vmin.f32 %v981_v4, 6.0  ;;  %v980_v8 = vmax.f32 %v838_v5, 0.0  ;;  %v853_v9 = vadd.f32 %v13937_v6, %v17295_v47 }
 0x164   : > { %v847_v10 = vpop.f32.mrf.mxu0 }
 0x165   : > { %1096 = vst.msk [vmem:[#allocation2 + $0x5a] sm:$0xff] %vm1040_vm0, %v1013_v7  ;;  %v1012_v11 = vmin.f32 %v980_v8, 6.0  ;;  %v983_v12 = vmax.f32 %v853_v9, 0.0  ;;  %v848_v13 = vadd.f32 %v17295_v47, %v847_v10 }
 0x166   : > { %v13940_v15 = vpop.f32.mrf.mxu0  ;;  %v1168_v16 = vld [vmem:[#allocation2 + $0x21] ss:$2 sm:$0xff]  ;;  %v1127_v17 = vld [vmem:[#allocation2 + $0x20] ss:$2 sm:$0xff] }
 0x167   : > { %1095 = vst.msk [vmem:[#allocation2 + $0x52] sm:$0xff] %vm1040_vm0, %v1012_v11  ;;  %v1015_v18 = vmin.f32 %v983_v12, 6.0  ;;  %v982_v19 = vmax.f32 %v848_v13, 0.0  ;;  %v863_v20 = vadd.f32 %v13940_v15, %v17295_v47  ;;  %13987 = vmatmul.mubr.msk.f32.vlgmr.msra.gmra.mxu1 %vm1040_vm0, %v1168_v16  ;;  %14050 = vmatmul.mubr.msk.f32.gmra.mxu0 %vm1040_vm0, %v1127_v17 }
 0x168   : > { %14101 = vmatpush3.msra.mxu1 %v12333_v14  ;;  %v857_v22 = vpop.f32.mrf.mxu0  ;;  %13989 = vmatprep.mubr.msk.f32.mxu1 %vm16804_vm4, %v16803_v0 }
 0x169   : > { %1098 = vst.msk [vmem:[#allocation2 + $0x6e] sm:$0xff] %vm1040_vm0, %v1015_v18  ;;  %v1014_v23 = vmin.f32 %v982_v19, 6.0  ;;  %v985_v24 = vmax.f32 %v863_v20, 0.0  ;;  %v858_v25 = vadd.f32 %v17295_v47, %v857_v22  ;;  %14052 = vmatprep.mubr.msk.f32.mxu0 %vm16804_vm4, %v16803_v0  ;;  %14102 = vmatprep.subr.mxu1 %v16803_v0 }
 0x16a   : > { %v13943_v26 = vpop.f32.mrf.mxu0  ;;  %v1170_v27 = vld [vmem:[#allocation2 + $0x31] ss:$2 sm:$0xff]  ;;  %v1129_v28 = vld [vmem:[#allocation2 + $0x30] ss:$2 sm:$0xff]  ;;  %14103 = vmatpush3.msra.mxu1 %v12332_v21  ;;  %v1172_v38 = vld [vmem:[#allocation2 + $0x41] ss:$2 sm:$0xff] }
 0x16b   : > { %1097 = vst.msk [vmem:[#allocation2 + $0x66] sm:$0xff] %vm1040_vm0, %v1014_v23  ;;  %v1017_v29 = vmin.f32 %v985_v24, 6.0  ;;  %v984_v30 = vmax.f32 %v858_v25, 0.0  ;;  %v873_v31 = vadd.f32 %v13943_v26, %v17295_v47  ;;  %13990 = vmatmul.mubr.msk.f32.gmra.mxu1 %vm1040_vm0, %v1170_v27  ;;  %14053 = vmatmul.mubr.msk.f32.gmra.mxu0 %vm1040_vm0, %v1129_v28  ;;  %v1131_v39 = vld [vmem:[#allocation2 + $0x40] ss:$2 sm:$0xff] }
 0x16c   : > { %v867_v33 = vpop.f32.mrf.mxu0  ;;  %13992 = vmatprep.mubr.msk.f32.mxu1 %vm16804_vm4, %v16803_v0  ;;  %14055 = vmatprep.mubr.msk.f32.mxu0 %vm16804_vm4, %v16803_v0 }
 0x16d   : > { %1100 = vst.msk [vmem:[#allocation2 + $0x82] sm:$0xff] %vm1040_vm0, %v1017_v29  ;;  %v1016_v34 = vmin.f32 %v984_v30, 6.0  ;;  %v987_v35 = vmax.f32 %v873_v31, 0.0  ;;  %v868_v36 = vadd.f32 %v17295_v47, %v867_v33  ;;  %14104 = vmatprep.subr.mxu1 %v16803_v0 }
 0x16e   : > { %v13946_v37 = vpop.f32.mrf.mxu0  ;;  %14105 = vmatpush3.msra.mxu1 %v12331_v32  ;;  %v1174_v48 = vld [vmem:[#allocation2 + $0x51] ss:$2 sm:$0xff]  ;;  %v1133_v49 = vld [vmem:[#allocation2 + $0x50] ss:$2 sm:$0xff] }
 0x16f   : > { %1099 = vst.msk [vmem:[#allocation2 + $0x7a] sm:$0xff] %vm1040_vm0, %v1016_v34  ;;  %v1019_v40 = vmin.f32 %v987_v35, 6.0  ;;  %v986_v41 = vmax.f32 %v868_v36, 0.0  ;;  %v883_v42 = vadd.f32 %v13946_v37, %v17295_v47  ;;  %13993 = vmatmul.mubr.msk.f32.gmra.mxu1 %vm1040_vm0, %v1172_v38  ;;  %14056 = vmatmul.mubr.msk.f32.gmra.mxu0 %vm1040_vm0, %v1131_v39 }
 0x170   : > { %v877_v43 = vpop.f32.mrf.mxu0  ;;  %13995 = vmatprep.mubr.msk.f32.mxu1 %vm16804_vm4, %v16803_v0  ;;  %14058 = vmatprep.mubr.msk.f32.mxu0 %vm16804_vm4, %v16803_v0 }
 0x171   : > { %1102 = vst.msk [vmem:[#allocation2 + $0x96] sm:$0xff] %vm1040_vm0, %v1019_v40  ;;  %v1018_v44 = vmin.f32 %v986_v41, 6.0  ;;  %v989_v45 = vmax.f32 %v883_v42, 0.0  ;;  %v878_v46 = vadd.f32 %v17295_v47, %v877_v43  ;;  %14226 = vmatprep.subr.mxu1 %v16803_v0 }
 0x172   : > { %v13949_v50 = vpop.f32.mrf.mxu0  ;;  %v1176_v58 = vld [vmem:[#allocation2 + $0x61] ss:$2 sm:$0xff]  ;;  %v1135_v59 = vld [vmem:[#allocation2 + $0x60] ss:$2 sm:$0xff] }
 0x173   : > { %1101 = vst.msk [vmem:[#allocation2 + $0x8e] sm:$0xff] %vm1040_vm0, %v1018_v44  ;;  %v1021_v51 = vmin.f32 %v989_v45, 6.0  ;;  %v988_v52 = vmax.f32 %v878_v46, 0.0  ;;  %13996 = vmatmul.mubr.msk.f32.gmra.mxu1 %vm1040_vm0, %v1174_v48  ;;  %14059 = vmatmul.mubr.msk.f32.gmra.mxu0 %vm1040_vm0, %v1133_v49  ;;  %v893_v53 = vadd.f32 %v13949_v50, %v17295_v47 }
 0x174   : > { %v887_v54 = vpop.f32.mrf.mxu0  ;;  %13998 = vmatprep.mubr.msk.f32.mxu1 %vm16804_vm4, %v16803_v0  ;;  %14061 = vmatprep.mubr.msk.f32.mxu0 %vm16804_vm4, %v16803_v0 }
 0x175   : > { %1104 = vst.msk [vmem:[#allocation2 + $0xaa] sm:$0xff] %vm1040_vm0, %v1021_v51  ;;  %v1020_v55 = vmin.f32 %v988_v52, 6.0  ;;  %v991_v56 = vmax.f32 %v893_v53, 0.0  ;;  %v888_v57 = vadd.f32 %v17295_v47, %v887_v54 }
 0x176   : > { %v13952_v60 = vpop.f32.mrf.mxu0  ;;  %v1178_v5 = vld [vmem:[#allocation2 + $0x71] ss:$2 sm:$0xff]  ;;  %v1137_v6 = vld [vmem:[#allocation2 + $0x70] ss:$2 sm:$0xff] }
 0x177   : > { %1103 = vst.msk [vmem:[#allocation2 + $0xa2] sm:$0xff] %vm1040_vm0, %v1020_v55  ;;  %v1023_v61 = vmin.f32 %v991_v56, 6.0  ;;  %v990_v62 = vmax.f32 %v888_v57, 0.0  ;;  %13999 = vmatmul.mubr.msk.f32.gmra.mxu1 %vm1040_vm0, %v1176_v58  ;;  %14062 = vmatmul.mubr.msk.f32.gmra.mxu0 %vm1040_vm0, %v1135_v59  ;;  %v903_v63 = vadd.f32 %v13952_v60, %v17295_v47 }
 0x178   : > { %v897_v1 = vpop.f32.mrf.mxu0  ;;  %14001 = vmatprep.mubr.msk.f32.mxu1 %vm16804_vm4, %v16803_v0  ;;  %14064 = vmatprep.mubr.msk.f32.mxu0 %vm16804_vm4, %v16803_v0 }
 0x179   : > { %1106 = vst.msk [vmem:[#allocation2 + $0xbe] sm:$0xff] %vm1040_vm0, %v1023_v61  ;;  %v1022_v2 = vmin.f32 %v990_v62, 6.0  ;;  %v993_v3 = vmax.f32 %v903_v63, 0.0  ;;  %v898_v4 = vadd.f32 %v17295_v47, %v897_v1 }
 0x17a   : > { %v13955_v7 = vpop.f32.mrf.mxu0  ;;  %v1180_v15 = vld [vmem:[#allocation2 + $0x81] ss:$2 sm:$0xff]  ;;  %v1139_v16 = vld [vmem:[#allocation2 + $0x80] ss:$2 sm:$0xff]  ;;  %v1182_v25 = vld [vmem:[#allocation2 + $0x91] ss:$2 sm:$0xff] }
 0x17b   : > { %1105 = vst.msk [vmem:[#allocation2 + $0xb6] sm:$0xff] %vm1040_vm0, %v1022_v2  ;;  %v1025_v8 = vmin.f32 %v993_v3, 6.0  ;;  %v992_v9 = vmax.f32 %v898_v4, 0.0  ;;  %14002 = vmatmul.mubr.msk.f32.gmra.mxu1 %vm1040_vm0, %v1178_v5  ;;  %14065 = vmatmul.mubr.msk.f32.gmra.mxu0 %vm1040_vm0, %v1137_v6  ;;  %v913_v10 = vadd.f32 %v13955_v7, %v17295_v47  ;;  %v1141_v26 = vld [vmem:[#allocation2 + $0x90] ss:$2 sm:$0xff] }
 0x17c   : > { %v907_v11 = vpop.f32.mrf.mxu0  ;;  %14004 = vmatprep.mubr.msk.f32.mxu1 %vm16804_vm4, %v16803_v0  ;;  %14067 = vmatprep.mubr.msk.f32.mxu0 %vm16804_vm4, %v16803_v0 }
 0x17d   : > { %1108 = vst.msk [vmem:[#allocation2 + $0xd2] sm:$0xff] %vm1040_vm0, %v1025_v8  ;;  %v1024_v12 = vmin.f32 %v992_v9, 6.0  ;;  %v995_v13 = vmax.f32 %v913_v10, 0.0  ;;  %v908_v14 = vadd.f32 %v17295_v47, %v907_v11 }
 0x17e   : > { %v13958_v17 = vpop.f32.mrf.mxu0  ;;  %v1184_v35 = vld [vmem:[#allocation2 + $0xa1] ss:$2 sm:$0xff]  ;;  %v1143_v36 = vld [vmem:[#allocation2 + $0xa0] ss:$2 sm:$0xff] }
 0x17f   : > { %1107 = vst.msk [vmem:[#allocation2 + $0xca] sm:$0xff] %vm1040_vm0, %v1024_v12  ;;  %v1027_v18 = vmin.f32 %v995_v13, 6.0  ;;  %v994_v19 = vmax.f32 %v908_v14, 0.0  ;;  %14005 = vmatmul.mubr.msk.f32.gmra.mxu1 %vm1040_vm0, %v1180_v15  ;;  %14068 = vmatmul.mubr.msk.f32.gmra.mxu0 %vm1040_vm0, %v1139_v16  ;;  %v923_v20 = vadd.f32 %v13958_v17, %v17295_v47 }
 0x180   : > { %v917_v21 = vpop.f32.mrf.mxu0  ;;  %14007 = vmatprep.mubr.msk.f32.mxu1 %vm16804_vm4, %v16803_v0  ;;  %14070 = vmatprep.mubr.msk.f32.mxu0 %vm16804_vm4, %v16803_v0 }
 0x181   : > { %1110 = vst.msk [vmem:[#allocation2 + $0xe6] sm:$0xff] %vm1040_vm0, %v1027_v18  ;;  %v1026_v22 = vmin.f32 %v994_v19, 6.0  ;;  %v997_v23 = vmax.f32 %v923_v20, 0.0  ;;  %v918_v24 = vadd.f32 %v17295_v47, %v917_v21 }
 0x182   : > { %v13961_v27 = vpop.f32.mrf.mxu0  ;;  %v1186_v45 = vld [vmem:[#allocation2 + $0xb1] ss:$2 sm:$0xff]  ;;  %v1145_v46 = vld [vmem:[#allocation2 + $0xb0] ss:$2 sm:$0xff] }
 0x183   : > { %1109 = vst.msk [vmem:[#allocation2 + $0xde] sm:$0xff] %vm1040_vm0, %v1026_v22  ;;  %v1029_v28 = vmin.f32 %v997_v23, 6.0  ;;  %v996_v29 = vmax.f32 %v918_v24, 0.0  ;;  %14008 = vmatmul.mubr.msk.f32.gmra.mxu1 %vm1040_vm0, %v1182_v25  ;;  %14071 = vmatmul.mubr.msk.f32.gmra.mxu0 %vm1040_vm0, %v1141_v26  ;;  %v933_v30 = vadd.f32 %v13961_v27, %v17295_v47 }
 0x184   : > { %14010 = vmatprep.mubr.msk.f32.mxu1 %vm16804_vm4, %v16803_v0  ;;  %14073 = vmatprep.mubr.msk.f32.mxu0 %vm16804_vm4, %v16803_v0  ;;  %v927_v31 = vpop.f32.mrf.mxu0 }
 0x185   : > { %1112 = vst.msk [vmem:[#allocation2 + $0xfa] sm:$0xff] %vm1040_vm0, %v1029_v28  ;;  %v1028_v32 = vmin.f32 %v996_v29, 6.0  ;;  %v999_v33 = vmax.f32 %v933_v30, 0.0  ;;  %v928_v34 = vadd.f32 %v17295_v47, %v927_v31 }
 0x186   : > { %v13964_v37 = vpop.f32.mrf.mxu0  ;;  %v1188_v56 = vld [vmem:[#allocation2 + $0xc1] ss:$2 sm:$0xff]  ;;  %v1147_v57 = vld [vmem:[#allocation2 + $0xc0] ss:$2 sm:$0xff] }
 0x187   : > { %1111 = vst.msk [vmem:[#allocation2 + $0xf2] sm:$0xff] %vm1040_vm0, %v1028_v32  ;;  %14011 = vmatmul.mubr.msk.f32.gmra.mxu1 %vm1040_vm0, %v1184_v35  ;;  %14074 = vmatmul.mubr.msk.f32.gmra.mxu0 %vm1040_vm0, %v1143_v36  ;;  %v1031_v38 = vmin.f32 %v999_v33, 6.0  ;;  %v998_v39 = vmax.f32 %v928_v34, 0.0  ;;  %v943_v40 = vadd.f32 %v13964_v37, %v17295_v47  ;;  %v1640_v35 = vld [vmem:[#allocation2 + $0x2] ss:$2 sm:$0xff] }
 0x188   : > { %14013 = vmatprep.mubr.msk.f32.mxu1 %vm16804_vm4, %v16803_v0  ;;  %14076 = vmatprep.mubr.msk.f32.mxu0 %vm16804_vm4, %v16803_v0  ;;  %v937_v41 = vpop.f32.mrf.mxu0  ;;  %v1918_v36 = vld [vmem:[#allocation2 + $0x3] ss:$2 sm:$0xff] }
 0x189   : > { %1114 = vst.msk [vmem:[#allocation2 + $0x10e] sm:$0xff] %vm1040_vm0, %v1031_v38  ;;  %v1030_v42 = vmin.f32 %v998_v39, 6.0  ;;  %v1001_v43 = vmax.f32 %v943_v40, 0.0  ;;  %v938_v44 = vadd.f32 %v17295_v47, %v937_v41  ;;  %v12377_v37 = vld [vmem:[%s20615_s3 + $0x70] sm:$0xff]  ;;  %v12376_v38 = vld [vmem:[%s20615_s3 + $0x68] sm:$0xff] }
 0x18a   : > { %v13967_v48 = vpop.f32.mrf.mxu0  ;;  %v1190_v3 = vld [vmem:[#allocation2 + $0xd1] ss:$2 sm:$0xff]  ;;  %v1149_v4 = vld [vmem:[#allocation2 + $0xd0] ss:$2 sm:$0xff]  ;;  %v1192_v13 = vld [vmem:[#allocation2 + $0xe1] ss:$2 sm:$0xff] }
 0x18b   : > { %1113 = vst.msk [vmem:[#allocation2 + $0x106] sm:$0xff] %vm1040_vm0, %v1030_v42  ;;  %14014 = vmatmul.mubr.msk.f32.gmra.mxu1 %vm1040_vm0, %v1186_v45  ;;  %14077 = vmatmul.mubr.msk.f32.gmra.mxu0 %vm1040_vm0, %v1145_v46  ;;  %v1033_v49 = vmin.f32 %v1001_v43, 6.0  ;;  %v1000_v50 = vmax.f32 %v938_v44, 0.0  ;;  %v953_v51 = vadd.f32 %v13967_v48, %v17295_v47  ;;  %v1151_v14 = vld [vmem:[#allocation2 + $0xe0] ss:$2 sm:$0xff]  ;;  %v12397_v46 = vld [vmem:[%s20615_s3 + $0x78] sm:$0xff] }
 0x18c   : > { %14016 = vmatprep.mubr.msk.f32.mxu1 %vm16804_vm4, %v16803_v0  ;;  %14079 = vmatprep.mubr.msk.f32.mxu0 %vm16804_vm4, %v16803_v0  ;;  %v947_v52 = vpop.f32.mrf.mxu0  ;;  %v12399_v39 = vld [vmem:[%s20615_s3 + $0x88] sm:$0xff]  ;;  %v1642_v40 = vld [vmem:[#allocation2 + $0x12] ss:$2 sm:$0xff]  ;;  %v1920_v41 = vld [vmem:[#allocation2 + $0x13] ss:$2 sm:$0xff] }
 0x18d   : > { %1116 = vst.msk [vmem:[#allocation2 + $0x122] sm:$0xff] %vm1040_vm0, %v1033_v49  ;;  %v1032_v53 = vmin.f32 %v1000_v50, 6.0  ;;  %v1003_v54 = vmax.f32 %v953_v51, 0.0  ;;  %v948_v55 = vadd.f32 %v17295_v47, %v947_v52  ;;  %v12375_v42 = vld [vmem:[%s20615_s3 + $0x60] sm:$0xff] }
 0x18e   : > { %v13970_v58 = vpop.f32.mrf.mxu0  ;;  %v1194_v19 = vld [vmem:[#allocation2 + $0xf1] ss:$2 sm:$0xff]  ;;  %v12398_v43 = vld [vmem:[%s20615_s3 + $0x80] sm:$0xff] }
 0x18f   : > { %1115 = vst.msk [vmem:[#allocation2 + $0x11a] sm:$0xff] %vm1040_vm0, %v1032_v53  ;;  %14017 = vmatmul.mubr.msk.f32.gmra.mxu1 %vm1040_vm0, %v1188_v56  ;;  %14080 = vmatmul.mubr.msk.f32.gmra.mxu0 %vm1040_vm0, %v1147_v57  ;;  %v1035_v59 = vmin.f32 %v1003_v54, 6.0  ;;  %v1002_v60 = vmax.f32 %v948_v55, 0.0  ;;  %v963_v61 = vadd.f32 %v13970_v58, %v17295_v47  ;;  %v1644_v44 = vld [vmem:[#allocation2 + $0x22] ss:$2 sm:$0xff] }
 0x190   : > { %14019 = vmatprep.mubr.msk.f32.mxu1 %vm16804_vm4, %v16803_v0  ;;  %14082 = vmatprep.mubr.msk.f32.mxu0 %vm16804_vm4, %v16803_v0  ;;  %v957_v62 = vpop.f32.mrf.mxu0  ;;  %v1922_v45 = vld [vmem:[#allocation2 + $0x23] ss:$2 sm:$0xff]  ;;  %v1646_v48 = vld [vmem:[#allocation2 + $0x32] ss:$2 sm:$0xff]  ;;  %v1924_v49 = vld [vmem:[#allocation2 + $0x33] ss:$2 sm:$0xff] }
 0x191   : > { %1118 = vst.msk [vmem:[#allocation2 + $0x136] sm:$0xff] %vm1040_vm0, %v1035_v59  ;;  %v1034_v63 = vmin.f32 %v1002_v60, 6.0  ;;  %v1005_v1 = vmax.f32 %v963_v61, 0.0  ;;  %v958_v2 = vadd.f32 %v17295_v47, %v957_v62  ;;  %v1648_v50 = vld [vmem:[#allocation2 + $0x42] ss:$2 sm:$0xff] }
 0x192   : > { %v13973_v5 = vpop.f32.mrf.mxu0  ;;  %v1196_v23 = vld [vmem:[#allocation2 + $0x101] ss:$2 sm:$0xff]  ;;  %v1155_v24 = vld [vmem:[#allocation2 + $0x100] ss:$2 sm:$0xff] }
 0x193   : > { %1117 = vst.msk [vmem:[#allocation2 + $0x12e] sm:$0xff] %vm1040_vm0, %v1034_v63  ;;  %14020 = vmatmul.mubr.msk.f32.gmra.mxu1 %vm1040_vm0, %v1190_v3  ;;  %14083 = vmatmul.mubr.msk.f32.gmra.mxu0 %vm1040_vm0, %v1149_v4  ;;  %v1037_v6 = vmin.f32 %v1005_v1, 6.0  ;;  %v1004_v7 = vmax.f32 %v958_v2, 0.0  ;;  %v973_v8 = vadd.f32 %v13973_v5, %v17295_v47  ;;  %v1926_v51 = vld [vmem:[#allocation2 + $0x43] ss:$2 sm:$0xff] }
 0x194   : > { %14022 = vmatprep.mubr.msk.f32.mxu1 %vm16804_vm4, %v16803_v0  ;;  %14085 = vmatprep.mubr.msk.f32.mxu0 %vm16804_vm4, %v16803_v0  ;;  %v967_v9 = vpop.f32.mrf.mxu0  ;;  %v1650_v52 = vld [vmem:[#allocation2 + $0x52] ss:$2 sm:$0xff]  ;;  %v1928_v53 = vld [vmem:[#allocation2 + $0x53] ss:$2 sm:$0xff]  ;;  %v1652_v54 = vld [vmem:[#allocation2 + $0x62] ss:$2 sm:$0xff] }
 0x195   : > { %1120 = vst.msk [vmem:[#allocation2 + $0x14a] sm:$0xff] %vm1040_vm0, %v1037_v6  ;;  %v1036_v10 = vmin.f32 %v1004_v7, 6.0  ;;  %v1007_v11 = vmax.f32 %v973_v8, 0.0  ;;  %v968_v12 = vadd.f32 %v17295_v47, %v967_v9  ;;  %v1153_v47 = vld [vmem:[#allocation2 + $0xf0] ss:$2 sm:$0xff] }
 0x196   : > { %v1328_v15 = vpop.f32.mrf.mxu0  ;;  %v1198_v28 = vld [vmem:[#allocation2 + $0x111] ss:$2 sm:$0xff]  ;;  %v1157_v29 = vld [vmem:[#allocation2 + $0x110] ss:$2 sm:$0xff] }
 0x197   : > { %14023 = vmatmul.mubr.msk.f32.gmra.mxu1 %vm1040_vm0, %v1192_v13  ;;  %14086 = vmatmul.mubr.msk.f32.gmra.mxu0 %vm1040_vm0, %v1151_v14  ;;  %1119 = vst.msk [vmem:[#allocation2 + $0x142] sm:$0xff] %vm1040_vm0, %v1036_v10  ;;  %v1039_v16 = vmin.f32 %v1007_v11, 6.0  ;;  %v1006_v17 = vmax.f32 %v968_v12, 0.0  ;;  %v1200_v33 = vld [vmem:[#allocation2 + $0x121] ss:$2 sm:$0xf] }
 0x198   : > { %14025 = vmatprep.mubr.msk.f32.mxu1 %vm16804_vm4, %v16803_v0  ;;  %14088 = vmatprep.mubr.msk.f32.mxu0 %vm16804_vm4, %v16803_v0  ;;  %v13982_v18 = vpop.f32.mrf.mxu0  ;;  %v1159_v34 = vld [vmem:[#allocation2 + $0x120] ss:$2 sm:$0xf]  ;;  %v1930_v55 = vld [vmem:[#allocation2 + $0x63] ss:$2 sm:$0xff] }
 0x199   : > { %1122 = vst.msk [vmem:[#allocation2 + $0x15e] sm:$0xff] %vm1040_vm0, %v1039_v16  ;;  %v1038_v20 = vmin.f32 %v1006_v17, 6.0  ;;  %v1654_v56 = vld [vmem:[#allocation2 + $0x72] ss:$2 sm:$0xff]  ;;  %v1932_v57 = vld [vmem:[#allocation2 + $0x73] ss:$2 sm:$0xff] }
 0x19a   : > { %v1333_v21 = vpop.f32.mrf.mxu0  ;;  %v1656_v58 = vld [vmem:[#allocation2 + $0x82] ss:$2 sm:$0xff]  ;;  %v1934_v59 = vld [vmem:[#allocation2 + $0x83] ss:$2 sm:$0xff]  ;;  %v1658_v60 = vld [vmem:[#allocation2 + $0x92] ss:$2 sm:$0xff] }
 0x19b   : > { %14026 = vmatmul.mubr.msk.f32.gmra.mxu1 %vm1040_vm0, %v1194_v19  ;;  %14089 = vmatmul.mubr.msk.f32.gmra.mxu0 %vm1040_vm0, %v1153_v47  ;;  %1121 = vst.msk [vmem:[#allocation2 + $0x156] sm:$0xff] %vm1040_vm0, %v1038_v20  ;;  %v1936_v61 = vld [vmem:[#allocation2 + $0x93] ss:$2 sm:$0xff]  ;;  %v1660_v62 = vld [vmem:[#allocation2 + $0xa2] ss:$2 sm:$0xff] }
 0x19c   : > { %14028 = vmatprep.mubr.msk.f32.mxu1 %vm16804_vm4, %v16803_v0  ;;  %14091 = vmatprep.mubr.msk.f32.mxu0 %vm16804_vm4, %v16803_v0  ;;  %v13985_v22 = vpop.f32.mrf.mxu0  ;;  %v1938_v63 = vld [vmem:[#allocation2 + $0xa3] ss:$2 sm:$0xff]  ;;  %v1662_v1 = vld [vmem:[#allocation2 + $0xb2] ss:$2 sm:$0xff]  ;;  %v1940_v2 = vld [vmem:[#allocation2 + $0xb3] ss:$2 sm:$0xff] }
 0x19d   : > { %v1664_v3 = vld [vmem:[#allocation2 + $0xc2] ss:$2 sm:$0xff]  ;;  %v1942_v4 = vld [vmem:[#allocation2 + $0xc3] ss:$2 sm:$0xff]  ;;  %v1666_v5 = vld [vmem:[#allocation2 + $0xd2] ss:$2 sm:$0xff] }
 0x19e   : > { %v1545_v25 = vpop.f32.mrf.mxu0  ;;  %v1944_v6 = vld [vmem:[#allocation2 + $0xd3] ss:$2 sm:$0xff]  ;;  %v1668_v7 = vld [vmem:[#allocation2 + $0xe2] ss:$2 sm:$0xff]  ;;  %v1946_v8 = vld [vmem:[#allocation2 + $0xe3] ss:$2 sm:$0xff] }
 0x19f   : > { %14029 = vmatmul.mubr.msk.f32.gmra.mxu1 %vm1040_vm0, %v1196_v23  ;;  %14092 = vmatmul.mubr.msk.f32.gmra.mxu0 %vm1040_vm0, %v1155_v24  ;;  %v17463_v26 = vadd.f32 %v1545_v25, %v1328_v15  ;;  %v1670_v9 = vld [vmem:[#allocation2 + $0xf2] ss:$2 sm:$0xff]  ;;  %v1948_v10 = vld [vmem:[#allocation2 + $0xf3] ss:$2 sm:$0xff]  ;;  %v1672_v11 = vld [vmem:[#allocation2 + $0x102] ss:$2 sm:$0xff] }
 0x1a0   : > { %14031 = vmatprep.mubr.msk.f32.mxu1 %vm16804_vm4, %v16803_v0  ;;  %14094 = vmatprep.mubr.msk.f32.mxu0 %vm16804_vm4, %v16803_v0  ;;  %v14045_v27 = vpop.f32.mrf.mxu0  ;;  %v1950_v12 = vld [vmem:[#allocation2 + $0x103] ss:$2 sm:$0xff]  ;;  %v1674_v13 = vld [vmem:[#allocation2 + $0x112] ss:$2 sm:$0xff]  ;;  %v1952_v14 = vld [vmem:[#allocation2 + $0x113] ss:$2 sm:$0xff] }
 0x1a1   : > { %v1676_v15 = vld [vmem:[#allocation2 + $0x122] ss:$2 sm:$0xf]  ;;  %v1954_v16 = vld [vmem:[#allocation2 + $0x123] ss:$2 sm:$0xf] }
 0x1a2   : > { %v1550_v30 = vpop.f32.mrf.mxu0  ;;  %v2196_v17 = vld [vmem:[#allocation2 + $0x4] ss:$2 sm:$0xff]  ;;  %v2473_v18 = vld [vmem:[#allocation2 + $0x14] ss:$2 sm:$0xff] }
 0x1a3   : > { %14032 = vmatmul.mubr.msk.f32.gmra.mxu1 %vm1040_vm0, %v1198_v28  ;;  %14095 = vmatmul.mubr.msk.f32.gmra.mxu0 %vm1040_vm0, %v1157_v29  ;;  %v17471_v31 = vadd.f32 %v1550_v30, %v1333_v21  ;;  %v12421_v19 = vld [vmem:[%s20615_s3 + $0xa0] sm:$0xff]  ;;  %v12420_v47 = vld [vmem:[%s20615_s3 + $0x98] sm:$0xff]  ;;  %v12419_v23 = vld [vmem:[%s20615_s3 + $0x90] sm:$0xff] }
 0x1a4   : > { %14034 = vmatprep.mubr.msk.f32.mxu1 %vm16804_vm4, %v16803_v0  ;;  %14097 = vmatprep.mubr.msk.f32.mxu0 %vm16804_vm4, %v16803_v0  ;;  %v14048_v32 = vpop.f32.mrf.mxu0  ;;  %v12443_v20 = vld [vmem:[%s20615_s3 + $0xb8] sm:$0xff]  ;;  %v2474_v22 = vld [vmem:[#allocation2 + $0x24] ss:$2 sm:$0xff] }
 0x1a5   : > { %v2198_v21 = vld [vmem:[#allocation2 + $0x14] ss:$2 sm:$0xff]  ;;  %v2200_v25 = vld [vmem:[#allocation2 + $0x24] ss:$2 sm:$0xff] }
 0x1a6   : > { %v12442_v24 = vld [vmem:[%s20615_s3 + $0xb0] sm:$0xff]  ;;  %v12441_v28 = vld [vmem:[%s20615_s3 + $0xa8] sm:$0xff] }
 0x1a7   : > { %14035 = vmatmul.mubr.msk.f32.gmra.mxu1 %vm1040_vm0, %v1200_v33  ;;  %14098 = vmatmul.mubr.msk.f32.gmra.mxu0 %vm1040_vm0, %v1159_v34  ;;  %v2475_v27 = vld [vmem:[#allocation2 + $0x34] ss:$2 sm:$0xff]  ;;  %v2476_v30 = vld [vmem:[#allocation2 + $0x44] ss:$2 sm:$0xff] }
 0x1a8   : > { %14106 = vmatprep.mubr.msk.f32.mxu1 %vm16804_vm4, %v16803_v0  ;;  %14169 = vmatprep.mubr.msk.f32.mxu0 %vm16804_vm4, %v16803_v0  ;;  %v2202_v29 = vld [vmem:[#allocation2 + $0x34] ss:$2 sm:$0xff]  ;;  %v2204_v32 = vld [vmem:[#allocation2 + $0x44] ss:$2 sm:$0xff] }
 0x1a9   : > { %v2477_v33 = vld [vmem:[#allocation2 + $0x54] ss:$2 sm:$0xff] }
 0x1aa   : > { %v2206_v34 = vld [vmem:[#allocation2 + $0x54] ss:$2 sm:$0xff] }
 0x1ab   : > { %14107 = vmatmul.mubr.msk.f32.vlgmr.msra.gmra.mxu1 %vm1040_vm0, %v1640_v35  ;;  %14170 = vmatmul.mubr.msk.f32.vlgmr.msra.gmra.mxu0 %vm1040_vm0, %v1918_v36  ;;  %v2478_v35 = vld [vmem:[#allocation2 + $0x64] ss:$2 sm:$0xff] }
 0x1ac   : > { %14227 = vmatpush3.msra.mxu1 %v12377_v37  ;;  %14109 = vmatprep.mubr.msk.f32.mxu1 %vm16804_vm4, %v16803_v0  ;;  %v2208_v36 = vld [vmem:[#allocation2 + $0x64] ss:$2 sm:$0xff]  ;;  %v2479_v37 = vld [vmem:[#allocation2 + $0x74] ss:$2 sm:$0xff] }
 0x1ad   : > { %14172 = vmatprep.mubr.msk.f32.mxu0 %vm16804_vm4, %v16803_v0  ;;  %14228 = vmatprep.subr.mxu1 %v16803_v0 }
 0x1ae   : > { %14229 = vmatpush3.msra.mxu1 %v12376_v38  ;;  %14290 = vmatpush3.msra.mxu0 %v12399_v39  ;;  %v2210_v38 = vld [vmem:[#allocation2 + $0x74] ss:$2 sm:$0xff]  ;;  %v2480_v39 = vld [vmem:[#allocation2 + $0x84] ss:$2 sm:$0xff] }
 0x1af   : > { %14110 = vmatmul.mubr.msk.f32.gmra.mxu1 %vm1040_vm0, %v1642_v40  ;;  %14173 = vmatmul.mubr.msk.f32.gmra.mxu0 %vm1040_vm0, %v1920_v41  ;;  %v2212_v40 = vld [vmem:[#allocation2 + $0x84] ss:$2 sm:$0xff]  ;;  %v2481_v41 = vld [vmem:[#allocation2 + $0x94] ss:$2 sm:$0xff] }
 0x1b0   : > { %14112 = vmatprep.mubr.msk.f32.mxu1 %vm16804_vm4, %v16803_v0  ;;  %14175 = vmatprep.mubr.msk.f32.mxu0 %vm16804_vm4, %v16803_v0 }
 0x1b1   : > { %14230 = vmatprep.subr.mxu1 %v16803_v0  ;;  %14291 = vmatprep.subr.mxu0 %v16803_v0 }
 0x1b2   : > { %14231 = vmatpush3.msra.mxu1 %v12375_v42  ;;  %14292 = vmatpush3.msra.mxu0 %v12398_v43  ;;  %v2214_v42 = vld [vmem:[#allocation2 + $0x94] ss:$2 sm:$0xff]  ;;  %v2482_v43 = vld [vmem:[#allocation2 + $0xa4] ss:$2 sm:$0xff] }
 0x1b3   : > { %14113 = vmatmul.mubr.msk.f32.gmra.mxu1 %vm1040_vm0, %v1644_v44  ;;  %14176 = vmatmul.mubr.msk.f32.gmra.mxu0 %vm1040_vm0, %v1922_v45  ;;  %v2216_v44 = vld [vmem:[#allocation2 + $0xa4] ss:$2 sm:$0xff]  ;;  %v2483_v45 = vld [vmem:[#allocation2 + $0xb4] ss:$2 sm:$0xff] }
 0x1b4   : > { %14115 = vmatprep.mubr.msk.f32.mxu1 %vm16804_vm4, %v16803_v0  ;;  %14178 = vmatprep.mubr.msk.f32.mxu0 %vm16804_vm4, %v16803_v0 }
 0x1b5   : > { %14293 = vmatprep.subr.mxu0 %v16803_v0  ;;  %14352 = vmatprep.subr.mxu1 %v16803_v0 }
 0x1b6   : > { %14294 = vmatpush3.msra.mxu0 %v12397_v46  ;;  %v2218_v46 = vld [vmem:[#allocation2 + $0xb4] ss:$2 sm:$0xff] }
 0x1b7   : > { %14116 = vmatmul.mubr.msk.f32.gmra.mxu1 %vm1040_vm0, %v1646_v48  ;;  %14179 = vmatmul.mubr.msk.f32.gmra.mxu0 %vm1040_vm0, %v1924_v49  ;;  %v2484_v48 = vld [vmem:[#allocation2 + $0xc4] ss:$2 sm:$0xff] }
 0x1b8   : > { %14118 = vmatprep.mubr.msk.f32.mxu1 %vm16804_vm4, %v16803_v0  ;;  %14181 = vmatprep.mubr.msk.f32.mxu0 %vm16804_vm4, %v16803_v0  ;;  %v2220_v49 = vld [vmem:[#allocation2 + $0xc4] ss:$2 sm:$0xff] }
 0x1b9   : > { %14415 = vmatprep.subr.mxu0 %v16803_v0 }
 0x1bb   : > { %14119 = vmatmul.mubr.msk.f32.gmra.mxu1 %vm1040_vm0, %v1648_v50  ;;  %14182 = vmatmul.mubr.msk.f32.gmra.mxu0 %vm1040_vm0, %v1926_v51  ;;  %v2485_v50 = vld [vmem:[#allocation2 + $0xd4] ss:$2 sm:$0xff] }
 0x1bc   : > { %14121 = vmatprep.mubr.msk.f32.mxu1 %vm16804_vm4, %v16803_v0  ;;  %14184 = vmatprep.mubr.msk.f32.mxu0 %vm16804_vm4, %v16803_v0 }
 0x1bf   : > { %14122 = vmatmul.mubr.msk.f32.gmra.mxu1 %vm1040_vm0, %v1650_v52  ;;  %14185 = vmatmul.mubr.msk.f32.gmra.mxu0 %vm1040_vm0, %v1928_v53 }
 0x1c0   : > { %14124 = vmatprep.mubr.msk.f32.mxu1 %vm16804_vm4, %v16803_v0  ;;  %14187 = vmatprep.mubr.msk.f32.mxu0 %vm16804_vm4, %v16803_v0 }
 0x1c3   : > { %14125 = vmatmul.mubr.msk.f32.gmra.mxu1 %vm1040_vm0, %v1652_v54  ;;  %14188 = vmatmul.mubr.msk.f32.gmra.mxu0 %vm1040_vm0, %v1930_v55 }
 0x1c4   : > { %14127 = vmatprep.mubr.msk.f32.mxu1 %vm16804_vm4, %v16803_v0  ;;  %14190 = vmatprep.mubr.msk.f32.mxu0 %vm16804_vm4, %v16803_v0 }
 0x1c7   : > { %14128 = vmatmul.mubr.msk.f32.gmra.mxu1 %vm1040_vm0, %v1654_v56  ;;  %14191 = vmatmul.mubr.msk.f32.gmra.mxu0 %vm1040_vm0, %v1932_v57  ;;  %v2222_v56 = vld [vmem:[#allocation2 + $0xd4] ss:$2 sm:$0xff]  ;;  %v2486_v57 = vld [vmem:[#allocation2 + $0xe4] ss:$2 sm:$0xff] }
 0x1c8   : > { %14130 = vmatprep.mubr.msk.f32.mxu1 %vm16804_vm4, %v16803_v0  ;;  %14193 = vmatprep.mubr.msk.f32.mxu0 %vm16804_vm4, %v16803_v0 }
 0x1cb   : > { %14131 = vmatmul.mubr.msk.f32.gmra.mxu1 %vm1040_vm0, %v1656_v58  ;;  %14194 = vmatmul.mubr.msk.f32.gmra.mxu0 %vm1040_vm0, %v1934_v59 }
 0x1cc   : > { %14133 = vmatprep.mubr.msk.f32.mxu1 %vm16804_vm4, %v16803_v0  ;;  %14196 = vmatprep.mubr.msk.f32.mxu0 %vm16804_vm4, %v16803_v0 }
 0x1cf   : > { %14134 = vmatmul.mubr.msk.f32.gmra.mxu1 %vm1040_vm0, %v1658_v60  ;;  %14197 = vmatmul.mubr.msk.f32.gmra.mxu0 %vm1040_vm0, %v1936_v61 }
 0x1d0   : > { %14136 = vmatprep.mubr.msk.f32.mxu1 %vm16804_vm4, %v16803_v0  ;;  %14199 = vmatprep.mubr.msk.f32.mxu0 %vm16804_vm4, %v16803_v0 }
 0x1d3   : > { %14137 = vmatmul.mubr.msk.f32.gmra.mxu1 %vm1040_vm0, %v1660_v62  ;;  %14200 = vmatmul.mubr.msk.f32.gmra.mxu0 %vm1040_vm0, %v1938_v63  ;;  %v2224_v63 = vld [vmem:[#allocation2 + $0xe4] ss:$2 sm:$0xff] }
 0x1d4   : > { %14139 = vmatprep.mubr.msk.f32.mxu1 %vm16804_vm4, %v16803_v0  ;;  %14202 = vmatprep.mubr.msk.f32.mxu0 %vm16804_vm4, %v16803_v0 }
 0x1d7   : > { %14140 = vmatmul.mubr.msk.f32.gmra.mxu1 %vm1040_vm0, %v1662_v1  ;;  %14203 = vmatmul.mubr.msk.f32.gmra.mxu0 %vm1040_vm0, %v1940_v2  ;;  %v2487_v1 = vld [vmem:[#allocation2 + $0xf4] ss:$2 sm:$0xff] }
 0x1d8   : > { %14142 = vmatprep.mubr.msk.f32.mxu1 %vm16804_vm4, %v16803_v0  ;;  %14205 = vmatprep.mubr.msk.f32.mxu0 %vm16804_vm4, %v16803_v0 }
 0x1db   : > { %14143 = vmatmul.mubr.msk.f32.gmra.mxu1 %vm1040_vm0, %v1664_v3  ;;  %14206 = vmatmul.mubr.msk.f32.gmra.mxu0 %vm1040_vm0, %v1942_v4 }
 0x1dc   : > { %14145 = vmatprep.mubr.msk.f32.mxu1 %vm16804_vm4, %v16803_v0  ;;  %14208 = vmatprep.mubr.msk.f32.mxu0 %vm16804_vm4, %v16803_v0 }
 0x1df   : > { %14146 = vmatmul.mubr.msk.f32.gmra.mxu1 %vm1040_vm0, %v1666_v5  ;;  %14209 = vmatmul.mubr.msk.f32.gmra.mxu0 %vm1040_vm0, %v1944_v6 }
 0x1e0   : > { %14148 = vmatprep.mubr.msk.f32.mxu1 %vm16804_vm4, %v16803_v0  ;;  %14211 = vmatprep.mubr.msk.f32.mxu0 %vm16804_vm4, %v16803_v0 }
 0x1e3   : > { %14149 = vmatmul.mubr.msk.f32.gmra.mxu1 %vm1040_vm0, %v1668_v7  ;;  %14212 = vmatmul.mubr.msk.f32.gmra.mxu0 %vm1040_vm0, %v1946_v8  ;;  %v2226_v7 = vld [vmem:[#allocation2 + $0xf4] ss:$2 sm:$0xff]  ;;  %v2488_v8 = vld [vmem:[#allocation2 + $0x104] ss:$2 sm:$0xff] }
 0x1e4   : > { %14151 = vmatprep.mubr.msk.f32.mxu1 %vm16804_vm4, %v16803_v0  ;;  %14214 = vmatprep.mubr.msk.f32.mxu0 %vm16804_vm4, %v16803_v0 }
 0x1e7   : > { %14152 = vmatmul.mubr.msk.f32.gmra.mxu1 %vm1040_vm0, %v1670_v9  ;;  %14215 = vmatmul.mubr.msk.f32.gmra.mxu0 %vm1040_vm0, %v1948_v10 }
 0x1e8   : > { %14154 = vmatprep.mubr.msk.f32.mxu1 %vm16804_vm4, %v16803_v0  ;;  %14217 = vmatprep.mubr.msk.f32.mxu0 %vm16804_vm4, %v16803_v0 }
 0x1eb   : > { %14155 = vmatmul.mubr.msk.f32.gmra.mxu1 %vm1040_vm0, %v1672_v11  ;;  %14218 = vmatmul.mubr.msk.f32.gmra.mxu0 %vm1040_vm0, %v1950_v12 }
 0x1ec   : > { %14157 = vmatprep.mubr.msk.f32.mxu1 %vm16804_vm4, %v16803_v0  ;;  %14220 = vmatprep.mubr.msk.f32.mxu0 %vm16804_vm4, %v16803_v0 }
 0x1ef   : > { %14158 = vmatmul.mubr.msk.f32.gmra.mxu1 %vm1040_vm0, %v1674_v13  ;;  %14221 = vmatmul.mubr.msk.f32.gmra.mxu0 %vm1040_vm0, %v1952_v14  ;;  %v2228_v14 = vld [vmem:[#allocation2 + $0x104] ss:$2 sm:$0xff] }
 0x1f0   : > { %14160 = vmatprep.mubr.msk.f32.mxu1 %vm16804_vm4, %v16803_v0  ;;  %14223 = vmatprep.mubr.msk.f32.mxu0 %vm16804_vm4, %v16803_v0 }
 0x1f3   : > { %14161 = vmatmul.mubr.msk.f32.gmra.mxu1 %vm1040_vm0, %v1676_v15  ;;  %14224 = vmatmul.mubr.msk.f32.gmra.mxu0 %vm1040_vm0, %v1954_v16  ;;  %v2489_v15 = vld [vmem:[#allocation2 + $0x114] ss:$2 sm:$0xff] }
 0x1f4   : > { %14232 = vmatprep.mubr.msk.f32.mxu1 %vm16804_vm4, %v16803_v0  ;;  %14295 = vmatprep.mubr.msk.f32.mxu0 %vm16804_vm4, %v16803_v0 }
 0x1f7   : > { %14233 = vmatmul.mubr.msk.f32.vlgmr.msra.gmra.mxu1 %vm1040_vm0, %v2196_v17  ;;  %14296 = vmatmul.mubr.msk.f32.vlgmr.msra.gmra.mxu0 %vm1040_vm0, %v2473_v18 }
 0x1f8   : > { %14353 = vmatpush3.msra.mxu1 %v12421_v19  ;;  %14235 = vmatprep.mubr.msk.f32.mxu1 %vm16804_vm4, %v16803_v0 }
 0x1f9   : > { %14298 = vmatprep.mubr.msk.f32.mxu0 %vm16804_vm4, %v16803_v0  ;;  %14354 = vmatprep.subr.mxu1 %v16803_v0 }
 0x1fa   : > { %14355 = vmatpush3.msra.mxu1 %v12420_v47  ;;  %14416 = vmatpush3.msra.mxu0 %v12443_v20  ;;  %v2230_v20 = vld [vmem:[#allocation2 + $0x114] ss:$2 sm:$0xff] }
 0x1fb   : > { %14236 = vmatmul.mubr.msk.f32.gmra.mxu1 %vm1040_vm0, %v2198_v21  ;;  %14299 = vmatmul.mubr.msk.f32.gmra.mxu0 %vm1040_vm0, %v2474_v22  ;;  %v2490_v21 = vld [vmem:[#allocation2 + $0x124] ss:$2 sm:$0xff] }
 0x1fc   : > { %14238 = vmatprep.mubr.msk.f32.mxu1 %vm16804_vm4, %v16803_v0  ;;  %14301 = vmatprep.mubr.msk.f32.mxu0 %vm16804_vm4, %v16803_v0 }
 0x1fd   : > { %14356 = vmatprep.subr.mxu1 %v16803_v0  ;;  %14417 = vmatprep.subr.mxu0 %v16803_v0 }
 0x1fe   : > { %14357 = vmatpush3.msra.mxu1 %v12419_v23  ;;  %14418 = vmatpush3.msra.mxu0 %v12442_v24 }
 0x1ff   : > { %14239 = vmatmul.mubr.msk.f32.gmra.mxu1 %vm1040_vm0, %v2200_v25  ;;  %14302 = vmatmul.mubr.msk.f32.gmra.mxu0 %vm1040_vm0, %v2475_v27  ;;  %v2492_v25 = vld [vmem:[#allocation2 + $0x134] ss:$2 sm:$0xf] }
 0x200   : > { %14241 = vmatprep.mubr.msk.f32.mxu1 %vm16804_vm4, %v16803_v0  ;;  %14304 = vmatprep.mubr.msk.f32.mxu0 %vm16804_vm4, %v16803_v0 }
 0x201   : > { %14419 = vmatprep.subr.mxu0 %v16803_v0  ;;  %14478 = vmatprep.subr.mxu1 %v16803_v0 }
 0x202   : > { %14420 = vmatpush3.msra.mxu0 %v12441_v28 }
 0x203   : > { %14242 = vmatmul.mubr.msk.f32.gmra.mxu1 %vm1040_vm0, %v2202_v29  ;;  %14305 = vmatmul.mubr.msk.f32.gmra.mxu0 %vm1040_vm0, %v2476_v30  ;;  %v2232_v29 = vld [vmem:[#allocation2 + $0x124] ss:$2 sm:$0xf] }
 0x204   : > { %14244 = vmatprep.mubr.msk.f32.mxu1 %vm16804_vm4, %v16803_v0  ;;  %14307 = vmatprep.mubr.msk.f32.mxu0 %vm16804_vm4, %v16803_v0 }
 0x205   : > { %14541 = vmatprep.subr.mxu0 %v16803_v0 }
 0x207   : > { %14245 = vmatmul.mubr.msk.f32.gmra.mxu1 %vm1040_vm0, %v2204_v32  ;;  %14308 = vmatmul.mubr.msk.f32.gmra.mxu0 %vm1040_vm0, %v2477_v33 }
 0x208   : > { %14247 = vmatprep.mubr.msk.f32.mxu1 %vm16804_vm4, %v16803_v0  ;;  %14310 = vmatprep.mubr.msk.f32.mxu0 %vm16804_vm4, %v16803_v0 }
 0x20b   : > { %14248 = vmatmul.mubr.msk.f32.gmra.mxu1 %vm1040_vm0, %v2206_v34  ;;  %14311 = vmatmul.mubr.msk.f32.gmra.mxu0 %vm1040_vm0, %v2478_v35  ;;  %v2734_v34 = vld [vmem:[#allocation2 + $0x15] ss:$2 sm:$0xff]  ;;  %v3012_v35 = vld [vmem:[#allocation2 + $0x16] ss:$2 sm:$0xff] }
 0x20c   : > { %14250 = vmatprep.mubr.msk.f32.mxu1 %vm16804_vm4, %v16803_v0  ;;  %14313 = vmatprep.mubr.msk.f32.mxu0 %vm16804_vm4, %v16803_v0 }
 0x20f   : > { %14251 = vmatmul.mubr.msk.f32.gmra.mxu1 %vm1040_vm0, %v2208_v36  ;;  %14314 = vmatmul.mubr.msk.f32.gmra.mxu0 %vm1040_vm0, %v2479_v37 }
 0x210   : > { %14253 = vmatprep.mubr.msk.f32.mxu1 %vm16804_vm4, %v16803_v0  ;;  %14316 = vmatprep.mubr.msk.f32.mxu0 %vm16804_vm4, %v16803_v0 }
 0x213   : > { %14254 = vmatmul.mubr.msk.f32.gmra.mxu1 %vm1040_vm0, %v2210_v38  ;;  %14317 = vmatmul.mubr.msk.f32.gmra.mxu0 %vm1040_vm0, %v2480_v39  ;;  %v12465_v38 = vld [vmem:[%s20615_s3 + $0xd0] sm:$0xff] }
 0x214   : > { %14256 = vmatprep.mubr.msk.f32.mxu1 %vm16804_vm4, %v16803_v0  ;;  %14319 = vmatprep.mubr.msk.f32.mxu0 %vm16804_vm4, %v16803_v0 }
 0x217   : > { %14257 = vmatmul.mubr.msk.f32.gmra.mxu1 %vm1040_vm0, %v2212_v40  ;;  %14320 = vmatmul.mubr.msk.f32.gmra.mxu0 %vm1040_vm0, %v2481_v41  ;;  %v12464_v41 = vld [vmem:[%s20615_s3 + $0xc8] sm:$0xff] }
 0x218   : > { %14259 = vmatprep.mubr.msk.f32.mxu1 %vm16804_vm4, %v16803_v0  ;;  %14322 = vmatprep.mubr.msk.f32.mxu0 %vm16804_vm4, %v16803_v0 }
 0x21b   : > { %14260 = vmatmul.mubr.msk.f32.gmra.mxu1 %vm1040_vm0, %v2214_v42  ;;  %14323 = vmatmul.mubr.msk.f32.gmra.mxu0 %vm1040_vm0, %v2482_v43  ;;  %v12487_v42 = vld [vmem:[%s20615_s3 + $0xe8] sm:$0xff] }
 0x21c   : > { %14262 = vmatprep.mubr.msk.f32.mxu1 %vm16804_vm4, %v16803_v0  ;;  %14325 = vmatprep.mubr.msk.f32.mxu0 %vm16804_vm4, %v16803_v0 }
 0x21f   : > { %14263 = vmatmul.mubr.msk.f32.gmra.mxu1 %vm1040_vm0, %v2216_v44  ;;  %14326 = vmatmul.mubr.msk.f32.gmra.mxu0 %vm1040_vm0, %v2483_v45 }
 0x220   : > { %14265 = vmatprep.mubr.msk.f32.mxu1 %vm16804_vm4, %v16803_v0  ;;  %14328 = vmatprep.mubr.msk.f32.mxu0 %vm16804_vm4, %v16803_v0 }
 0x223   : > { %14266 = vmatmul.mubr.msk.f32.gmra.mxu1 %vm1040_vm0, %v2218_v46  ;;  %14329 = vmatmul.mubr.msk.f32.gmra.mxu0 %vm1040_vm0, %v2484_v48  ;;  %v2736_v46 = vld [vmem:[#allocation2 + $0x25] ss:$2 sm:$0xff]  ;;  %v3014_v48 = vld [vmem:[#allocation2 + $0x26] ss:$2 sm:$0xff] }
 0x224   : > { %14268 = vmatprep.mubr.msk.f32.mxu1 %vm16804_vm4, %v16803_v0  ;;  %14331 = vmatprep.mubr.msk.f32.mxu0 %vm16804_vm4, %v16803_v0 }
 0x227   : > { %v1338_v51 = vpop.f32.mrf.mxu1  ;;  %v1555_v52 = vpop.f32.mrf.mxu0  ;;  %14269 = vmatmul.mubr.msk.f32.gmra.mxu1 %vm1040_vm0, %v2220_v49  ;;  %14332 = vmatmul.mubr.msk.f32.gmra.mxu0 %vm1040_vm0, %v2485_v50 }
 0x228   : > { %v17715_v53 = vadd.f32 %v1555_v52, %v1338_v51  ;;  %14271 = vmatprep.mubr.msk.f32.mxu1 %vm16804_vm4, %v16803_v0  ;;  %14334 = vmatprep.mubr.msk.f32.mxu0 %vm16804_vm4, %v16803_v0  ;;  %v12463_v51 = vld [vmem:[%s20615_s3 + $0xc0] sm:$0xff] }
 0x229   : > { %v13988_v54 = vpop.f32.mrf.mxu1  ;;  %v14051_v55 = vpop.f32.mrf.mxu0  ;;  %v12486_v52 = vld [vmem:[%s20615_s3 + $0xe0] sm:$0xff] }
 0x22b   : > { %v1343_v58 = vpop.f32.mrf.mxu1  ;;  %v1560_v59 = vpop.f32.mrf.mxu0  ;;  %14272 = vmatmul.mubr.msk.f32.gmra.mxu1 %vm1040_vm0, %v2222_v56  ;;  %14335 = vmatmul.mubr.msk.f32.gmra.mxu0 %vm1040_vm0, %v2486_v57  ;;  %v2738_v57 = vld [vmem:[#allocation2 + $0x35] ss:$2 sm:$0xff] }
 0x22c   : > { %v17723_v60 = vadd.f32 %v1560_v59, %v1343_v58  ;;  %14274 = vmatprep.mubr.msk.f32.mxu1 %vm16804_vm4, %v16803_v0  ;;  %14337 = vmatprep.mubr.msk.f32.mxu0 %vm16804_vm4, %v16803_v0  ;;  %v3016_v58 = vld [vmem:[#allocation2 + $0x36] ss:$2 sm:$0xff] }
 0x22d   : > { %v13991_v61 = vpop.f32.mrf.mxu1  ;;  %v14054_v62 = vpop.f32.mrf.mxu0 }
 0x22e   : > { %v12485_v62 = vld [vmem:[%s20615_s3 + $0xd8] sm:$0xff] }
 0x22f   : > { %v1348_v2 = vpop.f32.mrf.mxu1  ;;  %v1565_v3 = vpop.f32.mrf.mxu0  ;;  %14275 = vmatmul.mubr.msk.f32.gmra.mxu1 %vm1040_vm0, %v2224_v63  ;;  %14338 = vmatmul.mubr.msk.f32.gmra.mxu0 %vm1040_vm0, %v2487_v1 }
 0x230   : > { %v17731_v4 = vadd.f32 %v1565_v3, %v1348_v2  ;;  %14277 = vmatprep.mubr.msk.f32.mxu1 %vm16804_vm4, %v16803_v0  ;;  %14340 = vmatprep.mubr.msk.f32.mxu0 %vm16804_vm4, %v16803_v0  ;;  %v2740_v3 = vld [vmem:[#allocation2 + $0x45] ss:$2 sm:$0xff] }
 0x231   : > { %v13994_v5 = vpop.f32.mrf.mxu1  ;;  %v14057_v6 = vpop.f32.mrf.mxu0 }
 0x232   : > { %v3018_v5 = vld [vmem:[#allocation2 + $0x46] ss:$2 sm:$0xff] }
 0x233   : > { %v1353_v9 = vpop.f32.mrf.mxu1  ;;  %v1570_v10 = vpop.f32.mrf.mxu0  ;;  %14278 = vmatmul.mubr.msk.f32.gmra.mxu1 %vm1040_vm0, %v2226_v7  ;;  %14341 = vmatmul.mubr.msk.f32.gmra.mxu0 %vm1040_vm0, %v2488_v8 }
 0x234   : > { %v17739_v11 = vadd.f32 %v1570_v10, %v1353_v9  ;;  %14280 = vmatprep.mubr.msk.f32.mxu1 %vm16804_vm4, %v16803_v0  ;;  %14343 = vmatprep.mubr.msk.f32.mxu0 %vm16804_vm4, %v16803_v0 }
 0x235   : > { %v13997_v12 = vpop.f32.mrf.mxu1  ;;  %v14060_v13 = vpop.f32.mrf.mxu0 }
 0x236   : > { %v2742_v12 = vld [vmem:[#allocation2 + $0x55] ss:$2 sm:$0xff]  ;;  %v3020_v13 = vld [vmem:[#allocation2 + $0x56] ss:$2 sm:$0xff] }
 0x237   : > { %v1358_v16 = vpop.f32.mrf.mxu1  ;;  %v1575_v17 = vpop.f32.mrf.mxu0  ;;  %14281 = vmatmul.mubr.msk.f32.gmra.mxu1 %vm1040_vm0, %v2228_v14  ;;  %14344 = vmatmul.mubr.msk.f32.gmra.mxu0 %vm1040_vm0, %v2489_v15 }
 0x238   : > { %v17747_v18 = vadd.f32 %v1575_v17, %v1358_v16  ;;  %14283 = vmatprep.mubr.msk.f32.mxu1 %vm16804_vm4, %v16803_v0  ;;  %14346 = vmatprep.mubr.msk.f32.mxu0 %vm16804_vm4, %v16803_v0 }
 0x239   : > { %v14000_v19 = vpop.f32.mrf.mxu1  ;;  %v14063_v47 = vpop.f32.mrf.mxu0 }
 0x23a   : > { %v2744_v47 = vld [vmem:[#allocation2 + $0x65] ss:$2 sm:$0xff] }
 0x23b   : > { %v1363_v22 = vpop.f32.mrf.mxu1  ;;  %v1580_v23 = vpop.f32.mrf.mxu0  ;;  %14284 = vmatmul.mubr.msk.f32.gmra.mxu1 %vm1040_vm0, %v2230_v20  ;;  %14347 = vmatmul.mubr.msk.f32.gmra.mxu0 %vm1040_vm0, %v2490_v21  ;;  %v3022_v20 = vld [vmem:[#allocation2 + $0x66] ss:$2 sm:$0xff] }
 0x23c   : > { %v17755_v24 = vadd.f32 %v1580_v23, %v1363_v22  ;;  %14286 = vmatprep.mubr.msk.f32.mxu1 %vm16804_vm4, %v16803_v0  ;;  %14349 = vmatprep.mubr.msk.f32.mxu0 %vm16804_vm4, %v16803_v0 }
 0x23d   : > { %v14003_v27 = vpop.f32.mrf.mxu1  ;;  %v14066_v28 = vpop.f32.mrf.mxu0 }
 0x23e   : > { %v2746_v28 = vld [vmem:[#allocation2 + $0x75] ss:$2 sm:$0xff] }
 0x23f   : > { %v1368_v30 = vpop.f32.mrf.mxu1  ;;  %v1585_v32 = vpop.f32.mrf.mxu0  ;;  %14287 = vmatmul.mubr.msk.f32.gmra.mxu1 %vm1040_vm0, %v2232_v29  ;;  %14350 = vmatmul.mubr.msk.f32.gmra.mxu0 %vm1040_vm0, %v2492_v25  ;;  %v3024_v29 = vld [vmem:[#allocation2 + $0x76] ss:$2 sm:$0xff] }
 0x240   : > { %v17763_v33 = vadd.f32 %v1585_v32, %v1368_v30  ;;  %14358 = vmatprep.mubr.msk.f32.mxu1 %vm16804_vm4, %v16803_v0  ;;  %14421 = vmatprep.mubr.msk.f32.mxu0 %vm16804_vm4, %v16803_v0 }
 0x241   : > { %v14006_v36 = vpop.f32.mrf.mxu1  ;;  %v14069_v37 = vpop.f32.mrf.mxu0 }
 0x242   : > { %v2748_v37 = vld [vmem:[#allocation2 + $0x85] ss:$2 sm:$0xff] }
 0x243   : > { %v1373_v39 = vpop.f32.mrf.mxu1  ;;  %v1590_v40 = vpop.f32.mrf.mxu0  ;;  %14359 = vmatmul.mubr.msk.f32.vlgmr.msra.gmra.mxu1 %vm1040_vm0, %v2734_v34  ;;  %14422 = vmatmul.mubr.msk.f32.vlgmr.msra.gmra.mxu0 %vm1040_vm0, %v3012_v35 }
 0x244   : > { %v17780_v43 = vadd.f32 %v1590_v40, %v1373_v39  ;;  %14479 = vmatpush3.msra.mxu1 %v12465_v38  ;;  %14361 = vmatprep.mubr.msk.f32.mxu1 %vm16804_vm4, %v16803_v0  ;;  %v3026_v38 = vld [vmem:[#allocation2 + $0x86] ss:$2 sm:$0xff] }
 0x245   : > { %v14009_v44 = vpop.f32.mrf.mxu1  ;;  %v14072_v45 = vpop.f32.mrf.mxu0  ;;  %14424 = vmatprep.mubr.msk.f32.mxu0 %vm16804_vm4, %v16803_v0  ;;  %14480 = vmatprep.subr.mxu1 %v16803_v0 }
 0x246   : > { %14481 = vmatpush3.msra.mxu1 %v12464_v41  ;;  %14542 = vmatpush3.msra.mxu0 %v12487_v42  ;;  %v2750_v45 = vld [vmem:[#allocation2 + $0x95] ss:$2 sm:$0xff] }
 0x247   : > { %v1378_v49 = vpop.f32.mrf.mxu1  ;;  %v1595_v50 = vpop.f32.mrf.mxu0  ;;  %14362 = vmatmul.mubr.msk.f32.gmra.mxu1 %vm1040_vm0, %v2736_v46  ;;  %14425 = vmatmul.mubr.msk.f32.gmra.mxu0 %vm1040_vm0, %v3014_v48  ;;  %v3028_v46 = vld [vmem:[#allocation2 + $0x96] ss:$2 sm:$0xff] }
 0x248   : > { %v17795_v54 = vadd.f32 %v1595_v50, %v1378_v49  ;;  %14364 = vmatprep.mubr.msk.f32.mxu1 %vm16804_vm4, %v16803_v0  ;;  %14427 = vmatprep.mubr.msk.f32.mxu0 %vm16804_vm4, %v16803_v0 }
 0x249   : > { %v14012_v55 = vpop.f32.mrf.mxu1  ;;  %v14075_v56 = vpop.f32.mrf.mxu0  ;;  %14482 = vmatprep.subr.mxu1 %v16803_v0  ;;  %14543 = vmatprep.subr.mxu0 %v16803_v0 }
 0x24a   : > { %14483 = vmatpush3.msra.mxu1 %v12463_v51  ;;  %14544 = vmatpush3.msra.mxu0 %v12486_v52  ;;  %v2752_v55 = vld [vmem:[#allocation2 + $0xa5] ss:$2 sm:$0xff]  ;;  %v3030_v56 = vld [vmem:[#allocation2 + $0xa6] ss:$2 sm:$0xff] }
 0x24b   : > { %v1383_v59 = vpop.f32.mrf.mxu1  ;;  %v1600_v61 = vpop.f32.mrf.mxu0  ;;  %14365 = vmatmul.mubr.msk.f32.gmra.mxu1 %vm1040_vm0, %v2738_v57  ;;  %14428 = vmatmul.mubr.msk.f32.gmra.mxu0 %vm1040_vm0, %v3016_v58 }
 0x24c   : > { %v17808_v63 = vadd.f32 %v1600_v61, %v1383_v59  ;;  %14367 = vmatprep.mubr.msk.f32.mxu1 %vm16804_vm4, %v16803_v0  ;;  %14430 = vmatprep.mubr.msk.f32.mxu0 %vm16804_vm4, %v16803_v0 }
 0x24d   : > { %v14015_v1 = vpop.f32.mrf.mxu1  ;;  %v14078_v2 = vpop.f32.mrf.mxu0  ;;  %14545 = vmatprep.subr.mxu0 %v16803_v0  ;;  %14604 = vmatprep.subr.mxu1 %v16803_v0 }
 0x24e   : > { %14546 = vmatpush3.msra.mxu0 %v12485_v62  ;;  %v2754_v1 = vld [vmem:[#allocation2 + $0xb5] ss:$2 sm:$0xff]  ;;  %v3032_v2 = vld [vmem:[#allocation2 + $0xb6] ss:$2 sm:$0xff] }
 0x24f   : > { %v1388_v6 = vpop.f32.mrf.mxu1  ;;  %v1605_v7 = vpop.f32.mrf.mxu0  ;;  %14368 = vmatmul.mubr.msk.f32.gmra.mxu1 %vm1040_vm0, %v2740_v3  ;;  %14431 = vmatmul.mubr.msk.f32.gmra.mxu0 %vm1040_vm0, %v3018_v5 }
 0x250   : > { %v17818_v8 = vadd.f32 %v1605_v7, %v1388_v6  ;;  %14370 = vmatprep.mubr.msk.f32.mxu1 %vm16804_vm4, %v16803_v0  ;;  %14433 = vmatprep.mubr.msk.f32.mxu0 %vm16804_vm4, %v16803_v0 }
 0x251   : > { %v14018_v9 = vpop.f32.mrf.mxu1  ;;  %v14081_v10 = vpop.f32.mrf.mxu0  ;;  %14667 = vmatprep.subr.mxu0 %v16803_v0 }
 0x253   : > { %v1393_v14 = vpop.f32.mrf.mxu1  ;;  %v1610_v15 = vpop.f32.mrf.mxu0  ;;  %14371 = vmatmul.mubr.msk.f32.gmra.mxu1 %vm1040_vm0, %v2742_v12  ;;  %14434 = vmatmul.mubr.msk.f32.gmra.mxu0 %vm1040_vm0, %v3020_v13  ;;  %v2756_v12 = vld [vmem:[#allocation2 + $0xc5] ss:$2 sm:$0xff]  ;;  %v3034_v13 = vld [vmem:[#allocation2 + $0xc6] ss:$2 sm:$0xff] }
 0x254   : > { %v17827_v16 = vadd.f32 %v1610_v15, %v1393_v14  ;;  %14373 = vmatprep.mubr.msk.f32.mxu1 %vm16804_vm4, %v16803_v0  ;;  %14436 = vmatprep.mubr.msk.f32.mxu0 %vm16804_vm4, %v16803_v0 }
 0x255   : > { %v14021_v17 = vpop.f32.mrf.mxu1  ;;  %v14084_v19 = vpop.f32.mrf.mxu0 }
 0x257   : > { %v1398_v21 = vpop.f32.mrf.mxu1  ;;  %v1615_v22 = vpop.f32.mrf.mxu0  ;;  %14374 = vmatmul.mubr.msk.f32.gmra.mxu1 %vm1040_vm0, %v2744_v47  ;;  %14437 = vmatmul.mubr.msk.f32.gmra.mxu0 %vm1040_vm0, %v3022_v20  ;;  %v2758_v20 = vld [vmem:[#allocation2 + $0xd5] ss:$2 sm:$0xff] }
 0x258   : > { %v17835_v23 = vadd.f32 %v1615_v22, %v1398_v21  ;;  %14376 = vmatprep.mubr.msk.f32.mxu1 %vm16804_vm4, %v16803_v0  ;;  %14439 = vmatprep.mubr.msk.f32.mxu0 %vm16804_vm4, %v16803_v0  ;;  %v3036_v21 = vld [vmem:[#allocation2 + $0xd6] ss:$2 sm:$0xff] }
 0x259   : > { %v14024_v25 = vpop.f32.mrf.mxu1  ;;  %v14087_v27 = vpop.f32.mrf.mxu0 }
 0x25b   : > { %v1403_v30 = vpop.f32.mrf.mxu1  ;;  %v1620_v32 = vpop.f32.mrf.mxu0  ;;  %14377 = vmatmul.mubr.msk.f32.gmra.mxu1 %vm1040_vm0, %v2746_v28  ;;  %14440 = vmatmul.mubr.msk.f32.gmra.mxu0 %vm1040_vm0, %v3024_v29 }
 0x25c   : > { %v17843_v34 = vadd.f32 %v1620_v32, %v1403_v30  ;;  %14379 = vmatprep.mubr.msk.f32.mxu1 %vm16804_vm4, %v16803_v0  ;;  %14442 = vmatprep.mubr.msk.f32.mxu0 %vm16804_vm4, %v16803_v0  ;;  %v2760_v30 = vld [vmem:[#allocation2 + $0xe5] ss:$2 sm:$0xff]  ;;  %v3038_v32 = vld [vmem:[#allocation2 + $0xe6] ss:$2 sm:$0xff] }
 0x25d   : > { %v14027_v35 = vpop.f32.mrf.mxu1  ;;  %v14090_v36 = vpop.f32.mrf.mxu0 }
 0x25f   : > { %v1408_v39 = vpop.f32.mrf.mxu1  ;;  %v1625_v40 = vpop.f32.mrf.mxu0  ;;  %14380 = vmatmul.mubr.msk.f32.gmra.mxu1 %vm1040_vm0, %v2748_v37  ;;  %14443 = vmatmul.mubr.msk.f32.gmra.mxu0 %vm1040_vm0, %v3026_v38 }
 0x260   : > { %v17851_v41 = vadd.f32 %v1625_v40, %v1408_v39  ;;  %14382 = vmatprep.mubr.msk.f32.mxu1 %vm16804_vm4, %v16803_v0  ;;  %14445 = vmatprep.mubr.msk.f32.mxu0 %vm16804_vm4, %v16803_v0  ;;  %v2762_v40 = vld [vmem:[#allocation2 + $0xf5] ss:$2 sm:$0xff] }
 0x261   : > { %v14030_v42 = vpop.f32.mrf.mxu1  ;;  %v14093_v44 = vpop.f32.mrf.mxu0 }
 0x262   : > { %v3040_v42 = vld [vmem:[#allocation2 + $0xf6] ss:$2 sm:$0xff] }
 0x263   : > { %v1413_v48 = vpop.f32.mrf.mxu1  ;;  %v1630_v49 = vpop.f32.mrf.mxu0  ;;  %14383 = vmatmul.mubr.msk.f32.gmra.mxu1 %vm1040_vm0, %v2750_v45  ;;  %14446 = vmatmul.mubr.msk.f32.gmra.mxu0 %vm1040_vm0, %v3028_v46 }
 0x264   : > { %v17859_v50 = vadd.f32 %v1630_v49, %v1413_v48  ;;  %14385 = vmatprep.mubr.msk.f32.mxu1 %vm16804_vm4, %v16803_v0  ;;  %14448 = vmatprep.mubr.msk.f32.mxu0 %vm16804_vm4, %v16803_v0 }
 0x265   : > { %v14033_v51 = vpop.f32.mrf.mxu1  ;;  %v14096_v52 = vpop.f32.mrf.mxu0 }
 0x266   : > { %v2764_v51 = vld [vmem:[#allocation2 + $0x105] ss:$2 sm:$0xff]  ;;  %v3042_v52 = vld [vmem:[#allocation2 + $0x106] ss:$2 sm:$0xff] }
 0x267   : > { %v1418_v57 = vpop.f32.mrf.mxu1  ;;  %v1635_v58 = vpop.f32.mrf.mxu0  ;;  %14386 = vmatmul.mubr.msk.f32.gmra.mxu1 %vm1040_vm0, %v2752_v55  ;;  %14449 = vmatmul.mubr.msk.f32.gmra.mxu0 %vm1040_vm0, %v3030_v56 }
 0x268   : > { %v17867_v59 = vadd.f32 %v1635_v58, %v1418_v57  ;;  %14388 = vmatprep.mubr.msk.f32.mxu1 %vm16804_vm4, %v16803_v0  ;;  %14451 = vmatprep.mubr.msk.f32.mxu0 %vm16804_vm4, %v16803_v0 }
 0x269   : > { %v14036_v61 = vpop.f32.mrf.mxu1  ;;  %v14099_v62 = vpop.f32.mrf.mxu0 }
 0x26a   : > { %v2766_v62 = vld [vmem:[#allocation2 + $0x115] ss:$2 sm:$0xff] }
 0x26b   : > { %v1804_v3 = vpop.f32.mrf.mxu1  ;;  %v2082_v5 = vpop.f32.mrf.mxu0  ;;  %14389 = vmatmul.mubr.msk.f32.gmra.mxu1 %vm1040_vm0, %v2754_v1  ;;  %14452 = vmatmul.mubr.msk.f32.gmra.mxu0 %vm1040_vm0, %v3032_v2  ;;  %v3044_v1 = vld [vmem:[#allocation2 + $0x116] ss:$2 sm:$0xff] }
 0x26c   : > { %v1898_v6 = vadd.f32 %v1804_v3, %v17463_v26  ;;  %14391 = vmatprep.mubr.msk.f32.mxu1 %vm16804_vm4, %v16803_v0  ;;  %14454 = vmatprep.mubr.msk.f32.mxu0 %vm16804_vm4, %v16803_v0 }
 0x26d   : > { %v14108_v7 = vpop.f32.mrf.mxu1  ;;  %v14171_v9 = vpop.f32.mrf.mxu0 }
 0x26e   : > { %v17880_v10 = vadd.f32 %v2082_v5, %v1898_v6  ;;  %v2768_v9 = vld [vmem:[#allocation2 + $0x125] ss:$2 sm:$0xff] }
 0x26f   : > { %v1809_v14 = vpop.f32.mrf.mxu1  ;;  %v2087_v15 = vpop.f32.mrf.mxu0  ;;  %14392 = vmatmul.mubr.msk.f32.gmra.mxu1 %vm1040_vm0, %v2756_v12  ;;  %14455 = vmatmul.mubr.msk.f32.gmra.mxu0 %vm1040_vm0, %v3034_v13  ;;  %v3046_v12 = vld [vmem:[#allocation2 + $0x126] ss:$2 sm:$0xff] }
 0x270   : > { %v1899_v26 = vadd.f32 %v1809_v14, %v17471_v31  ;;  %14394 = vmatprep.mubr.msk.f32.mxu1 %vm16804_vm4, %v16803_v0  ;;  %14457 = vmatprep.mubr.msk.f32.mxu0 %vm16804_vm4, %v16803_v0 }
 0x271   : > { %v14111_v17 = vpop.f32.mrf.mxu1  ;;  %v14174_v19 = vpop.f32.mrf.mxu0 }
 0x272   : > { %v17889_v47 = vadd.f32 %v2087_v15, %v1899_v26  ;;  %v2770_v19 = vld [vmem:[#allocation2 + $0x135] ss:$2 sm:$0xf] }
 0x273   : > { %v1814_v22 = vpop.f32.mrf.mxu1  ;;  %v2092_v25 = vpop.f32.mrf.mxu0  ;;  %14395 = vmatmul.mubr.msk.f32.gmra.mxu1 %vm1040_vm0, %v2758_v20  ;;  %14458 = vmatmul.mubr.msk.f32.gmra.mxu0 %vm1040_vm0, %v3036_v21  ;;  %v3048_v20 = vld [vmem:[#allocation2 + $0x136] ss:$2 sm:$0xf] }
 0x274   : > { %v1900_v31 = vadd.f32 %v1814_v22, %v17715_v53  ;;  %14397 = vmatprep.mubr.msk.f32.mxu1 %vm16804_vm4, %v16803_v0  ;;  %14460 = vmatprep.mubr.msk.f32.mxu0 %vm16804_vm4, %v16803_v0 }
 0x275   : > { %v14114_v27 = vpop.f32.mrf.mxu1  ;;  %v14177_v28 = vpop.f32.mrf.mxu0 }
 0x276   : > { %v17898_v29 = vadd.f32 %v2092_v25, %v1900_v31  ;;  %v3290_v25 = vld [vmem:[#allocation2 + $0x17] ss:$2 sm:$0xff]  ;;  %v3568_v31 = vld [vmem:[#allocation2 + $0x18] ss:$2 sm:$0xff] }
 0x277   : > { %v1819_v35 = vpop.f32.mrf.mxu1  ;;  %v2097_v36 = vpop.f32.mrf.mxu0  ;;  %14398 = vmatmul.mubr.msk.f32.gmra.mxu1 %vm1040_vm0, %v2760_v30  ;;  %14461 = vmatmul.mubr.msk.f32.gmra.mxu0 %vm1040_vm0, %v3038_v32  ;;  %v12509_v30 = vld [vmem:[%s20615_s3 + $0x100] sm:$0xff] }
 0x278   : > { %v1901_v53 = vadd.f32 %v1819_v35, %v17723_v60  ;;  %14400 = vmatprep.mubr.msk.f32.mxu1 %vm16804_vm4, %v16803_v0  ;;  %14463 = vmatprep.mubr.msk.f32.mxu0 %vm16804_vm4, %v16803_v0 }
 0x279   : > { %v14117_v37 = vpop.f32.mrf.mxu1  ;;  %v14180_v38 = vpop.f32.mrf.mxu0 }
 0x27a   : > { %v17907_v39 = vadd.f32 %v2097_v36, %v1901_v53  ;;  %v12531_v53 = vld [vmem:[%s20615_s3 + $0x118] sm:$0xff] }
 0x27b   : > { %v1824_v44 = vpop.f32.mrf.mxu1  ;;  %v2102_v45 = vpop.f32.mrf.mxu0  ;;  %14401 = vmatmul.mubr.msk.f32.gmra.mxu1 %vm1040_vm0, %v2762_v40  ;;  %14464 = vmatmul.mubr.msk.f32.gmra.mxu0 %vm1040_vm0, %v3040_v42 }
 0x27c   : > { %v1902_v60 = vadd.f32 %v1824_v44, %v17731_v4  ;;  %14403 = vmatprep.mubr.msk.f32.mxu1 %vm16804_vm4, %v16803_v0  ;;  %14466 = vmatprep.mubr.msk.f32.mxu0 %vm16804_vm4, %v16803_v0  ;;  %v3292_v44 = vld [vmem:[#allocation2 + $0x27] ss:$2 sm:$0xff] }
 0x27d   : > { %v14120_v46 = vpop.f32.mrf.mxu1  ;;  %v14183_v48 = vpop.f32.mrf.mxu0 }
 0x27e   : > { %v17916_v49 = vadd.f32 %v2102_v45, %v1902_v60  ;;  %v3570_v45 = vld [vmem:[#allocation2 + $0x28] ss:$2 sm:$0xff] }
 0x27f   : > { %v1829_v55 = vpop.f32.mrf.mxu1  ;;  %v2107_v56 = vpop.f32.mrf.mxu0  ;;  %14404 = vmatmul.mubr.msk.f32.gmra.mxu1 %vm1040_vm0, %v2764_v51  ;;  %14467 = vmatmul.mubr.msk.f32.gmra.mxu0 %vm1040_vm0, %v3042_v52  ;;  %v12530_v48 = vld [vmem:[%s20615_s3 + $0x110] sm:$0xff] }
 0x280   : > { %v1903_v4 = vadd.f32 %v1829_v55, %v17739_v11  ;;  %14406 = vmatprep.mubr.msk.f32.mxu1 %vm16804_vm4, %v16803_v0  ;;  %14469 = vmatprep.mubr.msk.f32.mxu0 %vm16804_vm4, %v16803_v0 }
 0x281   : > { %v14123_v57 = vpop.f32.mrf.mxu1  ;;  %v14186_v58 = vpop.f32.mrf.mxu0 }
 0x282   : > { %v17925_v61 = vadd.f32 %v2107_v56, %v1903_v4  ;;  %v3294_v4 = vld [vmem:[#allocation2 + $0x37] ss:$2 sm:$0xff]  ;;  %v3572_v57 = vld [vmem:[#allocation2 + $0x38] ss:$2 sm:$0xff] }
 0x283   : > { %v1834_v2 = vpop.f32.mrf.mxu1  ;;  %v2112_v3 = vpop.f32.mrf.mxu0  ;;  %14407 = vmatmul.mubr.msk.f32.gmra.mxu1 %vm1040_vm0, %v2766_v62  ;;  %14470 = vmatmul.mubr.msk.f32.gmra.mxu0 %vm1040_vm0, %v3044_v1  ;;  %v12529_v62 = vld [vmem:[%s20615_s3 + $0x108] sm:$0xff] }
 0x284   : > { %v1904_v11 = vadd.f32 %v1834_v2, %v17747_v18  ;;  %14409 = vmatprep.mubr.msk.f32.mxu1 %vm16804_vm4, %v16803_v0  ;;  %14472 = vmatprep.mubr.msk.f32.mxu0 %vm16804_vm4, %v16803_v0 }
 0x285   : > { %v14126_v5 = vpop.f32.mrf.mxu1  ;;  %v14189_v6 = vpop.f32.mrf.mxu0 }
 0x286   : > { %v17934_v7 = vadd.f32 %v2112_v3, %v1904_v11  ;;  %v3296_v5 = vld [vmem:[#allocation2 + $0x47] ss:$2 sm:$0xff]  ;;  %v3574_v6 = vld [vmem:[#allocation2 + $0x48] ss:$2 sm:$0xff] }
 0x287   : > { %v1839_v13 = vpop.f32.mrf.mxu1  ;;  %v2117_v14 = vpop.f32.mrf.mxu0  ;;  %14410 = vmatmul.mubr.msk.f32.gmra.mxu1 %vm1040_vm0, %v2768_v9  ;;  %14473 = vmatmul.mubr.msk.f32.gmra.mxu0 %vm1040_vm0, %v3046_v12 }
 0x288   : > { %v1905_v18 = vadd.f32 %v1839_v13, %v17755_v24  ;;  %14412 = vmatprep.mubr.msk.f32.mxu1 %vm16804_vm4, %v16803_v0  ;;  %14475 = vmatprep.mubr.msk.f32.mxu0 %vm16804_vm4, %v16803_v0 }
 0x289   : > { %v14129_v15 = vpop.f32.mrf.mxu1  ;;  %v14192_v26 = vpop.f32.mrf.mxu0 }
 0x28a   : > { %v17943_v17 = vadd.f32 %v2117_v14, %v1905_v18  ;;  %v3298_v15 = vld [vmem:[#allocation2 + $0x57] ss:$2 sm:$0xff]  ;;  %v3576_v26 = vld [vmem:[#allocation2 + $0x58] ss:$2 sm:$0xff] }
 0x28b   : > { %v1844_v21 = vpop.f32.mrf.mxu1  ;;  %v2122_v22 = vpop.f32.mrf.mxu0  ;;  %14413 = vmatmul.mubr.msk.f32.gmra.mxu1 %vm1040_vm0, %v2770_v19  ;;  %14476 = vmatmul.mubr.msk.f32.gmra.mxu0 %vm1040_vm0, %v3048_v20 }
 0x28c   : > { %v1906_v24 = vadd.f32 %v1844_v21, %v17763_v33  ;;  %14484 = vmatprep.mubr.msk.f32.mxu1 %vm16804_vm4, %v16803_v0  ;;  %14547 = vmatprep.mubr.msk.f32.mxu0 %vm16804_vm4, %v16803_v0  ;;  %v12508_v33 = vld [vmem:[%s20615_s3 + $0xf8] sm:$0xff] }
 0x28d   : > { %v14132_v27 = vpop.f32.mrf.mxu1  ;;  %v14195_v28 = vpop.f32.mrf.mxu0 }
 0x28e   : > { %v17955_v32 = vadd.f32 %v2122_v22, %v1906_v24 }
 0x28f   : > { %v1849_v35 = vpop.f32.mrf.mxu1  ;;  %v2127_v36 = vpop.f32.mrf.mxu0  ;;  %14485 = vmatmul.mubr.msk.f32.vlgmr.msra.gmra.mxu1 %vm1040_vm0, %v3290_v25  ;;  %14548 = vmatmul.mubr.msk.f32.vlgmr.msra.gmra.mxu0 %vm1040_vm0, %v3568_v31  ;;  %v3300_v25 = vld [vmem:[#allocation2 + $0x67] ss:$2 sm:$0xff]  ;;  %v3578_v31 = vld [vmem:[#allocation2 + $0x68] ss:$2 sm:$0xff] }
 0x290   : > { %v1907_v37 = vadd.f32 %v1849_v35, %v17780_v43  ;;  %14605 = vmatpush3.msra.mxu1 %v12509_v30  ;;  %14487 = vmatprep.mubr.msk.f32.mxu1 %vm16804_vm4, %v16803_v0  ;;  %v12507_v43 = vld [vmem:[%s20615_s3 + $0xf0] sm:$0xff] }
 0x291   : > { %v14135_v38 = vpop.f32.mrf.mxu1  ;;  %v14198_v40 = vpop.f32.mrf.mxu0  ;;  %14550 = vmatprep.mubr.msk.f32.mxu0 %vm16804_vm4, %v16803_v0  ;;  %14606 = vmatprep.subr.mxu1 %v16803_v0 }
 0x292   : > { %v17971_v42 = vadd.f32 %v2127_v36, %v1907_v37  ;;  %14607 = vmatpush3.msra.mxu1 %v12508_v33  ;;  %14668 = vmatpush3.msra.mxu0 %v12531_v53  ;;  %v3302_v33 = vld [vmem:[#allocation2 + $0x77] ss:$2 sm:$0xff]  ;;  %v3580_v53 = vld [vmem:[#allocation2 + $0x78] ss:$2 sm:$0xff] }
 0x293   : > { %v1854_v60 = vpop.f32.mrf.mxu1  ;;  %v2132_v46 = vpop.f32.mrf.mxu0  ;;  %14488 = vmatmul.mubr.msk.f32.gmra.mxu1 %vm1040_vm0, %v3292_v44  ;;  %14551 = vmatmul.mubr.msk.f32.gmra.mxu0 %vm1040_vm0, %v3570_v45 }
 0x294   : > { %v1908_v51 = vadd.f32 %v1854_v60, %v17795_v54  ;;  %14490 = vmatprep.mubr.msk.f32.mxu1 %vm16804_vm4, %v16803_v0  ;;  %14553 = vmatprep.mubr.msk.f32.mxu0 %vm16804_vm4, %v16803_v0  ;;  %v3304_v60 = vld [vmem:[#allocation2 + $0x87] ss:$2 sm:$0xff] }
 0x295   : > { %v14138_v52 = vpop.f32.mrf.mxu1  ;;  %v14201_v55 = vpop.f32.mrf.mxu0  ;;  %14608 = vmatprep.subr.mxu1 %v16803_v0  ;;  %14669 = vmatprep.subr.mxu0 %v16803_v0 }
 0x296   : > { %v17988_v56 = vadd.f32 %v2132_v46, %v1908_v51  ;;  %14609 = vmatpush3.msra.mxu1 %v12507_v43  ;;  %14670 = vmatpush3.msra.mxu0 %v12530_v48  ;;  %v3582_v46 = vld [vmem:[#allocation2 + $0x88] ss:$2 sm:$0xff] }
 0x297   : > { %v1859_v58 = vpop.f32.mrf.mxu1  ;;  %v2137_v54 = vpop.f32.mrf.mxu0  ;;  %14491 = vmatmul.mubr.msk.f32.gmra.mxu1 %vm1040_vm0, %v3294_v4  ;;  %14554 = vmatmul.mubr.msk.f32.gmra.mxu0 %vm1040_vm0, %v3572_v57  ;;  %v3306_v4 = vld [vmem:[#allocation2 + $0x97] ss:$2 sm:$0xff]  ;;  %v3584_v57 = vld [vmem:[#allocation2 + $0x98] ss:$2 sm:$0xff] }
 0x298   : > { %v1909_v1 = vadd.f32 %v1859_v58, %v17808_v63  ;;  %14493 = vmatprep.mubr.msk.f32.mxu1 %vm16804_vm4, %v16803_v0  ;;  %14556 = vmatprep.mubr.msk.f32.mxu0 %vm16804_vm4, %v16803_v0 }
 0x299   : > { %v14141_v2 = vpop.f32.mrf.mxu1  ;;  %v14204_v3 = vpop.f32.mrf.mxu0  ;;  %14671 = vmatprep.subr.mxu0 %v16803_v0  ;;  %14730 = vmatprep.subr.mxu1 %v16803_v0 }
 0x29a   : > { %v18002_v11 = vadd.f32 %v2137_v54, %v1909_v1  ;;  %14672 = vmatpush3.msra.mxu0 %v12529_v62  ;;  %v3308_v3 = vld [vmem:[#allocation2 + $0xa7] ss:$2 sm:$0xff] }
 0x29b   : > { %v1864_v9 = vpop.f32.mrf.mxu1  ;;  %v2142_v12 = vpop.f32.mrf.mxu0  ;;  %14494 = vmatmul.mubr.msk.f32.gmra.mxu1 %vm1040_vm0, %v3296_v5  ;;  %14557 = vmatmul.mubr.msk.f32.gmra.mxu0 %vm1040_vm0, %v3574_v6  ;;  %v3586_v5 = vld [vmem:[#allocation2 + $0xa8] ss:$2 sm:$0xff] }
 0x29c   : > { %v1910_v63 = vadd.f32 %v1864_v9, %v17818_v8  ;;  %14496 = vmatprep.mubr.msk.f32.mxu1 %vm16804_vm4, %v16803_v0  ;;  %14559 = vmatprep.mubr.msk.f32.mxu0 %vm16804_vm4, %v16803_v0 }
 0x29d   : > { %v14144_v13 = vpop.f32.mrf.mxu1  ;;  %v14207_v14 = vpop.f32.mrf.mxu0  ;;  %14793 = vmatprep.subr.mxu0 %v16803_v0 }
 0x29e   : > { %v18012_v18 = vadd.f32 %v2142_v12, %v1910_v63  ;;  %v3310_v14 = vld [vmem:[#allocation2 + $0xb7] ss:$2 sm:$0xff] }
 0x29f   : > { %v1869_v19 = vpop.f32.mrf.mxu1  ;;  %v2147_v20 = vpop.f32.mrf.mxu0  ;;  %14497 = vmatmul.mubr.msk.f32.gmra.mxu1 %vm1040_vm0, %v3298_v15  ;;  %14560 = vmatmul.mubr.msk.f32.gmra.mxu0 %vm1040_vm0, %v3576_v26  ;;  %v3588_v15 = vld [vmem:[#allocation2 + $0xb8] ss:$2 sm:$0xff] }
 0x2a0   : > { %v1911_v8 = vadd.f32 %v1869_v19, %v17827_v16  ;;  %14499 = vmatprep.mubr.msk.f32.mxu1 %vm16804_vm4, %v16803_v0  ;;  %14562 = vmatprep.mubr.msk.f32.mxu0 %vm16804_vm4, %v16803_v0 }
 0x2a1   : > { %v14147_v21 = vpop.f32.mrf.mxu1  ;;  %v14210_v22 = vpop.f32.mrf.mxu0 }
 0x2a2   : > { %v18021_v24 = vadd.f32 %v2147_v20, %v1911_v8  ;;  %v3312_v22 = vld [vmem:[#allocation2 + $0xc7] ss:$2 sm:$0xff] }
 0x2a3   : > { %v1874_v27 = vpop.f32.mrf.mxu1  ;;  %v2152_v28 = vpop.f32.mrf.mxu0  ;;  %14500 = vmatmul.mubr.msk.f32.gmra.mxu1 %vm1040_vm0, %v3300_v25  ;;  %14563 = vmatmul.mubr.msk.f32.gmra.mxu0 %vm1040_vm0, %v3578_v31  ;;  %v3590_v25 = vld [vmem:[#allocation2 + $0xc8] ss:$2 sm:$0xff] }
 0x2a4   : > { %v1912_v16 = vadd.f32 %v1874_v27, %v17835_v23  ;;  %14502 = vmatprep.mubr.msk.f32.mxu1 %vm16804_vm4, %v16803_v0  ;;  %14565 = vmatprep.mubr.msk.f32.mxu0 %vm16804_vm4, %v16803_v0 }
 0x2a5   : > { %v14150_v30 = vpop.f32.mrf.mxu1  ;;  %v14213_v35 = vpop.f32.mrf.mxu0 }
 0x2a6   : > { %v18030_v36 = vadd.f32 %v2152_v28, %v1912_v16  ;;  %v3314_v35 = vld [vmem:[#allocation2 + $0xd7] ss:$2 sm:$0xff] }
 0x2a7   : > { %v1879_v37 = vpop.f32.mrf.mxu1  ;;  %v2157_v38 = vpop.f32.mrf.mxu0  ;;  %14503 = vmatmul.mubr.msk.f32.gmra.mxu1 %vm1040_vm0, %v3302_v33  ;;  %14566 = vmatmul.mubr.msk.f32.gmra.mxu0 %vm1040_vm0, %v3580_v53  ;;  %v3592_v33 = vld [vmem:[#allocation2 + $0xd8] ss:$2 sm:$0xff] }
 0x2a8   : > { %v1913_v23 = vadd.f32 %v1879_v37, %v17843_v34  ;;  %14505 = vmatprep.mubr.msk.f32.mxu1 %vm16804_vm4, %v16803_v0  ;;  %14568 = vmatprep.mubr.msk.f32.mxu0 %vm16804_vm4, %v16803_v0 }
 0x2a9   : > { %v14153_v40 = vpop.f32.mrf.mxu1  ;;  %v14216_v44 = vpop.f32.mrf.mxu0 }
 0x2aa   : > { %v18039_v45 = vadd.f32 %v2157_v38, %v1913_v23  ;;  %v3316_v44 = vld [vmem:[#allocation2 + $0xe7] ss:$2 sm:$0xff] }
 0x2ab   : > { %v1884_v43 = vpop.f32.mrf.mxu1  ;;  %v2162_v48 = vpop.f32.mrf.mxu0  ;;  %14506 = vmatmul.mubr.msk.f32.gmra.mxu1 %vm1040_vm0, %v3304_v60  ;;  %14569 = vmatmul.mubr.msk.f32.gmra.mxu0 %vm1040_vm0, %v3582_v46  ;;  %v3594_v60 = vld [vmem:[#allocation2 + $0xe8] ss:$2 sm:$0xff] }
 0x2ac   : > { %v1914_v34 = vadd.f32 %v1884_v43, %v17851_v41  ;;  %14508 = vmatprep.mubr.msk.f32.mxu1 %vm16804_vm4, %v16803_v0  ;;  %14571 = vmatprep.mubr.msk.f32.mxu0 %vm16804_vm4, %v16803_v0 }
 0x2ad   : > { %v14156_v51 = vpop.f32.mrf.mxu1  ;;  %v14219_v52 = vpop.f32.mrf.mxu0 }
 0x2ae   : > { %v18048_v55 = vadd.f32 %v2162_v48, %v1914_v34  ;;  %v3318_v52 = vld [vmem:[#allocation2 + $0xf7] ss:$2 sm:$0xff] }
 0x2af   : > { %v1889_v58 = vpop.f32.mrf.mxu1  ;;  %v2167_v54 = vpop.f32.mrf.mxu0  ;;  %14509 = vmatmul.mubr.msk.f32.gmra.mxu1 %vm1040_vm0, %v3306_v4  ;;  %14572 = vmatmul.mubr.msk.f32.gmra.mxu0 %vm1040_vm0, %v3584_v57  ;;  %v3596_v4 = vld [vmem:[#allocation2 + $0xf8] ss:$2 sm:$0xff] }
 0x2b0   : > { %v1915_v41 = vadd.f32 %v1889_v58, %v17859_v50  ;;  %14511 = vmatprep.mubr.msk.f32.mxu1 %vm16804_vm4, %v16803_v0  ;;  %14574 = vmatprep.mubr.msk.f32.mxu0 %vm16804_vm4, %v16803_v0 }
 0x2b1   : > { %v14159_v62 = vpop.f32.mrf.mxu1  ;;  %v14222_v1 = vpop.f32.mrf.mxu0 }
 0x2b2   : > { %v18057_v2 = vadd.f32 %v2167_v54, %v1915_v41  ;;  %v3320_v1 = vld [vmem:[#allocation2 + $0x107] ss:$2 sm:$0xff] }
 0x2b3   : > { %v1894_v6 = vpop.f32.mrf.mxu1  ;;  %v2172_v9 = vpop.f32.mrf.mxu0  ;;  %14512 = vmatmul.mubr.msk.f32.gmra.mxu1 %vm1040_vm0, %v3308_v3  ;;  %14575 = vmatmul.mubr.msk.f32.gmra.mxu0 %vm1040_vm0, %v3586_v5  ;;  %v3598_v3 = vld [vmem:[#allocation2 + $0x108] ss:$2 sm:$0xff] }
 0x2b4   : > { %v1916_v50 = vadd.f32 %v1894_v6, %v17867_v59  ;;  %14514 = vmatprep.mubr.msk.f32.mxu1 %vm16804_vm4, %v16803_v0  ;;  %14577 = vmatprep.mubr.msk.f32.mxu0 %vm16804_vm4, %v16803_v0 }
 0x2b5   : > { %v14162_v12 = vpop.f32.mrf.mxu1  ;;  %v14225_v63 = vpop.f32.mrf.mxu0 }
 0x2b6   : > { %v18066_v13 = vadd.f32 %v2172_v9, %v1916_v50  ;;  %v3322_v63 = vld [vmem:[#allocation2 + $0x117] ss:$2 sm:$0xff] }
 0x2b7   : > { %v2360_v26 = vpop.f32.mrf.mxu1  ;;  %v2620_v19 = vpop.f32.mrf.mxu0  ;;  %14515 = vmatmul.mubr.msk.f32.gmra.mxu1 %vm1040_vm0, %v3310_v14  ;;  %14578 = vmatmul.mubr.msk.f32.gmra.mxu0 %vm1040_vm0, %v3588_v15  ;;  %v3600_v14 = vld [vmem:[#allocation2 + $0x118] ss:$2 sm:$0xff] }
 0x2b8   : > { %v2454_v59 = vadd.f32 %v2360_v26, %v17880_v10  ;;  %14517 = vmatprep.mubr.msk.f32.mxu1 %vm16804_vm4, %v16803_v0  ;;  %14580 = vmatprep.mubr.msk.f32.mxu0 %vm16804_vm4, %v16803_v0 }
 0x2b9   : > { %v14234_v20 = vpop.f32.mrf.mxu1  ;;  %v14297_v8 = vpop.f32.mrf.mxu0 }
 0x2ba   : > { %v18075_v21 = vadd.f32 %v2620_v19, %v2454_v59  ;;  %v3324_v8 = vld [vmem:[#allocation2 + $0x127] ss:$2 sm:$0xff] }
 0x2bb   : > { %v2365_v31 = vpop.f32.mrf.mxu1  ;;  %v2625_v27 = vpop.f32.mrf.mxu0  ;;  %14518 = vmatmul.mubr.msk.f32.gmra.mxu1 %vm1040_vm0, %v3312_v22  ;;  %14581 = vmatmul.mubr.msk.f32.gmra.mxu0 %vm1040_vm0, %v3590_v25  ;;  %v3602_v22 = vld [vmem:[#allocation2 + $0x128] ss:$2 sm:$0xff] }
 0x2bc   : > { %v2455_v10 = vadd.f32 %v2365_v31, %v17889_v47  ;;  %14520 = vmatprep.mubr.msk.f32.mxu1 %vm16804_vm4, %v16803_v0  ;;  %14583 = vmatprep.mubr.msk.f32.mxu0 %vm16804_vm4, %v16803_v0 }
 0x2bd   : > { %v14237_v28 = vpop.f32.mrf.mxu1  ;;  %v14300_v16 = vpop.f32.mrf.mxu0 }
 0x2be   : > { %v18084_v30 = vadd.f32 %v2625_v27, %v2455_v10  ;;  %v3326_v16 = vld [vmem:[#allocation2 + $0x137] ss:$2 sm:$0xf] }
 0x2bf   : > { %v2370_v53 = vpop.f32.mrf.mxu1  ;;  %v2630_v37 = vpop.f32.mrf.mxu0  ;;  %14521 = vmatmul.mubr.msk.f32.gmra.mxu1 %vm1040_vm0, %v3314_v35  ;;  %14584 = vmatmul.mubr.msk.f32.gmra.mxu0 %vm1040_vm0, %v3592_v33  ;;  %v3604_v35 = vld [vmem:[#allocation2 + $0x138] ss:$2 sm:$0xf] }
 0x2c0   : > { %v2456_v47 = vadd.f32 %v2370_v53, %v17898_v29  ;;  %14523 = vmatprep.mubr.msk.f32.mxu1 %vm16804_vm4, %v16803_v0  ;;  %14586 = vmatprep.mubr.msk.f32.mxu0 %vm16804_vm4, %v16803_v0 }
 0x2c1   : > { %v14240_v38 = vpop.f32.mrf.mxu1  ;;  %v14303_v23 = vpop.f32.mrf.mxu0 }
 0x2c2   : > { %v18093_v40 = vadd.f32 %v2630_v37, %v2456_v47  ;;  %v12553_v38 = vld [vmem:[%s20615_s3 + $0x130] sm:$0xff] }
 0x2c3   : > { %v2375_v46 = vpop.f32.mrf.mxu1  ;;  %v2635_v43 = vpop.f32.mrf.mxu0  ;;  %14524 = vmatmul.mubr.msk.f32.gmra.mxu1 %vm1040_vm0, %v3316_v44  ;;  %14587 = vmatmul.mubr.msk.f32.gmra.mxu0 %vm1040_vm0, %v3594_v60  ;;  %v3845_v44 = vld [vmem:[#allocation2 + $0x28] ss:$2 sm:$0xff]  ;;  %v4106_v60 = vld [vmem:[#allocation2 + $0x29] ss:$2 sm:$0xff] }
 0x2c4   : > { %v2457_v29 = vadd.f32 %v2375_v46, %v17907_v39  ;;  %14526 = vmatprep.mubr.msk.f32.mxu1 %vm16804_vm4, %v16803_v0  ;;  %14589 = vmatprep.mubr.msk.f32.mxu0 %vm16804_vm4, %v16803_v0 }
 0x2c5   : > { %v14243_v48 = vpop.f32.mrf.mxu1  ;;  %v14306_v34 = vpop.f32.mrf.mxu0 }
 0x2c6   : > { %v18102_v51 = vadd.f32 %v2635_v43, %v2457_v29  ;;  %v12575_v29 = vld [vmem:[%s20615_s3 + $0x148] sm:$0xff] }
 0x2c7   : > { %v2380_v57 = vpop.f32.mrf.mxu1  ;;  %v2640_v58 = vpop.f32.mrf.mxu0  ;;  %14527 = vmatmul.mubr.msk.f32.gmra.mxu1 %vm1040_vm0, %v3318_v52  ;;  %14590 = vmatmul.mubr.msk.f32.gmra.mxu0 %vm1040_vm0, %v3596_v4 }
 0x2c8   : > { %v2458_v39 = vadd.f32 %v2380_v57, %v17916_v49  ;;  %14529 = vmatprep.mubr.msk.f32.mxu1 %vm16804_vm4, %v16803_v0  ;;  %14592 = vmatprep.mubr.msk.f32.mxu0 %vm16804_vm4, %v16803_v0  ;;  %v3846_v57 = vld [vmem:[#allocation2 + $0x38] ss:$2 sm:$0xff] }
 0x2c9   : > { %v14246_v54 = vpop.f32.mrf.mxu1  ;;  %v14309_v41 = vpop.f32.mrf.mxu0 }
 0x2ca   : > { %v18111_v62 = vadd.f32 %v2640_v58, %v2458_v39  ;;  %v4108_v58 = vld [vmem:[#allocation2 + $0x39] ss:$2 sm:$0xff] }
 0x2cb   : > { %v2385_v5 = vpop.f32.mrf.mxu1  ;;  %v2645_v6 = vpop.f32.mrf.mxu0  ;;  %14530 = vmatmul.mubr.msk.f32.gmra.mxu1 %vm1040_vm0, %v3320_v1  ;;  %14593 = vmatmul.mubr.msk.f32.gmra.mxu0 %vm1040_vm0, %v3598_v3  ;;  %v12574_v41 = vld [vmem:[%s20615_s3 + $0x140] sm:$0xff] }
 0x2cc   : > { %v2459_v49 = vadd.f32 %v2385_v5, %v17925_v61  ;;  %14532 = vmatprep.mubr.msk.f32.mxu1 %vm16804_vm4, %v16803_v0  ;;  %14595 = vmatprep.mubr.msk.f32.mxu0 %vm16804_vm4, %v16803_v0 }
 0x2cd   : > { %v14249_v9 = vpop.f32.mrf.mxu1  ;;  %v14312_v50 = vpop.f32.mrf.mxu0 }
 0x2ce   : > { %v18120_v12 = vadd.f32 %v2645_v6, %v2459_v49  ;;  %v3847_v49 = vld [vmem:[#allocation2 + $0x48] ss:$2 sm:$0xff]  ;;  %v4110_v9 = vld [vmem:[#allocation2 + $0x49] ss:$2 sm:$0xff] }
 0x2cf   : > { %v2390_v15 = vpop.f32.mrf.mxu1  ;;  %v2650_v26 = vpop.f32.mrf.mxu0  ;;  %14533 = vmatmul.mubr.msk.f32.gmra.mxu1 %vm1040_vm0, %v3322_v63  ;;  %14596 = vmatmul.mubr.msk.f32.gmra.mxu0 %vm1040_vm0, %v3600_v14  ;;  %v12573_v63 = vld [vmem:[%s20615_s3 + $0x138] sm:$0xff] }
 0x2d0   : > { %v2460_v61 = vadd.f32 %v2390_v15, %v17934_v7  ;;  %14535 = vmatprep.mubr.msk.f32.mxu1 %vm16804_vm4, %v16803_v0  ;;  %14598 = vmatprep.mubr.msk.f32.mxu0 %vm16804_vm4, %v16803_v0 }
 0x2d1   : > { %v14252_v19 = vpop.f32.mrf.mxu1  ;;  %v14315_v59 = vpop.f32.mrf.mxu0 }
 0x2d2   : > { %v18129_v20 = vadd.f32 %v2650_v26, %v2460_v61  ;;  %v3848_v19 = vld [vmem:[#allocation2 + $0x58] ss:$2 sm:$0xff]  ;;  %v4112_v59 = vld [vmem:[#allocation2 + $0x59] ss:$2 sm:$0xff] }
 0x2d3   : > { %v2395_v25 = vpop.f32.mrf.mxu1  ;;  %v2655_v31 = vpop.f32.mrf.mxu0  ;;  %14536 = vmatmul.mubr.msk.f32.gmra.mxu1 %vm1040_vm0, %v3324_v8  ;;  %14599 = vmatmul.mubr.msk.f32.gmra.mxu0 %vm1040_vm0, %v3602_v22 }
 0x2d4   : > { %v2461_v7 = vadd.f32 %v2395_v25, %v17943_v17  ;;  %14538 = vmatprep.mubr.msk.f32.mxu1 %vm16804_vm4, %v16803_v0  ;;  %14601 = vmatprep.mubr.msk.f32.mxu0 %vm16804_vm4, %v16803_v0 }
 0x2d5   : > { %v14255_v27 = vpop.f32.mrf.mxu1  ;;  %v14318_v10 = vpop.f32.mrf.mxu0 }
 0x2d6   : > { %v18138_v28 = vadd.f32 %v2655_v31, %v2461_v7  ;;  %v3849_v27 = vld [vmem:[#allocation2 + $0x68] ss:$2 sm:$0xff]  ;;  %v4114_v10 = vld [vmem:[#allocation2 + $0x69] ss:$2 sm:$0xff] }
 0x2d7   : > { %v2400_v33 = vpop.f32.mrf.mxu1  ;;  %v2660_v53 = vpop.f32.mrf.mxu0  ;;  %14539 = vmatmul.mubr.msk.f32.gmra.mxu1 %vm1040_vm0, %v3326_v16  ;;  %14602 = vmatmul.mubr.msk.f32.gmra.mxu0 %vm1040_vm0, %v3604_v35 }
 0x2d8   : > { %v2462_v17 = vadd.f32 %v2400_v33, %v17955_v32  ;;  %14610 = vmatprep.mubr.msk.f32.mxu1 %vm16804_vm4, %v16803_v0  ;;  %14673 = vmatprep.mubr.msk.f32.mxu0 %vm16804_vm4, %v16803_v0  ;;  %v12552_v32 = vld [vmem:[%s20615_s3 + $0x128] sm:$0xff] }
 0x2d9   : > { %v14258_v37 = vpop.f32.mrf.mxu1  ;;  %v14321_v47 = vpop.f32.mrf.mxu0 }
 0x2da   : > { %v18150_v23 = vadd.f32 %v2660_v53, %v2462_v17  ;;  %v3850_v37 = vld [vmem:[#allocation2 + $0x78] ss:$2 sm:$0xff]  ;;  %v4116_v47 = vld [vmem:[#allocation2 + $0x79] ss:$2 sm:$0xff] }
 0x2db   : > { %v2405_v46 = vpop.f32.mrf.mxu1  ;;  %v2665_v43 = vpop.f32.mrf.mxu0  ;;  %14611 = vmatmul.mubr.msk.f32.vlgmr.msra.gmra.mxu1 %vm1040_vm0, %v3845_v44  ;;  %14674 = vmatmul.mubr.msk.f32.vlgmr.msra.gmra.mxu0 %vm1040_vm0, %v4106_v60 }
 0x2dc   : > { %v2463_v48 = vadd.f32 %v2405_v46, %v17971_v42  ;;  %14731 = vmatpush3.msra.mxu1 %v12553_v38  ;;  %14613 = vmatprep.mubr.msk.f32.mxu1 %vm16804_vm4, %v16803_v0  ;;  %v12551_v42 = vld [vmem:[%s20615_s3 + $0x120] sm:$0xff] }
 0x2dd   : > { %v14261_v34 = vpop.f32.mrf.mxu1  ;;  %v14324_v52 = vpop.f32.mrf.mxu0  ;;  %14676 = vmatprep.mubr.msk.f32.mxu0 %vm16804_vm4, %v16803_v0  ;;  %14732 = vmatprep.subr.mxu1 %v16803_v0 }
 0x2de   : > { %v18166_v4 = vadd.f32 %v2665_v43, %v2463_v48  ;;  %14733 = vmatpush3.msra.mxu1 %v12552_v32  ;;  %14794 = vmatpush3.msra.mxu0 %v12575_v29  ;;  %v3851_v32 = vld [vmem:[#allocation2 + $0x88] ss:$2 sm:$0xff]  ;;  %v4118_v29 = vld [vmem:[#allocation2 + $0x89] ss:$2 sm:$0xff] }
 0x2df   : > { %v2410_v39 = vpop.f32.mrf.mxu1  ;;  %v2670_v54 = vpop.f32.mrf.mxu0  ;;  %14614 = vmatmul.mubr.msk.f32.gmra.mxu1 %vm1040_vm0, %v3846_v57  ;;  %14677 = vmatmul.mubr.msk.f32.gmra.mxu0 %vm1040_vm0, %v4108_v58 }
 0x2e0   : > { %v2464_v1 = vadd.f32 %v2410_v39, %v17988_v56  ;;  %14616 = vmatprep.mubr.msk.f32.mxu1 %vm16804_vm4, %v16803_v0  ;;  %14679 = vmatprep.mubr.msk.f32.mxu0 %vm16804_vm4, %v16803_v0  ;;  %v3852_v39 = vld [vmem:[#allocation2 + $0x98] ss:$2 sm:$0xff] }
 0x2e1   : > { %v14264_v3 = vpop.f32.mrf.mxu1  ;;  %v14327_v5 = vpop.f32.mrf.mxu0  ;;  %14734 = vmatprep.subr.mxu1 %v16803_v0  ;;  %14795 = vmatprep.subr.mxu0 %v16803_v0 }
 0x2e2   : > { %v18183_v6 = vadd.f32 %v2670_v54, %v2464_v1  ;;  %14735 = vmatpush3.msra.mxu1 %v12551_v42  ;;  %14796 = vmatpush3.msra.mxu0 %v12574_v41  ;;  %v4120_v54 = vld [vmem:[#allocation2 + $0x99] ss:$2 sm:$0xff] }
 0x2e3   : > { %v2415_v50 = vpop.f32.mrf.mxu1  ;;  %v2675_v56 = vpop.f32.mrf.mxu0  ;;  %14617 = vmatmul.mubr.msk.f32.gmra.mxu1 %vm1040_vm0, %v3847_v49  ;;  %14680 = vmatmul.mubr.msk.f32.gmra.mxu0 %vm1040_vm0, %v4110_v9  ;;  %v3853_v49 = vld [vmem:[#allocation2 + $0xa8] ss:$2 sm:$0xff]  ;;  %v4122_v9 = vld [vmem:[#allocation2 + $0xa9] ss:$2 sm:$0xff] }
 0x2e4   : > { %v2465_v14 = vadd.f32 %v2415_v50, %v18002_v11  ;;  %14619 = vmatprep.mubr.msk.f32.mxu1 %vm16804_vm4, %v16803_v0  ;;  %14682 = vmatprep.mubr.msk.f32.mxu0 %vm16804_vm4, %v16803_v0 }
 0x2e5   : > { %v14267_v15 = vpop.f32.mrf.mxu1  ;;  %v14330_v26 = vpop.f32.mrf.mxu0  ;;  %14797 = vmatprep.subr.mxu0 %v16803_v0  ;;  %14856 = vmatprep.subr.mxu1 %v16803_v0 }
 0x2e6   : > { %v18197_v61 = vadd.f32 %v2675_v56, %v2465_v14  ;;  %14798 = vmatpush3.msra.mxu0 %v12573_v63  ;;  %v3854_v26 = vld [vmem:[#allocation2 + $0xb8] ss:$2 sm:$0xff] }
 0x2e7   : > { %v2420_v8 = vpop.f32.mrf.mxu1  ;;  %v2680_v22 = vpop.f32.mrf.mxu0  ;;  %14620 = vmatmul.mubr.msk.f32.gmra.mxu1 %vm1040_vm0, %v3848_v19  ;;  %14683 = vmatmul.mubr.msk.f32.gmra.mxu0 %vm1040_vm0, %v4112_v59  ;;  %v4124_v19 = vld [vmem:[#allocation2 + $0xb9] ss:$2 sm:$0xff] }
 0x2e8   : > { %v2466_v11 = vadd.f32 %v2420_v8, %v18012_v18  ;;  %14622 = vmatprep.mubr.msk.f32.mxu1 %vm16804_vm4, %v16803_v0  ;;  %14685 = vmatprep.mubr.msk.f32.mxu0 %vm16804_vm4, %v16803_v0 }
 0x2e9   : > { %v14270_v25 = vpop.f32.mrf.mxu1  ;;  %v14333_v31 = vpop.f32.mrf.mxu0  ;;  %14919 = vmatprep.subr.mxu0 %v16803_v0 }
 0x2ea   : > { %v18207_v7 = vadd.f32 %v2680_v22, %v2466_v11  ;;  %v3855_v31 = vld [vmem:[#allocation2 + $0xc8] ss:$2 sm:$0xff] }
 0x2eb   : > { %v2425_v16 = vpop.f32.mrf.mxu1  ;;  %v2685_v35 = vpop.f32.mrf.mxu0  ;;  %14623 = vmatmul.mubr.msk.f32.gmra.mxu1 %vm1040_vm0, %v3849_v27  ;;  %14686 = vmatmul.mubr.msk.f32.gmra.mxu0 %vm1040_vm0, %v4114_v10  ;;  %v4126_v27 = vld [vmem:[#allocation2 + $0xc9] ss:$2 sm:$0xff] }
 0x2ec   : > { %v2467_v18 = vadd.f32 %v2425_v16, %v18021_v24  ;;  %14625 = vmatprep.mubr.msk.f32.mxu1 %vm16804_vm4, %v16803_v0  ;;  %14688 = vmatprep.mubr.msk.f32.mxu0 %vm16804_vm4, %v16803_v0 }
 0x2ed   : > { %v14273_v33 = vpop.f32.mrf.mxu1  ;;  %v14336_v53 = vpop.f32.mrf.mxu0 }
 0x2ee   : > { %v18216_v17 = vadd.f32 %v2685_v35, %v2467_v18  ;;  %v3856_v53 = vld [vmem:[#allocation2 + $0xd8] ss:$2 sm:$0xff] }
 0x2ef   : > { %v2430_v38 = vpop.f32.mrf.mxu1  ;;  %v2690_v44 = vpop.f32.mrf.mxu0  ;;  %14626 = vmatmul.mubr.msk.f32.gmra.mxu1 %vm1040_vm0, %v3850_v37  ;;  %14689 = vmatmul.mubr.msk.f32.gmra.mxu0 %vm1040_vm0, %v4116_v47  ;;  %v4128_v37 = vld [vmem:[#allocation2 + $0xd9] ss:$2 sm:$0xff] }
 0x2f0   : > { %v2468_v24 = vadd.f32 %v2430_v38, %v18030_v36  ;;  %14628 = vmatprep.mubr.msk.f32.mxu1 %vm16804_vm4, %v16803_v0  ;;  %14691 = vmatprep.mubr.msk.f32.mxu0 %vm16804_vm4, %v16803_v0 }
 0x2f1   : > { %v14276_v60 = vpop.f32.mrf.mxu1  ;;  %v14339_v46 = vpop.f32.mrf.mxu0 }
 0x2f2   : > { %v18225_v43 = vadd.f32 %v2690_v44, %v2468_v24  ;;  %v3857_v46 = vld [vmem:[#allocation2 + $0xe8] ss:$2 sm:$0xff] }
 0x2f3   : > { %v2435_v48 = vpop.f32.mrf.mxu1  ;;  %v2695_v34 = vpop.f32.mrf.mxu0  ;;  %14629 = vmatmul.mubr.msk.f32.gmra.mxu1 %vm1040_vm0, %v3851_v32  ;;  %14692 = vmatmul.mubr.msk.f32.gmra.mxu0 %vm1040_vm0, %v4118_v29  ;;  %v4130_v32 = vld [vmem:[#allocation2 + $0xe9] ss:$2 sm:$0xff] }
 0x2f4   : > { %v2469_v36 = vadd.f32 %v2435_v48, %v18039_v45  ;;  %14631 = vmatprep.mubr.msk.f32.mxu1 %vm16804_vm4, %v16803_v0  ;;  %14694 = vmatprep.mubr.msk.f32.mxu0 %vm16804_vm4, %v16803_v0 }
 0x2f5   : > { %v14279_v52 = vpop.f32.mrf.mxu1  ;;  %v14342_v57 = vpop.f32.mrf.mxu0 }
 0x2f6   : > { %v18234_v58 = vadd.f32 %v2695_v34, %v2469_v36  ;;  %v3858_v57 = vld [vmem:[#allocation2 + $0xf8] ss:$2 sm:$0xff] }
 0x2f7   : > { %v2440_v42 = vpop.f32.mrf.mxu1  ;;  %v2700_v41 = vpop.f32.mrf.mxu0  ;;  %14632 = vmatmul.mubr.msk.f32.gmra.mxu1 %vm1040_vm0, %v3852_v39  ;;  %14695 = vmatmul.mubr.msk.f32.gmra.mxu0 %vm1040_vm0, %v4120_v54  ;;  %v4132_v39 = vld [vmem:[#allocation2 + $0xf9] ss:$2 sm:$0xff] }
 0x2f8   : > { %v2470_v45 = vadd.f32 %v2440_v42, %v18048_v55  ;;  %14634 = vmatprep.mubr.msk.f32.mxu1 %vm16804_vm4, %v16803_v0  ;;  %14697 = vmatprep.mubr.msk.f32.mxu0 %vm16804_vm4, %v16803_v0 }
 0x2f9   : > { %v14282_v1 = vpop.f32.mrf.mxu1  ;;  %v14345_v3 = vpop.f32.mrf.mxu0 }
 0x2fa   : > { %v18243_v5 = vadd.f32 %v2700_v41, %v2470_v45  ;;  %v3859_v3 = vld [vmem:[#allocation2 + $0x108] ss:$2 sm:$0xff] }
 0x2fb   : > { %v2445_v50 = vpop.f32.mrf.mxu1  ;;  %v2705_v56 = vpop.f32.mrf.mxu0  ;;  %14635 = vmatmul.mubr.msk.f32.gmra.mxu1 %vm1040_vm0, %v3853_v49  ;;  %14698 = vmatmul.mubr.msk.f32.gmra.mxu0 %vm1040_vm0, %v4122_v9  ;;  %v4134_v49 = vld [vmem:[#allocation2 + $0x109] ss:$2 sm:$0xff] }
 0x2fc   : > { %v2471_v55 = vadd.f32 %v2445_v50, %v18057_v2  ;;  %14637 = vmatprep.mubr.msk.f32.mxu1 %vm16804_vm4, %v16803_v0  ;;  %14700 = vmatprep.mubr.msk.f32.mxu0 %vm16804_vm4, %v16803_v0 }
 0x2fd   : > { %v14285_v63 = vpop.f32.mrf.mxu1  ;;  %v14348_v14 = vpop.f32.mrf.mxu0 }
 0x2fe   : > { %v18252_v15 = vadd.f32 %v2705_v56, %v2471_v55  ;;  %v3860_v14 = vld [vmem:[#allocation2 + $0x118] ss:$2 sm:$0xff] }
 0x2ff   : > { %v2450_v59 = vpop.f32.mrf.mxu1  ;;  %v2710_v8 = vpop.f32.mrf.mxu0  ;;  %14638 = vmatmul.mubr.msk.f32.gmra.mxu1 %vm1040_vm0, %v3854_v26  ;;  %14701 = vmatmul.mubr.msk.f32.gmra.mxu0 %vm1040_vm0, %v4124_v19  ;;  %v4136_v26 = vld [vmem:[#allocation2 + $0x119] ss:$2 sm:$0xff] }
 0x300   : > { %v2472_v2 = vadd.f32 %v2450_v59, %v18066_v13  ;;  %14640 = vmatprep.mubr.msk.f32.mxu1 %vm16804_vm4, %v16803_v0  ;;  %14703 = vmatprep.mubr.msk.f32.mxu0 %vm16804_vm4, %v16803_v0 }
 0x301   : > { %v14288_v22 = vpop.f32.mrf.mxu1  ;;  %v14351_v11 = vpop.f32.mrf.mxu0 }
 0x302   : > { %v18261_v25 = vadd.f32 %v2710_v8, %v2472_v2  ;;  %v3861_v11 = vld [vmem:[#allocation2 + $0x128] ss:$2 sm:$0xff] }
 0x303   : > { %v2898_v10 = vpop.f32.mrf.mxu1  ;;  %v3176_v16 = vpop.f32.mrf.mxu0  ;;  %14641 = vmatmul.mubr.msk.f32.gmra.mxu1 %vm1040_vm0, %v3855_v31  ;;  %14704 = vmatmul.mubr.msk.f32.gmra.mxu0 %vm1040_vm0, %v4126_v27  ;;  %v4138_v31 = vld [vmem:[#allocation2 + $0x129] ss:$2 sm:$0xff] }
 0x304   : > { %v2992_v13 = vadd.f32 %v2898_v10, %v18075_v21  ;;  %14643 = vmatprep.mubr.msk.f32.mxu1 %vm16804_vm4, %v16803_v0  ;;  %14706 = vmatprep.mubr.msk.f32.mxu0 %vm16804_vm4, %v16803_v0 }
 0x305   : > { %v14360_v35 = vpop.f32.mrf.mxu1  ;;  %v14423_v18 = vpop.f32.mrf.mxu0 }
 0x306   : > { %v18270_v33 = vadd.f32 %v3176_v16, %v2992_v13  ;;  %v3862_v18 = vld [vmem:[#allocation2 + $0x138] ss:$2 sm:$0xff] }
 0x307   : > { %v2903_v47 = vpop.f32.mrf.mxu1  ;;  %v3181_v38 = vpop.f32.mrf.mxu0  ;;  %14644 = vmatmul.mubr.msk.f32.gmra.mxu1 %vm1040_vm0, %v3856_v53  ;;  %14707 = vmatmul.mubr.msk.f32.gmra.mxu0 %vm1040_vm0, %v4128_v37  ;;  %v4140_v53 = vld [vmem:[#allocation2 + $0x139] ss:$2 sm:$0xff] }
 0x308   : > { %v2993_v21 = vadd.f32 %v2903_v47, %v18084_v30  ;;  %14646 = vmatprep.mubr.msk.f32.mxu1 %vm16804_vm4, %v16803_v0  ;;  %14709 = vmatprep.mubr.msk.f32.mxu0 %vm16804_vm4, %v16803_v0 }
 0x309   : > { %v14363_v44 = vpop.f32.mrf.mxu1  ;;  %v14426_v24 = vpop.f32.mrf.mxu0 }
 0x30a   : > { %v18279_v60 = vadd.f32 %v3181_v38, %v2993_v21  ;;  %v3864_v24 = vld [vmem:[#allocation2 + $0x148] ss:$2 sm:$0xf] }
 0x30b   : > { %v2908_v29 = vpop.f32.mrf.mxu1  ;;  %v3186_v48 = vpop.f32.mrf.mxu0  ;;  %14647 = vmatmul.mubr.msk.f32.gmra.mxu1 %vm1040_vm0, %v3857_v46  ;;  %14710 = vmatmul.mubr.msk.f32.gmra.mxu0 %vm1040_vm0, %v4130_v32  ;;  %v4142_v46 = vld [vmem:[#allocation2 + $0x149] ss:$2 sm:$0xf] }
 0x30c   : > { %v2994_v30 = vadd.f32 %v2908_v29, %v18093_v40  ;;  %14649 = vmatprep.mubr.msk.f32.mxu1 %vm16804_vm4, %v16803_v0  ;;  %14712 = vmatprep.mubr.msk.f32.mxu0 %vm16804_vm4, %v16803_v0 }
 0x30d   : > { %v14366_v34 = vpop.f32.mrf.mxu1  ;;  %v14429_v36 = vpop.f32.mrf.mxu0 }
 0x30e   : > { %v18288_v52 = vadd.f32 %v3186_v48, %v2994_v30  ;;  %v12597_v34 = vld [vmem:[%s20615_s3 + $0x160] sm:$0xff] }
 0x30f   : > { %v2913_v54 = vpop.f32.mrf.mxu1  ;;  %v3191_v42 = vpop.f32.mrf.mxu0  ;;  %14650 = vmatmul.mubr.msk.f32.gmra.mxu1 %vm1040_vm0, %v3858_v57  ;;  %14713 = vmatmul.mubr.msk.f32.gmra.mxu0 %vm1040_vm0, %v4132_v39  ;;  %v4384_v57 = vld [vmem:[#allocation2 + $0x2a] ss:$2 sm:$0xff]  ;;  %v4662_v39 = vld [vmem:[#allocation2 + $0x2b] ss:$2 sm:$0xff] }
 0x310   : > { %v2995_v40 = vadd.f32 %v2913_v54, %v18102_v51  ;;  %14652 = vmatprep.mubr.msk.f32.mxu1 %vm16804_vm4, %v16803_v0  ;;  %14715 = vmatprep.mubr.msk.f32.mxu0 %vm16804_vm4, %v16803_v0 }
 0x311   : > { %v14369_v41 = vpop.f32.mrf.mxu1  ;;  %v14432_v45 = vpop.f32.mrf.mxu0 }
 0x312   : > { %v18297_v1 = vadd.f32 %v3191_v42, %v2995_v40  ;;  %v12619_v40 = vld [vmem:[%s20615_s3 + $0x178] sm:$0xff] }
 0x313   : > { %v2918_v9 = vpop.f32.mrf.mxu1  ;;  %v3196_v50 = vpop.f32.mrf.mxu0  ;;  %14653 = vmatmul.mubr.msk.f32.gmra.mxu1 %vm1040_vm0, %v3859_v3  ;;  %14716 = vmatmul.mubr.msk.f32.gmra.mxu0 %vm1040_vm0, %v4134_v49 }
 0x314   : > { %v2996_v51 = vadd.f32 %v2918_v9, %v18111_v62  ;;  %14655 = vmatprep.mubr.msk.f32.mxu1 %vm16804_vm4, %v16803_v0  ;;  %14718 = vmatprep.mubr.msk.f32.mxu0 %vm16804_vm4, %v16803_v0  ;;  %v4386_v9 = vld [vmem:[#allocation2 + $0x3a] ss:$2 sm:$0xff] }
 0x315   : > { %v14372_v56 = vpop.f32.mrf.mxu1  ;;  %v14435_v55 = vpop.f32.mrf.mxu0 }
 0x316   : > { %v18306_v63 = vadd.f32 %v3196_v50, %v2996_v51  ;;  %v4664_v50 = vld [vmem:[#allocation2 + $0x3b] ss:$2 sm:$0xff]  ;;  %v12618_v55 = vld [vmem:[%s20615_s3 + $0x170] sm:$0xff] }
 0x317   : > { %v2923_v19 = vpop.f32.mrf.mxu1  ;;  %v3201_v59 = vpop.f32.mrf.mxu0  ;;  %14656 = vmatmul.mubr.msk.f32.gmra.mxu1 %vm1040_vm0, %v3860_v14  ;;  %14719 = vmatmul.mubr.msk.f32.gmra.mxu0 %vm1040_vm0, %v4136_v26 }
 0x318   : > { %v2997_v62 = vadd.f32 %v2923_v19, %v18120_v12  ;;  %14658 = vmatprep.mubr.msk.f32.mxu1 %vm16804_vm4, %v16803_v0  ;;  %14721 = vmatprep.mubr.msk.f32.mxu0 %vm16804_vm4, %v16803_v0 }
 0x319   : > { %v14375_v8 = vpop.f32.mrf.mxu1  ;;  %v14438_v2 = vpop.f32.mrf.mxu0 }
 0x31a   : > { %v18315_v22 = vadd.f32 %v3201_v59, %v2997_v62  ;;  %v4388_v62 = vld [vmem:[#allocation2 + $0x4a] ss:$2 sm:$0xff]  ;;  %v4666_v8 = vld [vmem:[#allocation2 + $0x4b] ss:$2 sm:$0xff] }
 0x31b   : > { %v2928_v27 = vpop.f32.mrf.mxu1  ;;  %v3206_v10 = vpop.f32.mrf.mxu0  ;;  %14659 = vmatmul.mubr.msk.f32.gmra.mxu1 %vm1040_vm0, %v3861_v11  ;;  %14722 = vmatmul.mubr.msk.f32.gmra.mxu0 %vm1040_vm0, %v4138_v31  ;;  %v12617_v11 = vld [vmem:[%s20615_s3 + $0x168] sm:$0xff] }
 0x31c   : > { %v2998_v12 = vadd.f32 %v2928_v27, %v18129_v20  ;;  %14661 = vmatprep.mubr.msk.f32.mxu1 %vm16804_vm4, %v16803_v0  ;;  %14724 = vmatprep.mubr.msk.f32.mxu0 %vm16804_vm4, %v16803_v0 }
 0x31d   : > { %v14378_v16 = vpop.f32.mrf.mxu1  ;;  %v14441_v13 = vpop.f32.mrf.mxu0 }
 0x31e   : > { %v18324_v35 = vadd.f32 %v3206_v10, %v2998_v12  ;;  %v4390_v16 = vld [vmem:[#allocation2 + $0x5a] ss:$2 sm:$0xff]  ;;  %v4668_v13 = vld [vmem:[#allocation2 + $0x5b] ss:$2 sm:$0xff] }
 0x31f   : > { %v2933_v37 = vpop.f32.mrf.mxu1  ;;  %v3211_v47 = vpop.f32.mrf.mxu0  ;;  %14662 = vmatmul.mubr.msk.f32.gmra.mxu1 %vm1040_vm0, %v3862_v18  ;;  %14725 = vmatmul.mubr.msk.f32.gmra.mxu0 %vm1040_vm0, %v4140_v53 }
 0x320   : > { %v2999_v20 = vadd.f32 %v2933_v37, %v18138_v28  ;;  %14664 = vmatprep.mubr.msk.f32.mxu1 %vm16804_vm4, %v16803_v0  ;;  %14727 = vmatprep.mubr.msk.f32.mxu0 %vm16804_vm4, %v16803_v0 }
 0x321   : > { %v14381_v38 = vpop.f32.mrf.mxu1  ;;  %v14444_v21 = vpop.f32.mrf.mxu0 }
 0x322   : > { %v18333_v44 = vadd.f32 %v3211_v47, %v2999_v20  ;;  %v4392_v38 = vld [vmem:[#allocation2 + $0x6a] ss:$2 sm:$0xff]  ;;  %v4670_v21 = vld [vmem:[#allocation2 + $0x6b] ss:$2 sm:$0xff] }
 0x323   : > { %v2938_v32 = vpop.f32.mrf.mxu1  ;;  %v3216_v29 = vpop.f32.mrf.mxu0  ;;  %14665 = vmatmul.mubr.msk.f32.gmra.mxu1 %vm1040_vm0, %v3864_v24  ;;  %14728 = vmatmul.mubr.msk.f32.gmra.mxu0 %vm1040_vm0, %v4142_v46 }
 0x324   : > { %v3000_v28 = vadd.f32 %v2938_v32, %v18150_v23  ;;  %14736 = vmatprep.mubr.msk.f32.mxu1 %vm16804_vm4, %v16803_v0  ;;  %14799 = vmatprep.mubr.msk.f32.mxu0 %vm16804_vm4, %v16803_v0  ;;  %v12596_v23 = vld [vmem:[%s20615_s3 + $0x158] sm:$0xff] }
 0x325   : > { %v14384_v48 = vpop.f32.mrf.mxu1  ;;  %v14447_v30 = vpop.f32.mrf.mxu0 }
 0x326   : > { %v18345_v36 = vadd.f32 %v3216_v29, %v3000_v28  ;;  %v4394_v48 = vld [vmem:[#allocation2 + $0x7a] ss:$2 sm:$0xff]  ;;  %v4672_v30 = vld [vmem:[#allocation2 + $0x7b] ss:$2 sm:$0xff] }
 0x327   : > { %v2943_v54 = vpop.f32.mrf.mxu1  ;;  %v3221_v42 = vpop.f32.mrf.mxu0  ;;  %14737 = vmatmul.mubr.msk.f32.vlgmr.msra.gmra.mxu1 %vm1040_vm0, %v4384_v57  ;;  %14800 = vmatmul.mubr.msk.f32.vlgmr.msra.gmra.mxu0 %vm1040_vm0, %v4662_v39 }
 0x328   : > { %v3001_v41 = vadd.f32 %v2943_v54, %v18166_v4  ;;  %14857 = vmatpush3.msra.mxu1 %v12597_v34  ;;  %14739 = vmatprep.mubr.msk.f32.mxu1 %vm16804_vm4, %v16803_v0  ;;  %v12595_v4 = vld [vmem:[%s20615_s3 + $0x150] sm:$0xff] }
 0x329   : > { %v14387_v45 = vpop.f32.mrf.mxu1  ;;  %v14450_v3 = vpop.f32.mrf.mxu0  ;;  %14802 = vmatprep.mubr.msk.f32.mxu0 %vm16804_vm4, %v16803_v0  ;;  %14858 = vmatprep.subr.mxu1 %v16803_v0 }
 0x32a   : > { %v18361_v49 = vadd.f32 %v3221_v42, %v3001_v41  ;;  %14859 = vmatpush3.msra.mxu1 %v12596_v23  ;;  %14920 = vmatpush3.msra.mxu0 %v12619_v40  ;;  %v4396_v23 = vld [vmem:[#allocation2 + $0x8a] ss:$2 sm:$0xff]  ;;  %v4674_v40 = vld [vmem:[#allocation2 + $0x8b] ss:$2 sm:$0xff] }
 0x32b   : > { %v2948_v51 = vpop.f32.mrf.mxu1  ;;  %v3226_v56 = vpop.f32.mrf.mxu0  ;;  %14740 = vmatmul.mubr.msk.f32.gmra.mxu1 %vm1040_vm0, %v4386_v9  ;;  %14803 = vmatmul.mubr.msk.f32.gmra.mxu0 %vm1040_vm0, %v4664_v50 }
 0x32c   : > { %v3002_v14 = vadd.f32 %v2948_v51, %v18183_v6  ;;  %14742 = vmatprep.mubr.msk.f32.mxu1 %vm16804_vm4, %v16803_v0  ;;  %14805 = vmatprep.mubr.msk.f32.mxu0 %vm16804_vm4, %v16803_v0  ;;  %v4398_v51 = vld [vmem:[#allocation2 + $0x9a] ss:$2 sm:$0xff] }
 0x32d   : > { %v14390_v26 = vpop.f32.mrf.mxu1  ;;  %v14453_v19 = vpop.f32.mrf.mxu0  ;;  %14860 = vmatprep.subr.mxu1 %v16803_v0  ;;  %14921 = vmatprep.subr.mxu0 %v16803_v0 }
 0x32e   : > { %v18378_v59 = vadd.f32 %v3226_v56, %v3002_v14  ;;  %14861 = vmatpush3.msra.mxu1 %v12595_v4  ;;  %14922 = vmatpush3.msra.mxu0 %v12618_v55  ;;  %v4676_v56 = vld [vmem:[#allocation2 + $0x9b] ss:$2 sm:$0xff] }
 0x32f   : > { %v2953_v2 = vpop.f32.mrf.mxu1  ;;  %v3231_v6 = vpop.f32.mrf.mxu0  ;;  %14743 = vmatmul.mubr.msk.f32.gmra.mxu1 %vm1040_vm0, %v4388_v62  ;;  %14806 = vmatmul.mubr.msk.f32.gmra.mxu0 %vm1040_vm0, %v4666_v8  ;;  %v4400_v62 = vld [vmem:[#allocation2 + $0xaa] ss:$2 sm:$0xff]  ;;  %v4678_v8 = vld [vmem:[#allocation2 + $0xab] ss:$2 sm:$0xff] }
 0x330   : > { %v3003_v31 = vadd.f32 %v2953_v2, %v18197_v61  ;;  %14745 = vmatprep.mubr.msk.f32.mxu1 %vm16804_vm4, %v16803_v0  ;;  %14808 = vmatprep.mubr.msk.f32.mxu0 %vm16804_vm4, %v16803_v0 }
 0x331   : > { %v14393_v27 = vpop.f32.mrf.mxu1  ;;  %v14456_v10 = vpop.f32.mrf.mxu0  ;;  %14923 = vmatprep.subr.mxu0 %v16803_v0  ;;  %14982 = vmatprep.subr.mxu1 %v16803_v0 }
 0x332   : > { %v18392_v12 = vadd.f32 %v3231_v6, %v3003_v31  ;;  %14924 = vmatpush3.msra.mxu0 %v12617_v11  ;;  %v4402_v10 = vld [vmem:[#allocation2 + $0xba] ss:$2 sm:$0xff] }
 0x333   : > { %v2958_v18 = vpop.f32.mrf.mxu1  ;;  %v3236_v53 = vpop.f32.mrf.mxu0  ;;  %14746 = vmatmul.mubr.msk.f32.gmra.mxu1 %vm1040_vm0, %v4390_v16  ;;  %14809 = vmatmul.mubr.msk.f32.gmra.mxu0 %vm1040_vm0, %v4668_v13  ;;  %v4680_v16 = vld [vmem:[#allocation2 + $0xbb] ss:$2 sm:$0xff] }
 0x334   : > { %v3004_v61 = vadd.f32 %v2958_v18, %v18207_v7  ;;  %14748 = vmatprep.mubr.msk.f32.mxu1 %vm16804_vm4, %v16803_v0  ;;  %14811 = vmatprep.mubr.msk.f32.mxu0 %vm16804_vm4, %v16803_v0 }
 0x335   : > { %v14396_v37 = vpop.f32.mrf.mxu1  ;;  %v14459_v47 = vpop.f32.mrf.mxu0  ;;  %15045 = vmatprep.subr.mxu0 %v16803_v0 }
 0x336   : > { %v18402_v20 = vadd.f32 %v3236_v53, %v3004_v61  ;;  %v4404_v47 = vld [vmem:[#allocation2 + $0xca] ss:$2 sm:$0xff] }
 0x337   : > { %v2963_v24 = vpop.f32.mrf.mxu1  ;;  %v3241_v46 = vpop.f32.mrf.mxu0  ;;  %14749 = vmatmul.mubr.msk.f32.gmra.mxu1 %vm1040_vm0, %v4392_v38  ;;  %14812 = vmatmul.mubr.msk.f32.gmra.mxu0 %vm1040_vm0, %v4670_v21  ;;  %v4682_v38 = vld [vmem:[#allocation2 + $0xcb] ss:$2 sm:$0xff] }
 0x338   : > { %v3005_v7 = vadd.f32 %v2963_v24, %v18216_v17  ;;  %14751 = vmatprep.mubr.msk.f32.mxu1 %vm16804_vm4, %v16803_v0  ;;  %14814 = vmatprep.mubr.msk.f32.mxu0 %vm16804_vm4, %v16803_v0 }
 0x339   : > { %v14399_v32 = vpop.f32.mrf.mxu1  ;;  %v14462_v29 = vpop.f32.mrf.mxu0 }
 0x33a   : > { %v18411_v28 = vadd.f32 %v3241_v46, %v3005_v7  ;;  %v4406_v29 = vld [vmem:[#allocation2 + $0xda] ss:$2 sm:$0xff] }
 0x33b   : > { %v2968_v34 = vpop.f32.mrf.mxu1  ;;  %v3246_v57 = vpop.f32.mrf.mxu0  ;;  %14752 = vmatmul.mubr.msk.f32.gmra.mxu1 %vm1040_vm0, %v4394_v48  ;;  %14815 = vmatmul.mubr.msk.f32.gmra.mxu0 %vm1040_vm0, %v4672_v30  ;;  %v4684_v48 = vld [vmem:[#allocation2 + $0xdb] ss:$2 sm:$0xff] }
 0x33c   : > { %v3006_v17 = vadd.f32 %v2968_v34, %v18225_v43  ;;  %14754 = vmatprep.mubr.msk.f32.mxu1 %vm16804_vm4, %v16803_v0  ;;  %14817 = vmatprep.mubr.msk.f32.mxu0 %vm16804_vm4, %v16803_v0 }
 0x33d   : > { %v14402_v39 = vpop.f32.mrf.mxu1  ;;  %v14465_v54 = vpop.f32.mrf.mxu0 }
 0x33e   : > { %v18420_v42 = vadd.f32 %v3246_v57, %v3006_v17  ;;  %v4408_v54 = vld [vmem:[#allocation2 + $0xea] ss:$2 sm:$0xff] }
 0x33f   : > { %v2973_v41 = vpop.f32.mrf.mxu1  ;;  %v3251_v45 = vpop.f32.mrf.mxu0  ;;  %14755 = vmatmul.mubr.msk.f32.gmra.mxu1 %vm1040_vm0, %v4396_v23  ;;  %14818 = vmatmul.mubr.msk.f32.gmra.mxu0 %vm1040_vm0, %v4674_v40  ;;  %v4686_v23 = vld [vmem:[#allocation2 + $0xeb] ss:$2 sm:$0xff] }
 0x340   : > { %v3007_v43 = vadd.f32 %v2973_v41, %v18234_v58  ;;  %14757 = vmatprep.mubr.msk.f32.mxu1 %vm16804_vm4, %v16803_v0  ;;  %14820 = vmatprep.mubr.msk.f32.mxu0 %vm16804_vm4, %v16803_v0 }
 0x341   : > { %v14405_v3 = vpop.f32.mrf.mxu1  ;;  %v14468_v9 = vpop.f32.mrf.mxu0 }
 0x342   : > { %v18429_v50 = vadd.f32 %v3251_v45, %v3007_v43  ;;  %v4410_v9 = vld [vmem:[#allocation2 + $0xfa] ss:$2 sm:$0xff] }
 0x343   : > { %v2978_v4 = vpop.f32.mrf.mxu1  ;;  %v3256_v55 = vpop.f32.mrf.mxu0  ;;  %14758 = vmatmul.mubr.msk.f32.gmra.mxu1 %vm1040_vm0, %v4398_v51  ;;  %14821 = vmatmul.mubr.msk.f32.gmra.mxu0 %vm1040_vm0, %v4676_v56  ;;  %v4688_v51 = vld [vmem:[#allocation2 + $0xfb] ss:$2 sm:$0xff] }
 0x344   : > { %v3008_v58 = vadd.f32 %v2978_v4, %v18243_v5  ;;  %14760 = vmatprep.mubr.msk.f32.mxu1 %vm16804_vm4, %v16803_v0  ;;  %14823 = vmatprep.mubr.msk.f32.mxu0 %vm16804_vm4, %v16803_v0 }
 0x345   : > { %v14408_v14 = vpop.f32.mrf.mxu1  ;;  %v14471_v26 = vpop.f32.mrf.mxu0 }
 0x346   : > { %v18438_v19 = vadd.f32 %v3256_v55, %v3008_v58  ;;  %v4412_v26 = vld [vmem:[#allocation2 + $0x10a] ss:$2 sm:$0xff] }
 0x347   : > { %v2983_v2 = vpop.f32.mrf.mxu1  ;;  %v3261_v6 = vpop.f32.mrf.mxu0  ;;  %14761 = vmatmul.mubr.msk.f32.gmra.mxu1 %vm1040_vm0, %v4400_v62  ;;  %14824 = vmatmul.mubr.msk.f32.gmra.mxu0 %vm1040_vm0, %v4678_v8  ;;  %v4690_v62 = vld [vmem:[#allocation2 + $0x10b] ss:$2 sm:$0xff] }
 0x348   : > { %v3009_v5 = vadd.f32 %v2983_v2, %v18252_v15  ;;  %14763 = vmatprep.mubr.msk.f32.mxu1 %vm16804_vm4, %v16803_v0  ;;  %14826 = vmatprep.mubr.msk.f32.mxu0 %vm16804_vm4, %v16803_v0 }
 0x349   : > { %v14411_v11 = vpop.f32.mrf.mxu1  ;;  %v14474_v31 = vpop.f32.mrf.mxu0 }
 0x34a   : > { %v18447_v27 = vadd.f32 %v3261_v6, %v3009_v5  ;;  %v4414_v31 = vld [vmem:[#allocation2 + $0x11a] ss:$2 sm:$0xff] }
 0x34b   : > { %v2988_v13 = vpop.f32.mrf.mxu1  ;;  %v3266_v18 = vpop.f32.mrf.mxu0  ;;  %14764 = vmatmul.mubr.msk.f32.gmra.mxu1 %vm1040_vm0, %v4402_v10  ;;  %14827 = vmatmul.mubr.msk.f32.gmra.mxu0 %vm1040_vm0, %v4680_v16  ;;  %v4692_v10 = vld [vmem:[#allocation2 + $0x11b] ss:$2 sm:$0xff] }
 0x34c   : > { %v3010_v15 = vadd.f32 %v2988_v13, %v18261_v25  ;;  %14766 = vmatprep.mubr.msk.f32.mxu1 %vm16804_vm4, %v16803_v0  ;;  %14829 = vmatprep.mubr.msk.f32.mxu0 %vm16804_vm4, %v16803_v0 }
 0x34d   : > { %v14414_v53 = vpop.f32.mrf.mxu1  ;;  %v14477_v61 = vpop.f32.mrf.mxu0 }
 0x34e   : > { %v18456_v37 = vadd.f32 %v3266_v18, %v3010_v15  ;;  %v4416_v61 = vld [vmem:[#allocation2 + $0x12a] ss:$2 sm:$0xff] }
 0x34f   : > { %v3454_v21 = vpop.f32.mrf.mxu1  ;;  %v3732_v24 = vpop.f32.mrf.mxu0  ;;  %14767 = vmatmul.mubr.msk.f32.gmra.mxu1 %vm1040_vm0, %v4404_v47  ;;  %14830 = vmatmul.mubr.msk.f32.gmra.mxu0 %vm1040_vm0, %v4682_v38  ;;  %v4694_v47 = vld [vmem:[#allocation2 + $0x12b] ss:$2 sm:$0xff] }
 0x350   : > { %v3548_v25 = vadd.f32 %v3454_v21, %v18270_v33  ;;  %14769 = vmatprep.mubr.msk.f32.mxu1 %vm16804_vm4, %v16803_v0  ;;  %14832 = vmatprep.mubr.msk.f32.mxu0 %vm16804_vm4, %v16803_v0 }
 0x351   : > { %v14486_v46 = vpop.f32.mrf.mxu1  ;;  %v14549_v7 = vpop.f32.mrf.mxu0 }
 0x352   : > { %v18465_v32 = vadd.f32 %v3732_v24, %v3548_v25  ;;  %v4418_v7 = vld [vmem:[#allocation2 + $0x13a] ss:$2 sm:$0xff] }
 0x353   : > { %v3459_v30 = vpop.f32.mrf.mxu1  ;;  %v3737_v34 = vpop.f32.mrf.mxu0  ;;  %14770 = vmatmul.mubr.msk.f32.gmra.mxu1 %vm1040_vm0, %v4406_v29  ;;  %14833 = vmatmul.mubr.msk.f32.gmra.mxu0 %vm1040_vm0, %v4684_v48  ;;  %v4696_v29 = vld [vmem:[#allocation2 + $0x13b] ss:$2 sm:$0xff] }
 0x354   : > { %v3549_v33 = vadd.f32 %v3459_v30, %v18279_v60  ;;  %14772 = vmatprep.mubr.msk.f32.mxu1 %vm16804_vm4, %v16803_v0  ;;  %14835 = vmatprep.mubr.msk.f32.mxu0 %vm16804_vm4, %v16803_v0 }
 0x355   : > { %v14489_v57 = vpop.f32.mrf.mxu1  ;;  %v14552_v17 = vpop.f32.mrf.mxu0 }
 0x356   : > { %v18474_v39 = vadd.f32 %v3737_v34, %v3549_v33  ;;  %v4420_v17 = vld [vmem:[#allocation2 + $0x14a] ss:$2 sm:$0xf] }
 0x357   : > { %v3464_v40 = vpop.f32.mrf.mxu1  ;;  %v3742_v41 = vpop.f32.mrf.mxu0  ;;  %14773 = vmatmul.mubr.msk.f32.gmra.mxu1 %vm1040_vm0, %v4408_v54  ;;  %14836 = vmatmul.mubr.msk.f32.gmra.mxu0 %vm1040_vm0, %v4686_v23  ;;  %v4698_v54 = vld [vmem:[#allocation2 + $0x14b] ss:$2 sm:$0xf] }
 0x358   : > { %v3550_v60 = vadd.f32 %v3464_v40, %v18288_v52  ;;  %14775 = vmatprep.mubr.msk.f32.mxu1 %vm16804_vm4, %v16803_v0  ;;  %14838 = vmatprep.mubr.msk.f32.mxu0 %vm16804_vm4, %v16803_v0 }
 0x359   : > { %v14492_v45 = vpop.f32.mrf.mxu1  ;;  %v14555_v43 = vpop.f32.mrf.mxu0 }
 0x35a   : > { %v18483_v3 = vadd.f32 %v3742_v41, %v3550_v60  ;;  %v12641_v45 = vld [vmem:[%s20615_s3 + $0x190] sm:$0xff] }
 0x35b   : > { %v3469_v56 = vpop.f32.mrf.mxu1  ;;  %v3747_v4 = vpop.f32.mrf.mxu0  ;;  %14776 = vmatmul.mubr.msk.f32.gmra.mxu1 %vm1040_vm0, %v4410_v9  ;;  %14839 = vmatmul.mubr.msk.f32.gmra.mxu0 %vm1040_vm0, %v4688_v51  ;;  %v4940_v9 = vld [vmem:[#allocation2 + $0x2c] ss:$2 sm:$0xff]  ;;  %v5217_v51 = vld [vmem:[#allocation2 + $0x3c] ss:$2 sm:$0xff] }
 0x35c   : > { %v3551_v52 = vadd.f32 %v3469_v56, %v18297_v1  ;;  %14778 = vmatprep.mubr.msk.f32.mxu1 %vm16804_vm4, %v16803_v0  ;;  %14841 = vmatprep.mubr.msk.f32.mxu0 %vm16804_vm4, %v16803_v0 }
 0x35d   : > { %v14495_v55 = vpop.f32.mrf.mxu1  ;;  %v14558_v58 = vpop.f32.mrf.mxu0 }
 0x35e   : > { %v18492_v14 = vadd.f32 %v3747_v4, %v3551_v52  ;;  %v12663_v52 = vld [vmem:[%s20615_s3 + $0x1a8] sm:$0xff] }
 0x35f   : > { %v3474_v8 = vpop.f32.mrf.mxu1  ;;  %v3752_v2 = vpop.f32.mrf.mxu0  ;;  %14779 = vmatmul.mubr.msk.f32.gmra.mxu1 %vm1040_vm0, %v4412_v26  ;;  %14842 = vmatmul.mubr.msk.f32.gmra.mxu0 %vm1040_vm0, %v4690_v62 }
 0x360   : > { %v3552_v1 = vadd.f32 %v3474_v8, %v18306_v63  ;;  %14781 = vmatprep.mubr.msk.f32.mxu1 %vm16804_vm4, %v16803_v0  ;;  %14844 = vmatprep.mubr.msk.f32.mxu0 %vm16804_vm4, %v16803_v0  ;;  %v4942_v8 = vld [vmem:[#allocation2 + $0x3c] ss:$2 sm:$0xff] }
 0x361   : > { %v14498_v6 = vpop.f32.mrf.mxu1  ;;  %v14561_v5 = vpop.f32.mrf.mxu0 }
 0x362   : > { %v18501_v11 = vadd.f32 %v3752_v2, %v3552_v1  ;;  %v5218_v2 = vld [vmem:[#allocation2 + $0x4c] ss:$2 sm:$0xff]  ;;  %v12662_v5 = vld [vmem:[%s20615_s3 + $0x1a0] sm:$0xff] }
 0x363   : > { %v3479_v16 = vpop.f32.mrf.mxu1  ;;  %v3757_v13 = vpop.f32.mrf.mxu0  ;;  %14782 = vmatmul.mubr.msk.f32.gmra.mxu1 %vm1040_vm0, %v4414_v31  ;;  %14845 = vmatmul.mubr.msk.f32.gmra.mxu0 %vm1040_vm0, %v4692_v10 }
 0x364   : > { %v3553_v63 = vadd.f32 %v3479_v16, %v18315_v22  ;;  %14784 = vmatprep.mubr.msk.f32.mxu1 %vm16804_vm4, %v16803_v0  ;;  %14847 = vmatprep.mubr.msk.f32.mxu0 %vm16804_vm4, %v16803_v0 }
 0x365   : > { %v14501_v18 = vpop.f32.mrf.mxu1  ;;  %v14564_v15 = vpop.f32.mrf.mxu0 }
 0x366   : > { %v18510_v53 = vadd.f32 %v3757_v13, %v3553_v63  ;;  %v4944_v63 = vld [vmem:[#allocation2 + $0x4c] ss:$2 sm:$0xff]  ;;  %v5219_v18 = vld [vmem:[#allocation2 + $0x5c] ss:$2 sm:$0xff] }
 0x367   : > { %v3484_v38 = vpop.f32.mrf.mxu1  ;;  %v3762_v21 = vpop.f32.mrf.mxu0  ;;  %14785 = vmatmul.mubr.msk.f32.gmra.mxu1 %vm1040_vm0, %v4416_v61  ;;  %14848 = vmatmul.mubr.msk.f32.gmra.mxu0 %vm1040_vm0, %v4694_v47  ;;  %v12661_v61 = vld [vmem:[%s20615_s3 + $0x198] sm:$0xff] }
 0x368   : > { %v3554_v22 = vadd.f32 %v3484_v38, %v18324_v35  ;;  %14787 = vmatprep.mubr.msk.f32.mxu1 %vm16804_vm4, %v16803_v0  ;;  %14850 = vmatprep.mubr.msk.f32.mxu0 %vm16804_vm4, %v16803_v0 }
 0x369   : > { %v14504_v24 = vpop.f32.mrf.mxu1  ;;  %v14567_v25 = vpop.f32.mrf.mxu0 }
 0x36a   : > { %v18519_v46 = vadd.f32 %v3762_v21, %v3554_v22  ;;  %v4946_v24 = vld [vmem:[#allocation2 + $0x5c] ss:$2 sm:$0xff]  ;;  %v5220_v25 = vld [vmem:[#allocation2 + $0x6c] ss:$2 sm:$0xff] }
 0x36b   : > { %v3489_v48 = vpop.f32.mrf.mxu1  ;;  %v3767_v30 = vpop.f32.mrf.mxu0  ;;  %14788 = vmatmul.mubr.msk.f32.gmra.mxu1 %vm1040_vm0, %v4418_v7  ;;  %14851 = vmatmul.mubr.msk.f32.gmra.mxu0 %vm1040_vm0, %v4696_v29 }
 0x36c   : > { %v3555_v35 = vadd.f32 %v3489_v48, %v18333_v44  ;;  %14790 = vmatprep.mubr.msk.f32.mxu1 %vm16804_vm4, %v16803_v0  ;;  %14853 = vmatprep.mubr.msk.f32.mxu0 %vm16804_vm4, %v16803_v0 }
 0x36d   : > { %v14507_v34 = vpop.f32.mrf.mxu1  ;;  %v14570_v33 = vpop.f32.mrf.mxu0 }
 0x36e   : > { %v18528_v57 = vadd.f32 %v3767_v30, %v3555_v35  ;;  %v4948_v34 = vld [vmem:[#allocation2 + $0x6c] ss:$2 sm:$0xff]  ;;  %v5221_v33 = vld [vmem:[#allocation2 + $0x7c] ss:$2 sm:$0xff] }
 0x36f   : > { %v3494_v23 = vpop.f32.mrf.mxu1  ;;  %v3772_v40 = vpop.f32.mrf.mxu0  ;;  %14791 = vmatmul.mubr.msk.f32.gmra.mxu1 %vm1040_vm0, %v4420_v17  ;;  %14854 = vmatmul.mubr.msk.f32.gmra.mxu0 %vm1040_vm0, %v4698_v54 }
 0x370   : > { %v3556_v44 = vadd.f32 %v3494_v23, %v18345_v36  ;;  %14862 = vmatprep.mubr.msk.f32.mxu1 %vm16804_vm4, %v16803_v0  ;;  %14925 = vmatprep.mubr.msk.f32.mxu0 %vm16804_vm4, %v16803_v0  ;;  %v12640_v36 = vld [vmem:[%s20615_s3 + $0x188] sm:$0xff] }
 0x371   : > { %v14510_v41 = vpop.f32.mrf.mxu1  ;;  %v14573_v60 = vpop.f32.mrf.mxu0 }
 0x372   : > { %v18540_v43 = vadd.f32 %v3772_v40, %v3556_v44  ;;  %v4950_v41 = vld [vmem:[#allocation2 + $0x7c] ss:$2 sm:$0xff]  ;;  %v5222_v60 = vld [vmem:[#allocation2 + $0x8c] ss:$2 sm:$0xff] }
 0x373   : > { %v3499_v56 = vpop.f32.mrf.mxu1  ;;  %v3777_v4 = vpop.f32.mrf.mxu0  ;;  %14863 = vmatmul.mubr.msk.f32.vlgmr.msra.gmra.mxu1 %vm1040_vm0, %v4940_v9  ;;  %14926 = vmatmul.mubr.msk.f32.vlgmr.msra.gmra.mxu0 %vm1040_vm0, %v5217_v51 }
 0x374   : > { %v3557_v55 = vadd.f32 %v3499_v56, %v18361_v49  ;;  %14983 = vmatpush3.msra.mxu1 %v12641_v45  ;;  %14865 = vmatprep.mubr.msk.f32.mxu1 %vm16804_vm4, %v16803_v0  ;;  %v12639_v49 = vld [vmem:[%s20615_s3 + $0x180] sm:$0xff] }
 0x375   : > { %v14513_v58 = vpop.f32.mrf.mxu1  ;;  %v14576_v26 = vpop.f32.mrf.mxu0  ;;  %14928 = vmatprep.mubr.msk.f32.mxu0 %vm16804_vm4, %v16803_v0  ;;  %14984 = vmatprep.subr.mxu1 %v16803_v0 }
 0x376   : > { %v18556_v62 = vadd.f32 %v3777_v4, %v3557_v55  ;;  %14985 = vmatpush3.msra.mxu1 %v12640_v36  ;;  %15046 = vmatpush3.msra.mxu0 %v12663_v52  ;;  %v4952_v36 = vld [vmem:[#allocation2 + $0x8c] ss:$2 sm:$0xff]  ;;  %v5223_v52 = vld [vmem:[#allocation2 + $0x9c] ss:$2 sm:$0xff] }
 0x377   : > { %v3504_v1 = vpop.f32.mrf.mxu1  ;;  %v3782_v6 = vpop.f32.mrf.mxu0  ;;  %14866 = vmatmul.mubr.msk.f32.gmra.mxu1 %vm1040_vm0, %v4942_v8  ;;  %14929 = vmatmul.mubr.msk.f32.gmra.mxu0 %vm1040_vm0, %v5218_v2 }
 0x378   : > { %v3558_v31 = vadd.f32 %v3504_v1, %v18378_v59  ;;  %14868 = vmatprep.mubr.msk.f32.mxu1 %vm16804_vm4, %v16803_v0  ;;  %14931 = vmatprep.mubr.msk.f32.mxu0 %vm16804_vm4, %v16803_v0  ;;  %v4954_v1 = vld [vmem:[#allocation2 + $0x9c] ss:$2 sm:$0xff] }
 0x379   : > { %v14516_v10 = vpop.f32.mrf.mxu1  ;;  %v14579_v16 = vpop.f32.mrf.mxu0  ;;  %14986 = vmatprep.subr.mxu1 %v16803_v0  ;;  %15047 = vmatprep.subr.mxu0 %v16803_v0 }
 0x37a   : > { %v18573_v13 = vadd.f32 %v3782_v6, %v3558_v31  ;;  %14987 = vmatpush3.msra.mxu1 %v12639_v49  ;;  %15048 = vmatpush3.msra.mxu0 %v12662_v5  ;;  %v5224_v6 = vld [vmem:[#allocation2 + $0xac] ss:$2 sm:$0xff] }
 0x37b   : > { %v3509_v15 = vpop.f32.mrf.mxu1  ;;  %v3787_v59 = vpop.f32.mrf.mxu0  ;;  %14869 = vmatmul.mubr.msk.f32.gmra.mxu1 %vm1040_vm0, %v4944_v63  ;;  %14932 = vmatmul.mubr.msk.f32.gmra.mxu0 %vm1040_vm0, %v5219_v18  ;;  %v4956_v63 = vld [vmem:[#allocation2 + $0xac] ss:$2 sm:$0xff]  ;;  %v5225_v18 = vld [vmem:[#allocation2 + $0xbc] ss:$2 sm:$0xff] }
 0x37c   : > { %v3559_v47 = vadd.f32 %v3509_v15, %v18392_v12  ;;  %14871 = vmatprep.mubr.msk.f32.mxu1 %vm16804_vm4, %v16803_v0  ;;  %14934 = vmatprep.mubr.msk.f32.mxu0 %vm16804_vm4, %v16803_v0 }
 0x37d   : > { %v14519_v38 = vpop.f32.mrf.mxu1  ;;  %v14582_v21 = vpop.f32.mrf.mxu0  ;;  %15049 = vmatprep.subr.mxu0 %v16803_v0  ;;  %15108 = vmatprep.subr.mxu1 %v16803_v0 }
 0x37e   : > { %v18587_v22 = vadd.f32 %v3787_v59, %v3559_v47  ;;  %15050 = vmatpush3.msra.mxu0 %v12661_v61  ;;  %v4958_v21 = vld [vmem:[#allocation2 + $0xbc] ss:$2 sm:$0xff] }
 0x37f   : > { %v3514_v7 = vpop.f32.mrf.mxu1  ;;  %v3792_v29 = vpop.f32.mrf.mxu0  ;;  %14872 = vmatmul.mubr.msk.f32.gmra.mxu1 %vm1040_vm0, %v4946_v24  ;;  %14935 = vmatmul.mubr.msk.f32.gmra.mxu0 %vm1040_vm0, %v5220_v25  ;;  %v5226_v24 = vld [vmem:[#allocation2 + $0xcc] ss:$2 sm:$0xff] }
 0x380   : > { %v3560_v12 = vadd.f32 %v3514_v7, %v18402_v20  ;;  %14874 = vmatprep.mubr.msk.f32.mxu1 %vm16804_vm4, %v16803_v0  ;;  %14937 = vmatprep.mubr.msk.f32.mxu0 %vm16804_vm4, %v16803_v0 }
 0x381   : > { %v14522_v48 = vpop.f32.mrf.mxu1  ;;  %v14585_v30 = vpop.f32.mrf.mxu0  ;;  %15171 = vmatprep.subr.mxu0 %v16803_v0 }
 0x382   : > { %v18597_v35 = vadd.f32 %v3792_v29, %v3560_v12  ;;  %v4960_v30 = vld [vmem:[#allocation2 + $0xcc] ss:$2 sm:$0xff] }
 0x383   : > { %v3519_v17 = vpop.f32.mrf.mxu1  ;;  %v3797_v54 = vpop.f32.mrf.mxu0  ;;  %14875 = vmatmul.mubr.msk.f32.gmra.mxu1 %vm1040_vm0, %v4948_v34  ;;  %14938 = vmatmul.mubr.msk.f32.gmra.mxu0 %vm1040_vm0, %v5221_v33  ;;  %v5227_v34 = vld [vmem:[#allocation2 + $0xdc] ss:$2 sm:$0xff] }
 0x384   : > { %v3561_v20 = vadd.f32 %v3519_v17, %v18411_v28  ;;  %14877 = vmatprep.mubr.msk.f32.mxu1 %vm16804_vm4, %v16803_v0  ;;  %14940 = vmatprep.mubr.msk.f32.mxu0 %vm16804_vm4, %v16803_v0 }
 0x385   : > { %v14525_v23 = vpop.f32.mrf.mxu1  ;;  %v14588_v40 = vpop.f32.mrf.mxu0 }
 0x386   : > { %v18606_v44 = vadd.f32 %v3797_v54, %v3561_v20  ;;  %v4962_v40 = vld [vmem:[#allocation2 + $0xdc] ss:$2 sm:$0xff] }
 0x387   : > { %v3524_v45 = vpop.f32.mrf.mxu1  ;;  %v3802_v9 = vpop.f32.mrf.mxu0  ;;  %14878 = vmatmul.mubr.msk.f32.gmra.mxu1 %vm1040_vm0, %v4950_v41  ;;  %14941 = vmatmul.mubr.msk.f32.gmra.mxu0 %vm1040_vm0, %v5222_v60  ;;  %v5228_v41 = vld [vmem:[#allocation2 + $0xec] ss:$2 sm:$0xff] }
 0x388   : > { %v3562_v28 = vadd.f32 %v3524_v45, %v18420_v42  ;;  %14880 = vmatprep.mubr.msk.f32.mxu1 %vm16804_vm4, %v16803_v0  ;;  %14943 = vmatprep.mubr.msk.f32.mxu0 %vm16804_vm4, %v16803_v0 }
 0x389   : > { %v14528_v51 = vpop.f32.mrf.mxu1  ;;  %v14591_v56 = vpop.f32.mrf.mxu0 }
 0x38a   : > { %v18615_v4 = vadd.f32 %v3802_v9, %v3562_v28  ;;  %v4964_v56 = vld [vmem:[#allocation2 + $0xec] ss:$2 sm:$0xff] }
 0x38b   : > { %v3529_v55 = vpop.f32.mrf.mxu1  ;;  %v3807_v58 = vpop.f32.mrf.mxu0  ;;  %14881 = vmatmul.mubr.msk.f32.gmra.mxu1 %vm1040_vm0, %v4952_v36  ;;  %14944 = vmatmul.mubr.msk.f32.gmra.mxu0 %vm1040_vm0, %v5223_v52  ;;  %v5229_v36 = vld [vmem:[#allocation2 + $0xfc] ss:$2 sm:$0xff] }
 0x38c   : > { %v3563_v42 = vadd.f32 %v3529_v55, %v18429_v50  ;;  %14883 = vmatprep.mubr.msk.f32.mxu1 %vm16804_vm4, %v16803_v0  ;;  %14946 = vmatprep.mubr.msk.f32.mxu0 %vm16804_vm4, %v16803_v0 }
 0x38d   : > { %v14531_v26 = vpop.f32.mrf.mxu1  ;;  %v14594_v8 = vpop.f32.mrf.mxu0 }
 0x38e   : > { %v18624_v2 = vadd.f32 %v3807_v58, %v3563_v42  ;;  %v4966_v8 = vld [vmem:[#allocation2 + $0xfc] ss:$2 sm:$0xff] }
 0x38f   : > { %v3534_v49 = vpop.f32.mrf.mxu1  ;;  %v3812_v5 = vpop.f32.mrf.mxu0  ;;  %14884 = vmatmul.mubr.msk.f32.gmra.mxu1 %vm1040_vm0, %v4954_v1  ;;  %14947 = vmatmul.mubr.msk.f32.gmra.mxu0 %vm1040_vm0, %v5224_v6  ;;  %v5230_v1 = vld [vmem:[#allocation2 + $0x10c] ss:$2 sm:$0xff] }
 0x390   : > { %v3564_v50 = vadd.f32 %v3534_v49, %v18438_v19  ;;  %14886 = vmatprep.mubr.msk.f32.mxu1 %vm16804_vm4, %v16803_v0  ;;  %14949 = vmatprep.mubr.msk.f32.mxu0 %vm16804_vm4, %v16803_v0 }
 0x391   : > { %v14534_v31 = vpop.f32.mrf.mxu1  ;;  %v14597_v10 = vpop.f32.mrf.mxu0 }
 0x392   : > { %v18633_v16 = vadd.f32 %v3812_v5, %v3564_v50  ;;  %v4968_v10 = vld [vmem:[#allocation2 + $0x10c] ss:$2 sm:$0xff] }
 0x393   : > { %v3539_v15 = vpop.f32.mrf.mxu1  ;;  %v3817_v59 = vpop.f32.mrf.mxu0  ;;  %14887 = vmatmul.mubr.msk.f32.gmra.mxu1 %vm1040_vm0, %v4956_v63  ;;  %14950 = vmatmul.mubr.msk.f32.gmra.mxu0 %vm1040_vm0, %v5225_v18  ;;  %v5231_v63 = vld [vmem:[#allocation2 + $0x11c] ss:$2 sm:$0xff] }
 0x394   : > { %v3565_v19 = vadd.f32 %v3539_v15, %v18447_v27  ;;  %14889 = vmatprep.mubr.msk.f32.mxu1 %vm16804_vm4, %v16803_v0  ;;  %14952 = vmatprep.mubr.msk.f32.mxu0 %vm16804_vm4, %v16803_v0 }
 0x395   : > { %v14537_v61 = vpop.f32.mrf.mxu1  ;;  %v14600_v47 = vpop.f32.mrf.mxu0 }
 0x396   : > { %v18642_v38 = vadd.f32 %v3817_v59, %v3565_v19  ;;  %v4970_v47 = vld [vmem:[#allocation2 + $0x11c] ss:$2 sm:$0xff] }
 0x397   : > { %v3544_v25 = vpop.f32.mrf.mxu1  ;;  %v3822_v7 = vpop.f32.mrf.mxu0  ;;  %14890 = vmatmul.mubr.msk.f32.gmra.mxu1 %vm1040_vm0, %v4958_v21  ;;  %14953 = vmatmul.mubr.msk.f32.gmra.mxu0 %vm1040_vm0, %v5226_v24  ;;  %v5232_v21 = vld [vmem:[#allocation2 + $0x12c] ss:$2 sm:$0xff] }
 0x398   : > { %v3566_v27 = vadd.f32 %v3544_v25, %v18456_v37  ;;  %14892 = vmatprep.mubr.msk.f32.mxu1 %vm16804_vm4, %v16803_v0  ;;  %14955 = vmatprep.mubr.msk.f32.mxu0 %vm16804_vm4, %v16803_v0 }
 0x399   : > { %v14540_v29 = vpop.f32.mrf.mxu1  ;;  %v14603_v12 = vpop.f32.mrf.mxu0 }
 0x39a   : > { %v18651_v48 = vadd.f32 %v3822_v7, %v3566_v27  ;;  %v4972_v12 = vld [vmem:[#allocation2 + $0x12c] ss:$2 sm:$0xff] }
 0x39b   : > { %v3992_v33 = vpop.f32.mrf.mxu1  ;;  %v4270_v17 = vpop.f32.mrf.mxu0  ;;  %14893 = vmatmul.mubr.msk.f32.gmra.mxu1 %vm1040_vm0, %v4960_v30  ;;  %14956 = vmatmul.mubr.msk.f32.gmra.mxu0 %vm1040_vm0, %v5227_v34  ;;  %v5233_v30 = vld [vmem:[#allocation2 + $0x13c] ss:$2 sm:$0xff] }
 0x39c   : > { %v4086_v37 = vadd.f32 %v3992_v33, %v18465_v32  ;;  %14895 = vmatprep.mubr.msk.f32.mxu1 %vm16804_vm4, %v16803_v0  ;;  %14958 = vmatprep.mubr.msk.f32.mxu0 %vm16804_vm4, %v16803_v0 }
 0x39d   : > { %v14612_v54 = vpop.f32.mrf.mxu1  ;;  %v14675_v20 = vpop.f32.mrf.mxu0 }
 0x39e   : > { %v18660_v23 = vadd.f32 %v4270_v17, %v4086_v37  ;;  %v4974_v20 = vld [vmem:[#allocation2 + $0x13c] ss:$2 sm:$0xff] }
 0x39f   : > { %v3997_v60 = vpop.f32.mrf.mxu1  ;;  %v4275_v45 = vpop.f32.mrf.mxu0  ;;  %14896 = vmatmul.mubr.msk.f32.gmra.mxu1 %vm1040_vm0, %v4962_v40  ;;  %14959 = vmatmul.mubr.msk.f32.gmra.mxu0 %vm1040_vm0, %v5228_v41  ;;  %v5234_v40 = vld [vmem:[#allocation2 + $0x14c] ss:$2 sm:$0xff] }
 0x3a0   : > { %v4087_v32 = vadd.f32 %v3997_v60, %v18474_v39  ;;  %14898 = vmatprep.mubr.msk.f32.mxu1 %vm16804_vm4, %v16803_v0  ;;  %14961 = vmatprep.mubr.msk.f32.mxu0 %vm16804_vm4, %v16803_v0 }
 0x3a1   : > { %v14615_v9 = vpop.f32.mrf.mxu1  ;;  %v14678_v28 = vpop.f32.mrf.mxu0 }
 0x3a2   : > { %v18669_v51 = vadd.f32 %v4275_v45, %v4087_v32  ;;  %v4976_v28 = vld [vmem:[#allocation2 + $0x14c] ss:$2 sm:$0xf] }
 0x3a3   : > { %v4002_v52 = vpop.f32.mrf.mxu1  ;;  %v4280_v55 = vpop.f32.mrf.mxu0  ;;  %14899 = vmatmul.mubr.msk.f32.gmra.mxu1 %vm1040_vm0, %v4964_v56  ;;  %14962 = vmatmul.mubr.msk.f32.gmra.mxu0 %vm1040_vm0, %v5229_v36  ;;  %v5236_v56 = vld [vmem:[#allocation2 + $0x15c] ss:$2 sm:$0xf] }
 0x3a4   : > { %v4088_v39 = vadd.f32 %v4002_v52, %v18483_v3  ;;  %14901 = vmatprep.mubr.msk.f32.mxu1 %vm16804_vm4, %v16803_v0  ;;  %14964 = vmatprep.mubr.msk.f32.mxu0 %vm16804_vm4, %v16803_v0 }
 0x3a5   : > { %v14618_v58 = vpop.f32.mrf.mxu1  ;;  %v14681_v42 = vpop.f32.mrf.mxu0 }
 0x3a6   : > { %v18678_v26 = vadd.f32 %v4280_v55, %v4088_v39  ;;  %v12685_v58 = vld [vmem:[%s20615_s3 + $0x1c0] sm:$0xff] }
 0x3a7   : > { %v4007_v6 = vpop.f32.mrf.mxu1  ;;  %v4285_v49 = vpop.f32.mrf.mxu0  ;;  %14902 = vmatmul.mubr.msk.f32.gmra.mxu1 %vm1040_vm0, %v4966_v8  ;;  %14965 = vmatmul.mubr.msk.f32.gmra.mxu0 %vm1040_vm0, %v5230_v1  ;;  %v5478_v8 = vld [vmem:[#allocation2 + $0x3d] ss:$2 sm:$0xff]  ;;  %v5756_v1 = vld [vmem:[#allocation2 + $0x3e] ss:$2 sm:$0xff] }
 0x3a8   : > { %v4089_v3 = vadd.f32 %v4007_v6, %v18492_v14  ;;  %14904 = vmatprep.mubr.msk.f32.mxu1 %vm16804_vm4, %v16803_v0  ;;  %14967 = vmatprep.mubr.msk.f32.mxu0 %vm16804_vm4, %v16803_v0 }
 0x3a9   : > { %v14621_v5 = vpop.f32.mrf.mxu1  ;;  %v14684_v50 = vpop.f32.mrf.mxu0 }
 0x3aa   : > { %v18687_v31 = vadd.f32 %v4285_v49, %v4089_v3  ;;  %v12707_v3 = vld [vmem:[%s20615_s3 + $0x1d8] sm:$0xff] }
 0x3ab   : > { %v4012_v18 = vpop.f32.mrf.mxu1  ;;  %v4290_v15 = vpop.f32.mrf.mxu0  ;;  %14905 = vmatmul.mubr.msk.f32.gmra.mxu1 %vm1040_vm0, %v4968_v10  ;;  %14968 = vmatmul.mubr.msk.f32.gmra.mxu0 %vm1040_vm0, %v5231_v63 }
 0x3ac   : > { %v4090_v14 = vadd.f32 %v4012_v18, %v18501_v11  ;;  %14907 = vmatprep.mubr.msk.f32.mxu1 %vm16804_vm4, %v16803_v0  ;;  %14970 = vmatprep.mubr.msk.f32.mxu0 %vm16804_vm4, %v16803_v0  ;;  %v5480_v18 = vld [vmem:[#allocation2 + $0x4d] ss:$2 sm:$0xff] }
 0x3ad   : > { %v14624_v59 = vpop.f32.mrf.mxu1  ;;  %v14687_v19 = vpop.f32.mrf.mxu0 }
 0x3ae   : > { %v18696_v61 = vadd.f32 %v4290_v15, %v4090_v14  ;;  %v5758_v15 = vld [vmem:[#allocation2 + $0x4e] ss:$2 sm:$0xff] }
 0x3af   : > { %v4017_v24 = vpop.f32.mrf.mxu1  ;;  %v4295_v25 = vpop.f32.mrf.mxu0  ;;  %14908 = vmatmul.mubr.msk.f32.gmra.mxu1 %vm1040_vm0, %v4970_v47  ;;  %14971 = vmatmul.mubr.msk.f32.gmra.mxu0 %vm1040_vm0, %v5232_v21  ;;  %v12706_v19 = vld [vmem:[%s20615_s3 + $0x1d0] sm:$0xff] }
 0x3b0   : > { %v4091_v11 = vadd.f32 %v4017_v24, %v18510_v53  ;;  %14910 = vmatprep.mubr.msk.f32.mxu1 %vm16804_vm4, %v16803_v0  ;;  %14973 = vmatprep.mubr.msk.f32.mxu0 %vm16804_vm4, %v16803_v0 }
 0x3b1   : > { %v14627_v7 = vpop.f32.mrf.mxu1  ;;  %v14690_v27 = vpop.f32.mrf.mxu0 }
 0x3b2   : > { %v18705_v29 = vadd.f32 %v4295_v25, %v4091_v11  ;;  %v5482_v11 = vld [vmem:[#allocation2 + $0x5d] ss:$2 sm:$0xff]  ;;  %v5760_v7 = vld [vmem:[#allocation2 + $0x5e] ss:$2 sm:$0xff] }
 0x3b3   : > { %v4022_v34 = vpop.f32.mrf.mxu1  ;;  %v4300_v33 = vpop.f32.mrf.mxu0  ;;  %14911 = vmatmul.mubr.msk.f32.gmra.mxu1 %vm1040_vm0, %v4972_v12  ;;  %14974 = vmatmul.mubr.msk.f32.gmra.mxu0 %vm1040_vm0, %v5233_v30  ;;  %v12705_v12 = vld [vmem:[%s20615_s3 + $0x1c8] sm:$0xff] }
 0x3b4   : > { %v4092_v53 = vadd.f32 %v4022_v34, %v18519_v46  ;;  %14913 = vmatprep.mubr.msk.f32.mxu1 %vm16804_vm4, %v16803_v0  ;;  %14976 = vmatprep.mubr.msk.f32.mxu0 %vm16804_vm4, %v16803_v0 }
 0x3b5   : > { %v14630_v17 = vpop.f32.mrf.mxu1  ;;  %v14693_v37 = vpop.f32.mrf.mxu0 }
 0x3b6   : > { %v18714_v54 = vadd.f32 %v4300_v33, %v4092_v53  ;;  %v5484_v17 = vld [vmem:[#allocation2 + $0x6d] ss:$2 sm:$0xff]  ;;  %v5762_v37 = vld [vmem:[#allocation2 + $0x6e] ss:$2 sm:$0xff] }
 0x3b7   : > { %v4027_v41 = vpop.f32.mrf.mxu1  ;;  %v4305_v60 = vpop.f32.mrf.mxu0  ;;  %14914 = vmatmul.mubr.msk.f32.gmra.mxu1 %vm1040_vm0, %v4974_v20  ;;  %14977 = vmatmul.mubr.msk.f32.gmra.mxu0 %vm1040_vm0, %v5234_v40 }
 0x3b8   : > { %v4093_v46 = vadd.f32 %v4027_v41, %v18528_v57  ;;  %14916 = vmatprep.mubr.msk.f32.mxu1 %vm16804_vm4, %v16803_v0  ;;  %14979 = vmatprep.mubr.msk.f32.mxu0 %vm16804_vm4, %v16803_v0 }
 0x3b9   : > { %v14633_v45 = vpop.f32.mrf.mxu1  ;;  %v14696_v32 = vpop.f32.mrf.mxu0 }
 0x3ba   : > { %v18723_v9 = vadd.f32 %v4305_v60, %v4093_v46  ;;  %v5486_v45 = vld [vmem:[#allocation2 + $0x7d] ss:$2 sm:$0xff]  ;;  %v5764_v32 = vld [vmem:[#allocation2 + $0x7e] ss:$2 sm:$0xff] }
 0x3bb   : > { %v4032_v36 = vpop.f32.mrf.mxu1  ;;  %v4310_v52 = vpop.f32.mrf.mxu0  ;;  %14917 = vmatmul.mubr.msk.f32.gmra.mxu1 %vm1040_vm0, %v4976_v28  ;;  %14980 = vmatmul.mubr.msk.f32.gmra.mxu0 %vm1040_vm0, %v5236_v56 }
 0x3bc   : > { %v4094_v57 = vadd.f32 %v4032_v36, %v18540_v43  ;;  %14988 = vmatprep.mubr.msk.f32.mxu1 %vm16804_vm4, %v16803_v0  ;;  %15051 = vmatprep.mubr.msk.f32.mxu0 %vm16804_vm4, %v16803_v0  ;;  %v12684_v43 = vld [vmem:[%s20615_s3 + $0x1b8] sm:$0xff] }
 0x3bd   : > { %v14636_v55 = vpop.f32.mrf.mxu1  ;;  %v14699_v39 = vpop.f32.mrf.mxu0 }
 0x3be   : > { %v18735_v42 = vadd.f32 %v4310_v52, %v4094_v57  ;;  %v5488_v55 = vld [vmem:[#allocation2 + $0x8d] ss:$2 sm:$0xff]  ;;  %v5766_v39 = vld [vmem:[#allocation2 + $0x8e] ss:$2 sm:$0xff] }
 0x3bf   : > { %v4037_v6 = vpop.f32.mrf.mxu1  ;;  %v4315_v49 = vpop.f32.mrf.mxu0  ;;  %14989 = vmatmul.mubr.msk.f32.vlgmr.msra.gmra.mxu1 %vm1040_vm0, %v5478_v8  ;;  %15052 = vmatmul.mubr.msk.f32.vlgmr.msra.gmra.mxu0 %vm1040_vm0, %v5756_v1 }
 0x3c0   : > { %v4095_v5 = vadd.f32 %v4037_v6, %v18556_v62  ;;  %15109 = vmatpush3.msra.mxu1 %v12685_v58  ;;  %14991 = vmatprep.mubr.msk.f32.mxu1 %vm16804_vm4, %v16803_v0  ;;  %v12683_v62 = vld [vmem:[%s20615_s3 + $0x1b0] sm:$0xff] }
 0x3c1   : > { %v14639_v50 = vpop.f32.mrf.mxu1  ;;  %v14702_v10 = vpop.f32.mrf.mxu0  ;;  %15054 = vmatprep.mubr.msk.f32.mxu0 %vm16804_vm4, %v16803_v0  ;;  %15110 = vmatprep.subr.mxu1 %v16803_v0 }
 0x3c2   : > { %v18751_v63 = vadd.f32 %v4315_v49, %v4095_v5  ;;  %15111 = vmatpush3.msra.mxu1 %v12684_v43  ;;  %15172 = vmatpush3.msra.mxu0 %v12707_v3  ;;  %v5490_v43 = vld [vmem:[#allocation2 + $0x9d] ss:$2 sm:$0xff]  ;;  %v5768_v3 = vld [vmem:[#allocation2 + $0x9e] ss:$2 sm:$0xff] }
 0x3c3   : > { %v4042_v14 = vpop.f32.mrf.mxu1  ;;  %v4320_v59 = vpop.f32.mrf.mxu0  ;;  %14992 = vmatmul.mubr.msk.f32.gmra.mxu1 %vm1040_vm0, %v5480_v18  ;;  %15055 = vmatmul.mubr.msk.f32.gmra.mxu0 %vm1040_vm0, %v5758_v15 }
 0x3c4   : > { %v4096_v47 = vadd.f32 %v4042_v14, %v18573_v13  ;;  %14994 = vmatprep.mubr.msk.f32.mxu1 %vm16804_vm4, %v16803_v0  ;;  %15057 = vmatprep.mubr.msk.f32.mxu0 %vm16804_vm4, %v16803_v0  ;;  %v5492_v14 = vld [vmem:[#allocation2 + $0xad] ss:$2 sm:$0xff] }
 0x3c5   : > { %v14642_v21 = vpop.f32.mrf.mxu1  ;;  %v14705_v24 = vpop.f32.mrf.mxu0  ;;  %15112 = vmatprep.subr.mxu1 %v16803_v0  ;;  %15173 = vmatprep.subr.mxu0 %v16803_v0 }
 0x3c6   : > { %v18768_v25 = vadd.f32 %v4320_v59, %v4096_v47  ;;  %15113 = vmatpush3.msra.mxu1 %v12683_v62  ;;  %15174 = vmatpush3.msra.mxu0 %v12706_v19  ;;  %v5770_v59 = vld [vmem:[#allocation2 + $0xae] ss:$2 sm:$0xff] }
 0x3c7   : > { %v4047_v27 = vpop.f32.mrf.mxu1  ;;  %v4325_v13 = vpop.f32.mrf.mxu0  ;;  %14995 = vmatmul.mubr.msk.f32.gmra.mxu1 %vm1040_vm0, %v5482_v11  ;;  %15058 = vmatmul.mubr.msk.f32.gmra.mxu0 %vm1040_vm0, %v5760_v7  ;;  %v5494_v11 = vld [vmem:[#allocation2 + $0xbd] ss:$2 sm:$0xff]  ;;  %v5772_v7 = vld [vmem:[#allocation2 + $0xbe] ss:$2 sm:$0xff] }
 0x3c8   : > { %v4097_v30 = vadd.f32 %v4047_v27, %v18587_v22  ;;  %14997 = vmatprep.mubr.msk.f32.mxu1 %vm16804_vm4, %v16803_v0  ;;  %15060 = vmatprep.mubr.msk.f32.mxu0 %vm16804_vm4, %v16803_v0 }
 0x3c9   : > { %v14645_v34 = vpop.f32.mrf.mxu1  ;;  %v14708_v33 = vpop.f32.mrf.mxu0  ;;  %15175 = vmatprep.subr.mxu0 %v16803_v0  ;;  %15234 = vmatprep.subr.mxu1 %v16803_v0 }
 0x3ca   : > { %v18782_v53 = vadd.f32 %v4325_v13, %v4097_v30  ;;  %15176 = vmatpush3.msra.mxu0 %v12705_v12  ;;  %v5496_v33 = vld [vmem:[#allocation2 + $0xcd] ss:$2 sm:$0xff] }
 0x3cb   : > { %v4052_v20 = vpop.f32.mrf.mxu1  ;;  %v4330_v40 = vpop.f32.mrf.mxu0  ;;  %14998 = vmatmul.mubr.msk.f32.gmra.mxu1 %vm1040_vm0, %v5484_v17  ;;  %15061 = vmatmul.mubr.msk.f32.gmra.mxu0 %vm1040_vm0, %v5762_v37  ;;  %v5774_v17 = vld [vmem:[#allocation2 + $0xce] ss:$2 sm:$0xff] }
 0x3cc   : > { %v4098_v22 = vadd.f32 %v4052_v20, %v18597_v35  ;;  %15000 = vmatprep.mubr.msk.f32.mxu1 %vm16804_vm4, %v16803_v0  ;;  %15063 = vmatprep.mubr.msk.f32.mxu0 %vm16804_vm4, %v16803_v0 }
 0x3cd   : > { %v14648_v41 = vpop.f32.mrf.mxu1  ;;  %v14711_v60 = vpop.f32.mrf.mxu0  ;;  %15297 = vmatprep.subr.mxu0 %v16803_v0 }
 0x3ce   : > { %v18792_v46 = vadd.f32 %v4330_v40, %v4098_v22  ;;  %v5498_v60 = vld [vmem:[#allocation2 + $0xdd] ss:$2 sm:$0xff] }
 0x3cf   : > { %v4057_v28 = vpop.f32.mrf.mxu1  ;;  %v4335_v56 = vpop.f32.mrf.mxu0  ;;  %15001 = vmatmul.mubr.msk.f32.gmra.mxu1 %vm1040_vm0, %v5486_v45  ;;  %15064 = vmatmul.mubr.msk.f32.gmra.mxu0 %vm1040_vm0, %v5764_v32  ;;  %v5776_v45 = vld [vmem:[#allocation2 + $0xde] ss:$2 sm:$0xff] }
 0x3d0   : > { %v4099_v35 = vadd.f32 %v4057_v28, %v18606_v44  ;;  %15003 = vmatprep.mubr.msk.f32.mxu1 %vm16804_vm4, %v16803_v0  ;;  %15066 = vmatprep.mubr.msk.f32.mxu0 %vm16804_vm4, %v16803_v0 }
 0x3d1   : > { %v14651_v36 = vpop.f32.mrf.mxu1  ;;  %v14714_v52 = vpop.f32.mrf.mxu0 }
 0x3d2   : > { %v18801_v57 = vadd.f32 %v4335_v56, %v4099_v35  ;;  %v5500_v52 = vld [vmem:[#allocation2 + $0xed] ss:$2 sm:$0xff] }
 0x3d3   : > { %v4062_v58 = vpop.f32.mrf.mxu1  ;;  %v4340_v8 = vpop.f32.mrf.mxu0  ;;  %15004 = vmatmul.mubr.msk.f32.gmra.mxu1 %vm1040_vm0, %v5488_v55  ;;  %15067 = vmatmul.mubr.msk.f32.gmra.mxu0 %vm1040_vm0, %v5766_v39  ;;  %v5778_v55 = vld [vmem:[#allocation2 + $0xee] ss:$2 sm:$0xff] }
 0x3d4   : > { %v4100_v44 = vadd.f32 %v4062_v58, %v18615_v4  ;;  %15006 = vmatprep.mubr.msk.f32.mxu1 %vm16804_vm4, %v16803_v0  ;;  %15069 = vmatprep.mubr.msk.f32.mxu0 %vm16804_vm4, %v16803_v0 }
 0x3d5   : > { %v14654_v1 = vpop.f32.mrf.mxu1  ;;  %v14717_v6 = vpop.f32.mrf.mxu0 }
 0x3d6   : > { %v18810_v49 = vadd.f32 %v4340_v8, %v4100_v44  ;;  %v5502_v6 = vld [vmem:[#allocation2 + $0xfd] ss:$2 sm:$0xff] }
 0x3d7   : > { %v4067_v5 = vpop.f32.mrf.mxu1  ;;  %v4345_v50 = vpop.f32.mrf.mxu0  ;;  %15007 = vmatmul.mubr.msk.f32.gmra.mxu1 %vm1040_vm0, %v5490_v43  ;;  %15070 = vmatmul.mubr.msk.f32.gmra.mxu0 %vm1040_vm0, %v5768_v3  ;;  %v5780_v43 = vld [vmem:[#allocation2 + $0xfe] ss:$2 sm:$0xff] }
 0x3d8   : > { %v4101_v4 = vadd.f32 %v4067_v5, %v18624_v2  ;;  %15009 = vmatprep.mubr.msk.f32.mxu1 %vm16804_vm4, %v16803_v0  ;;  %15072 = vmatprep.mubr.msk.f32.mxu0 %vm16804_vm4, %v16803_v0 }
 0x3d9   : > { %v14657_v10 = vpop.f32.mrf.mxu1  ;;  %v14720_v18 = vpop.f32.mrf.mxu0 }
 0x3da   : > { %v18819_v15 = vadd.f32 %v4345_v50, %v4101_v4  ;;  %v5504_v18 = vld [vmem:[#allocation2 + $0x10d] ss:$2 sm:$0xff] }
 0x3db   : > { %v4072_v62 = vpop.f32.mrf.mxu1  ;;  %v4350_v19 = vpop.f32.mrf.mxu0  ;;  %15010 = vmatmul.mubr.msk.f32.gmra.mxu1 %vm1040_vm0, %v5492_v14  ;;  %15073 = vmatmul.mubr.msk.f32.gmra.mxu0 %vm1040_vm0, %v5770_v59  ;;  %v5782_v14 = vld [vmem:[#allocation2 + $0x10e] ss:$2 sm:$0xff] }
 0x3dc   : > { %v4102_v2 = vadd.f32 %v4072_v62, %v18633_v16  ;;  %15012 = vmatprep.mubr.msk.f32.mxu1 %vm16804_vm4, %v16803_v0  ;;  %15075 = vmatprep.mubr.msk.f32.mxu0 %vm16804_vm4, %v16803_v0 }
 0x3dd   : > { %v14660_v47 = vpop.f32.mrf.mxu1  ;;  %v14723_v21 = vpop.f32.mrf.mxu0 }
 0x3de   : > { %v18828_v24 = vadd.f32 %v4350_v19, %v4102_v2  ;;  %v5506_v21 = vld [vmem:[#allocation2 + $0x11d] ss:$2 sm:$0xff] }
 0x3df   : > { %v4077_v27 = vpop.f32.mrf.mxu1  ;;  %v4355_v13 = vpop.f32.mrf.mxu0  ;;  %15013 = vmatmul.mubr.msk.f32.gmra.mxu1 %vm1040_vm0, %v5494_v11  ;;  %15076 = vmatmul.mubr.msk.f32.gmra.mxu0 %vm1040_vm0, %v5772_v7  ;;  %v5784_v11 = vld [vmem:[#allocation2 + $0x11e] ss:$2 sm:$0xff] }
 0x3e0   : > { %v4103_v16 = vadd.f32 %v4077_v27, %v18642_v38  ;;  %15015 = vmatprep.mubr.msk.f32.mxu1 %vm16804_vm4, %v16803_v0  ;;  %15078 = vmatprep.mubr.msk.f32.mxu0 %vm16804_vm4, %v16803_v0 }
 0x3e1   : > { %v14663_v12 = vpop.f32.mrf.mxu1  ;;  %v14726_v30 = vpop.f32.mrf.mxu0 }
 0x3e2   : > { %v18837_v34 = vadd.f32 %v4355_v13, %v4103_v16  ;;  %v5508_v30 = vld [vmem:[#allocation2 + $0x12d] ss:$2 sm:$0xff] }
 0x3e3   : > { %v4082_v37 = vpop.f32.mrf.mxu1  ;;  %v4360_v20 = vpop.f32.mrf.mxu0  ;;  %15016 = vmatmul.mubr.msk.f32.gmra.mxu1 %vm1040_vm0, %v5496_v33  ;;  %15079 = vmatmul.mubr.msk.f32.gmra.mxu0 %vm1040_vm0, %v5774_v17  ;;  %v5786_v33 = vld [vmem:[#allocation2 + $0x12e] ss:$2 sm:$0xff] }
 0x3e4   : > { %v4104_v38 = vadd.f32 %v4082_v37, %v18651_v48  ;;  %15018 = vmatprep.mubr.msk.f32.mxu1 %vm16804_vm4, %v16803_v0  ;;  %15081 = vmatprep.mubr.msk.f32.mxu0 %vm16804_vm4, %v16803_v0 }
 0x3e5   : > { %v14666_v40 = vpop.f32.mrf.mxu1  ;;  %v14729_v22 = vpop.f32.mrf.mxu0 }
 0x3e6   : > { %v18846_v41 = vadd.f32 %v4360_v20, %v4104_v38  ;;  %v5510_v22 = vld [vmem:[#allocation2 + $0x13d] ss:$2 sm:$0xff] }
 0x3e7   : > { %v4548_v32 = vpop.f32.mrf.mxu1  ;;  %v4826_v28 = vpop.f32.mrf.mxu0  ;;  %15019 = vmatmul.mubr.msk.f32.gmra.mxu1 %vm1040_vm0, %v5498_v60  ;;  %15082 = vmatmul.mubr.msk.f32.gmra.mxu0 %vm1040_vm0, %v5776_v45  ;;  %v5788_v60 = vld [vmem:[#allocation2 + $0x13e] ss:$2 sm:$0xff] }
 0x3e8   : > { %v4642_v48 = vadd.f32 %v4548_v32, %v18660_v23  ;;  %15021 = vmatprep.mubr.msk.f32.mxu1 %vm16804_vm4, %v16803_v0  ;;  %15084 = vmatprep.mubr.msk.f32.mxu0 %vm16804_vm4, %v16803_v0 }
 0x3e9   : > { %v14738_v56 = vpop.f32.mrf.mxu1  ;;  %v14801_v35 = vpop.f32.mrf.mxu0 }
 0x3ea   : > { %v18855_v36 = vadd.f32 %v4826_v28, %v4642_v48  ;;  %v5512_v35 = vld [vmem:[#allocation2 + $0x14d] ss:$2 sm:$0xff] }
 0x3eb   : > { %v4553_v39 = vpop.f32.mrf.mxu1  ;;  %v4831_v58 = vpop.f32.mrf.mxu0  ;;  %15022 = vmatmul.mubr.msk.f32.gmra.mxu1 %vm1040_vm0, %v5500_v52  ;;  %15085 = vmatmul.mubr.msk.f32.gmra.mxu0 %vm1040_vm0, %v5778_v55  ;;  %v5790_v52 = vld [vmem:[#allocation2 + $0x14e] ss:$2 sm:$0xff] }
 0x3ec   : > { %v4643_v23 = vadd.f32 %v4553_v39, %v18669_v51  ;;  %15024 = vmatprep.mubr.msk.f32.mxu1 %vm16804_vm4, %v16803_v0  ;;  %15087 = vmatprep.mubr.msk.f32.mxu0 %vm16804_vm4, %v16803_v0 }
 0x3ed   : > { %v14741_v8 = vpop.f32.mrf.mxu1  ;;  %v14804_v44 = vpop.f32.mrf.mxu0 }
 0x3ee   : > { %v18864_v1 = vadd.f32 %v4831_v58, %v4643_v23  ;;  %v5514_v44 = vld [vmem:[#allocation2 + $0x15d] ss:$2 sm:$0xf] }
 0x3ef   : > { %v4558_v3 = vpop.f32.mrf.mxu1  ;;  %v4836_v5 = vpop.f32.mrf.mxu0  ;;  %15025 = vmatmul.mubr.msk.f32.gmra.mxu1 %vm1040_vm0, %v5502_v6  ;;  %15088 = vmatmul.mubr.msk.f32.gmra.mxu0 %vm1040_vm0, %v5780_v43  ;;  %v5792_v6 = vld [vmem:[#allocation2 + $0x15e] ss:$2 sm:$0xf] }
 0x3f0   : > { %v4644_v51 = vadd.f32 %v4558_v3, %v18678_v26  ;;  %15027 = vmatprep.mubr.msk.f32.mxu1 %vm16804_vm4, %v16803_v0  ;;  %15090 = vmatprep.mubr.msk.f32.mxu0 %vm16804_vm4, %v16803_v0 }
 0x3f1   : > { %v14744_v50 = vpop.f32.mrf.mxu1  ;;  %v14807_v4 = vpop.f32.mrf.mxu0 }
 0x3f2   : > { %v18873_v10 = vadd.f32 %v4836_v5, %v4644_v51  ;;  %v12729_v50 = vld [vmem:[%s20615_s3 + $0x1f0] sm:$0xff] }
 0x3f3   : > { %v4563_v59 = vpop.f32.mrf.mxu1  ;;  %v4841_v62 = vpop.f32.mrf.mxu0  ;;  %15028 = vmatmul.mubr.msk.f32.gmra.mxu1 %vm1040_vm0, %v5504_v18  ;;  %15091 = vmatmul.mubr.msk.f32.gmra.mxu0 %vm1040_vm0, %v5782_v14  ;;  %v6034_v18 = vld [vmem:[#allocation2 + $0x3f] ss:$2 sm:$0xff]  ;;  %v6311_v14 = vld [vmem:[#allocation2 + $0x40] ss:$2 sm:$0xff] }
 0x3f4   : > { %v4645_v26 = vadd.f32 %v4563_v59, %v18687_v31  ;;  %15030 = vmatprep.mubr.msk.f32.mxu1 %vm16804_vm4, %v16803_v0  ;;  %15093 = vmatprep.mubr.msk.f32.mxu0 %vm16804_vm4, %v16803_v0 }
 0x3f5   : > { %v14747_v19 = vpop.f32.mrf.mxu1  ;;  %v14810_v2 = vpop.f32.mrf.mxu0 }
 0x3f6   : > { %v18882_v47 = vadd.f32 %v4841_v62, %v4645_v26  ;;  %v12751_v26 = vld [vmem:[%s20615_s3 + $0x208] sm:$0xff] }
 0x3f7   : > { %v4568_v7 = vpop.f32.mrf.mxu1  ;;  %v4846_v27 = vpop.f32.mrf.mxu0  ;;  %15031 = vmatmul.mubr.msk.f32.gmra.mxu1 %vm1040_vm0, %v5506_v21  ;;  %15094 = vmatmul.mubr.msk.f32.gmra.mxu0 %vm1040_vm0, %v5784_v11 }
 0x3f8   : > { %v4646_v31 = vadd.f32 %v4568_v7, %v18696_v61  ;;  %15033 = vmatprep.mubr.msk.f32.mxu1 %vm16804_vm4, %v16803_v0  ;;  %15096 = vmatprep.mubr.msk.f32.mxu0 %vm16804_vm4, %v16803_v0  ;;  %v6036_v7 = vld [vmem:[#allocation2 + $0x4f] ss:$2 sm:$0xff] }
 0x3f9   : > { %v14750_v13 = vpop.f32.mrf.mxu1  ;;  %v14813_v16 = vpop.f32.mrf.mxu0 }
 0x3fa   : > { %v18891_v12 = vadd.f32 %v4846_v27, %v4646_v31  ;;  %v6312_v27 = vld [vmem:[#allocation2 + $0x50] ss:$2 sm:$0xff]  ;;  %v12750_v16 = vld [vmem:[%s20615_s3 + $0x200] sm:$0xff] }
 0x3fb   : > { %v4573_v17 = vpop.f32.mrf.mxu1  ;;  %v4851_v37 = vpop.f32.mrf.mxu0  ;;  %15034 = vmatmul.mubr.msk.f32.gmra.mxu1 %vm1040_vm0, %v5508_v30  ;;  %15097 = vmatmul.mubr.msk.f32.gmra.mxu0 %vm1040_vm0, %v5786_v33 }
 0x3fc   : > { %v4647_v61 = vadd.f32 %v4573_v17, %v18705_v29  ;;  %15036 = vmatprep.mubr.msk.f32.mxu1 %vm16804_vm4, %v16803_v0  ;;  %15099 = vmatprep.mubr.msk.f32.mxu0 %vm16804_vm4, %v16803_v0 }
 0x3fd   : > { %v14753_v20 = vpop.f32.mrf.mxu1  ;;  %v14816_v38 = vpop.f32.mrf.mxu0 }
 0x3fe   : > { %v18900_v40 = vadd.f32 %v4851_v37, %v4647_v61  ;;  %v6038_v61 = vld [vmem:[#allocation2 + $0x5f] ss:$2 sm:$0xff]  ;;  %v6313_v20 = vld [vmem:[#allocation2 + $0x60] ss:$2 sm:$0xff] }
 0x3ff   : > { %v4578_v45 = vpop.f32.mrf.mxu1  ;;  %v4856_v32 = vpop.f32.mrf.mxu0  ;;  %15037 = vmatmul.mubr.msk.f32.gmra.mxu1 %vm1040_vm0, %v5510_v22  ;;  %15100 = vmatmul.mubr.msk.f32.gmra.mxu0 %vm1040_vm0, %v5788_v60  ;;  %v12749_v22 = vld [vmem:[%s20615_s3 + $0x1f8] sm:$0xff] }
 0x400   : > { %v4648_v29 = vadd.f32 %v4578_v45, %v18714_v54  ;;  %15039 = vmatprep.mubr.msk.f32.mxu1 %vm16804_vm4, %v16803_v0  ;;  %15102 = vmatprep.mubr.msk.f32.mxu0 %vm16804_vm4, %v16803_v0 }
 0x401   : > { %v14756_v28 = vpop.f32.mrf.mxu1  ;;  %v14819_v48 = vpop.f32.mrf.mxu0 }
 0x402   : > { %v18909_v56 = vadd.f32 %v4856_v32, %v4648_v29  ;;  %v6040_v28 = vld [vmem:[#allocation2 + $0x6f] ss:$2 sm:$0xff]  ;;  %v6314_v48 = vld [vmem:[#allocation2 + $0x70] ss:$2 sm:$0xff] }
 0x403   : > { %v4583_v55 = vpop.f32.mrf.mxu1  ;;  %v4861_v39 = vpop.f32.mrf.mxu0  ;;  %15040 = vmatmul.mubr.msk.f32.gmra.mxu1 %vm1040_vm0, %v5512_v35  ;;  %15103 = vmatmul.mubr.msk.f32.gmra.mxu0 %vm1040_vm0, %v5790_v52 }
 0x404   : > { %v4649_v54 = vadd.f32 %v4583_v55, %v18723_v9  ;;  %15042 = vmatprep.mubr.msk.f32.mxu1 %vm16804_vm4, %v16803_v0  ;;  %15105 = vmatprep.mubr.msk.f32.mxu0 %vm16804_vm4, %v16803_v0 }
 0x405   : > { %v14759_v58 = vpop.f32.mrf.mxu1  ;;  %v14822_v23 = vpop.f32.mrf.mxu0 }
 0x406   : > { %v18918_v8 = vadd.f32 %v4861_v39, %v4649_v54  ;;  %v6042_v58 = vld [vmem:[#allocation2 + $0x7f] ss:$2 sm:$0xff]  ;;  %v6315_v23 = vld [vmem:[#allocation2 + $0x80] ss:$2 sm:$0xff] }
 0x407   : > { %v4588_v43 = vpop.f32.mrf.mxu1  ;;  %v4866_v3 = vpop.f32.mrf.mxu0  ;;  %15043 = vmatmul.mubr.msk.f32.gmra.mxu1 %vm1040_vm0, %v5514_v44  ;;  %15106 = vmatmul.mubr.msk.f32.gmra.mxu0 %vm1040_vm0, %v5792_v6 }
 0x408   : > { %v4650_v9 = vadd.f32 %v4588_v43, %v18735_v42  ;;  %15114 = vmatprep.mubr.msk.f32.mxu1 %vm16804_vm4, %v16803_v0  ;;  %15177 = vmatprep.mubr.msk.f32.mxu0 %vm16804_vm4, %v16803_v0  ;;  %v12728_v42 = vld [vmem:[%s20615_s3 + $0x1e8] sm:$0xff] }
 0x409   : > { %v14762_v5 = vpop.f32.mrf.mxu1  ;;  %v14825_v51 = vpop.f32.mrf.mxu0 }
 0x40a   : > { %v18930_v4 = vadd.f32 %v4866_v3, %v4650_v9  ;;  %v6044_v5 = vld [vmem:[#allocation2 + $0x8f] ss:$2 sm:$0xff]  ;;  %v6316_v51 = vld [vmem:[#allocation2 + $0x90] ss:$2 sm:$0xff] }
 0x40b   : > { %v4593_v59 = vpop.f32.mrf.mxu1  ;;  %v4871_v62 = vpop.f32.mrf.mxu0  ;;  %15115 = vmatmul.mubr.msk.f32.vlgmr.msra.gmra.mxu1 %vm1040_vm0, %v6034_v18  ;;  %15178 = vmatmul.mubr.msk.f32.vlgmr.msra.gmra.mxu0 %vm1040_vm0, %v6311_v14 }
 0x40c   : > { %v4651_v19 = vadd.f32 %v4593_v59, %v18751_v63  ;;  %15235 = vmatpush3.msra.mxu1 %v12729_v50  ;;  %15117 = vmatprep.mubr.msk.f32.mxu1 %vm16804_vm4, %v16803_v0  ;;  %v12727_v63 = vld [vmem:[%s20615_s3 + $0x1e0] sm:$0xff] }
 0x40d   : > { %v14765_v2 = vpop.f32.mrf.mxu1  ;;  %v14828_v21 = vpop.f32.mrf.mxu0  ;;  %15180 = vmatprep.mubr.msk.f32.mxu0 %vm16804_vm4, %v16803_v0  ;;  %15236 = vmatprep.subr.mxu1 %v16803_v0 }
 0x40e   : > { %v18946_v11 = vadd.f32 %v4871_v62, %v4651_v19  ;;  %15237 = vmatpush3.msra.mxu1 %v12728_v42  ;;  %15298 = vmatpush3.msra.mxu0 %v12751_v26  ;;  %v6046_v42 = vld [vmem:[#allocation2 + $0x9f] ss:$2 sm:$0xff]  ;;  %v6317_v26 = vld [vmem:[#allocation2 + $0xa0] ss:$2 sm:$0xff] }
 0x40f   : > { %v4598_v31 = vpop.f32.mrf.mxu1  ;;  %v4876_v13 = vpop.f32.mrf.mxu0  ;;  %15118 = vmatmul.mubr.msk.f32.gmra.mxu1 %vm1040_vm0, %v6036_v7  ;;  %15181 = vmatmul.mubr.msk.f32.gmra.mxu0 %vm1040_vm0, %v6312_v27 }
 0x410   : > { %v4652_v30 = vadd.f32 %v4598_v31, %v18768_v25  ;;  %15120 = vmatprep.mubr.msk.f32.mxu1 %vm16804_vm4, %v16803_v0  ;;  %15183 = vmatprep.mubr.msk.f32.mxu0 %vm16804_vm4, %v16803_v0  ;;  %v6048_v31 = vld [vmem:[#allocation2 + $0xaf] ss:$2 sm:$0xff] }
 0x411   : > { %v14768_v33 = vpop.f32.mrf.mxu1  ;;  %v14831_v17 = vpop.f32.mrf.mxu0  ;;  %15238 = vmatprep.subr.mxu1 %v16803_v0  ;;  %15299 = vmatprep.subr.mxu0 %v16803_v0 }
 0x412   : > { %v18963_v37 = vadd.f32 %v4876_v13, %v4652_v30  ;;  %15239 = vmatpush3.msra.mxu1 %v12727_v63  ;;  %15300 = vmatpush3.msra.mxu0 %v12750_v16  ;;  %v6318_v13 = vld [vmem:[#allocation2 + $0xb0] ss:$2 sm:$0xff] }
 0x413   : > { %v4603_v38 = vpop.f32.mrf.mxu1  ;;  %v4881_v25 = vpop.f32.mrf.mxu0  ;;  %15121 = vmatmul.mubr.msk.f32.gmra.mxu1 %vm1040_vm0, %v6038_v61  ;;  %15184 = vmatmul.mubr.msk.f32.gmra.mxu0 %vm1040_vm0, %v6313_v20  ;;  %v6050_v61 = vld [vmem:[#allocation2 + $0xbf] ss:$2 sm:$0xff]  ;;  %v6319_v20 = vld [vmem:[#allocation2 + $0xc0] ss:$2 sm:$0xff] }
 0x414   : > { %v4653_v60 = vadd.f32 %v4603_v38, %v18782_v53  ;;  %15123 = vmatprep.mubr.msk.f32.mxu1 %vm16804_vm4, %v16803_v0  ;;  %15186 = vmatprep.mubr.msk.f32.mxu0 %vm16804_vm4, %v16803_v0 }
 0x415   : > { %v14771_v45 = vpop.f32.mrf.mxu1  ;;  %v14834_v32 = vpop.f32.mrf.mxu0  ;;  %15301 = vmatprep.subr.mxu0 %v16803_v0  ;;  %15360 = vmatprep.subr.mxu1 %v16803_v0 }
 0x416   : > { %v18977_v29 = vadd.f32 %v4881_v25, %v4653_v60  ;;  %15302 = vmatpush3.msra.mxu0 %v12749_v22  ;;  %v6052_v32 = vld [vmem:[#allocation2 + $0xcf] ss:$2 sm:$0xff] }
 0x417   : > { %v4608_v35 = vpop.f32.mrf.mxu1  ;;  %v4886_v52 = vpop.f32.mrf.mxu0  ;;  %15124 = vmatmul.mubr.msk.f32.gmra.mxu1 %vm1040_vm0, %v6040_v28  ;;  %15187 = vmatmul.mubr.msk.f32.gmra.mxu0 %vm1040_vm0, %v6314_v48  ;;  %v6320_v28 = vld [vmem:[#allocation2 + $0xd0] ss:$2 sm:$0xff] }
 0x418   : > { %v4654_v53 = vadd.f32 %v4608_v35, %v18792_v46  ;;  %15126 = vmatprep.mubr.msk.f32.mxu1 %vm16804_vm4, %v16803_v0  ;;  %15189 = vmatprep.mubr.msk.f32.mxu0 %vm16804_vm4, %v16803_v0 }
 0x419   : > { %v14774_v55 = vpop.f32.mrf.mxu1  ;;  %v14837_v39 = vpop.f32.mrf.mxu0  ;;  %15423 = vmatprep.subr.mxu0 %v16803_v0 }
 0x41a   : > { %v18987_v54 = vadd.f32 %v4886_v52, %v4654_v53  ;;  %v6054_v39 = vld [vmem:[#allocation2 + $0xdf] ss:$2 sm:$0xff] }
 0x41b   : > { %v4613_v44 = vpop.f32.mrf.mxu1  ;;  %v4891_v6 = vpop.f32.mrf.mxu0  ;;  %15127 = vmatmul.mubr.msk.f32.gmra.mxu1 %vm1040_vm0, %v6042_v58  ;;  %15190 = vmatmul.mubr.msk.f32.gmra.mxu0 %vm1040_vm0, %v6315_v23  ;;  %v6321_v58 = vld [vmem:[#allocation2 + $0xe0] ss:$2 sm:$0xff] }
 0x41c   : > { %v4655_v46 = vadd.f32 %v4613_v44, %v18801_v57  ;;  %15129 = vmatprep.mubr.msk.f32.mxu1 %vm16804_vm4, %v16803_v0  ;;  %15192 = vmatprep.mubr.msk.f32.mxu0 %vm16804_vm4, %v16803_v0 }
 0x41d   : > { %v14777_v43 = vpop.f32.mrf.mxu1  ;;  %v14840_v3 = vpop.f32.mrf.mxu0 }
 0x41e   : > { %v18996_v9 = vadd.f32 %v4891_v6, %v4655_v46  ;;  %v6056_v3 = vld [vmem:[#allocation2 + $0xef] ss:$2 sm:$0xff] }
 0x41f   : > { %v4618_v50 = vpop.f32.mrf.mxu1  ;;  %v4896_v18 = vpop.f32.mrf.mxu0  ;;  %15130 = vmatmul.mubr.msk.f32.gmra.mxu1 %vm1040_vm0, %v6044_v5  ;;  %15193 = vmatmul.mubr.msk.f32.gmra.mxu0 %vm1040_vm0, %v6316_v51  ;;  %v6322_v5 = vld [vmem:[#allocation2 + $0xf0] ss:$2 sm:$0xff] }
 0x420   : > { %v4656_v57 = vadd.f32 %v4618_v50, %v18810_v49  ;;  %15132 = vmatprep.mubr.msk.f32.mxu1 %vm16804_vm4, %v16803_v0  ;;  %15195 = vmatprep.mubr.msk.f32.mxu0 %vm16804_vm4, %v16803_v0 }
 0x421   : > { %v14780_v14 = vpop.f32.mrf.mxu1  ;;  %v14843_v59 = vpop.f32.mrf.mxu0 }
 0x422   : > { %v19005_v62 = vadd.f32 %v4896_v18, %v4656_v57  ;;  %v6058_v59 = vld [vmem:[#allocation2 + $0xff] ss:$2 sm:$0xff] }
 0x423   : > { %v4623_v19 = vpop.f32.mrf.mxu1  ;;  %v4901_v2 = vpop.f32.mrf.mxu0  ;;  %15133 = vmatmul.mubr.msk.f32.gmra.mxu1 %vm1040_vm0, %v6046_v42  ;;  %15196 = vmatmul.mubr.msk.f32.gmra.mxu0 %vm1040_vm0, %v6317_v26  ;;  %v6323_v42 = vld [vmem:[#allocation2 + $0x100] ss:$2 sm:$0xff] }
 0x424   : > { %v4657_v49 = vadd.f32 %v4623_v19, %v18819_v15  ;;  %15135 = vmatprep.mubr.msk.f32.mxu1 %vm16804_vm4, %v16803_v0  ;;  %15198 = vmatprep.mubr.msk.f32.mxu0 %vm16804_vm4, %v16803_v0 }
 0x425   : > { %v14783_v21 = vpop.f32.mrf.mxu1  ;;  %v14846_v7 = vpop.f32.mrf.mxu0 }
 0x426   : > { %v19014_v27 = vadd.f32 %v4901_v2, %v4657_v49  ;;  %v6060_v7 = vld [vmem:[#allocation2 + $0x10f] ss:$2 sm:$0xff] }
 0x427   : > { %v4628_v63 = vpop.f32.mrf.mxu1  ;;  %v4906_v16 = vpop.f32.mrf.mxu0  ;;  %15136 = vmatmul.mubr.msk.f32.gmra.mxu1 %vm1040_vm0, %v6048_v31  ;;  %15199 = vmatmul.mubr.msk.f32.gmra.mxu0 %vm1040_vm0, %v6318_v13  ;;  %v6324_v31 = vld [vmem:[#allocation2 + $0x110] ss:$2 sm:$0xff] }
 0x428   : > { %v4658_v15 = vadd.f32 %v4628_v63, %v18828_v24  ;;  %15138 = vmatprep.mubr.msk.f32.mxu1 %vm16804_vm4, %v16803_v0  ;;  %15201 = vmatprep.mubr.msk.f32.mxu0 %vm16804_vm4, %v16803_v0 }
 0x429   : > { %v14786_v30 = vpop.f32.mrf.mxu1  ;;  %v14849_v33 = vpop.f32.mrf.mxu0 }
 0x42a   : > { %v19023_v17 = vadd.f32 %v4906_v16, %v4658_v15  ;;  %v6062_v33 = vld [vmem:[#allocation2 + $0x11f] ss:$2 sm:$0xff] }
 0x42b   : > { %v4633_v38 = vpop.f32.mrf.mxu1  ;;  %v4911_v25 = vpop.f32.mrf.mxu0  ;;  %15139 = vmatmul.mubr.msk.f32.gmra.mxu1 %vm1040_vm0, %v6050_v61  ;;  %15202 = vmatmul.mubr.msk.f32.gmra.mxu0 %vm1040_vm0, %v6319_v20  ;;  %v6325_v61 = vld [vmem:[#allocation2 + $0x120] ss:$2 sm:$0xff] }
 0x42c   : > { %v4659_v24 = vadd.f32 %v4633_v38, %v18837_v34  ;;  %15141 = vmatprep.mubr.msk.f32.mxu1 %vm16804_vm4, %v16803_v0  ;;  %15204 = vmatprep.mubr.msk.f32.mxu0 %vm16804_vm4, %v16803_v0 }
 0x42d   : > { %v14789_v22 = vpop.f32.mrf.mxu1  ;;  %v14852_v60 = vpop.f32.mrf.mxu0 }
 0x42e   : > { %v19032_v45 = vadd.f32 %v4911_v25, %v4659_v24  ;;  %v6064_v60 = vld [vmem:[#allocation2 + $0x12f] ss:$2 sm:$0xff] }
 0x42f   : > { %v4638_v48 = vpop.f32.mrf.mxu1  ;;  %v4916_v35 = vpop.f32.mrf.mxu0  ;;  %15142 = vmatmul.mubr.msk.f32.gmra.mxu1 %vm1040_vm0, %v6052_v32  ;;  %15205 = vmatmul.mubr.msk.f32.gmra.mxu0 %vm1040_vm0, %v6320_v28  ;;  %v6327_v32 = vld [vmem:[#allocation2 + $0x130] ss:$2 sm:$0xff] }
 0x430   : > { %v4660_v34 = vadd.f32 %v4638_v48, %v18846_v41  ;;  %15144 = vmatprep.mubr.msk.f32.mxu1 %vm16804_vm4, %v16803_v0  ;;  %15207 = vmatprep.mubr.msk.f32.mxu0 %vm16804_vm4, %v16803_v0 }
 0x431   : > { %v14792_v52 = vpop.f32.mrf.mxu1  ;;  %v14855_v53 = vpop.f32.mrf.mxu0 }
 0x432   : > { %v19041_v55 = vadd.f32 %v4916_v35, %v4660_v34  ;;  %v6066_v53 = vld [vmem:[#allocation2 + $0x13f] ss:$2 sm:$0xff] }
 0x433   : > { %v5104_v23 = vpop.f32.mrf.mxu1  ;;  %v5364_v44 = vpop.f32.mrf.mxu0  ;;  %15145 = vmatmul.mubr.msk.f32.gmra.mxu1 %vm1040_vm0, %v6054_v39  ;;  %15208 = vmatmul.mubr.msk.f32.gmra.mxu0 %vm1040_vm0, %v6321_v58  ;;  %v6329_v39 = vld [vmem:[#allocation2 + $0x140] ss:$2 sm:$0xff] }
 0x434   : > { %v5198_v41 = vadd.f32 %v5104_v23, %v18855_v36  ;;  %15147 = vmatprep.mubr.msk.f32.mxu1 %vm16804_vm4, %v16803_v0  ;;  %15210 = vmatprep.mubr.msk.f32.mxu0 %vm16804_vm4, %v16803_v0 }
 0x435   : > { %v14864_v6 = vpop.f32.mrf.mxu1  ;;  %v14927_v46 = vpop.f32.mrf.mxu0 }
 0x436   : > { %v19050_v43 = vadd.f32 %v5364_v44, %v5198_v41  ;;  %v6068_v46 = vld [vmem:[#allocation2 + $0x14f] ss:$2 sm:$0xff] }
 0x437   : > { %v5109_v51 = vpop.f32.mrf.mxu1  ;;  %v5369_v50 = vpop.f32.mrf.mxu0  ;;  %15148 = vmatmul.mubr.msk.f32.gmra.mxu1 %vm1040_vm0, %v6056_v3  ;;  %15211 = vmatmul.mubr.msk.f32.gmra.mxu0 %vm1040_vm0, %v6322_v5  ;;  %v6331_v3 = vld [vmem:[#allocation2 + $0x150] ss:$2 sm:$0xff] }
 0x438   : > { %v5199_v36 = vadd.f32 %v5109_v51, %v18864_v1  ;;  %15150 = vmatprep.mubr.msk.f32.mxu1 %vm16804_vm4, %v16803_v0  ;;  %15213 = vmatprep.mubr.msk.f32.mxu0 %vm16804_vm4, %v16803_v0 }
 0x439   : > { %v14867_v18 = vpop.f32.mrf.mxu1  ;;  %v14930_v57 = vpop.f32.mrf.mxu0 }
 0x43a   : > { %v19059_v14 = vadd.f32 %v5369_v50, %v5199_v36  ;;  %v6070_v57 = vld [vmem:[#allocation2 + $0x15f] ss:$2 sm:$0xf] }
 0x43b   : > { %v5114_v26 = vpop.f32.mrf.mxu1  ;;  %v5374_v19 = vpop.f32.mrf.mxu0  ;;  %15151 = vmatmul.mubr.msk.f32.gmra.mxu1 %vm1040_vm0, %v6058_v59  ;;  %15214 = vmatmul.mubr.msk.f32.gmra.mxu0 %vm1040_vm0, %v6323_v42  ;;  %v6333_v59 = vld [vmem:[#allocation2 + $0x160] ss:$2 sm:$0xf] }
 0x43c   : > { %v5200_v1 = vadd.f32 %v5114_v26, %v18873_v10  ;;  %15153 = vmatprep.mubr.msk.f32.mxu1 %vm16804_vm4, %v16803_v0  ;;  %15216 = vmatprep.mubr.msk.f32.mxu0 %vm16804_vm4, %v16803_v0 }
 0x43d   : > { %v14870_v2 = vpop.f32.mrf.mxu1  ;;  %v14933_v49 = vpop.f32.mrf.mxu0 }
 0x43e   : > { %v19068_v21 = vadd.f32 %v5374_v19, %v5200_v1  ;;  %v12773_v2 = vld [vmem:[%s20615_s3 + $0x220] sm:$0xff] }
 0x43f   : > { %v5119_v13 = vpop.f32.mrf.mxu1  ;;  %v5379_v63 = vpop.f32.mrf.mxu0  ;;  %15154 = vmatmul.mubr.msk.f32.gmra.mxu1 %vm1040_vm0, %v6060_v7  ;;  %15217 = vmatmul.mubr.msk.f32.gmra.mxu0 %vm1040_vm0, %v6324_v31  ;;  %v6574_v7 = vld [vmem:[#allocation2 + $0x50] ss:$2 sm:$0xff]  ;;  %v6834_v31 = vld [vmem:[#allocation2 + $0x51] ss:$2 sm:$0xff] }
 0x440   : > { %v5201_v10 = vadd.f32 %v5119_v13, %v18882_v47  ;;  %15156 = vmatprep.mubr.msk.f32.mxu1 %vm16804_vm4, %v16803_v0  ;;  %15219 = vmatprep.mubr.msk.f32.mxu0 %vm16804_vm4, %v16803_v0 }
 0x441   : > { %v14873_v16 = vpop.f32.mrf.mxu1  ;;  %v14936_v15 = vpop.f32.mrf.mxu0 }
 0x442   : > { %v19077_v30 = vadd.f32 %v5379_v63, %v5201_v10  ;;  %v12795_v10 = vld [vmem:[%s20615_s3 + $0x238] sm:$0xff] }
 0x443   : > { %v5124_v20 = vpop.f32.mrf.mxu1  ;;  %v5384_v38 = vpop.f32.mrf.mxu0  ;;  %15157 = vmatmul.mubr.msk.f32.gmra.mxu1 %vm1040_vm0, %v6062_v33  ;;  %15220 = vmatmul.mubr.msk.f32.gmra.mxu0 %vm1040_vm0, %v6325_v61 }
 0x444   : > { %v5202_v47 = vadd.f32 %v5124_v20, %v18891_v12  ;;  %15159 = vmatprep.mubr.msk.f32.mxu1 %vm16804_vm4, %v16803_v0  ;;  %15222 = vmatprep.mubr.msk.f32.mxu0 %vm16804_vm4, %v16803_v0  ;;  %v6575_v20 = vld [vmem:[#allocation2 + $0x60] ss:$2 sm:$0xff] }
 0x445   : > { %v14876_v25 = vpop.f32.mrf.mxu1  ;;  %v14939_v24 = vpop.f32.mrf.mxu0 }
 0x446   : > { %v19086_v22 = vadd.f32 %v5384_v38, %v5202_v47  ;;  %v6835_v38 = vld [vmem:[#allocation2 + $0x61] ss:$2 sm:$0xff]  ;;  %v12794_v24 = vld [vmem:[%s20615_s3 + $0x230] sm:$0xff] }
 0x447   : > { %v5129_v28 = vpop.f32.mrf.mxu1  ;;  %v5389_v48 = vpop.f32.mrf.mxu0  ;;  %15160 = vmatmul.mubr.msk.f32.gmra.mxu1 %vm1040_vm0, %v6064_v60  ;;  %15223 = vmatmul.mubr.msk.f32.gmra.mxu0 %vm1040_vm0, %v6327_v32 }
 0x448   : > { %v5203_v12 = vadd.f32 %v5129_v28, %v18900_v40  ;;  %15162 = vmatprep.mubr.msk.f32.mxu1 %vm16804_vm4, %v16803_v0  ;;  %15225 = vmatprep.mubr.msk.f32.mxu0 %vm16804_vm4, %v16803_v0 }
 0x449   : > { %v14879_v35 = vpop.f32.mrf.mxu1  ;;  %v14942_v34 = vpop.f32.mrf.mxu0 }
 0x44a   : > { %v19095_v52 = vadd.f32 %v5389_v48, %v5203_v12  ;;  %v6576_v12 = vld [vmem:[#allocation2 + $0x70] ss:$2 sm:$0xff]  ;;  %v6836_v35 = vld [vmem:[#allocation2 + $0x71] ss:$2 sm:$0xff] }
 0x44b   : > { %v5134_v58 = vpop.f32.mrf.mxu1  ;;  %v5394_v23 = vpop.f32.mrf.mxu0  ;;  %15163 = vmatmul.mubr.msk.f32.gmra.mxu1 %vm1040_vm0, %v6066_v53  ;;  %15226 = vmatmul.mubr.msk.f32.gmra.mxu0 %vm1040_vm0, %v6329_v39  ;;  %v12793_v53 = vld [vmem:[%s20615_s3 + $0x228] sm:$0xff] }
 0x44c   : > { %v5204_v40 = vadd.f32 %v5134_v58, %v18909_v56  ;;  %15165 = vmatprep.mubr.msk.f32.mxu1 %vm16804_vm4, %v16803_v0  ;;  %15228 = vmatprep.mubr.msk.f32.mxu0 %vm16804_vm4, %v16803_v0 }
 0x44d   : > { %v14882_v44 = vpop.f32.mrf.mxu1  ;;  %v14945_v41 = vpop.f32.mrf.mxu0 }
 0x44e   : > { %v19104_v6 = vadd.f32 %v5394_v23, %v5204_v40  ;;  %v6577_v44 = vld [vmem:[#allocation2 + $0x80] ss:$2 sm:$0xff]  ;;  %v6837_v41 = vld [vmem:[#allocation2 + $0x81] ss:$2 sm:$0xff] }
 0x44f   : > { %v5139_v5 = vpop.f32.mrf.mxu1  ;;  %v5399_v51 = vpop.f32.mrf.mxu0  ;;  %15166 = vmatmul.mubr.msk.f32.gmra.mxu1 %vm1040_vm0, %v6068_v46  ;;  %15229 = vmatmul.mubr.msk.f32.gmra.mxu0 %vm1040_vm0, %v6331_v3 }
 0x450   : > { %v5205_v56 = vadd.f32 %v5139_v5, %v18918_v8  ;;  %15168 = vmatprep.mubr.msk.f32.mxu1 %vm16804_vm4, %v16803_v0  ;;  %15231 = vmatprep.mubr.msk.f32.mxu0 %vm16804_vm4, %v16803_v0 }
 0x451   : > { %v14885_v50 = vpop.f32.mrf.mxu1  ;;  %v14948_v36 = vpop.f32.mrf.mxu0 }
 0x452   : > { %v19113_v18 = vadd.f32 %v5399_v51, %v5205_v56  ;;  %v6578_v50 = vld [vmem:[#allocation2 + $0x90] ss:$2 sm:$0xff]  ;;  %v6838_v36 = vld [vmem:[#allocation2 + $0x91] ss:$2 sm:$0xff] }
 0x453   : > { %v5144_v42 = vpop.f32.mrf.mxu1  ;;  %v5404_v26 = vpop.f32.mrf.mxu0  ;;  %15169 = vmatmul.mubr.msk.f32.gmra.mxu1 %vm1040_vm0, %v6070_v57  ;;  %15232 = vmatmul.mubr.msk.f32.gmra.mxu0 %vm1040_vm0, %v6333_v59 }
 0x454   : > { %v5206_v8 = vadd.f32 %v5144_v42, %v18930_v4  ;;  %15240 = vmatprep.mubr.msk.f32.mxu1 %vm16804_vm4, %v16803_v0  ;;  %15303 = vmatprep.mubr.msk.f32.mxu0 %vm16804_vm4, %v16803_v0  ;;  %v12772_v4 = vld [vmem:[%s20615_s3 + $0x218] sm:$0xff] }
 0x455   : > { %v14888_v19 = vpop.f32.mrf.mxu1  ;;  %v14951_v1 = vpop.f32.mrf.mxu0 }
 0x456   : > { %v19125_v49 = vadd.f32 %v5404_v26, %v5206_v8  ;;  %v6579_v19 = vld [vmem:[#allocation2 + $0xa0] ss:$2 sm:$0xff]  ;;  %v6839_v1 = vld [vmem:[#allocation2 + $0xa1] ss:$2 sm:$0xff] }
 0x457   : > { %v5149_v13 = vpop.f32.mrf.mxu1  ;;  %v5409_v63 = vpop.f32.mrf.mxu0  ;;  %15241 = vmatmul.mubr.msk.f32.vlgmr.msra.gmra.mxu1 %vm1040_vm0, %v6574_v7  ;;  %15304 = vmatmul.mubr.msk.f32.vlgmr.msra.gmra.mxu0 %vm1040_vm0, %v6834_v31 }
 0x458   : > { %v5207_v16 = vadd.f32 %v5149_v13, %v18946_v11  ;;  %15361 = vmatpush3.msra.mxu1 %v12773_v2  ;;  %15243 = vmatprep.mubr.msk.f32.mxu1 %vm16804_vm4, %v16803_v0  ;;  %v12771_v11 = vld [vmem:[%s20615_s3 + $0x210] sm:$0xff] }
 0x459   : > { %v14891_v15 = vpop.f32.mrf.mxu1  ;;  %v14954_v33 = vpop.f32.mrf.mxu0  ;;  %15306 = vmatprep.mubr.msk.f32.mxu0 %vm16804_vm4, %v16803_v0  ;;  %15362 = vmatprep.subr.mxu1 %v16803_v0 }
 0x45a   : > { %v19141_v61 = vadd.f32 %v5409_v63, %v5207_v16  ;;  %15363 = vmatpush3.msra.mxu1 %v12772_v4  ;;  %15424 = vmatpush3.msra.mxu0 %v12795_v10  ;;  %v6580_v4 = vld [vmem:[#allocation2 + $0xb0] ss:$2 sm:$0xff]  ;;  %v6840_v10 = vld [vmem:[#allocation2 + $0xb1] ss:$2 sm:$0xff] }
 0x45b   : > { %v5154_v47 = vpop.f32.mrf.mxu1  ;;  %v5414_v25 = vpop.f32.mrf.mxu0  ;;  %15244 = vmatmul.mubr.msk.f32.gmra.mxu1 %vm1040_vm0, %v6575_v20  ;;  %15307 = vmatmul.mubr.msk.f32.gmra.mxu0 %vm1040_vm0, %v6835_v38 }
 0x45c   : > { %v5208_v60 = vadd.f32 %v5154_v47, %v18963_v37  ;;  %15246 = vmatprep.mubr.msk.f32.mxu1 %vm16804_vm4, %v16803_v0  ;;  %15309 = vmatprep.mubr.msk.f32.mxu0 %vm16804_vm4, %v16803_v0  ;;  %v6581_v47 = vld [vmem:[#allocation2 + $0xc0] ss:$2 sm:$0xff] }
 0x45d   : > { %v14894_v32 = vpop.f32.mrf.mxu1  ;;  %v14957_v28 = vpop.f32.mrf.mxu0  ;;  %15364 = vmatprep.subr.mxu1 %v16803_v0  ;;  %15425 = vmatprep.subr.mxu0 %v16803_v0 }
 0x45e   : > { %v19158_v48 = vadd.f32 %v5414_v25, %v5208_v60  ;;  %15365 = vmatpush3.msra.mxu1 %v12771_v11  ;;  %15426 = vmatpush3.msra.mxu0 %v12794_v24  ;;  %v6841_v25 = vld [vmem:[#allocation2 + $0xc1] ss:$2 sm:$0xff] }
 0x45f   : > { %v5159_v34 = vpop.f32.mrf.mxu1  ;;  %v5419_v37 = vpop.f32.mrf.mxu0  ;;  %15247 = vmatmul.mubr.msk.f32.gmra.mxu1 %vm1040_vm0, %v6576_v12  ;;  %15310 = vmatmul.mubr.msk.f32.gmra.mxu0 %vm1040_vm0, %v6836_v35  ;;  %v6582_v12 = vld [vmem:[#allocation2 + $0xd0] ss:$2 sm:$0xff]  ;;  %v6842_v35 = vld [vmem:[#allocation2 + $0xd1] ss:$2 sm:$0xff] }
 0x460   : > { %v5209_v39 = vadd.f32 %v5159_v34, %v18977_v29  ;;  %15249 = vmatprep.mubr.msk.f32.mxu1 %vm16804_vm4, %v16803_v0  ;;  %15312 = vmatprep.mubr.msk.f32.mxu0 %vm16804_vm4, %v16803_v0 }
 0x461   : > { %v14897_v58 = vpop.f32.mrf.mxu1  ;;  %v14960_v23 = vpop.f32.mrf.mxu0  ;;  %15427 = vmatprep.subr.mxu0 %v16803_v0  ;;  %15486 = vmatprep.subr.mxu1 %v16803_v0 }
 0x462   : > { %v19172_v40 = vadd.f32 %v5419_v37, %v5209_v39  ;;  %15428 = vmatpush3.msra.mxu0 %v12793_v53  ;;  %v6583_v23 = vld [vmem:[#allocation2 + $0xe0] ss:$2 sm:$0xff] }
 0x463   : > { %v5164_v46 = vpop.f32.mrf.mxu1  ;;  %v5424_v3 = vpop.f32.mrf.mxu0  ;;  %15250 = vmatmul.mubr.msk.f32.gmra.mxu1 %vm1040_vm0, %v6577_v44  ;;  %15313 = vmatmul.mubr.msk.f32.gmra.mxu0 %vm1040_vm0, %v6837_v41  ;;  %v6843_v44 = vld [vmem:[#allocation2 + $0xe1] ss:$2 sm:$0xff] }
 0x464   : > { %v5210_v29 = vadd.f32 %v5164_v46, %v18987_v54  ;;  %15252 = vmatprep.mubr.msk.f32.mxu1 %vm16804_vm4, %v16803_v0  ;;  %15315 = vmatprep.mubr.msk.f32.mxu0 %vm16804_vm4, %v16803_v0 }
 0x465   : > { %v14900_v5 = vpop.f32.mrf.mxu1  ;;  %v14963_v51 = vpop.f32.mrf.mxu0  ;;  %15549 = vmatprep.subr.mxu0 %v16803_v0 }
 0x466   : > { %v19182_v56 = vadd.f32 %v5424_v3, %v5210_v29  ;;  %v6584_v51 = vld [vmem:[#allocation2 + $0xf0] ss:$2 sm:$0xff] }
 0x467   : > { %v5169_v57 = vpop.f32.mrf.mxu1  ;;  %v5429_v59 = vpop.f32.mrf.mxu0  ;;  %15253 = vmatmul.mubr.msk.f32.gmra.mxu1 %vm1040_vm0, %v6578_v50  ;;  %15316 = vmatmul.mubr.msk.f32.gmra.mxu0 %vm1040_vm0, %v6838_v36  ;;  %v6844_v50 = vld [vmem:[#allocation2 + $0xf1] ss:$2 sm:$0xff] }
 0x468   : > { %v5211_v54 = vadd.f32 %v5169_v57, %v18996_v9  ;;  %15255 = vmatprep.mubr.msk.f32.mxu1 %vm16804_vm4, %v16803_v0  ;;  %15318 = vmatprep.mubr.msk.f32.mxu0 %vm16804_vm4, %v16803_v0 }
 0x469   : > { %v14903_v42 = vpop.f32.mrf.mxu1  ;;  %v14966_v26 = vpop.f32.mrf.mxu0 }
 0x46a   : > { %v19191_v8 = vadd.f32 %v5429_v59, %v5211_v54  ;;  %v6585_v26 = vld [vmem:[#allocation2 + $0x100] ss:$2 sm:$0xff] }
 0x46b   : > { %v5174_v2 = vpop.f32.mrf.mxu1  ;;  %v5434_v7 = vpop.f32.mrf.mxu0  ;;  %15256 = vmatmul.mubr.msk.f32.gmra.mxu1 %vm1040_vm0, %v6579_v19  ;;  %15319 = vmatmul.mubr.msk.f32.gmra.mxu0 %vm1040_vm0, %v6839_v1  ;;  %v6845_v19 = vld [vmem:[#allocation2 + $0x101] ss:$2 sm:$0xff] }
 0x46c   : > { %v5212_v9 = vadd.f32 %v5174_v2, %v19005_v62  ;;  %15258 = vmatprep.mubr.msk.f32.mxu1 %vm16804_vm4, %v16803_v0  ;;  %15321 = vmatprep.mubr.msk.f32.mxu0 %vm16804_vm4, %v16803_v0 }
 0x46d   : > { %v14906_v31 = vpop.f32.mrf.mxu1  ;;  %v14969_v13 = vpop.f32.mrf.mxu0 }
 0x46e   : > { %v19200_v63 = vadd.f32 %v5434_v7, %v5212_v9  ;;  %v6586_v13 = vld [vmem:[#allocation2 + $0x110] ss:$2 sm:$0xff] }
 0x46f   : > { %v5179_v16 = vpop.f32.mrf.mxu1  ;;  %v5439_v15 = vpop.f32.mrf.mxu0  ;;  %15259 = vmatmul.mubr.msk.f32.gmra.mxu1 %vm1040_vm0, %v6580_v4  ;;  %15322 = vmatmul.mubr.msk.f32.gmra.mxu0 %vm1040_vm0, %v6840_v10  ;;  %v6846_v4 = vld [vmem:[#allocation2 + $0x111] ss:$2 sm:$0xff] }
 0x470   : > { %v5213_v62 = vadd.f32 %v5179_v16, %v19014_v27  ;;  %15261 = vmatprep.mubr.msk.f32.mxu1 %vm16804_vm4, %v16803_v0  ;;  %15324 = vmatprep.mubr.msk.f32.mxu0 %vm16804_vm4, %v16803_v0 }
 0x471   : > { %v14909_v33 = vpop.f32.mrf.mxu1  ;;  %v14972_v20 = vpop.f32.mrf.mxu0 }
 0x472   : > { %v19209_v38 = vadd.f32 %v5439_v15, %v5213_v62  ;;  %v6587_v20 = vld [vmem:[#allocation2 + $0x120] ss:$2 sm:$0xff] }
 0x473   : > { %v5184_v11 = vpop.f32.mrf.mxu1  ;;  %v5444_v24 = vpop.f32.mrf.mxu0  ;;  %15262 = vmatmul.mubr.msk.f32.gmra.mxu1 %vm1040_vm0, %v6581_v47  ;;  %15325 = vmatmul.mubr.msk.f32.gmra.mxu0 %vm1040_vm0, %v6841_v25  ;;  %v6847_v47 = vld [vmem:[#allocation2 + $0x121] ss:$2 sm:$0xff] }
 0x474   : > { %v5214_v27 = vadd.f32 %v5184_v11, %v19023_v17  ;;  %15264 = vmatprep.mubr.msk.f32.mxu1 %vm16804_vm4, %v16803_v0  ;;  %15327 = vmatprep.mubr.msk.f32.mxu0 %vm16804_vm4, %v16803_v0 }
 0x475   : > { %v14912_v60 = vpop.f32.mrf.mxu1  ;;  %v14975_v32 = vpop.f32.mrf.mxu0 }
 0x476   : > { %v19218_v28 = vadd.f32 %v5444_v24, %v5214_v27  ;;  %v6588_v32 = vld [vmem:[#allocation2 + $0x130] ss:$2 sm:$0xff] }
 0x477   : > { %v5189_v34 = vpop.f32.mrf.mxu1  ;;  %v5449_v37 = vpop.f32.mrf.mxu0  ;;  %15265 = vmatmul.mubr.msk.f32.gmra.mxu1 %vm1040_vm0, %v6582_v12  ;;  %15328 = vmatmul.mubr.msk.f32.gmra.mxu0 %vm1040_vm0, %v6842_v35  ;;  %v6849_v12 = vld [vmem:[#allocation2 + $0x131] ss:$2 sm:$0xff] }
 0x478   : > { %v5215_v17 = vadd.f32 %v5189_v34, %v19032_v45  ;;  %15267 = vmatprep.mubr.msk.f32.mxu1 %vm16804_vm4, %v16803_v0  ;;  %15330 = vmatprep.mubr.msk.f32.mxu0 %vm16804_vm4, %v16803_v0 }
 0x479   : > { %v14915_v53 = vpop.f32.mrf.mxu1  ;;  %v14978_v39 = vpop.f32.mrf.mxu0 }
 0x47a   : > { %v19227_v58 = vadd.f32 %v5449_v37, %v5215_v17  ;;  %v6589_v39 = vld [vmem:[#allocation2 + $0x140] ss:$2 sm:$0xff] }
 0x47b   : > { %v5194_v41 = vpop.f32.mrf.mxu1  ;;  %v5454_v46 = vpop.f32.mrf.mxu0  ;;  %15268 = vmatmul.mubr.msk.f32.gmra.mxu1 %vm1040_vm0, %v6583_v23  ;;  %15331 = vmatmul.mubr.msk.f32.gmra.mxu0 %vm1040_vm0, %v6843_v44  ;;  %v6851_v23 = vld [vmem:[#allocation2 + $0x141] ss:$2 sm:$0xff] }
 0x47c   : > { %v5216_v45 = vadd.f32 %v5194_v41, %v19041_v55  ;;  %15270 = vmatprep.mubr.msk.f32.mxu1 %vm16804_vm4, %v16803_v0  ;;  %15333 = vmatprep.mubr.msk.f32.mxu0 %vm16804_vm4, %v16803_v0 }
 0x47d   : > { %v14918_v3 = vpop.f32.mrf.mxu1  ;;  %v14981_v29 = vpop.f32.mrf.mxu0 }
 0x47e   : > { %v19236_v5 = vadd.f32 %v5454_v46, %v5216_v45  ;;  %v6590_v29 = vld [vmem:[#allocation2 + $0x150] ss:$2 sm:$0xff] }
 0x47f   : > { %v5642_v36 = vpop.f32.mrf.mxu1  ;;  %v5920_v57 = vpop.f32.mrf.mxu0  ;;  %15271 = vmatmul.mubr.msk.f32.gmra.mxu1 %vm1040_vm0, %v6584_v51  ;;  %15334 = vmatmul.mubr.msk.f32.gmra.mxu0 %vm1040_vm0, %v6844_v50  ;;  %v6853_v51 = vld [vmem:[#allocation2 + $0x151] ss:$2 sm:$0xff] }
 0x480   : > { %v5736_v55 = vadd.f32 %v5642_v36, %v19050_v43  ;;  %15273 = vmatprep.mubr.msk.f32.mxu1 %vm16804_vm4, %v16803_v0  ;;  %15336 = vmatprep.mubr.msk.f32.mxu0 %vm16804_vm4, %v16803_v0 }
 0x481   : > { %v14990_v59 = vpop.f32.mrf.mxu1  ;;  %v15053_v54 = vpop.f32.mrf.mxu0 }
 0x482   : > { %v19245_v42 = vadd.f32 %v5920_v57, %v5736_v55  ;;  %v6591_v54 = vld [vmem:[#allocation2 + $0x160] ss:$2 sm:$0xff] }
 0x483   : > { %v5647_v1 = vpop.f32.mrf.mxu1  ;;  %v5925_v2 = vpop.f32.mrf.mxu0  ;;  %15274 = vmatmul.mubr.msk.f32.gmra.mxu1 %vm1040_vm0, %v6585_v26  ;;  %15337 = vmatmul.mubr.msk.f32.gmra.mxu0 %vm1040_vm0, %v6845_v19  ;;  %v6855_v26 = vld [vmem:[#allocation2 + $0x161] ss:$2 sm:$0xff] }
 0x484   : > { %v5737_v43 = vadd.f32 %v5647_v1, %v19059_v14  ;;  %15276 = vmatprep.mubr.msk.f32.mxu1 %vm16804_vm4, %v16803_v0  ;;  %15339 = vmatprep.mubr.msk.f32.mxu0 %vm16804_vm4, %v16803_v0 }
 0x485   : > { %v14993_v7 = vpop.f32.mrf.mxu1  ;;  %v15056_v9 = vpop.f32.mrf.mxu0 }
 0x486   : > { %v19254_v31 = vadd.f32 %v5925_v2, %v5737_v43  ;;  %v6593_v2 = vld [vmem:[#allocation2 + $0x170] ss:$2 sm:$0xf]  ;;  %v6857_v43 = vld [vmem:[#allocation2 + $0x171] ss:$2 sm:$0xf] }
 0x487   : > { %v5652_v10 = vpop.f32.mrf.mxu1  ;;  %v5930_v16 = vpop.f32.mrf.mxu0  ;;  %15277 = vmatmul.mubr.msk.f32.gmra.mxu1 %vm1040_vm0, %v6586_v13  ;;  %15340 = vmatmul.mubr.msk.f32.gmra.mxu0 %vm1040_vm0, %v6846_v4 }
 0x488   : > { %v5738_v14 = vadd.f32 %v5652_v10, %v19068_v21  ;;  %15279 = vmatprep.mubr.msk.f32.mxu1 %vm16804_vm4, %v16803_v0  ;;  %15342 = vmatprep.mubr.msk.f32.mxu0 %vm16804_vm4, %v16803_v0 }
 0x489   : > { %v14996_v15 = vpop.f32.mrf.mxu1  ;;  %v15059_v62 = vpop.f32.mrf.mxu0 }
 0x48a   : > { %v19263_v33 = vadd.f32 %v5930_v16, %v5738_v14  ;;  %v12817_v15 = vld [vmem:[%s20615_s3 + $0x250] sm:$0xff] }
 0x48b   : > { %v5657_v25 = vpop.f32.mrf.mxu1  ;;  %v5935_v11 = vpop.f32.mrf.mxu0  ;;  %15280 = vmatmul.mubr.msk.f32.gmra.mxu1 %vm1040_vm0, %v6587_v20  ;;  %15343 = vmatmul.mubr.msk.f32.gmra.mxu0 %vm1040_vm0, %v6847_v47  ;;  %v7098_v20 = vld [vmem:[#allocation2 + $0x52] ss:$2 sm:$0xff]  ;;  %v7362_v47 = vld [vmem:[#allocation2 + $0x53] ss:$2 sm:$0xff] }
 0x48c   : > { %v5739_v21 = vadd.f32 %v5657_v25, %v19077_v30  ;;  %15282 = vmatprep.mubr.msk.f32.mxu1 %vm16804_vm4, %v16803_v0  ;;  %15345 = vmatprep.mubr.msk.f32.mxu0 %vm16804_vm4, %v16803_v0 }
 0x48d   : > { %v14999_v24 = vpop.f32.mrf.mxu1  ;;  %v15062_v27 = vpop.f32.mrf.mxu0 }
 0x48e   : > { %v19272_v60 = vadd.f32 %v5935_v11, %v5739_v21 }
 0x48f   : > { %v5662_v35 = vpop.f32.mrf.mxu1  ;;  %v5940_v34 = vpop.f32.mrf.mxu0  ;;  %15283 = vmatmul.mubr.msk.f32.gmra.mxu1 %vm1040_vm0, %v6588_v32  ;;  %15346 = vmatmul.mubr.msk.f32.gmra.mxu0 %vm1040_vm0, %v6849_v12  ;;  %v7099_v12 = vld [vmem:[#allocation2 + $0x62] ss:$2 sm:$0xff] }
 0x490   : > { %v5740_v30 = vadd.f32 %v5662_v35, %v19086_v22  ;;  %15285 = vmatprep.mubr.msk.f32.mxu1 %vm16804_vm4, %v16803_v0  ;;  %15348 = vmatprep.mubr.msk.f32.mxu0 %vm16804_vm4, %v16803_v0  ;;  %v7363_v35 = vld [vmem:[#allocation2 + $0x63] ss:$2 sm:$0xff] }
 0x491   : > { %v15002_v37 = vpop.f32.mrf.mxu1  ;;  %v15065_v17 = vpop.f32.mrf.mxu0 }
 0x492   : > { %v19281_v53 = vadd.f32 %v5940_v34, %v5740_v30 }
 0x493   : > { %v5667_v44 = vpop.f32.mrf.mxu1  ;;  %v5945_v41 = vpop.f32.mrf.mxu0  ;;  %15286 = vmatmul.mubr.msk.f32.gmra.mxu1 %vm1040_vm0, %v6589_v39  ;;  %15349 = vmatmul.mubr.msk.f32.gmra.mxu0 %vm1040_vm0, %v6851_v23 }
 0x494   : > { %v5741_v22 = vadd.f32 %v5667_v44, %v19095_v52  ;;  %15288 = vmatprep.mubr.msk.f32.mxu1 %vm16804_vm4, %v16803_v0  ;;  %15351 = vmatprep.mubr.msk.f32.mxu0 %vm16804_vm4, %v16803_v0  ;;  %v7100_v44 = vld [vmem:[#allocation2 + $0x72] ss:$2 sm:$0xff] }
 0x495   : > { %v15005_v46 = vpop.f32.mrf.mxu1  ;;  %v15068_v45 = vpop.f32.mrf.mxu0 }
 0x496   : > { %v19290_v3 = vadd.f32 %v5945_v41, %v5741_v22  ;;  %v7364_v41 = vld [vmem:[#allocation2 + $0x73] ss:$2 sm:$0xff] }
 0x497   : > { %v5672_v50 = vpop.f32.mrf.mxu1  ;;  %v5950_v36 = vpop.f32.mrf.mxu0  ;;  %15289 = vmatmul.mubr.msk.f32.gmra.mxu1 %vm1040_vm0, %v6590_v29  ;;  %15352 = vmatmul.mubr.msk.f32.gmra.mxu0 %vm1040_vm0, %v6853_v51 }
 0x498   : > { %v5742_v52 = vadd.f32 %v5672_v50, %v19104_v6  ;;  %15291 = vmatprep.mubr.msk.f32.mxu1 %vm16804_vm4, %v16803_v0  ;;  %15354 = vmatprep.mubr.msk.f32.mxu0 %vm16804_vm4, %v16803_v0  ;;  %v7101_v50 = vld [vmem:[#allocation2 + $0x82] ss:$2 sm:$0xff] }
 0x499   : > { %v15008_v57 = vpop.f32.mrf.mxu1  ;;  %v15071_v55 = vpop.f32.mrf.mxu0 }
 0x49a   : > { %v19299_v59 = vadd.f32 %v5950_v36, %v5742_v52  ;;  %v7365_v36 = vld [vmem:[#allocation2 + $0x83] ss:$2 sm:$0xff] }
 0x49b   : > { %v5677_v19 = vpop.f32.mrf.mxu1  ;;  %v5955_v1 = vpop.f32.mrf.mxu0  ;;  %15292 = vmatmul.mubr.msk.f32.gmra.mxu1 %vm1040_vm0, %v6591_v54  ;;  %15355 = vmatmul.mubr.msk.f32.gmra.mxu0 %vm1040_vm0, %v6855_v26 }
 0x49c   : > { %v5743_v6 = vadd.f32 %v5677_v19, %v19113_v18  ;;  %15294 = vmatprep.mubr.msk.f32.mxu1 %vm16804_vm4, %v16803_v0  ;;  %15357 = vmatprep.mubr.msk.f32.mxu0 %vm16804_vm4, %v16803_v0  ;;  %v7102_v19 = vld [vmem:[#allocation2 + $0x92] ss:$2 sm:$0xff] }
 0x49d   : > { %v15011_v7 = vpop.f32.mrf.mxu1  ;;  %v15074_v9 = vpop.f32.mrf.mxu0 }
 0x49e   : > { %v19308_v13 = vadd.f32 %v5955_v1, %v5743_v6  ;;  %v7366_v1 = vld [vmem:[#allocation2 + $0x93] ss:$2 sm:$0xff] }
 0x49f   : > { %v5682_v4 = vpop.f32.mrf.mxu1  ;;  %v5960_v10 = vpop.f32.mrf.mxu0  ;;  %15295 = vmatmul.mubr.msk.f32.gmra.mxu1 %vm1040_vm0, %v6593_v2  ;;  %15358 = vmatmul.mubr.msk.f32.gmra.mxu0 %vm1040_vm0, %v6857_v43 }
 0x4a0   : > { %v5744_v18 = vadd.f32 %v5682_v4, %v19125_v49  ;;  %15366 = vmatprep.mubr.msk.f32.mxu1 %vm16804_vm4, %v16803_v0  ;;  %15429 = vmatprep.mubr.msk.f32.mxu0 %vm16804_vm4, %v16803_v0  ;;  %v12816_v49 = vld [vmem:[%s20615_s3 + $0x248] sm:$0xff] }
 0x4a1   : > { %v15014_v16 = vpop.f32.mrf.mxu1  ;;  %v15077_v14 = vpop.f32.mrf.mxu0  ;;  %v7103_v4 = vld [vmem:[#allocation2 + $0xa2] ss:$2 sm:$0xff] }
 0x4a2   : > { %v19320_v62 = vadd.f32 %v5960_v10, %v5744_v18  ;;  %v7367_v10 = vld [vmem:[#allocation2 + $0xa3] ss:$2 sm:$0xff] }
 0x4a3   : > { %v5687_v25 = vpop.f32.mrf.mxu1  ;;  %v5965_v11 = vpop.f32.mrf.mxu0  ;;  %15367 = vmatmul.mubr.msk.f32.vlgmr.msra.gmra.mxu1 %vm1040_vm0, %v7098_v20  ;;  %15430 = vmatmul.mubr.msk.f32.vlgmr.msra.gmra.mxu0 %vm1040_vm0, %v7362_v47  ;;  %v7104_v47 = vld [vmem:[#allocation2 + $0xb2] ss:$2 sm:$0xff] }
 0x4a4   : > { %v5745_v21 = vadd.f32 %v5687_v25, %v19141_v61  ;;  %15487 = vmatpush3.msra.mxu1 %v12817_v15  ;;  %15369 = vmatprep.mubr.msk.f32.mxu1 %vm16804_vm4, %v16803_v0  ;;  %v12815_v61 = vld [vmem:[%s20615_s3 + $0x240] sm:$0xff] }
 0x4a5   : > { %v15017_v24 = vpop.f32.mrf.mxu1  ;;  %v15080_v27 = vpop.f32.mrf.mxu0  ;;  %15432 = vmatprep.mubr.msk.f32.mxu0 %vm16804_vm4, %v16803_v0  ;;  %15488 = vmatprep.subr.mxu1 %v16803_v0  ;;  %v7368_v25 = vld [vmem:[#allocation2 + $0xb3] ss:$2 sm:$0xff] }
 0x4a6   : > { %v19333_v32 = vadd.f32 %v5965_v11, %v5745_v21  ;;  %15489 = vmatpush3.msra.mxu1 %v12816_v49 }
 0x4a7   : > { %v5692_v34 = vpop.f32.mrf.mxu1  ;;  %v5970_v30 = vpop.f32.mrf.mxu0  ;;  %15370 = vmatmul.mubr.msk.f32.gmra.mxu1 %vm1040_vm0, %v7099_v12  ;;  %15433 = vmatmul.mubr.msk.f32.gmra.mxu0 %vm1040_vm0, %v7363_v35  ;;  %v7105_v12 = vld [vmem:[#allocation2 + $0xc2] ss:$2 sm:$0xff]  ;;  %v7369_v35 = vld [vmem:[#allocation2 + $0xc3] ss:$2 sm:$0xff] }
 0x4a8   : > { %v5746_v37 = vadd.f32 %v5692_v34, %v19158_v48  ;;  %15372 = vmatprep.mubr.msk.f32.mxu1 %vm16804_vm4, %v16803_v0  ;;  %15435 = vmatprep.mubr.msk.f32.mxu0 %vm16804_vm4, %v16803_v0 }
 0x4a9   : > { %v15020_v17 = vpop.f32.mrf.mxu1  ;;  %v15083_v39 = vpop.f32.mrf.mxu0  ;;  %15490 = vmatprep.subr.mxu1 %v16803_v0 }
 0x4aa   : > { %v19346_v23 = vadd.f32 %v5970_v30, %v5746_v37  ;;  %15491 = vmatpush3.msra.mxu1 %v12815_v61  ;;  %v7106_v39 = vld [vmem:[#allocation2 + $0xd2] ss:$2 sm:$0xff] }
 0x4ab   : > { %v5697_v22 = vpop.f32.mrf.mxu1  ;;  %v5975_v46 = vpop.f32.mrf.mxu0  ;;  %15373 = vmatmul.mubr.msk.f32.gmra.mxu1 %vm1040_vm0, %v7100_v44  ;;  %15436 = vmatmul.mubr.msk.f32.gmra.mxu0 %vm1040_vm0, %v7364_v41  ;;  %v7370_v44 = vld [vmem:[#allocation2 + $0xd3] ss:$2 sm:$0xff] }
 0x4ac   : > { %v5747_v48 = vadd.f32 %v5697_v22, %v19172_v40  ;;  %15375 = vmatprep.mubr.msk.f32.mxu1 %vm16804_vm4, %v16803_v0  ;;  %15438 = vmatprep.mubr.msk.f32.mxu0 %vm16804_vm4, %v16803_v0 }
 0x4ad   : > { %v15023_v45 = vpop.f32.mrf.mxu1  ;;  %v15086_v29 = vpop.f32.mrf.mxu0  ;;  %15612 = vmatprep.subr.mxu1 %v16803_v0 }
 0x4ae   : > { %v19356_v51 = vadd.f32 %v5975_v46, %v5747_v48  ;;  %v7107_v29 = vld [vmem:[#allocation2 + $0xe2] ss:$2 sm:$0xff] }
 0x4af   : > { %v5702_v52 = vpop.f32.mrf.mxu1  ;;  %v5980_v57 = vpop.f32.mrf.mxu0  ;;  %15376 = vmatmul.mubr.msk.f32.gmra.mxu1 %vm1040_vm0, %v7101_v50  ;;  %15439 = vmatmul.mubr.msk.f32.gmra.mxu0 %vm1040_vm0, %v7365_v36  ;;  %v7371_v50 = vld [vmem:[#allocation2 + $0xe3] ss:$2 sm:$0xff] }
 0x4b0   : > { %v5748_v40 = vadd.f32 %v5702_v52, %v19182_v56  ;;  %15378 = vmatprep.mubr.msk.f32.mxu1 %vm16804_vm4, %v16803_v0  ;;  %15441 = vmatprep.mubr.msk.f32.mxu0 %vm16804_vm4, %v16803_v0 }
 0x4b1   : > { %v15026_v55 = vpop.f32.mrf.mxu1  ;;  %v15089_v54 = vpop.f32.mrf.mxu0 }
 0x4b2   : > { %v19365_v26 = vadd.f32 %v5980_v57, %v5748_v40  ;;  %v7108_v54 = vld [vmem:[#allocation2 + $0xf2] ss:$2 sm:$0xff] }
 0x4b3   : > { %v5707_v6 = vpop.f32.mrf.mxu1  ;;  %v5985_v2 = vpop.f32.mrf.mxu0  ;;  %15379 = vmatmul.mubr.msk.f32.gmra.mxu1 %vm1040_vm0, %v7102_v19  ;;  %15442 = vmatmul.mubr.msk.f32.gmra.mxu0 %vm1040_vm0, %v7366_v1  ;;  %v7372_v19 = vld [vmem:[#allocation2 + $0xf3] ss:$2 sm:$0xff] }
 0x4b4   : > { %v5749_v56 = vadd.f32 %v5707_v6, %v19191_v8  ;;  %15381 = vmatprep.mubr.msk.f32.mxu1 %vm16804_vm4, %v16803_v0  ;;  %15444 = vmatprep.mubr.msk.f32.mxu0 %vm16804_vm4, %v16803_v0 }
 0x4b5   : > { %v15029_v43 = vpop.f32.mrf.mxu1  ;;  %v15092_v7 = vpop.f32.mrf.mxu0 }
 0x4b6   : > { %v19374_v9 = vadd.f32 %v5985_v2, %v5749_v56  ;;  %v7109_v7 = vld [vmem:[#allocation2 + $0x102] ss:$2 sm:$0xff] }
 0x4b7   : > { %v5712_v18 = vpop.f32.mrf.mxu1  ;;  %v5990_v16 = vpop.f32.mrf.mxu0  ;;  %15382 = vmatmul.mubr.msk.f32.gmra.mxu1 %vm1040_vm0, %v7103_v4  ;;  %15445 = vmatmul.mubr.msk.f32.gmra.mxu0 %vm1040_vm0, %v7367_v10  ;;  %v7373_v4 = vld [vmem:[#allocation2 + $0x103] ss:$2 sm:$0xff] }
 0x4b8   : > { %v5750_v8 = vadd.f32 %v5712_v18, %v19200_v63  ;;  %15384 = vmatprep.mubr.msk.f32.mxu1 %vm16804_vm4, %v16803_v0  ;;  %15447 = vmatprep.mubr.msk.f32.mxu0 %vm16804_vm4, %v16803_v0 }
 0x4b9   : > { %v15032_v14 = vpop.f32.mrf.mxu1  ;;  %v15095_v15 = vpop.f32.mrf.mxu0 }
 0x4ba   : > { %v19383_v20 = vadd.f32 %v5990_v16, %v5750_v8  ;;  %v7110_v15 = vld [vmem:[#allocation2 + $0x112] ss:$2 sm:$0xff] }
 0x4bb   : > { %v5717_v11 = vpop.f32.mrf.mxu1  ;;  %v5995_v49 = vpop.f32.mrf.mxu0  ;;  %15385 = vmatmul.mubr.msk.f32.gmra.mxu1 %vm1040_vm0, %v7104_v47  ;;  %15448 = vmatmul.mubr.msk.f32.gmra.mxu0 %vm1040_vm0, %v7368_v25  ;;  %v7374_v47 = vld [vmem:[#allocation2 + $0x113] ss:$2 sm:$0xff] }
 0x4bc   : > { %v5751_v63 = vadd.f32 %v5717_v11, %v19209_v38  ;;  %15387 = vmatprep.mubr.msk.f32.mxu1 %vm16804_vm4, %v16803_v0  ;;  %15450 = vmatprep.mubr.msk.f32.mxu0 %vm16804_vm4, %v16803_v0 }
 0x4bd   : > { %v15035_v21 = vpop.f32.mrf.mxu1  ;;  %v15098_v24 = vpop.f32.mrf.mxu0 }
 0x4be   : > { %v19392_v27 = vadd.f32 %v5995_v49, %v5751_v63  ;;  %v7111_v24 = vld [vmem:[#allocation2 + $0x122] ss:$2 sm:$0xff] }
 0x4bf   : > { %v5722_v34 = vpop.f32.mrf.mxu1  ;;  %v6000_v30 = vpop.f32.mrf.mxu0  ;;  %15388 = vmatmul.mubr.msk.f32.gmra.mxu1 %vm1040_vm0, %v7105_v12  ;;  %15451 = vmatmul.mubr.msk.f32.gmra.mxu0 %vm1040_vm0, %v7369_v35  ;;  %v7375_v12 = vld [vmem:[#allocation2 + $0x123] ss:$2 sm:$0xff] }
 0x4c0   : > { %v5752_v38 = vadd.f32 %v5722_v34, %v19218_v28  ;;  %15390 = vmatprep.mubr.msk.f32.mxu1 %vm16804_vm4, %v16803_v0  ;;  %15453 = vmatprep.mubr.msk.f32.mxu0 %vm16804_vm4, %v16803_v0 }
 0x4c1   : > { %v15038_v61 = vpop.f32.mrf.mxu1  ;;  %v15101_v37 = vpop.f32.mrf.mxu0 }
 0x4c2   : > { %v19401_v17 = vadd.f32 %v6000_v30, %v5752_v38  ;;  %v7113_v37 = vld [vmem:[#allocation2 + $0x132] ss:$2 sm:$0xff] }
 0x4c3   : > { %v5727_v41 = vpop.f32.mrf.mxu1  ;;  %v6005_v22 = vpop.f32.mrf.mxu0  ;;  %15391 = vmatmul.mubr.msk.f32.gmra.mxu1 %vm1040_vm0, %v7106_v39  ;;  %15454 = vmatmul.mubr.msk.f32.gmra.mxu0 %vm1040_vm0, %v7370_v44  ;;  %v7377_v39 = vld [vmem:[#allocation2 + $0x133] ss:$2 sm:$0xff] }
 0x4c4   : > { %v5753_v28 = vadd.f32 %v5727_v41, %v19227_v58  ;;  %15393 = vmatprep.mubr.msk.f32.mxu1 %vm16804_vm4, %v16803_v0  ;;  %15456 = vmatprep.mubr.msk.f32.mxu0 %vm16804_vm4, %v16803_v0 }
 0x4c5   : > { %v15041_v46 = vpop.f32.mrf.mxu1  ;;  %v15104_v48 = vpop.f32.mrf.mxu0 }
 0x4c6   : > { %v19410_v45 = vadd.f32 %v6005_v22, %v5753_v28  ;;  %v7115_v48 = vld [vmem:[#allocation2 + $0x142] ss:$2 sm:$0xff] }
 0x4c7   : > { %v5732_v36 = vpop.f32.mrf.mxu1  ;;  %v6010_v52 = vpop.f32.mrf.mxu0  ;;  %15394 = vmatmul.mubr.msk.f32.gmra.mxu1 %vm1040_vm0, %v7107_v29  ;;  %15457 = vmatmul.mubr.msk.f32.gmra.mxu0 %vm1040_vm0, %v7371_v50  ;;  %v7379_v29 = vld [vmem:[#allocation2 + $0x143] ss:$2 sm:$0xff] }
 0x4c8   : > { %v5754_v58 = vadd.f32 %v5732_v36, %v19236_v5  ;;  %15396 = vmatprep.mubr.msk.f32.mxu1 %vm16804_vm4, %v16803_v0  ;;  %15459 = vmatprep.mubr.msk.f32.mxu0 %vm16804_vm4, %v16803_v0 }
 0x4c9   : > { %v15044_v57 = vpop.f32.mrf.mxu1  ;;  %v15107_v40 = vpop.f32.mrf.mxu0 }
 0x4ca   : > { %v19419_v55 = vadd.f32 %v6010_v52, %v5754_v58  ;;  %v7117_v40 = vld [vmem:[#allocation2 + $0x152] ss:$2 sm:$0xff] }
 0x4cb   : > { %v6198_v1 = vpop.f32.mrf.mxu1  ;;  %v6461_v6 = vpop.f32.mrf.mxu0  ;;  %15397 = vmatmul.mubr.msk.f32.gmra.mxu1 %vm1040_vm0, %v7108_v54  ;;  %15460 = vmatmul.mubr.msk.f32.gmra.mxu0 %vm1040_vm0, %v7372_v19  ;;  %v7381_v54 = vld [vmem:[#allocation2 + $0x153] ss:$2 sm:$0xff] }
 0x4cc   : > { %v6292_v5 = vadd.f32 %v6198_v1, %v19245_v42  ;;  %15399 = vmatprep.mubr.msk.f32.mxu1 %vm16804_vm4, %v16803_v0  ;;  %15462 = vmatprep.mubr.msk.f32.mxu0 %vm16804_vm4, %v16803_v0 }
 0x4cd   : > { %v15116_v2 = vpop.f32.mrf.mxu1  ;;  %v15179_v56 = vpop.f32.mrf.mxu0 }
 0x4ce   : > { %v19428_v43 = vadd.f32 %v6461_v6, %v6292_v5  ;;  %v7119_v56 = vld [vmem:[#allocation2 + $0x162] ss:$2 sm:$0xff] }
 0x4cf   : > { %v6203_v10 = vpop.f32.mrf.mxu1  ;;  %v6466_v18 = vpop.f32.mrf.mxu0  ;;  %15400 = vmatmul.mubr.msk.f32.gmra.mxu1 %vm1040_vm0, %v7109_v7  ;;  %15463 = vmatmul.mubr.msk.f32.gmra.mxu0 %vm1040_vm0, %v7373_v4  ;;  %v7383_v7 = vld [vmem:[#allocation2 + $0x163] ss:$2 sm:$0xff] }
 0x4d0   : > { %v6293_v42 = vadd.f32 %v6203_v10, %v19254_v31  ;;  %15402 = vmatprep.mubr.msk.f32.mxu1 %vm16804_vm4, %v16803_v0  ;;  %15465 = vmatprep.mubr.msk.f32.mxu0 %vm16804_vm4, %v16803_v0 }
 0x4d1   : > { %v15119_v16 = vpop.f32.mrf.mxu1  ;;  %v15182_v8 = vpop.f32.mrf.mxu0 }
 0x4d2   : > { %v19437_v14 = vadd.f32 %v6466_v18, %v6293_v42  ;;  %v7121_v18 = vld [vmem:[#allocation2 + $0x172] ss:$2 sm:$0xf]  ;;  %v7385_v42 = vld [vmem:[#allocation2 + $0x173] ss:$2 sm:$0xf] }
 0x4d3   : > { %v6208_v25 = vpop.f32.mrf.mxu1  ;;  %v6471_v11 = vpop.f32.mrf.mxu0  ;;  %15403 = vmatmul.mubr.msk.f32.gmra.mxu1 %vm1040_vm0, %v7110_v15  ;;  %15466 = vmatmul.mubr.msk.f32.gmra.mxu0 %vm1040_vm0, %v7374_v47 }
 0x4d4   : > { %v6294_v31 = vadd.f32 %v6208_v25, %v19263_v33  ;;  %15405 = vmatprep.mubr.msk.f32.mxu1 %vm16804_vm4, %v16803_v0  ;;  %15468 = vmatprep.mubr.msk.f32.mxu0 %vm16804_vm4, %v16803_v0 }
 0x4d5   : > { %v15122_v49 = vpop.f32.mrf.mxu1  ;;  %v15185_v63 = vpop.f32.mrf.mxu0 }
 0x4d6   : > { %v19446_v21 = vadd.f32 %v6471_v11, %v6294_v31  ;;  %v7626_v63 = vld [vmem:[#allocation2 + $0x54] ss:$2 sm:$0xff] }
 0x4d7   : > { %v6213_v35 = vpop.f32.mrf.mxu1  ;;  %v6476_v34 = vpop.f32.mrf.mxu0  ;;  %15406 = vmatmul.mubr.msk.f32.gmra.mxu1 %vm1040_vm0, %v7111_v24  ;;  %15469 = vmatmul.mubr.msk.f32.gmra.mxu0 %vm1040_vm0, %v7375_v12  ;;  %v7955_v24 = vld [vmem:[#allocation9 + $0x10] sm:$0xff] }
 0x4d8   : > { %v6295_v33 = vadd.f32 %v6213_v35, %v19272_v60  ;;  %15408 = vmatprep.mubr.msk.f32.mxu1 %vm16804_vm4, %v16803_v0  ;;  %15471 = vmatprep.mubr.msk.f32.mxu0 %vm16804_vm4, %v16803_v0 }
 0x4d9   : > { %v15125_v30 = vpop.f32.mrf.mxu1  ;;  %v15188_v38 = vpop.f32.mrf.mxu0  ;;  %15550 = vmatpush3.msra.mxu0 %v7955_v24  ;;  %v7633_v24 = vld [vmem:[#allocation2 + $0xc4] ss:$2 sm:$0xff] }
 0x4da   : > { %v19455_v61 = vadd.f32 %v6476_v34, %v6295_v33  ;;  %15551 = vmatprep.subr.mxu0 %v16803_v0  ;;  %v7627_v38 = vld [vmem:[#allocation2 + $0x64] ss:$2 sm:$0xff] }
 0x4db   : > { %v6218_v44 = vpop.f32.mrf.mxu1  ;;  %v6481_v41 = vpop.f32.mrf.mxu0  ;;  %15409 = vmatmul.mubr.msk.f32.gmra.mxu1 %vm1040_vm0, %v7113_v37  ;;  %15472 = vmatmul.mubr.msk.f32.gmra.mxu0 %vm1040_vm0, %v7377_v39 }
 0x4dc   : > { %v6296_v60 = vadd.f32 %v6218_v44, %v19281_v53  ;;  %15411 = vmatprep.mubr.msk.f32.mxu1 %vm16804_vm4, %v16803_v0  ;;  %15474 = vmatprep.mubr.msk.f32.mxu0 %vm16804_vm4, %v16803_v0 }
 0x4dd   : > { %v15128_v22 = vpop.f32.mrf.mxu1  ;;  %v15191_v28 = vpop.f32.mrf.mxu0 }
 0x4de   : > { %v19464_v46 = vadd.f32 %v6481_v41, %v6296_v60  ;;  %v7628_v22 = vld [vmem:[#allocation2 + $0x74] ss:$2 sm:$0xff] }
 0x4df   : > { %v6223_v50 = vpop.f32.mrf.mxu1  ;;  %v6486_v36 = vpop.f32.mrf.mxu0  ;;  %15412 = vmatmul.mubr.msk.f32.gmra.mxu1 %vm1040_vm0, %v7115_v48  ;;  %15475 = vmatmul.mubr.msk.f32.gmra.mxu0 %vm1040_vm0, %v7379_v29 }
 0x4e0   : > { %v6297_v53 = vadd.f32 %v6223_v50, %v19290_v3  ;;  %15414 = vmatprep.mubr.msk.f32.mxu1 %vm16804_vm4, %v16803_v0  ;;  %15477 = vmatprep.mubr.msk.f32.mxu0 %vm16804_vm4, %v16803_v0 }
 0x4e1   : > { %v15131_v52 = vpop.f32.mrf.mxu1  ;;  %v15194_v58 = vpop.f32.mrf.mxu0 }
 0x4e2   : > { %v19473_v57 = vadd.f32 %v6486_v36, %v6297_v53  ;;  %v7629_v53 = vld [vmem:[#allocation2 + $0x84] ss:$2 sm:$0xff] }
 0x4e3   : > { %v6228_v19 = vpop.f32.mrf.mxu1  ;;  %v6491_v1 = vpop.f32.mrf.mxu0  ;;  %15415 = vmatmul.mubr.msk.f32.gmra.mxu1 %vm1040_vm0, %v7117_v40  ;;  %15478 = vmatmul.mubr.msk.f32.gmra.mxu0 %vm1040_vm0, %v7381_v54 }
 0x4e4   : > { %v6298_v3 = vadd.f32 %v6228_v19, %v19299_v59  ;;  %15417 = vmatprep.mubr.msk.f32.mxu1 %vm16804_vm4, %v16803_v0  ;;  %15480 = vmatprep.mubr.msk.f32.mxu0 %vm16804_vm4, %v16803_v0 }
 0x4e5   : > { %v15134_v6 = vpop.f32.mrf.mxu1  ;;  %v15197_v5 = vpop.f32.mrf.mxu0 }
 0x4e6   : > { %v19482_v2 = vadd.f32 %v6491_v1, %v6298_v3  ;;  %v7630_v1 = vld [vmem:[#allocation2 + $0x94] ss:$2 sm:$0xff] }
 0x4e7   : > { %v6233_v4 = vpop.f32.mrf.mxu1  ;;  %v6496_v10 = vpop.f32.mrf.mxu0  ;;  %15418 = vmatmul.mubr.msk.f32.gmra.mxu1 %vm1040_vm0, %v7119_v56  ;;  %15481 = vmatmul.mubr.msk.f32.gmra.mxu0 %vm1040_vm0, %v7383_v7 }
 0x4e8   : > { %v6299_v59 = vadd.f32 %v6233_v4, %v19308_v13  ;;  %15420 = vmatprep.mubr.msk.f32.mxu1 %vm16804_vm4, %v16803_v0  ;;  %15483 = vmatprep.mubr.msk.f32.mxu0 %vm16804_vm4, %v16803_v0  ;;  %v7631_v4 = vld [vmem:[#allocation2 + $0xa4] ss:$2 sm:$0xff] }
 0x4e9   : > { %v15137_v16 = vpop.f32.mrf.mxu1  ;;  %v15200_v8 = vpop.f32.mrf.mxu0 }
 0x4ea   : > { %v19491_v15 = vadd.f32 %v6496_v10, %v6299_v59  ;;  %v7632_v8 = vld [vmem:[#allocation2 + $0xb4] ss:$2 sm:$0xff] }
 0x4eb   : > { %v6238_v47 = vpop.f32.mrf.mxu1  ;;  %v6501_v25 = vpop.f32.mrf.mxu0  ;;  %15421 = vmatmul.mubr.msk.f32.gmra.mxu1 %vm1040_vm0, %v7121_v18  ;;  %15484 = vmatmul.mubr.msk.f32.gmra.mxu0 %vm1040_vm0, %v7385_v42 }
 0x4ec   : > { %v6300_v13 = vadd.f32 %v6238_v47, %v19320_v62  ;;  %15492 = vmatprep.mubr.msk.f32.mxu1 %vm16804_vm4, %v16803_v0  ;;  %15555 = vmatprep.mubr.msk.f32.mxu0 %vm16804_vm4, %v16803_v0  ;;  %v7954_v47 = vld [vmem:[#allocation9 + $0x8] sm:$0xff] }
 0x4ed   : > { %v15140_v11 = vpop.f32.mrf.mxu1  ;;  %v15203_v31 = vpop.f32.mrf.mxu0  ;;  %15552 = vmatpush3.msra.mxu0 %v7954_v47  ;;  %v7953_v47 = vld [vmem:[#allocation9] sm:$0xff] }
 0x4ee   : > { %v19500_v49 = vadd.f32 %v6501_v25, %v6300_v13  ;;  %15553 = vmatprep.subr.mxu0 %v16803_v0 }
 0x4ef   : > { %v6243_v12 = vpop.f32.mrf.mxu1  ;;  %v6506_v35 = vpop.f32.mrf.mxu0  ;;  %15493 = vmatmul.mubr.msk.f32.vlgmr.msra.gmra.mxu1 %vm1040_vm0, %v7626_v63  ;;  %15554 = vmatpush3.msra.mxu0 %v7953_v47 }
 0x4f0   : > { %v6301_v34 = vadd.f32 %v6243_v12, %v19333_v32  ;;  %15495 = vmatprep.mubr.msk.f32.mxu1 %vm16804_vm4, %v16803_v0  ;;  %15671 = vmatprep.subr.mxu0 %v16803_v0 }
 0x4f1   : > { %v15143_v62 = vpop.f32.mrf.mxu1  ;;  %v15206_v33 = vpop.f32.mrf.mxu0 }
 0x4f2   : > { %v19507_v30 = vadd.f32 %v6506_v35, %v6301_v34 }
 0x4f3   : > { %v6248_v37 = vpop.f32.mrf.mxu1  ;;  %v6511_v39 = vpop.f32.mrf.mxu0  ;;  %15496 = vmatmul.mubr.msk.f32.gmra.mxu1 %vm1040_vm0, %v7627_v38  ;;  %v7634_v38 = vld [vmem:[#allocation2 + $0xd4] ss:$2 sm:$0xff] }
 0x4f4   : > { %v6302_v44 = vadd.f32 %v6248_v37, %v19346_v23  ;;  %15498 = vmatprep.mubr.msk.f32.mxu1 %vm16804_vm4, %v16803_v0 }
 0x4f5   : > { %v15146_v32 = vpop.f32.mrf.mxu1  ;;  %v15209_v41 = vpop.f32.mrf.mxu0 }
 0x4f6   : > { %v19513_v60 = vadd.f32 %v6511_v39, %v6302_v44 }
 0x4f7   : > { %v6253_v28 = vpop.f32.mrf.mxu1  ;;  %v6516_v48 = vpop.f32.mrf.mxu0  ;;  %15499 = vmatmul.mubr.msk.f32.gmra.mxu1 %vm1040_vm0, %v7628_v22  ;;  %v7635_v22 = vld [vmem:[#allocation2 + $0xe4] ss:$2 sm:$0xff] }
 0x4f8   : > { %v6303_v29 = vadd.f32 %v6253_v28, %v19356_v51  ;;  %15501 = vmatprep.mubr.msk.f32.mxu1 %vm16804_vm4, %v16803_v0 }
 0x4f9   : > { %v15149_v50 = vpop.f32.mrf.mxu1  ;;  %v15212_v36 = vpop.f32.mrf.mxu0 }
 0x4fa   : > { %v19519_v23 = vadd.f32 %v6516_v48, %v6303_v29 }
 0x4fb   : > { %v6258_v52 = vpop.f32.mrf.mxu1  ;;  %v6521_v58 = vpop.f32.mrf.mxu0  ;;  %15502 = vmatmul.mubr.msk.f32.gmra.mxu1 %vm1040_vm0, %v7629_v53  ;;  %v7636_v53 = vld [vmem:[#allocation2 + $0xf4] ss:$2 sm:$0xff] }
 0x4fc   : > { %v6304_v40 = vadd.f32 %v6258_v52, %v19365_v26  ;;  %15504 = vmatprep.mubr.msk.f32.mxu1 %vm16804_vm4, %v16803_v0 }
 0x4fd   : > { %v15152_v54 = vpop.f32.mrf.mxu1  ;;  %v15215_v19 = vpop.f32.mrf.mxu0 }
 0x4fe   : > { %v19525_v51 = vadd.f32 %v6521_v58, %v6304_v40 }
 0x4ff   : > { %v6263_v3 = vpop.f32.mrf.mxu1  ;;  %v6526_v6 = vpop.f32.mrf.mxu0  ;;  %15505 = vmatmul.mubr.msk.f32.gmra.mxu1 %vm1040_vm0, %v7630_v1  ;;  %v7637_v1 = vld [vmem:[#allocation2 + $0x104] ss:$2 sm:$0xff] }
 0x500   : > { %v6305_v5 = vadd.f32 %v6263_v3, %v19374_v9  ;;  %15507 = vmatprep.mubr.msk.f32.mxu1 %vm16804_vm4, %v16803_v0 }
 0x501   : > { %v15155_v56 = vpop.f32.mrf.mxu1  ;;  %v15218_v7 = vpop.f32.mrf.mxu0 }
 0x502   : > { %v19531_v26 = vadd.f32 %v6526_v6, %v6305_v5 }
 0x503   : > { %v6268_v10 = vpop.f32.mrf.mxu1  ;;  %v6531_v59 = vpop.f32.mrf.mxu0  ;;  %15508 = vmatmul.mubr.msk.f32.gmra.mxu1 %vm1040_vm0, %v7631_v4  ;;  %v7638_v4 = vld [vmem:[#allocation2 + $0x114] ss:$2 sm:$0xff] }
 0x504   : > { %v6306_v18 = vadd.f32 %v6268_v10, %v19383_v20  ;;  %15510 = vmatprep.mubr.msk.f32.mxu1 %vm16804_vm4, %v16803_v0 }
 0x505   : > { %v15158_v42 = vpop.f32.mrf.mxu1  ;;  %v15221_v16 = vpop.f32.mrf.mxu0 }
 0x506   : > { %v19537_v9 = vadd.f32 %v6531_v59, %v6306_v18 }
 0x507   : > { %v6273_v25 = vpop.f32.mrf.mxu1  ;;  %v6536_v13 = vpop.f32.mrf.mxu0  ;;  %15511 = vmatmul.mubr.msk.f32.gmra.mxu1 %vm1040_vm0, %v7632_v8  ;;  %v7639_v8 = vld [vmem:[#allocation2 + $0x124] ss:$2 sm:$0xff] }
 0x508   : > { %v6307_v11 = vadd.f32 %v6273_v25, %v19392_v27  ;;  %15513 = vmatprep.mubr.msk.f32.mxu1 %vm16804_vm4, %v16803_v0 }
 0x509   : > { %v15161_v20 = vpop.f32.mrf.mxu1  ;;  %v15224_v31 = vpop.f32.mrf.mxu0 }
 0x50a   : > { %v19544_v63 = vadd.f32 %v6536_v13, %v6307_v11 }
 0x50b   : > { %v6278_v12 = vpop.f32.mrf.mxu1  ;;  %v6541_v35 = vpop.f32.mrf.mxu0  ;;  %15514 = vmatmul.mubr.msk.f32.gmra.mxu1 %vm1040_vm0, %v7633_v24  ;;  %v7640_v24 = vld [vmem:[#allocation2 + $0x134] ss:$2 sm:$0xff] }
 0x50c   : > { %v6308_v34 = vadd.f32 %v6278_v12, %v19401_v17  ;;  %15516 = vmatprep.mubr.msk.f32.mxu1 %vm16804_vm4, %v16803_v0 }
 0x50d   : > { %v15164_v27 = vpop.f32.mrf.mxu1  ;;  %v15227_v62 = vpop.f32.mrf.mxu0 }
 0x50e   : > { %v19550_v33 = vadd.f32 %v6541_v35, %v6308_v34 }
 0x50f   : > { %v6283_v37 = vpop.f32.mrf.mxu1  ;;  %v6546_v39 = vpop.f32.mrf.mxu0  ;;  %15517 = vmatmul.mubr.msk.f32.gmra.mxu1 %vm1040_vm0, %v7634_v38  ;;  %v7642_v38 = vld [vmem:[#allocation2 + $0x144] ss:$2 sm:$0xff] }
 0x510   : > { %v6309_v44 = vadd.f32 %v6283_v37, %v19410_v45  ;;  %15519 = vmatprep.mubr.msk.f32.mxu1 %vm16804_vm4, %v16803_v0 }
 0x511   : > { %v15167_v32 = vpop.f32.mrf.mxu1  ;;  %v15230_v41 = vpop.f32.mrf.mxu0 }
 0x512   : > { %v19556_v17 = vadd.f32 %v6546_v39, %v6309_v44 }
 0x513   : > { %v6288_v28 = vpop.f32.mrf.mxu1  ;;  %v6551_v48 = vpop.f32.mrf.mxu0  ;;  %15520 = vmatmul.mubr.msk.f32.gmra.mxu1 %vm1040_vm0, %v7635_v22  ;;  %v7644_v22 = vld [vmem:[#allocation2 + $0x154] ss:$2 sm:$0xff] }
 0x514   : > { %v6310_v29 = vadd.f32 %v6288_v28, %v19419_v55  ;;  %15522 = vmatprep.mubr.msk.f32.mxu1 %vm16804_vm4, %v16803_v0 }
 0x515   : > { %v15170_v50 = vpop.f32.mrf.mxu1  ;;  %v15233_v36 = vpop.f32.mrf.mxu0 }
 0x516   : > { %v19562_v45 = vadd.f32 %v6551_v48, %v6310_v29 }
 0x517   : > { %v6721_v52 = vpop.f32.mrf.mxu1  ;;  %v6985_v58 = vpop.f32.mrf.mxu0  ;;  %15523 = vmatmul.mubr.msk.f32.gmra.mxu1 %vm1040_vm0, %v7636_v53  ;;  %v7646_v53 = vld [vmem:[#allocation2 + $0x164] ss:$2 sm:$0xff] }
 0x518   : > { %v6815_v40 = vadd.f32 %v6721_v52, %v19428_v43  ;;  %15525 = vmatprep.mubr.msk.f32.mxu1 %vm16804_vm4, %v16803_v0 }
 0x519   : > { %v15242_v54 = vpop.f32.mrf.mxu1  ;;  %v15305_v19 = vpop.f32.mrf.mxu0 }
 0x51a   : > { %v19568_v55 = vadd.f32 %v6985_v58, %v6815_v40  ;;  %v7648_v54 = vld [vmem:[#allocation2 + $0x174] ss:$2 sm:$0xf] }
 0x51b   : > { %v6726_v3 = vpop.f32.mrf.mxu1  ;;  %v6990_v6 = vpop.f32.mrf.mxu0  ;;  %15526 = vmatmul.mubr.msk.f32.gmra.mxu1 %vm1040_vm0, %v7637_v1 }
 0x51c   : > { %v6816_v5 = vadd.f32 %v6726_v3, %v19437_v14  ;;  %15528 = vmatprep.mubr.msk.f32.mxu1 %vm16804_vm4, %v16803_v0 }
 0x51d   : > { %v15245_v56 = vpop.f32.mrf.mxu1  ;;  %v15308_v7 = vpop.f32.mrf.mxu0 }
 0x51e   : > { %v19574_v43 = vadd.f32 %v6990_v6, %v6816_v5 }
 0x51f   : > { %v6731_v10 = vpop.f32.mrf.mxu1  ;;  %v6995_v59 = vpop.f32.mrf.mxu0  ;;  %15529 = vmatmul.mubr.msk.f32.gmra.mxu1 %vm1040_vm0, %v7638_v4 }
 0x520   : > { %v6817_v18 = vadd.f32 %v6731_v10, %v19446_v21  ;;  %15531 = vmatprep.mubr.msk.f32.mxu1 %vm16804_vm4, %v16803_v0 }
 0x521   : > { %v15248_v42 = vpop.f32.mrf.mxu1  ;;  %v15311_v16 = vpop.f32.mrf.mxu0 }
 0x522   : > { %v19580_v14 = vadd.f32 %v6995_v59, %v6817_v18 }
 0x523   : > { %v6736_v25 = vpop.f32.mrf.mxu1  ;;  %v7000_v13 = vpop.f32.mrf.mxu0  ;;  %15532 = vmatmul.mubr.msk.f32.gmra.mxu1 %vm1040_vm0, %v7639_v8 }
 0x524   : > { %v6818_v11 = vadd.f32 %v6736_v25, %v19455_v61  ;;  %15534 = vmatprep.mubr.msk.f32.mxu1 %vm16804_vm4, %v16803_v0 }
 0x525   : > { %v15251_v21 = vpop.f32.mrf.mxu1  ;;  %v15314_v20 = vpop.f32.mrf.mxu0 }
 0x526   : > { %v19587_v31 = vadd.f32 %v7000_v13, %v6818_v11 }
 0x527   : > { %v6741_v12 = vpop.f32.mrf.mxu1  ;;  %v7005_v35 = vpop.f32.mrf.mxu0  ;;  %15535 = vmatmul.mubr.msk.f32.gmra.mxu1 %vm1040_vm0, %v7640_v24 }
 0x528   : > { %v6819_v34 = vadd.f32 %v6741_v12, %v19464_v46  ;;  %15537 = vmatprep.mubr.msk.f32.mxu1 %vm16804_vm4, %v16803_v0 }
 0x529   : > { %v15254_v61 = vpop.f32.mrf.mxu1  ;;  %v15317_v27 = vpop.f32.mrf.mxu0 }
 0x52a   : > { %v19593_v62 = vadd.f32 %v7005_v35, %v6819_v34 }
 0x52b   : > { %v6746_v37 = vpop.f32.mrf.mxu1  ;;  %v7010_v39 = vpop.f32.mrf.mxu0  ;;  %15538 = vmatmul.mubr.msk.f32.gmra.mxu1 %vm1040_vm0, %v7642_v38 }
 0x52c   : > { %v6820_v44 = vadd.f32 %v6746_v37, %v19473_v57  ;;  %15540 = vmatprep.mubr.msk.f32.mxu1 %vm16804_vm4, %v16803_v0 }
 0x52d   : > { %v15257_v32 = vpop.f32.mrf.mxu1  ;;  %v15320_v41 = vpop.f32.mrf.mxu0 }
 0x52e   : > { %v19599_v46 = vadd.f32 %v7010_v39, %v6820_v44 }
 0x52f   : > { %v6751_v28 = vpop.f32.mrf.mxu1  ;;  %v7015_v48 = vpop.f32.mrf.mxu0  ;;  %15541 = vmatmul.mubr.msk.f32.gmra.mxu1 %vm1040_vm0, %v7644_v22 }
 0x530   : > { %v6821_v29 = vadd.f32 %v6751_v28, %v19482_v2  ;;  %15543 = vmatprep.mubr.msk.f32.mxu1 %vm16804_vm4, %v16803_v0 }
 0x531   : > { %v15260_v50 = vpop.f32.mrf.mxu1  ;;  %v15323_v36 = vpop.f32.mrf.mxu0 }
 0x532   : > { %v19605_v57 = vadd.f32 %v7015_v48, %v6821_v29 }
 0x533   : > { %v6756_v52 = vpop.f32.mrf.mxu1  ;;  %v7020_v58 = vpop.f32.mrf.mxu0  ;;  %15544 = vmatmul.mubr.msk.f32.gmra.mxu1 %vm1040_vm0, %v7646_v53 }
 0x534   : > { %v6822_v40 = vadd.f32 %v6756_v52, %v19491_v15  ;;  %15546 = vmatprep.mubr.msk.f32.mxu1 %vm16804_vm4, %v16803_v0 }
 0x535   : > { %v15263_v19 = vpop.f32.mrf.mxu1  ;;  %v15326_v2 = vpop.f32.mrf.mxu0 }
 0x536   : > { %v19611_v1 = vadd.f32 %v7020_v58, %v6822_v40 }
 0x537   : > { %v6761_v3 = vpop.f32.mrf.mxu1  ;;  %v7025_v6 = vpop.f32.mrf.mxu0  ;;  %15547 = vmatmul.mubr.msk.f32.gmra.mxu1 %vm1040_vm0, %v7648_v54 }
 0x538   : > { %v6823_v5 = vadd.f32 %v6761_v3, %v19500_v49  ;;  %15614 = vmatprep.mubr.msk.f32.mxu1 %vm16804_vm4, %v16803_v0 }
 0x539   : > { %v15266_v56 = vpop.f32.mrf.mxu1  ;;  %v15329_v7 = vpop.f32.mrf.mxu0 }
 0x53a   : > { %v19617_v15 = vadd.f32 %v7025_v6, %v6823_v5 }
 0x53b   : > { %v6766_v4 = vpop.f32.mrf.mxu1  ;;  %v7030_v10 = vpop.f32.mrf.mxu0 }
 0x53c   : > { %v6824_v59 = vadd.f32 %v6766_v4, %v19507_v30 }
 0x53d   : > { %v15269_v18 = vpop.f32.mrf.mxu1  ;;  %v15332_v42 = vpop.f32.mrf.mxu0 }
 0x53e   : > { %v19620_v16 = vadd.f32 %v7030_v10, %v6824_v59 }
 0x53f   : > { %v6771_v8 = vpop.f32.mrf.mxu1  ;;  %v7035_v47 = vpop.f32.mrf.mxu0 }
 0x540   : > { %v6825_v25 = vadd.f32 %v6771_v8, %v19513_v60 }
 0x541   : > { %v15272_v49 = vpop.f32.mrf.mxu1  ;;  %v15335_v13 = vpop.f32.mrf.mxu0 }
 0x542   : > { %v19623_v11 = vadd.f32 %v7035_v47, %v6825_v25 }
 0x543   : > { %v6776_v21 = vpop.f32.mrf.mxu1  ;;  %v7040_v20 = vpop.f32.mrf.mxu0 }
 0x544   : > { %v6826_v24 = vadd.f32 %v6776_v21, %v19519_v23 }
 0x545   : > { %v15275_v12 = vpop.f32.mrf.mxu1  ;;  %v15338_v35 = vpop.f32.mrf.mxu0 }
 0x546   : > { %v19626_v34 = vadd.f32 %v7040_v20, %v6826_v24 }
 0x547   : > { %v6781_v30 = vpop.f32.mrf.mxu1  ;;  %v7045_v61 = vpop.f32.mrf.mxu0 }
 0x548   : > { %v6827_v27 = vadd.f32 %v6781_v30, %v19525_v51 }
 0x549   : > { %v15278_v38 = vpop.f32.mrf.mxu1  ;;  %v15341_v37 = vpop.f32.mrf.mxu0 }
 0x54a   : > { %v19629_v39 = vadd.f32 %v7045_v61, %v6827_v27 }
 0x54b   : > { %v6786_v60 = vpop.f32.mrf.mxu1  ;;  %v7050_v44 = vpop.f32.mrf.mxu0 }
 0x54c   : > { %v6828_v32 = vadd.f32 %v6786_v60, %v19531_v26 }
 0x54d   : > { %v15281_v41 = vpop.f32.mrf.mxu1  ;;  %v15344_v22 = vpop.f32.mrf.mxu0 }
 0x54e   : > { %v19632_v28 = vadd.f32 %v7050_v44, %v6828_v32 }
 0x54f   : > { %v6791_v23 = vpop.f32.mrf.mxu1  ;;  %v7055_v48 = vpop.f32.mrf.mxu0 }
 0x550   : > { %v6829_v29 = vadd.f32 %v6791_v23, %v19537_v9 }
 0x551   : > { %v15284_v50 = vpop.f32.mrf.mxu1  ;;  %v15347_v36 = vpop.f32.mrf.mxu0 }
 0x552   : > { %v19635_v53 = vadd.f32 %v7055_v48, %v6829_v29 }
 0x553   : > { %v6796_v51 = vpop.f32.mrf.mxu1  ;;  %v7060_v52 = vpop.f32.mrf.mxu0 }
 0x554   : > { %v6830_v58 = vadd.f32 %v6796_v51, %v19544_v63 }
 0x555   : > { %v15287_v40 = vpop.f32.mrf.mxu1  ;;  %v15350_v54 = vpop.f32.mrf.mxu0 }
 0x556   : > { %v19638_v19 = vadd.f32 %v7060_v52, %v6830_v58 }
 0x557   : > { %v6801_v26 = vpop.f32.mrf.mxu1  ;;  %v7065_v2 = vpop.f32.mrf.mxu0 }
 0x558   : > { %v6831_v3 = vadd.f32 %v6801_v26, %v19550_v33 }
 0x559   : > { %v15290_v6 = vpop.f32.mrf.mxu1  ;;  %v15353_v5 = vpop.f32.mrf.mxu0 }
 0x55a   : > { %v19641_v56 = vadd.f32 %v7065_v2, %v6831_v3 }
 0x55b   : > { %v6806_v9 = vpop.f32.mrf.mxu1  ;;  %v7070_v7 = vpop.f32.mrf.mxu0 }
 0x55c   : > { %v6832_v4 = vadd.f32 %v6806_v9, %v19556_v17 }
 0x55d   : > { %v15293_v10 = vpop.f32.mrf.mxu1  ;;  %v15356_v59 = vpop.f32.mrf.mxu0 }
 0x55e   : > { %v19644_v18 = vadd.f32 %v7070_v7, %v6832_v4 }
 0x55f   : > { %v6811_v63 = vpop.f32.mrf.mxu1  ;;  %v7075_v42 = vpop.f32.mrf.mxu0 }
 0x560   : > { %v6833_v8 = vadd.f32 %v6811_v63, %v19562_v45 }
 0x561   : > { %v15296_v47 = vpop.f32.mrf.mxu1  ;;  %v15359_v25 = vpop.f32.mrf.mxu0 }
 0x562   : > { %v19647_v49 = vadd.f32 %v7075_v42, %v6833_v8 }
 0x563   : > { %v7249_v33 = vpop.f32.mrf.mxu1  ;;  %v7513_v13 = vpop.f32.mrf.mxu0 }
 0x564   : > { %v7343_v21 = vadd.f32 %v7249_v33, %v19568_v55 }
 0x565   : > { %v15368_v20 = vpop.f32.mrf.mxu1  ;;  %v15431_v24 = vpop.f32.mrf.mxu0 }
 0x566   : > { %v19650_v12 = vadd.f32 %v7513_v13, %v7343_v21 }
 0x567   : > { %v7254_v17 = vpop.f32.mrf.mxu1  ;;  %v7518_v35 = vpop.f32.mrf.mxu0 }
 0x568   : > { %v7344_v30 = vadd.f32 %v7254_v17, %v19574_v43 }
 0x569   : > { %v15371_v61 = vpop.f32.mrf.mxu1  ;;  %v15434_v27 = vpop.f32.mrf.mxu0 }
 0x56a   : > { %v19653_v38 = vadd.f32 %v7518_v35, %v7344_v30 }
 0x56b   : > { %v7259_v45 = vpop.f32.mrf.mxu1  ;;  %v7523_v37 = vpop.f32.mrf.mxu0 }
 0x56c   : > { %v7345_v60 = vadd.f32 %v7259_v45, %v19580_v14 }
 0x56d   : > { %v15374_v44 = vpop.f32.mrf.mxu1  ;;  %v15437_v32 = vpop.f32.mrf.mxu0 }
 0x56e   : > { %v19656_v41 = vadd.f32 %v7523_v37, %v7345_v60 }
 0x56f   : > { %v7264_v55 = vpop.f32.mrf.mxu1  ;;  %v7528_v22 = vpop.f32.mrf.mxu0 }
 0x570   : > { %v7346_v23 = vadd.f32 %v7264_v55, %v19587_v31 }
 0x571   : > { %v15377_v48 = vpop.f32.mrf.mxu1  ;;  %v15440_v29 = vpop.f32.mrf.mxu0 }
 0x572   : > { %v19659_v50 = vadd.f32 %v7528_v22, %v7346_v23 }
 0x573   : > { %v7269_v43 = vpop.f32.mrf.mxu1  ;;  %v7533_v36 = vpop.f32.mrf.mxu0 }
 0x574   : > { %v7347_v51 = vadd.f32 %v7269_v43, %v19593_v62 }
 0x575   : > { %v15380_v52 = vpop.f32.mrf.mxu1  ;;  %v15443_v58 = vpop.f32.mrf.mxu0 }
 0x576   : > { %v19662_v40 = vadd.f32 %v7533_v36, %v7347_v51 }
 0x577   : > { %v7274_v14 = vpop.f32.mrf.mxu1  ;;  %v7538_v54 = vpop.f32.mrf.mxu0 }
 0x578   : > { %v7348_v26 = vadd.f32 %v7274_v14, %v19599_v46  ;;  %v8218_v46 = vld [vmem:[%s20619_s7] sm:$0xff] }
 0x579   : > { %v15383_v2 = vpop.f32.mrf.mxu1  ;;  %v15446_v3 = vpop.f32.mrf.mxu0  ;;  %15613 = vmatpush3.msra.mxu1 %v8218_v46 }
 0x57a   : > { %v19665_v6 = vadd.f32 %v7538_v54, %v7348_v26  ;;  %15698 = vmatprep.subr.mxu1 %v16803_v0 }
 0x57b   : > { %v7279_v31 = vpop.f32.mrf.mxu1  ;;  %v7543_v5 = vpop.f32.mrf.mxu0 }
 0x57c   : > { %v7349_v9 = vadd.f32 %v7279_v31, %v19605_v57 }
 0x57d   : > { %v15386_v7 = vpop.f32.mrf.mxu1  ;;  %v15449_v4 = vpop.f32.mrf.mxu0 }
 0x57e   : > { %v19668_v10 = vadd.f32 %v7543_v5, %v7349_v9 }
 0x57f   : > { %v7284_v62 = vpop.f32.mrf.mxu1  ;;  %v7548_v59 = vpop.f32.mrf.mxu0 }
 0x580   : > { %v7350_v63 = vadd.f32 %v7284_v62, %v19611_v1 }
 0x581   : > { %v15389_v42 = vpop.f32.mrf.mxu1  ;;  %v15452_v8 = vpop.f32.mrf.mxu0 }
 0x582   : > { %v19674_v47 = vadd.f32 %v7548_v59, %v7350_v63 }
 0x583   : > { %v7289_v57 = vpop.f32.mrf.mxu1  ;;  %v7553_v25 = vpop.f32.mrf.mxu0 }
 0x584   : > { %v7351_v33 = vadd.f32 %v7289_v57, %v19617_v15 }
 0x585   : > { %v15392_v13 = vpop.f32.mrf.mxu1  ;;  %v15455_v21 = vpop.f32.mrf.mxu0 }
 0x586   : > { %v19678_v20 = vadd.f32 %v7553_v25, %v7351_v33 }
 0x587   : > { %v7294_v1 = vpop.f32.mrf.mxu1  ;;  %v7558_v24 = vpop.f32.mrf.mxu0 }
 0x588   : > { %v7352_v17 = vadd.f32 %v7294_v1, %v19620_v16 }
 0x589   : > { %v15395_v35 = vpop.f32.mrf.mxu1  ;;  %v15458_v30 = vpop.f32.mrf.mxu0 }
 0x58a   : > { %v19681_v61 = vadd.f32 %v7558_v24, %v7352_v17 }
 0x58b   : > { %v7299_v27 = vpop.f32.mrf.mxu1  ;;  %v7563_v45 = vpop.f32.mrf.mxu0 }
 0x58c   : > { %v7353_v37 = vadd.f32 %v7299_v27, %v19623_v11 }
 0x58d   : > { %v15398_v60 = vpop.f32.mrf.mxu1  ;;  %v15461_v44 = vpop.f32.mrf.mxu0 }
 0x58e   : > { %v19684_v32 = vadd.f32 %v7563_v45, %v7353_v37  ;;  %v19710_v44 = vld [vmem:[#allocation8] ss:$0 sm:$0xff] }
 0x58f   : > { %v7304_v15 = vpop.f32.mrf.mxu1  ;;  %v7568_v55 = vpop.f32.mrf.mxu0 }
 0x590   : > { %v7354_v22 = vadd.f32 %v7304_v15, %v19626_v34 }
 0x591   : > { %v15401_v23 = vpop.f32.mrf.mxu1  ;;  %v15464_v48 = vpop.f32.mrf.mxu0 }
 0x592   : > { %v19687_v29 = vadd.f32 %v7568_v55, %v7354_v22 }
 0x593   : > { %v7309_v16 = vpop.f32.mrf.mxu1  ;;  %v7573_v43 = vpop.f32.mrf.mxu0 }
 0x594   : > { %v7355_v36 = vadd.f32 %v7309_v16, %v19629_v39 }
 0x595   : > { %v15404_v51 = vpop.f32.mrf.mxu1  ;;  %v15467_v52 = vpop.f32.mrf.mxu0 }
 0x596   : > { %v19690_v58 = vadd.f32 %v7573_v43, %v7355_v36 }
 0x597   : > { %v7314_v11 = vpop.f32.mrf.mxu1  ;;  %v7578_v14 = vpop.f32.mrf.mxu0 }
 0x598   : > { %v7356_v54 = vadd.f32 %v7314_v11, %v19632_v28 }
 0x599   : > { %v15407_v26 = vpop.f32.mrf.mxu1  ;;  %v15470_v2 = vpop.f32.mrf.mxu0 }
 0x59a   : > { %v19693_v3 = vadd.f32 %v7578_v14, %v7356_v54 }
 0x59b   : > { %v7319_v34 = vpop.f32.mrf.mxu1  ;;  %v7583_v31 = vpop.f32.mrf.mxu0 }
 0x59c   : > { %v7357_v5 = vadd.f32 %v7319_v34, %v19635_v53 }
 0x59d   : > { %v15410_v9 = vpop.f32.mrf.mxu1  ;;  %v15473_v7 = vpop.f32.mrf.mxu0 }
 0x59e   : > { %v19696_v4 = vadd.f32 %v7583_v31, %v7357_v5 }
 0x59f   : > { %v7324_v39 = vpop.f32.mrf.mxu1  ;;  %v7588_v62 = vpop.f32.mrf.mxu0 }
 0x5a0   : > { %v7358_v59 = vadd.f32 %v7324_v39, %v19638_v19 }
 0x5a1   : > { %v15413_v63 = vpop.f32.mrf.mxu1  ;;  %v15476_v46 = vpop.f32.mrf.mxu0 }
 0x5a2   : > { %v19699_v42 = vadd.f32 %v7588_v62, %v7358_v59 }
 0x5a3   : > { %v7329_v28 = vpop.f32.mrf.mxu1  ;;  %v7593_v8 = vpop.f32.mrf.mxu0 }
 0x5a4   : > { %v7359_v57 = vadd.f32 %v7329_v28, %v19641_v56 }
 0x5a5   : > { %v15416_v25 = vpop.f32.mrf.mxu1  ;;  %v15479_v33 = vpop.f32.mrf.mxu0 }
 0x5a6   : > { %v19702_v13 = vadd.f32 %v7593_v8, %v7359_v57 }
 0x5a7   : > { %v7334_v53 = vpop.f32.mrf.mxu1  ;;  %v7598_v21 = vpop.f32.mrf.mxu0 }
 0x5a8   : > { %v7360_v1 = vadd.f32 %v7334_v53, %v19644_v18 }
 0x5a9   : > { %v15419_v24 = vpop.f32.mrf.mxu1  ;;  %v15482_v17 = vpop.f32.mrf.mxu0 }
 0x5aa   : > { %v19705_v35 = vadd.f32 %v7598_v21, %v7360_v1 }
 0x5ab   : > { %v7339_v19 = vpop.f32.mrf.mxu1  ;;  %v7603_v30 = vpop.f32.mrf.mxu0 }
 0x5ac   : > { %v7361_v27 = vadd.f32 %v7339_v19, %v19647_v49 }
 0x5ad   : > { %v15422_v45 = vpop.f32.mrf.mxu1  ;;  %v15485_v37 = vpop.f32.mrf.mxu0 }
 0x5ae   : > { %v19708_v60 = vadd.f32 %v7603_v30, %v7361_v27 }
 0x5af   : > { %v7776_v56 = vpop.f32.mrf.mxu1 }
 0x5b0   : > { %v7870_v15 = vadd.f32 %v7776_v56, %v19650_v12 }
 0x5b1   : > { %v15494_v55 = vpop.f32.mrf.mxu1 }
 0x5b2   : > { %v7896_v18 = vadd.f32 %v19710_v44, %v7870_v15 }
 0x5b3   : > { %v7781_v22 = vpop.f32.mrf.mxu1 }
 0x5b4   : > { %v7915_v23 = vmax.f32 %v7896_v18, 0.0  ;;  %v7871_v48 = vadd.f32 %v7781_v22, %v19653_v38 }
 0x5b5   : > { %v15497_v16 = vpop.f32.mrf.mxu1 }
 0x5b6   : > { %v7934_v43 = vmin.f32 %v7915_v23, 6.0  ;;  %v7897_v49 = vadd.f32 %v19710_v44, %v7871_v48 }
 0x5b7   : > { %v7786_v36 = vpop.f32.mrf.mxu1 }
 0x5b8   : > { %v7916_v51 = vmax.f32 %v7897_v49, 0.0  ;;  %v7872_v52 = vadd.f32 %v7786_v36, %v19656_v41  ;;  %15556 = vmatmul.mubr.msk.f32.vlgmr.msra.gmra.mxu0 %vm1040_vm0, %v7934_v43 }
 0x5b9   : > { %v15500_v11 = vpop.f32.mrf.mxu1  ;;  %15558 = vmatprep.mubr.msk.f32.mxu0 %vm16804_vm4, %v16803_v0 }
 0x5ba   : > { %v7935_v12 = vmin.f32 %v7916_v51, 6.0  ;;  %v7898_v14 = vadd.f32 %v19710_v44, %v7872_v52 }
 0x5bb   : > { %v7791_v54 = vpop.f32.mrf.mxu1 }
 0x5bc   : > { %v7917_v26 = vmax.f32 %v7898_v14, 0.0  ;;  %v7873_v38 = vadd.f32 %v7791_v54, %v19659_v50  ;;  %15559 = vmatmul.mubr.msk.f32.gmra.mxu0 %vm1040_vm0, %v7935_v12 }
 0x5bd   : > { %v15503_v2 = vpop.f32.mrf.mxu1  ;;  %15561 = vmatprep.mubr.msk.f32.mxu0 %vm16804_vm4, %v16803_v0 }
 0x5be   : > { %v7936_v41 = vmin.f32 %v7917_v26, 6.0  ;;  %v7899_v34 = vadd.f32 %v19710_v44, %v7873_v38 }
 0x5bf   : > { %v7796_v31 = vpop.f32.mrf.mxu1 }
 0x5c0   : > { %v7918_v5 = vmax.f32 %v7899_v34, 0.0  ;;  %v7874_v9 = vadd.f32 %v7796_v31, %v19662_v40  ;;  %15562 = vmatmul.mubr.msk.f32.gmra.mxu0 %vm1040_vm0, %v7936_v41 }
 0x5c1   : > { %v15506_v7 = vpop.f32.mrf.mxu1  ;;  %15564 = vmatprep.mubr.msk.f32.mxu0 %vm16804_vm4, %v16803_v0 }
 0x5c2   : > { %v7937_v50 = vmin.f32 %v7918_v5, 6.0  ;;  %v7900_v39 = vadd.f32 %v19710_v44, %v7874_v9 }
 0x5c3   : > { %v7801_v62 = vpop.f32.mrf.mxu1 }
 0x5c4   : > { %v7919_v59 = vmax.f32 %v7900_v39, 0.0  ;;  %v7875_v63 = vadd.f32 %v7801_v62, %v19665_v6  ;;  %15565 = vmatmul.mubr.msk.f32.gmra.mxu0 %vm1040_vm0, %v7937_v50 }
 0x5c5   : > { %v15509_v46 = vpop.f32.mrf.mxu1  ;;  %15567 = vmatprep.mubr.msk.f32.mxu0 %vm16804_vm4, %v16803_v0 }
 0x5c6   : > { %v7938_v40 = vmin.f32 %v7919_v59, 6.0  ;;  %v7901_v28 = vadd.f32 %v19710_v44, %v7875_v63 }
 0x5c7   : > { %v7806_v8 = vpop.f32.mrf.mxu1 }
 0x5c8   : > { %v7920_v57 = vmax.f32 %v7901_v28, 0.0  ;;  %v7876_v25 = vadd.f32 %v7806_v8, %v19668_v10  ;;  %15568 = vmatmul.mubr.msk.f32.gmra.mxu0 %vm1040_vm0, %v7938_v40 }
 0x5c9   : > { %v15512_v33 = vpop.f32.mrf.mxu1  ;;  %15570 = vmatprep.mubr.msk.f32.mxu0 %vm16804_vm4, %v16803_v0 }
 0x5ca   : > { %v7939_v6 = vmin.f32 %v7920_v57, 6.0  ;;  %v7902_v53 = vadd.f32 %v19710_v44, %v7876_v25 }
 0x5cb   : > { %v7811_v21 = vpop.f32.mrf.mxu1 }
 0x5cc   : > { %v7921_v1 = vmax.f32 %v7902_v53, 0.0  ;;  %v7877_v24 = vadd.f32 %v7811_v21, %v19674_v47  ;;  %15571 = vmatmul.mubr.msk.f32.gmra.mxu0 %vm1040_vm0, %v7939_v6 }
 0x5cd   : > { %v15515_v17 = vpop.f32.mrf.mxu1  ;;  %15573 = vmatprep.mubr.msk.f32.mxu0 %vm16804_vm4, %v16803_v0 }
 0x5ce   : > { %v7940_v10 = vmin.f32 %v7921_v1, 6.0  ;;  %v7903_v19 = vadd.f32 %v19710_v44, %v7877_v24 }
 0x5cf   : > { %v7816_v30 = vpop.f32.mrf.mxu1 }
 0x5d0   : > { %v7922_v27 = vmax.f32 %v7903_v19, 0.0  ;;  %v7878_v45 = vadd.f32 %v7816_v30, %v19678_v20  ;;  %15574 = vmatmul.mubr.msk.f32.gmra.mxu0 %vm1040_vm0, %v7940_v10 }
 0x5d1   : > { %v15518_v37 = vpop.f32.mrf.mxu1  ;;  %15576 = vmatprep.mubr.msk.f32.mxu0 %vm16804_vm4, %v16803_v0 }
 0x5d2   : > { %v7941_v47 = vmin.f32 %v7922_v27, 6.0  ;;  %v7904_v56 = vadd.f32 %v19710_v44, %v7878_v45 }
 0x5d3   : > { %v7821_v15 = vpop.f32.mrf.mxu1 }
 0x5d4   : > { %v7923_v55 = vmax.f32 %v7904_v56, 0.0  ;;  %v7879_v18 = vadd.f32 %v7821_v15, %v19681_v61  ;;  %15577 = vmatmul.mubr.msk.f32.gmra.mxu0 %vm1040_vm0, %v7941_v47 }
 0x5d5   : > { %v15521_v22 = vpop.f32.mrf.mxu1  ;;  %15579 = vmatprep.mubr.msk.f32.mxu0 %vm16804_vm4, %v16803_v0 }
 0x5d6   : > { %v7942_v20 = vmin.f32 %v7923_v55, 6.0  ;;  %v7905_v23 = vadd.f32 %v19710_v44, %v7879_v18  ;;  %v8524_v55 = vld [vmem:[#allocation14 + $0x50] sm:$0xff]  ;;  %v8523_v18 = vld [vmem:[#allocation14 + $0x48] sm:$0xff] }
 0x5d7   : > { %v7826_v48 = vpop.f32.mrf.mxu1 }
 0x5d8   : > { %v7924_v16 = vmax.f32 %v7905_v23, 0.0  ;;  %v7880_v43 = vadd.f32 %v7826_v48, %v19684_v32  ;;  %15580 = vmatmul.mubr.msk.f32.gmra.mxu0 %vm1040_vm0, %v7942_v20 }
 0x5d9   : > { %v15524_v49 = vpop.f32.mrf.mxu1  ;;  %15582 = vmatprep.mubr.msk.f32.mxu0 %vm16804_vm4, %v16803_v0 }
 0x5da   : > { %v7943_v61 = vmin.f32 %v7924_v16, 6.0  ;;  %v7906_v36 = vadd.f32 %v19710_v44, %v7880_v43 }
 0x5db   : > { %v7831_v51 = vpop.f32.mrf.mxu1 }
 0x5dc   : > { %v7925_v52 = vmax.f32 %v7906_v36, 0.0  ;;  %v7881_v11 = vadd.f32 %v7831_v51, %v19687_v29  ;;  %15583 = vmatmul.mubr.msk.f32.gmra.mxu0 %vm1040_vm0, %v7943_v61  ;;  %v8508_v61 = vld [vmem:[#allocation14 + $0x28] sm:$0xff] }
 0x5dd   : > { %v15527_v12 = vpop.f32.mrf.mxu1  ;;  %15585 = vmatprep.mubr.msk.f32.mxu0 %vm16804_vm4, %v16803_v0 }
 0x5de   : > { %v7944_v32 = vmin.f32 %v7925_v52, 6.0  ;;  %v7907_v14 = vadd.f32 %v19710_v44, %v7881_v11  ;;  %v8507_v52 = vld [vmem:[#allocation14 + $0x20] sm:$0xff] }
 0x5df   : > { %v7836_v54 = vpop.f32.mrf.mxu1 }
 0x5e0   : > { %v7926_v26 = vmax.f32 %v7907_v14, 0.0  ;;  %v7882_v38 = vadd.f32 %v7836_v54, %v19690_v58  ;;  %15586 = vmatmul.mubr.msk.f32.gmra.mxu0 %vm1040_vm0, %v7944_v32 }
 0x5e1   : > { %v15530_v2 = vpop.f32.mrf.mxu1  ;;  %15588 = vmatprep.mubr.msk.f32.mxu0 %vm16804_vm4, %v16803_v0 }
 0x5e2   : > { %v7945_v29 = vmin.f32 %v7926_v26, 6.0  ;;  %v7908_v41 = vadd.f32 %v19710_v44, %v7882_v38 }
 0x5e3   : > { %v7841_v34 = vpop.f32.mrf.mxu1 }
 0x5e4   : > { %v7927_v31 = vmax.f32 %v7908_v41, 0.0  ;;  %v7883_v5 = vadd.f32 %v7841_v34, %v19693_v3  ;;  %15589 = vmatmul.mubr.msk.f32.gmra.mxu0 %vm1040_vm0, %v7945_v29 }
 0x5e5   : > { %v15533_v9 = vpop.f32.mrf.mxu1  ;;  %15591 = vmatprep.mubr.msk.f32.mxu0 %vm16804_vm4, %v16803_v0 }
 0x5e6   : > { %v7946_v58 = vmin.f32 %v7927_v31, 6.0  ;;  %v7909_v7 = vadd.f32 %v19710_v44, %v7883_v5 }
 0x5e7   : > { %v7846_v50 = vpop.f32.mrf.mxu1 }
 0x5e8   : > { %v7928_v39 = vmax.f32 %v7909_v7, 0.0  ;;  %v7884_v62 = vadd.f32 %v7846_v50, %v19696_v4  ;;  %15592 = vmatmul.mubr.msk.f32.gmra.mxu0 %vm1040_vm0, %v7946_v58 }
 0x5e9   : > { %v15536_v59 = vpop.f32.mrf.mxu1  ;;  %15594 = vmatprep.mubr.msk.f32.mxu0 %vm16804_vm4, %v16803_v0 }
 0x5ea   : > { %v7947_v3 = vmin.f32 %v7928_v39, 6.0  ;;  %v7910_v63 = vadd.f32 %v19710_v44, %v7884_v62 }
 0x5eb   : > { %v7851_v46 = vpop.f32.mrf.mxu1 }
 0x5ec   : > { %v7929_v40 = vmax.f32 %v7910_v63, 0.0  ;;  %v7885_v28 = vadd.f32 %v7851_v46, %v19699_v42  ;;  %15595 = vmatmul.mubr.msk.f32.gmra.mxu0 %vm1040_vm0, %v7947_v3 }
 0x5ed   : > { %v15539_v8 = vpop.f32.mrf.mxu1  ;;  %15597 = vmatprep.mubr.msk.f32.mxu0 %vm16804_vm4, %v16803_v0 }
 0x5ee   : > { %v7948_v4 = vmin.f32 %v7929_v40, 6.0  ;;  %v7911_v57 = vadd.f32 %v19710_v44, %v7885_v28 }
 0x5ef   : > { %v7856_v25 = vpop.f32.mrf.mxu1 }
 0x5f0   : > { %v7930_v33 = vmax.f32 %v7911_v57, 0.0  ;;  %v7886_v6 = vadd.f32 %v7856_v25, %v19702_v13  ;;  %15598 = vmatmul.mubr.msk.f32.gmra.mxu0 %vm1040_vm0, %v7948_v4 }
 0x5f1   : > { %v15542_v53 = vpop.f32.mrf.mxu1  ;;  %15600 = vmatprep.mubr.msk.f32.mxu0 %vm16804_vm4, %v16803_v0 }
 0x5f2   : > { %v7949_v42 = vmin.f32 %v7930_v33, 6.0  ;;  %v7912_v21 = vadd.f32 %v19710_v44, %v7886_v6 }
 0x5f3   : > { %v7861_v1 = vpop.f32.mrf.mxu1 }
 0x5f4   : > { %v7931_v24 = vmax.f32 %v7912_v21, 0.0  ;;  %v7887_v17 = vadd.f32 %v7861_v1, %v19705_v35  ;;  %15601 = vmatmul.mubr.msk.f32.gmra.mxu0 %vm1040_vm0, %v7949_v42 }
 0x5f5   : > { %v15545_v10 = vpop.f32.mrf.mxu1  ;;  %15603 = vmatprep.mubr.msk.f32.mxu0 %vm16804_vm4, %v16803_v0 }
 0x5f6   : > { %v7950_v13 = vmin.f32 %v7931_v24, 6.0  ;;  %v7913_v19 = vadd.f32 %v19710_v44, %v7887_v17 }
 0x5f7   : > { %v7866_v30 = vpop.f32.mrf.mxu1 }
 0x5f8   : > { %v7932_v27 = vmax.f32 %v7913_v19, 0.0  ;;  %v7888_v45 = vadd.f32 %v7866_v30, %v19708_v60  ;;  %15604 = vmatmul.mubr.msk.f32.gmra.mxu0 %vm1040_vm0, %v7950_v13  ;;  %v8525_v60 = vld [vmem:[#allocation14 + $0x58] sm:$0xff] }
 0x5f9   : > { %15606 = vmatprep.mubr.msk.f32.mxu0 %vm16804_vm4, %v16803_v0  ;;  %v15548_v37 = vpop.f32.mrf.mxu1  ;;  %15672 = vmatpush3.msra.mxu0 %v8525_v60 }
 0x5fa   : > { %v7951_v35 = vmin.f32 %v7932_v27, 6.0  ;;  %v7914_v47 = vadd.f32 %v19710_v44, %v7888_v45  ;;  %15673 = vmatprep.subr.mxu0 %v16803_v0  ;;  %v19810_v44 = vld [vmem:[#allocation11] ss:$0 sm:$0xff] }
 0x5fb   : > { %15674 = vmatpush3.msra.mxu0 %v8524_v55 }
 0x5fc   : > { %v7933_v56 = vmax.f32 %v7914_v47, 0.0  ;;  %15607 = vmatmul.mubr.msk.f32.gmra.mxu0 %vm1040_vm0, %v7951_v35  ;;  %15675 = vmatprep.subr.mxu0 %v16803_v0 }
 0x5fd   : > { %15609 = vmatprep.mubr.msk.f32.mxu0 %vm16804_vm4, %v16803_v0  ;;  %15676 = vmatpush3.msra.mxu0 %v8523_v18 }
 0x5fe   : > { %v7952_v15 = vmin.f32 %v7933_v56, 6.0  ;;  %15677 = vmatprep.subr.mxu0 %v16803_v0 }
 0x600   : > { %15610 = vmatmul.mubr.msk.f32.gmra.mxu0 %vm1040_vm0, %v7952_v15 }
 0x601   : > { %15683 = vmatprep.mubr.msk.f32.mxu0 %vm16804_vm4, %v16803_v0 }
 0x678   : > { %v8086_v22 = vpop.f32.mrf.mxu0 }
 0x679   : > { %v8087_v20 = vadd.f32 %v19810_v44, %v8086_v22 }
 0x67a   : > { %v15557_v23 = vpop.f32.mrf.mxu0 }
 0x67b   : > { %v8180_v48 = vmax.f32 %v8087_v20, 0.0 }
 0x67c   : > { %v8091_v16 = vpop.f32.mrf.mxu0 }
 0x67d   : > { %v8199_v43 = vmin.f32 %v8180_v48, 6.0  ;;  %v8092_v49 = vadd.f32 %v19810_v44, %v8091_v16 }
 0x67e   : > { %v15560_v36 = vpop.f32.mrf.mxu0 }
 0x67f   : > { %v8181_v51 = vmax.f32 %v8092_v49, 0.0  ;;  %15615 = vmatmul.mubr.msk.f32.vlgmr.msra.gmra.mxu1 %vm8226_vm5, %v8199_v43 }
 0x680   : > { %v8096_v11 = vpop.f32.mrf.mxu0  ;;  %15617 = vmatprep.mubr.msk.f32.mxu1 %vm16804_vm4, %v16803_v0  ;;  %15699 = vmatpush3.msra.mxu1 %v8508_v61 }
 0x681   : > { %v8200_v12 = vmin.f32 %v8181_v51, 6.0  ;;  %v8097_v32 = vadd.f32 %v19810_v44, %v8096_v11  ;;  %15700 = vmatprep.subr.mxu1 %v16803_v0 }
 0x682   : > { %v15563_v14 = vpop.f32.mrf.mxu0  ;;  %15701 = vmatpush3.msra.mxu1 %v8507_v52 }
 0x683   : > { %v8182_v54 = vmax.f32 %v8097_v32, 0.0  ;;  %15618 = vmatmul.mubr.msk.f32.gmra.mxu1 %vm8226_vm5, %v8200_v12  ;;  %15702 = vmatprep.subr.mxu1 %v16803_v0 }
 0x684   : > { %v8101_v26 = vpop.f32.mrf.mxu0  ;;  %15620 = vmatprep.mubr.msk.f32.mxu1 %vm16804_vm4, %v16803_v0 }
 0x685   : > { %v8201_v38 = vmin.f32 %v8182_v54, 6.0  ;;  %v8102_v2 = vadd.f32 %v19810_v44, %v8101_v26 }
 0x686   : > { %v15566_v29 = vpop.f32.mrf.mxu0 }
 0x687   : > { %v8183_v41 = vmax.f32 %v8102_v2, 0.0  ;;  %15621 = vmatmul.mubr.msk.f32.gmra.mxu1 %vm8226_vm5, %v8201_v38 }
 0x688   : > { %v8106_v34 = vpop.f32.mrf.mxu0  ;;  %15623 = vmatprep.mubr.msk.f32.mxu1 %vm16804_vm4, %v16803_v0 }
 0x689   : > { %v8202_v31 = vmin.f32 %v8183_v41, 6.0  ;;  %v8107_v5 = vadd.f32 %v19810_v44, %v8106_v34 }
 0x68a   : > { %v15569_v9 = vpop.f32.mrf.mxu0 }
 0x68b   : > { %v8184_v58 = vmax.f32 %v8107_v5, 0.0  ;;  %15624 = vmatmul.mubr.msk.f32.gmra.mxu1 %vm8226_vm5, %v8202_v31 }
 0x68c   : > { %v8111_v7 = vpop.f32.mrf.mxu0  ;;  %15626 = vmatprep.mubr.msk.f32.mxu1 %vm16804_vm4, %v16803_v0 }
 0x68d   : > { %v8203_v50 = vmin.f32 %v8184_v58, 6.0  ;;  %v8112_v39 = vadd.f32 %v19810_v44, %v8111_v7 }
 0x68e   : > { %v15572_v62 = vpop.f32.mrf.mxu0 }
 0x68f   : > { %v8185_v59 = vmax.f32 %v8112_v39, 0.0  ;;  %15627 = vmatmul.mubr.msk.f32.gmra.mxu1 %vm8226_vm5, %v8203_v50 }
 0x690   : > { %v8116_v3 = vpop.f32.mrf.mxu0  ;;  %15629 = vmatprep.mubr.msk.f32.mxu1 %vm16804_vm4, %v16803_v0 }
 0x691   : > { %v8204_v63 = vmin.f32 %v8185_v59, 6.0  ;;  %v8117_v46 = vadd.f32 %v19810_v44, %v8116_v3 }
 0x692   : > { %v15575_v40 = vpop.f32.mrf.mxu0 }
 0x693   : > { %v8186_v28 = vmax.f32 %v8117_v46, 0.0  ;;  %15630 = vmatmul.mubr.msk.f32.gmra.mxu1 %vm8226_vm5, %v8204_v63 }
 0x694   : > { %v8121_v8 = vpop.f32.mrf.mxu0  ;;  %15632 = vmatprep.mubr.msk.f32.mxu1 %vm16804_vm4, %v16803_v0 }
 0x695   : > { %v8205_v4 = vmin.f32 %v8186_v28, 6.0  ;;  %v8122_v57 = vadd.f32 %v19810_v44, %v8121_v8  ;;  %v8522_v28 = vld [vmem:[#allocation14 + $0x40] sm:$0xff]  ;;  %v8506_v8 = vld [vmem:[#allocation14 + $0x18] sm:$0xff] }
 0x696   : > { %v15578_v25 = vpop.f32.mrf.mxu0  ;;  %15678 = vmatpush3.msra.mxu0 %v8522_v28  ;;  %15703 = vmatpush3.msra.mxu1 %v8506_v8 }
 0x697   : > { %v8187_v33 = vmax.f32 %v8122_v57, 0.0  ;;  %15633 = vmatmul.mubr.msk.f32.gmra.mxu1 %vm8226_vm5, %v8205_v4  ;;  %v8505_v4 = vld [vmem:[#allocation14 + $0x10] sm:$0xff]  ;;  %15679 = vmatprep.subr.mxu0 %v16803_v0  ;;  %v8504_v57 = vld [vmem:[#allocation14 + $0x8] sm:$0xff] }
 0x698   : > { %v8126_v6 = vpop.f32.mrf.mxu0  ;;  %15635 = vmatprep.mubr.msk.f32.mxu1 %vm16804_vm4, %v16803_v0  ;;  %15704 = vmatprep.subr.mxu1 %v16803_v0  ;;  %v8520_v25 = vld [vmem:[#allocation14 + $0x30] sm:$0xff] }
 0x699   : > { %v8206_v53 = vmin.f32 %v8187_v33, 6.0  ;;  %v8127_v42 = vadd.f32 %v19810_v44, %v8126_v6  ;;  %15705 = vmatpush3.msra.mxu1 %v8505_v4  ;;  %v8503_v33 = vld [vmem:[#allocation14] sm:$0xff]  ;;  %v8510_v6 = vld [vmem:[#allocation3 + $0x1] ss:$2 sm:$0xff] }
 0x69a   : > { %v15581_v21 = vpop.f32.mrf.mxu0  ;;  %15706 = vmatprep.subr.mxu1 %v16803_v0 }
 0x69b   : > { %v8188_v1 = vmax.f32 %v8127_v42, 0.0  ;;  %15636 = vmatmul.mubr.msk.f32.gmra.mxu1 %vm8226_vm5, %v8206_v53  ;;  %v8494_v53 = vld [vmem:[#allocation3] ss:$2 sm:$0xff]  ;;  %v8751_v21 = vld [vmem:[#allocation14 + $0x80] sm:$0xff] }
 0x69c   : > { %v8131_v24 = vpop.f32.mrf.mxu0  ;;  %15638 = vmatprep.mubr.msk.f32.mxu1 %vm16804_vm4, %v16803_v0  ;;  %15707 = vmatpush3.msra.mxu1 %v8504_v57  ;;  %v8752_v42 = vld [vmem:[#allocation14 + $0x88] sm:$0xff] }
 0x69d   : > { %v8207_v17 = vmin.f32 %v8188_v1, 6.0  ;;  %v8132_v10 = vadd.f32 %v19810_v44, %v8131_v24  ;;  %15708 = vmatprep.subr.mxu1 %v16803_v0  ;;  %v8750_v1 = vld [vmem:[#allocation14 + $0x78] sm:$0xff] }
 0x69e   : > { %v15584_v13 = vpop.f32.mrf.mxu0  ;;  %15709 = vmatpush3.msra.mxu1 %v8503_v33  ;;  %v8879_v24 = vld [vmem:[#allocation14 + $0xb8] sm:$0xff] }
 0x69f   : > { %v8189_v19 = vmax.f32 %v8132_v10, 0.0  ;;  %15639 = vmatmul.mubr.msk.f32.gmra.mxu1 %vm8226_vm5, %v8207_v17  ;;  %15752 = vmatprep.subr.mxu1 %v16803_v0  ;;  %v8749_v17 = vld [vmem:[#allocation14 + $0x70] sm:$0xff]  ;;  %v8877_v13 = vld [vmem:[#allocation14 + $0xa8] sm:$0xff] }
 0x6a0   : > { %v8136_v30 = vpop.f32.mrf.mxu0  ;;  %15641 = vmatprep.mubr.msk.f32.mxu1 %vm16804_vm4, %v16803_v0  ;;  %v8878_v10 = vld [vmem:[#allocation14 + $0xb0] sm:$0xff] }
 0x6a1   : > { %v8208_v27 = vmin.f32 %v8189_v19, 6.0  ;;  %v8137_v45 = vadd.f32 %v19810_v44, %v8136_v30  ;;  %v8748_v19 = vld [vmem:[#allocation14 + $0x68] sm:$0xff]  ;;  %v8876_v30 = vld [vmem:[#allocation14 + $0xa0] sm:$0xff] }
 0x6a2   : > { %v15587_v37 = vpop.f32.mrf.mxu0 }
 0x6a3   : > { %v8190_v35 = vmax.f32 %v8137_v45, 0.0  ;;  %15642 = vmatmul.mubr.msk.f32.gmra.mxu1 %vm8226_vm5, %v8208_v27  ;;  %v8747_v27 = vld [vmem:[#allocation14 + $0x60] sm:$0xff]  ;;  %v8875_v45 = vld [vmem:[#allocation14 + $0x98] sm:$0xff]  ;;  %v8874_v37 = vld [vmem:[#allocation14 + $0x90] sm:$0xff] }
 0x6a4   : > { %v8141_v47 = vpop.f32.mrf.mxu0  ;;  %15644 = vmatprep.mubr.msk.f32.mxu1 %vm16804_vm4, %v16803_v0 }
 0x6a5   : > { %v8209_v56 = vmin.f32 %v8190_v35, 6.0  ;;  %v8142_v15 = vadd.f32 %v19810_v44, %v8141_v47  ;;  %v19915_v35 = vld [vmem:[#allocation12] ss:$0 sm:$0xff] }
 0x6a6   : > { %v15590_v60 = vpop.f32.mrf.mxu0 }
 0x6a7   : > { %v8191_v55 = vmax.f32 %v8142_v15, 0.0  ;;  %15645 = vmatmul.mubr.msk.f32.gmra.mxu1 %vm8226_vm5, %v8209_v56 }
 0x6a8   : > { %v8146_v18 = vpop.f32.mrf.mxu0  ;;  %15647 = vmatprep.mubr.msk.f32.mxu1 %vm16804_vm4, %v16803_v0 }
 0x6a9   : > { %v8210_v22 = vmin.f32 %v8191_v55, 6.0  ;;  %v8147_v20 = vadd.f32 %v19810_v44, %v8146_v18 }
 0x6aa   : > { %v15593_v23 = vpop.f32.mrf.mxu0 }
 0x6ab   : > { %v8192_v48 = vmax.f32 %v8147_v20, 0.0  ;;  %15648 = vmatmul.mubr.msk.f32.gmra.mxu1 %vm8226_vm5, %v8210_v22 }
 0x6ac   : > { %v8151_v16 = vpop.f32.mrf.mxu0  ;;  %15650 = vmatprep.mubr.msk.f32.mxu1 %vm16804_vm4, %v16803_v0 }
 0x6ad   : > { %v8211_v43 = vmin.f32 %v8192_v48, 6.0  ;;  %v8152_v49 = vadd.f32 %v19810_v44, %v8151_v16 }
 0x6ae   : > { %v15596_v61 = vpop.f32.mrf.mxu0 }
 0x6af   : > { %v8193_v36 = vmax.f32 %v8152_v49, 0.0  ;;  %15651 = vmatmul.mubr.msk.f32.gmra.mxu1 %vm8226_vm5, %v8211_v43 }
 0x6b0   : > { %v8156_v51 = vpop.f32.mrf.mxu0  ;;  %15653 = vmatprep.mubr.msk.f32.mxu1 %vm16804_vm4, %v16803_v0 }
 0x6b1   : > { %v8212_v52 = vmin.f32 %v8193_v36, 6.0  ;;  %v8157_v11 = vadd.f32 %v19810_v44, %v8156_v51 }
 0x6b2   : > { %v15599_v12 = vpop.f32.mrf.mxu0 }
 0x6b3   : > { %v8194_v32 = vmax.f32 %v8157_v11, 0.0  ;;  %15654 = vmatmul.mubr.msk.f32.gmra.mxu1 %vm8226_vm5, %v8212_v52 }
 0x6b4   : > { %v8161_v14 = vpop.f32.mrf.mxu0  ;;  %15656 = vmatprep.mubr.msk.f32.mxu1 %vm16804_vm4, %v16803_v0 }
 0x6b5   : > { %v8213_v54 = vmin.f32 %v8194_v32, 6.0  ;;  %v8162_v26 = vadd.f32 %v19810_v44, %v8161_v14 }
 0x6b6   : > { %v15602_v38 = vpop.f32.mrf.mxu0 }
 0x6b7   : > { %v8195_v2 = vmax.f32 %v8162_v26, 0.0  ;;  %15657 = vmatmul.mubr.msk.f32.gmra.mxu1 %vm8226_vm5, %v8213_v54 }
 0x6b8   : > { %v8166_v29 = vpop.f32.mrf.mxu0  ;;  %15659 = vmatprep.mubr.msk.f32.mxu1 %vm16804_vm4, %v16803_v0 }
 0x6b9   : > { %v8214_v41 = vmin.f32 %v8195_v2, 6.0  ;;  %v8167_v34 = vadd.f32 %v19810_v44, %v8166_v29 }
 0x6ba   : > { %v15605_v31 = vpop.f32.mrf.mxu0 }
 0x6bb   : > { %v8196_v5 = vmax.f32 %v8167_v34, 0.0  ;;  %15660 = vmatmul.mubr.msk.f32.gmra.mxu1 %vm8226_vm5, %v8214_v41 }
 0x6bc   : > { %v8171_v9 = vpop.f32.mrf.mxu0  ;;  %15662 = vmatprep.mubr.msk.f32.mxu1 %vm16804_vm4, %v16803_v0 }
 0x6bd   : > { %v8215_v58 = vmin.f32 %v8196_v5, 6.0  ;;  %v8172_v7 = vadd.f32 %v19810_v44, %v8171_v9 }
 0x6be   : > { %v15608_v50 = vpop.f32.mrf.mxu0 }
 0x6bf   : > { %v8197_v39 = vmax.f32 %v8172_v7, 0.0  ;;  %15663 = vmatmul.mubr.msk.f32.gmra.mxu1 %vm8226_vm5, %v8215_v58 }
 0x6c0   : > { %v8176_v62 = vpop.f32.mrf.mxu0  ;;  %15665 = vmatprep.mubr.msk.f32.mxu1 %vm16804_vm4, %v16803_v0 }
 0x6c1   : > { %v8216_v59 = vmin.f32 %v8197_v39, 6.0  ;;  %v8177_v3 = vadd.f32 %v19810_v44, %v8176_v62  ;;  %v8521_v44 = vld [vmem:[#allocation14 + $0x38] sm:$0xff] }
 0x6c2   : > { %v15611_v63 = vpop.f32.mrf.mxu0  ;;  %15680 = vmatpush3.msra.mxu0 %v8521_v44 }
 0x6c3   : > { %v8198_v46 = vmax.f32 %v8177_v3, 0.0  ;;  %15666 = vmatmul.mubr.msk.f32.gmra.mxu1 %vm8226_vm5, %v8216_v59  ;;  %15681 = vmatprep.subr.mxu0 %v16803_v0 }
 0x6c4   : > { %15668 = vmatprep.mubr.msk.f32.mxu1 %vm16804_vm4, %v16803_v0  ;;  %15682 = vmatpush3.msra.mxu0 %v8520_v25 }
 0x6c5   : > { %v8217_v40 = vmin.f32 %v8198_v46, 6.0  ;;  %15684 = vmatmul.mubr.msk.f32.vlgmr.msra.gmra.mxu0 %vm8461_vm1, %v8510_v6  ;;  %15725 = vmatprep.subr.mxu0 %v16803_v0 }
 0x6c6   : > { %15686 = vmatprep.mubr.msk.f32.mxu0 %vm16804_vm4, %v16803_v0  ;;  %15726 = vmatpush3.msra.mxu0 %v8752_v42 }
 0x6c7   : > { %15669 = vmatmul.mubr.msk.f32.gmra.mxu1 %vm8226_vm5, %v8217_v40  ;;  %15727 = vmatprep.subr.mxu0 %v16803_v0 }
 0x6c8   : > { %15710 = vmatprep.mubr.msk.f32.mxu1 %vm16804_vm4, %v16803_v0  ;;  %15728 = vmatpush3.msra.mxu0 %v8751_v21 }
 0x6c9   : > { %15729 = vmatprep.subr.mxu0 %v16803_v0 }
 0x6ca   : > { %15730 = vmatpush3.msra.mxu0 %v8750_v1 }
 0x6cb   : > { %15711 = vmatmul.mubr.msk.f32.vlgmr.msra.gmra.mxu1 %vm8461_vm1, %v8494_v53  ;;  %15731 = vmatprep.subr.mxu0 %v16803_v0 }
 0x6cc   : > { %15713 = vmatprep.mubr.msk.f32.mxu1 %vm16804_vm4, %v16803_v0  ;;  %15753 = vmatpush3.msra.mxu1 %v8879_v24 }
 0x6cd   : > { %15732 = vmatpush3.msra.mxu0 %v8749_v17  ;;  %15754 = vmatprep.subr.mxu1 %v16803_v0 }
 0x6ce   : > { %15733 = vmatprep.subr.mxu0 %v16803_v0  ;;  %15755 = vmatpush3.msra.mxu1 %v8878_v10 }
 0x6cf   : > { %15756 = vmatprep.subr.mxu1 %v16803_v0  ;;  %15734 = vmatpush3.msra.mxu0 %v8748_v19 }
 0x6d0   : > { %15757 = vmatpush3.msra.mxu1 %v8877_v13  ;;  %15735 = vmatprep.subr.mxu0 %v16803_v0 }
 0x6d1   : > { %15758 = vmatprep.subr.mxu1 %v16803_v0  ;;  %15736 = vmatpush3.msra.mxu0 %v8747_v27 }
 0x6d2   : > { %15759 = vmatpush3.msra.mxu1 %v8876_v30  ;;  %15779 = vmatprep.subr.mxu0 %v16803_v0 }
 0x6d3   : > { %15760 = vmatprep.subr.mxu1 %v16803_v0 }
 0x6d4   : > { %15761 = vmatpush3.msra.mxu1 %v8875_v45 }
 0x6d5   : > { %15762 = vmatprep.subr.mxu1 %v16803_v0 }
 0x6d6   : > { %15763 = vmatpush3.msra.mxu1 %v8874_v37 }
 0x6d7   : > { %15806 = vmatprep.subr.mxu1 %v16803_v0 }
 0x73f   : > { %v8350_v47 = vpop.f32.mrf.mxu1 }
 0x740   : > { %v8351_v56 = vadd.f32 %v19915_v35, %v8350_v47 }
 0x741   : > { %v15616_v15 = vpop.f32.mrf.mxu1 }
 0x742   : > { %v8437_v60 = vmax.f32 %v8351_v56, 0.0  ;;  %v8737_v56 = vld [vmem:[#allocation3 + $0x2] ss:$2 sm:$0xff]  ;;  %v8864_v15 = vld [vmem:[#allocation3 + $0x3] ss:$2 sm:$0xff] }
 0x743   : > { %v8355_v55 = vpop.f32.mrf.mxu1 }
 0x744   : > { %v8449_v18 = vmin.f32 %v8437_v60, 6.0  ;;  %v9006_v55 = vld [vmem:[#allocation14 + $0xe8] sm:$0xff] }
 0x745   : > { %v15619_v22 = vpop.f32.mrf.mxu1 }
 0x746   : > { %8480 = vst.msk [vmem:[#allocation3 + $0x1a] sm:$0xff] %vm8461_vm1, %v8449_v18  ;;  %v9005_v22 = vld [vmem:[#allocation14 + $0xe0] sm:$0xff] }
 0x747   : > { %v8359_v20 = vpop.f32.mrf.mxu1 }
 0x748   : > { %v8360_v23 = vadd.f32 %v19915_v35, %v8359_v20  ;;  %v9133_v20 = vld [vmem:[#allocation14 + $0x118] sm:$0xff] }
 0x749   : > { %v15622_v48 = vpop.f32.mrf.mxu1 }
 0x74a   : > { %v8438_v16 = vmax.f32 %v8360_v23, 0.0 }
 0x74b   : > { %v8364_v43 = vpop.f32.mrf.mxu1 }
 0x74c   : > { %v8450_v49 = vmin.f32 %v8438_v16, 6.0  ;;  %v8365_v61 = vadd.f32 %v19915_v35, %v8364_v43 }
 0x74d   : > { %v15625_v36 = vpop.f32.mrf.mxu1  ;;  %v8512_v51 = vld [vmem:[#allocation3 + $0x11] ss:$2 sm:$0xff]  ;;  %v8496_v52 = vld [vmem:[#allocation3 + $0x10] ss:$2 sm:$0xff] }
 0x74e   : > { %8482 = vst.msk [vmem:[#allocation3 + $0x22] sm:$0xf0] %vm8481_vm6, %v8450_v49  ;;  %v8439_v11 = vmax.f32 %v8365_v61, 0.0  ;;  %15687 = vmatmul.mubr.msk.f32.gmra.mxu0 %vm8461_vm1, %v8512_v51  ;;  %15714 = vmatmul.mubr.msk.f32.gmra.mxu1 %vm8461_vm1, %v8496_v52  ;;  %v8739_v43 = vld [vmem:[#allocation3 + $0x12] ss:$2 sm:$0xff] }
 0x74f   : > { %v8369_v12 = vpop.f32.mrf.mxu1  ;;  %15689 = vmatprep.mubr.msk.f32.mxu0 %vm16804_vm4, %v16803_v0  ;;  %15716 = vmatprep.mubr.msk.f32.mxu1 %vm16804_vm4, %v16803_v0  ;;  %v8866_v49 = vld [vmem:[#allocation3 + $0x13] ss:$2 sm:$0xff] }
 0x750   : > { %v8451_v32 = vmin.f32 %v8439_v11, 6.0  ;;  %v9004_v61 = vld [vmem:[#allocation14 + $0xd8] sm:$0xff]  ;;  %v9003_v11 = vld [vmem:[#allocation14 + $0xd0] sm:$0xff] }
 0x751   : > { %v15628_v14 = vpop.f32.mrf.mxu1 }
 0x752   : > { %8484 = vst.msk [vmem:[#allocation3 + $0x2a] sm:$0xf] %vm8483_vm7, %v8451_v32 }
 0x753   : > { %v8373_v54 = vpop.f32.mrf.mxu1 }
 0x754   : > { %v8374_v26 = vadd.f32 %v19915_v35, %v8373_v54  ;;  %v9132_v54 = vld [vmem:[#allocation14 + $0x110] sm:$0xff] }
 0x755   : > { %v15631_v38 = vpop.f32.mrf.mxu1 }
 0x756   : > { %v8440_v2 = vmax.f32 %v8374_v26, 0.0 }
 0x757   : > { %v8378_v29 = vpop.f32.mrf.mxu1 }
 0x758   : > { %v8452_v41 = vmin.f32 %v8440_v2, 6.0  ;;  %v9131_v2 = vld [vmem:[#allocation14 + $0x108] sm:$0xff] }
 0x759   : > { %v15634_v34 = vpop.f32.mrf.mxu1  ;;  %v8514_v31 = vld [vmem:[#allocation3 + $0x21] ss:$2 sm:$0xff]  ;;  %v8498_v5 = vld [vmem:[#allocation3 + $0x20] ss:$2 sm:$0xff] }
 0x75a   : > { %8485 = vst.msk [vmem:[#allocation3 + $0x32] sm:$0xff] %vm8461_vm1, %v8452_v41  ;;  %15690 = vmatmul.mubr.msk.f32.gmra.mxu0 %vm8461_vm1, %v8514_v31  ;;  %15717 = vmatmul.mubr.msk.f32.gmra.mxu1 %vm8461_vm1, %v8498_v5  ;;  %v8741_v32 = vld [vmem:[#allocation3 + $0x22] ss:$2 sm:$0xff]  ;;  %v8868_v14 = vld [vmem:[#allocation3 + $0x23] ss:$2 sm:$0xff] }
 0x75b   : > { %v8382_v9 = vpop.f32.mrf.mxu1  ;;  %15692 = vmatprep.mubr.msk.f32.mxu0 %vm16804_vm4, %v16803_v0  ;;  %15719 = vmatprep.mubr.msk.f32.mxu1 %vm16804_vm4, %v16803_v0  ;;  %v9002_v29 = vld [vmem:[#allocation14 + $0xc8] sm:$0xff] }
 0x75c   : > { %v8383_v58 = vadd.f32 %v19915_v35, %v8382_v9  ;;  %v9130_v9 = vld [vmem:[#allocation14 + $0x100] sm:$0xff] }
 0x75d   : > { %v15637_v7 = vpop.f32.mrf.mxu1 }
 0x75e   : > { %v8441_v50 = vmax.f32 %v8383_v58, 0.0 }
 0x75f   : > { %v8387_v39 = vpop.f32.mrf.mxu1 }
 0x760   : > { %v8453_v62 = vmin.f32 %v8441_v50, 6.0  ;;  %v8388_v59 = vadd.f32 %v19915_v35, %v8387_v39  ;;  %v9001_v39 = vld [vmem:[#allocation14 + $0xc0] sm:$0xff] }
 0x761   : > { %v15640_v3 = vpop.f32.mrf.mxu1 }
 0x762   : > { %8486 = vst.msk [vmem:[#allocation3 + $0x3a] sm:$0xf0] %vm8481_vm6, %v8453_v62  ;;  %v8442_v63 = vmax.f32 %v8388_v59, 0.0 }
 0x763   : > { %v8392_v46 = vpop.f32.mrf.mxu1 }
 0x764   : > { %v8454_v40 = vmin.f32 %v8442_v63, 6.0  ;;  %v9129_v63 = vld [vmem:[#allocation14 + $0xf8] sm:$0xff] }
 0x765   : > { %v15643_v28 = vpop.f32.mrf.mxu1 }
 0x766   : > { %8487 = vst.msk [vmem:[#allocation3 + $0x42] sm:$0xf] %vm8483_vm7, %v8454_v40  ;;  %v8991_v28 = vld [vmem:[#allocation3 + $0x4] ss:$2 sm:$0xff] }
 0x767   : > { %v8396_v8 = vpop.f32.mrf.mxu1 }
 0x768   : > { %v8397_v4 = vadd.f32 %v19915_v35, %v8396_v8  ;;  %v9260_v8 = vld [vmem:[#allocation14 + $0x148] sm:$0xff] }
 0x769   : > { %v15646_v44 = vpop.f32.mrf.mxu1  ;;  %v8516_v57 = vld [vmem:[#allocation3 + $0x31] ss:$2 sm:$0xff]  ;;  %v8500_v25 = vld [vmem:[#allocation3 + $0x30] ss:$2 sm:$0xff] }
 0x76a   : > { %v8443_v33 = vmax.f32 %v8397_v4, 0.0  ;;  %15693 = vmatmul.mubr.msk.f32.gmra.mxu0 %vm8461_vm1, %v8516_v57  ;;  %15720 = vmatmul.mubr.msk.f32.gmra.mxu1 %vm8461_vm1, %v8500_v25  ;;  %v8743_v34 = vld [vmem:[#allocation3 + $0x32] ss:$2 sm:$0xff]  ;;  %v8870_v31 = vld [vmem:[#allocation3 + $0x33] ss:$2 sm:$0xff] }
 0x76b   : > { %v8401_v6 = vpop.f32.mrf.mxu1  ;;  %15695 = vmatprep.mubr.msk.f32.mxu0 %vm16804_vm4, %v16803_v0  ;;  %15722 = vmatprep.mubr.msk.f32.mxu1 %vm16804_vm4, %v16803_v0  ;;  %v9118_v4 = vld [vmem:[#allocation3 + $0xc] ss:$2 sm:$0xff] }
 0x76c   : > { %v8455_v53 = vmin.f32 %v8443_v33, 6.0  ;;  %v9387_v44 = vld [vmem:[#allocation14 + $0x178] sm:$0xff]  ;;  %v9259_v57 = vld [vmem:[#allocation14 + $0x140] sm:$0xff]  ;;  %v9120_v33 = vld [vmem:[#allocation3 + $0x1c] ss:$2 sm:$0xff] }
 0x76d   : > { %v15649_v42 = vpop.f32.mrf.mxu1  ;;  %v8993_v25 = vld [vmem:[#allocation3 + $0x14] ss:$2 sm:$0xff]  ;;  %v9258_v6 = vld [vmem:[#allocation14 + $0x138] sm:$0xff] }
 0x76e   : > { %8488 = vst.msk [vmem:[#allocation3 + $0x4a] sm:$0xff] %vm8461_vm1, %v8455_v53  ;;  %v9257_v53 = vld [vmem:[#allocation14 + $0x130] sm:$0xff] }
 0x76f   : > { %v8405_v21 = vpop.f32.mrf.mxu1  ;;  %v8995_v42 = vld [vmem:[#allocation3 + $0x24] ss:$2 sm:$0xff] }
 0x770   : > { %v8406_v1 = vadd.f32 %v19915_v35, %v8405_v21 }
 0x771   : > { %v15652_v24 = vpop.f32.mrf.mxu1 }
 0x772   : > { %v8444_v17 = vmax.f32 %v8406_v1, 0.0  ;;  %v9122_v24 = vld [vmem:[#allocation3 + $0x2c] ss:$2 sm:$0xff] }
 0x773   : > { %v8410_v10 = vpop.f32.mrf.mxu1 }
 0x774   : > { %v8456_v13 = vmin.f32 %v8444_v17, 6.0  ;;  %v8411_v19 = vadd.f32 %v19915_v35, %v8410_v10  ;;  %v9386_v17 = vld [vmem:[#allocation14 + $0x170] sm:$0xff] }
 0x775   : > { %v15655_v30 = vpop.f32.mrf.mxu1  ;;  %v8518_v27 = vld [vmem:[#allocation3 + $0x41] ss:$2 sm:$0xff]  ;;  %v8502_v45 = vld [vmem:[#allocation3 + $0x40] ss:$2 sm:$0xff] }
 0x776   : > { %8489 = vst.msk [vmem:[#allocation3 + $0x52] sm:$0xf0] %vm8481_vm6, %v8456_v13  ;;  %v8445_v37 = vmax.f32 %v8411_v19, 0.0  ;;  %15696 = vmatmul.mubr.msk.f32.gmra.mxu0 %vm8461_vm1, %v8518_v27  ;;  %15723 = vmatmul.mubr.msk.f32.gmra.mxu1 %vm8461_vm1, %v8502_v45  ;;  %v8745_v59 = vld [vmem:[#allocation3 + $0x42] ss:$2 sm:$0xff] }
 0x777   : > { %v8415_v47 = vpop.f32.mrf.mxu1  ;;  %15737 = vmatprep.mubr.msk.f32.mxu0 %vm16804_vm4, %v16803_v0  ;;  %15764 = vmatprep.mubr.msk.f32.mxu1 %vm16804_vm4, %v16803_v0  ;;  %v8872_v3 = vld [vmem:[#allocation3 + $0x43] ss:$2 sm:$0xff]  ;;  %v8997_v30 = vld [vmem:[#allocation3 + $0x34] ss:$2 sm:$0xff] }
 0x778   : > { %v8457_v60 = vmin.f32 %v8445_v37, 6.0  ;;  %v9385_v27 = vld [vmem:[#allocation14 + $0x168] sm:$0xff]  ;;  %v9384_v47 = vld [vmem:[#allocation14 + $0x160] sm:$0xff] }
 0x779   : > { %v15658_v18 = vpop.f32.mrf.mxu1  ;;  %v9256_v45 = vld [vmem:[#allocation14 + $0x128] sm:$0xff] }
 0x77a   : > { %8490 = vst.msk [vmem:[#allocation3 + $0x5a] sm:$0xf] %vm8483_vm7, %v8457_v60  ;;  %15738 = vmatmul.mubr.msk.f32.vlgmr.msra.gmra.mxu0 %vm8461_vm1, %v8737_v56  ;;  %15765 = vmatmul.mubr.msk.f32.vlgmr.msra.gmra.mxu1 %vm8461_vm1, %v8864_v15  ;;  %v9124_v37 = vld [vmem:[#allocation3 + $0x3c] ss:$2 sm:$0xff]  ;;  %v9255_v56 = vld [vmem:[#allocation14 + $0x120] sm:$0xff] }
 0x77b   : > { %15780 = vmatpush3.msra.mxu0 %v9006_v55  ;;  %v8419_v23 = vpop.f32.mrf.mxu1  ;;  %15740 = vmatprep.mubr.msk.f32.mxu0 %vm16804_vm4, %v16803_v0  ;;  %v8999_v15 = vld [vmem:[#allocation3 + $0x44] ss:$2 sm:$0xff] }
 0x77c   : > { %v8420_v48 = vadd.f32 %v19915_v35, %v8419_v23  ;;  %15767 = vmatprep.mubr.msk.f32.mxu1 %vm16804_vm4, %v16803_v0  ;;  %15781 = vmatprep.subr.mxu0 %v16803_v0  ;;  %v9383_v55 = vld [vmem:[#allocation14 + $0x158] sm:$0xff]  ;;  %v9382_v18 = vld [vmem:[#allocation14 + $0x150] sm:$0xff] }
 0x77d   : > { %v15661_v16 = vpop.f32.mrf.mxu1  ;;  %15782 = vmatpush3.msra.mxu0 %v9005_v22  ;;  %15807 = vmatpush3.msra.mxu1 %v9133_v20  ;;  %v9514_v22 = vld [vmem:[#allocation14 + $0x1a8] sm:$0xff]  ;;  %v9245_v20 = vld [vmem:[#allocation3 + $0xd] ss:$2 sm:$0xff] }
 0x77e   : > { %v8446_v36 = vmax.f32 %v8420_v48, 0.0  ;;  %15741 = vmatmul.mubr.msk.f32.gmra.mxu0 %vm8461_vm1, %v8739_v43  ;;  %15768 = vmatmul.mubr.msk.f32.gmra.mxu1 %vm8461_vm1, %v8866_v49  ;;  %v9372_v23 = vld [vmem:[#allocation3 + $0xe] ss:$2 sm:$0xff]  ;;  %v9247_v43 = vld [vmem:[#allocation3 + $0x1d] ss:$2 sm:$0xff] }
 0x77f   : > { %v8424_v51 = vpop.f32.mrf.mxu1  ;;  %15783 = vmatprep.subr.mxu0 %v16803_v0  ;;  %15743 = vmatprep.mubr.msk.f32.mxu0 %vm16804_vm4, %v16803_v0  ;;  %v9637_v48 = vld [vmem:[#allocation14 + $0x1d8] sm:$0xff]  ;;  %v9513_v16 = vld [vmem:[#allocation14 + $0x1a0] sm:$0xff] }
 0x780   : > { %v8458_v52 = vmin.f32 %v8446_v36, 6.0  ;;  %15770 = vmatprep.mubr.msk.f32.mxu1 %vm16804_vm4, %v16803_v0  ;;  %15784 = vmatpush3.msra.mxu0 %v9004_v61  ;;  %v9374_v49 = vld [vmem:[#allocation3 + $0x1e] ss:$2 sm:$0xff]  ;;  %v9249_v51 = vld [vmem:[#allocation3 + $0x2d] ss:$2 sm:$0xff] }
 0x781   : > { %v15664_v12 = vpop.f32.mrf.mxu1  ;;  %15785 = vmatprep.subr.mxu0 %v16803_v0  ;;  %15808 = vmatprep.subr.mxu1 %v16803_v0  ;;  %v9126_v60 = vld [vmem:[#allocation3 + $0x4c] ss:$2 sm:$0xff]  ;;  %v9511_v36 = vld [vmem:[#allocation14 + $0x190] sm:$0xff] }
 0x782   : > { %8491 = vst.msk [vmem:[#allocation3 + $0x62] sm:$0xff] %vm8461_vm1, %v8458_v52  ;;  %15744 = vmatmul.mubr.msk.f32.gmra.mxu0 %vm8461_vm1, %v8741_v32  ;;  %15771 = vmatmul.mubr.msk.f32.gmra.mxu1 %vm8461_vm1, %v8868_v14  ;;  %v9512_v61 = vld [vmem:[#allocation14 + $0x198] sm:$0xff]  ;;  %v9251_v12 = vld [vmem:[#allocation3 + $0x3d] ss:$2 sm:$0xff] }
 0x783   : > { %v8428_v26 = vpop.f32.mrf.mxu1  ;;  %15786 = vmatpush3.msra.mxu0 %v9003_v11  ;;  %15746 = vmatprep.mubr.msk.f32.mxu0 %vm16804_vm4, %v16803_v0  ;;  %v9376_v52 = vld [vmem:[#allocation3 + $0x2e] ss:$2 sm:$0xff]  ;;  %v9636_v11 = vld [vmem:[#allocation14 + $0x1d0] sm:$0xff] }
 0x784   : > { %v8429_v38 = vadd.f32 %v19915_v35, %v8428_v26  ;;  %15773 = vmatprep.mubr.msk.f32.mxu1 %vm16804_vm4, %v16803_v0  ;;  %15809 = vmatpush3.msra.mxu1 %v9132_v54  ;;  %v9635_v32 = vld [vmem:[#allocation14 + $0x1c8] sm:$0xff]  ;;  %v9634_v26 = vld [vmem:[#allocation14 + $0x1c0] sm:$0xff] }
 0x785   : > { %v15667_v41 = vpop.f32.mrf.mxu1  ;;  %15810 = vmatprep.subr.mxu1 %v16803_v0  ;;  %15787 = vmatprep.subr.mxu0 %v16803_v0  ;;  %v8607_v21 = vpop.f32.mrf.mxu0  ;;  %v9510_v14 = vld [vmem:[#allocation14 + $0x188] sm:$0xff] }
 0x786   : > { %v8447_v5 = vmax.f32 %v8429_v38, 0.0  ;;  %15747 = vmatmul.mubr.msk.f32.gmra.mxu0 %vm8461_vm1, %v8743_v34  ;;  %15774 = vmatmul.mubr.msk.f32.gmra.mxu1 %vm8461_vm1, %v8870_v31  ;;  %v9378_v54 = vld [vmem:[#allocation3 + $0x3e] ss:$2 sm:$0xff]  ;;  %v9509_v38 = vld [vmem:[#allocation14 + $0x180] sm:$0xff] }
 0x787   : > { %v8433_v58 = vpop.f32.mrf.mxu1  ;;  %15811 = vmatpush3.msra.mxu1 %v9131_v2  ;;  %15788 = vmatpush3.msra.mxu0 %v9002_v29  ;;  %v15685_v13 = vpop.f32.mrf.mxu0  ;;  %v9253_v2 = vld [vmem:[#allocation3 + $0x4d] ss:$2 sm:$0xff]  ;;  %v9380_v29 = vld [vmem:[#allocation3 + $0x4e] ss:$2 sm:$0xff]  ;;  %v9632_v34 = vld [vmem:[#allocation14 + $0x1b0] sm:$0xff] }
 0x788   : > { %v8459_v7 = vmin.f32 %v8447_v5, 6.0  ;;  %v8434_v50 = vadd.f32 %v19915_v35, %v8433_v58  ;;  %15812 = vmatprep.subr.mxu1 %v16803_v0  ;;  %15749 = vmatprep.mubr.msk.f32.mxu0 %vm16804_vm4, %v16803_v0  ;;  %v9128_v35 = vld [vmem:[#allocation14 + $0xf0] sm:$0xff]  ;;  %v9633_v41 = vld [vmem:[#allocation14 + $0x1b8] sm:$0xff]  ;;  %v9764_v31 = vld [vmem:[#allocation14 + $0x208] sm:$0xff] }
 0x789   : > { %v15670_v62 = vpop.f32.mrf.mxu1  ;;  %15776 = vmatprep.mubr.msk.f32.mxu1 %vm16804_vm4, %v16803_v0  ;;  %15813 = vmatpush3.msra.mxu1 %v9130_v9  ;;  %v9499_v5 = vld [vmem:[#allocation3 + $0xf] ss:$2 sm:$0xff]  ;;  %v9625_v9 = vld [vmem:[#allocation3 + $0x10] ss:$2 sm:$0xff] }
 0x78a   : > { %8492 = vst.msk [vmem:[#allocation3 + $0x6a] sm:$0xf0] %vm8481_vm6, %v8459_v7  ;;  %v8448_v46 = vmax.f32 %v8434_v50, 0.0  ;;  %15750 = vmatmul.mubr.msk.f32.gmra.mxu0 %vm8461_vm1, %v8745_v59  ;;  %15777 = vmatmul.mubr.msk.f32.gmra.mxu1 %vm8461_vm1, %v8872_v3  ;;  %v9891_v58 = vld [vmem:[#allocation14 + $0x238] sm:$0xff]  ;;  %v9763_v7 = vld [vmem:[#allocation14 + $0x200] sm:$0xff]  ;;  %v9761_v59 = vld [vmem:[#allocation14 + $0x1f0] sm:$0xff] }
 0x78b   : > { %15789 = vmatprep.subr.mxu0 %v16803_v0  ;;  %15814 = vmatprep.subr.mxu1 %v16803_v0  ;;  %v8712_v1 = vpop.f32.mrf.mxu1  ;;  %v9501_v50 = vld [vmem:[#allocation3 + $0x1f] ss:$2 sm:$0xff]  ;;  %v9503_v3 = vld [vmem:[#allocation3 + $0x2f] ss:$2 sm:$0xff] }
 0x78c   : > { %v8460_v40 = vmin.f32 %v8448_v46, 6.0  ;;  %15790 = vmatpush3.msra.mxu0 %v9001_v39  ;;  %15815 = vmatpush3.msra.mxu1 %v9129_v63  ;;  %v20023_v10 = vadd.f32 %v8712_v1, %v8607_v21  ;;  %v9626_v39 = vld [vmem:[#allocation3 + $0x20] ss:$2 sm:$0xff]  ;;  %v9627_v63 = vld [vmem:[#allocation3 + $0x30] ss:$2 sm:$0xff] }
 0x78d   : > { %15816 = vmatprep.subr.mxu1 %v16803_v0  ;;  %15791 = vmatprep.mubr.msk.f32.mxu0 %vm16804_vm4, %v16803_v0  ;;  %v15712_v19 = vpop.f32.mrf.mxu1  ;;  %v9762_v62 = vld [vmem:[#allocation14 + $0x1f8] sm:$0xff]  ;;  %v9890_v46 = vld [vmem:[#allocation14 + $0x230] sm:$0xff] }
 0x78e   : > { %8493 = vst.msk [vmem:[#allocation3 + $0x72] sm:$0xf] %vm8483_vm7, %v8460_v40  ;;  %15817 = vmatpush3.msra.mxu1 %v9128_v35  ;;  %15818 = vmatprep.mubr.msk.f32.mxu1 %vm16804_vm4, %v16803_v0  ;;  %v9505_v35 = vld [vmem:[#allocation3 + $0x3f] ss:$2 sm:$0xff] }
 0x78f   : > { %15833 = vmatprep.subr.mxu0 %v16803_v0  ;;  %15792 = vmatmul.mubr.msk.f32.vlgmr.msra.gmra.mxu0 %vm8461_vm1, %v8991_v28  ;;  %v9889_v40 = vld [vmem:[#allocation14 + $0x228] sm:$0xff]  ;;  %v10145_v1 = vld [vmem:[#allocation14 + $0x298] sm:$0xff] }
 0x790   : > { %15819 = vmatmul.mubr.msk.f32.vlgmr.msra.gmra.mxu1 %vm8461_vm1, %v9118_v4  ;;  %15834 = vmatpush3.msra.mxu0 %v9260_v8  ;;  %v9760_v28 = vld [vmem:[#allocation14 + $0x1e8] sm:$0xff]  ;;  %v9888_v4 = vld [vmem:[#allocation14 + $0x220] sm:$0xff]  ;;  %v10016_v19 = vld [vmem:[#allocation14 + $0x258] sm:$0xff] }
 0x791   : > { %15794 = vmatprep.mubr.msk.f32.mxu0 %vm16804_vm4, %v16803_v0  ;;  %15821 = vmatprep.mubr.msk.f32.mxu1 %vm16804_vm4, %v16803_v0  ;;  %v9628_v8 = vld [vmem:[#allocation3 + $0x40] ss:$2 sm:$0xff]  ;;  %v9876_v21 = vld [vmem:[#allocation3 + $0x19] ss:$2 sm:$0xff]  ;;  %v9878_v13 = vld [vmem:[#allocation3 + $0x29] ss:$2 sm:$0xff] }
 0x792   : > { %15835 = vmatprep.subr.mxu0 %v16803_v0  ;;  %15860 = vmatprep.subr.mxu1 %v16803_v0 }
 0x793   : > { %15795 = vmatmul.mubr.msk.f32.gmra.mxu0 %vm8461_vm1, %v8993_v25  ;;  %15861 = vmatpush3.msra.mxu1 %v9387_v44  ;;  %v9759_v44 = vld [vmem:[#allocation14 + $0x1e0] sm:$0xff] }
 0x794   : > { %15822 = vmatmul.mubr.msk.f32.gmra.mxu1 %vm8461_vm1, %v9120_v33  ;;  %15836 = vmatpush3.msra.mxu0 %v9259_v57  ;;  %v9507_v57 = vld [vmem:[#allocation3 + $0x4f] ss:$2 sm:$0xff]  ;;  %v9630_v25 = vld [vmem:[#allocation3 + $0x50] ss:$2 sm:$0xff] }
 0x795   : > { %15837 = vmatprep.subr.mxu0 %v16803_v0  ;;  %15797 = vmatprep.mubr.msk.f32.mxu0 %vm16804_vm4, %v16803_v0  ;;  %v9887_v33 = vld [vmem:[#allocation14 + $0x218] sm:$0xff] }
 0x796   : > { %15824 = vmatprep.mubr.msk.f32.mxu1 %vm16804_vm4, %v16803_v0  ;;  %15838 = vmatpush3.msra.mxu0 %v9258_v6  ;;  %v9886_v6 = vld [vmem:[#allocation14 + $0x210] sm:$0xff] }
 0x797   : > { %15798 = vmatmul.mubr.msk.f32.gmra.mxu0 %vm8461_vm1, %v8995_v42  ;;  %15839 = vmatprep.subr.mxu0 %v16803_v0  ;;  %v9749_v42 = vld [vmem:[#allocation3 + $0x18] ss:$2 sm:$0xff] }
 0x798   : > { %15825 = vmatmul.mubr.msk.f32.gmra.mxu1 %vm8461_vm1, %v9122_v24  ;;  %15840 = vmatpush3.msra.mxu0 %v9257_v53  ;;  %v10018_v53 = vld [vmem:[#allocation14 + $0x268] sm:$0xff]  ;;  %v10017_v24 = vld [vmem:[#allocation14 + $0x260] sm:$0xff] }
 0x799   : > { %15862 = vmatprep.subr.mxu1 %v16803_v0  ;;  %15800 = vmatprep.mubr.msk.f32.mxu0 %vm16804_vm4, %v16803_v0 }
 0x79a   : > { %15827 = vmatprep.mubr.msk.f32.mxu1 %vm16804_vm4, %v16803_v0  ;;  %15863 = vmatpush3.msra.mxu1 %v9386_v17  ;;  %v9751_v17 = vld [vmem:[#allocation3 + $0x28] ss:$2 sm:$0xff] }
 0x79b   : > { %15801 = vmatmul.mubr.msk.f32.gmra.mxu0 %vm8461_vm1, %v8997_v30  ;;  %15864 = vmatprep.subr.mxu1 %v16803_v0  ;;  %v10015_v30 = vld [vmem:[#allocation14 + $0x250] sm:$0xff] }
 0x79c   : > { %15828 = vmatmul.mubr.msk.f32.gmra.mxu1 %vm8461_vm1, %v9124_v37  ;;  %15841 = vmatprep.subr.mxu0 %v16803_v0  ;;  %v10144_v37 = vld [vmem:[#allocation14 + $0x290] sm:$0xff] }
 0x79d   : > { %15865 = vmatpush3.msra.mxu1 %v9385_v27  ;;  %15842 = vmatpush3.msra.mxu0 %v9256_v45  ;;  %v9753_v27 = vld [vmem:[#allocation3 + $0x38] ss:$2 sm:$0xff]  ;;  %v9880_v45 = vld [vmem:[#allocation3 + $0x39] ss:$2 sm:$0xff] }
 0x79e   : > { %15866 = vmatprep.subr.mxu1 %v16803_v0  ;;  %15803 = vmatprep.mubr.msk.f32.mxu0 %vm16804_vm4, %v16803_v0 }
 0x79f   : > { %15830 = vmatprep.mubr.msk.f32.mxu1 %vm16804_vm4, %v16803_v0  ;;  %15867 = vmatpush3.msra.mxu1 %v9384_v47  ;;  %v9755_v47 = vld [vmem:[#allocation3 + $0x48] ss:$2 sm:$0xff] }
 0x7a0   : > { %15804 = vmatmul.mubr.msk.f32.gmra.mxu0 %vm8461_vm1, %v8999_v15  ;;  %15831 = vmatmul.mubr.msk.f32.gmra.mxu1 %vm8461_vm1, %v9126_v60  ;;  %v10014_v15 = vld [vmem:[#allocation14 + $0x248] sm:$0xff]  ;;  %v9882_v60 = vld [vmem:[#allocation3 + $0x49] ss:$2 sm:$0xff] }
 0x7a1   : > { %15843 = vmatprep.subr.mxu0 %v16803_v0  ;;  %15868 = vmatprep.subr.mxu1 %v16803_v0 }
 0x7a2   : > { %15844 = vmatpush3.msra.mxu0 %v9255_v56  ;;  %15869 = vmatpush3.msra.mxu1 %v9383_v55  ;;  %v10143_v56 = vld [vmem:[#allocation14 + $0x288] sm:$0xff]  ;;  %v10142_v55 = vld [vmem:[#allocation14 + $0x280] sm:$0xff] }
 0x7a3   : > { %15870 = vmatprep.subr.mxu1 %v16803_v0  ;;  %15845 = vmatprep.mubr.msk.f32.mxu0 %vm16804_vm4, %v16803_v0 }
 0x7a4   : > { %15871 = vmatpush3.msra.mxu1 %v9382_v18  ;;  %15872 = vmatprep.mubr.msk.f32.mxu1 %vm16804_vm4, %v16803_v0  ;;  %v10013_v18 = vld [vmem:[#allocation14 + $0x240] sm:$0xff] }
 0x7a5   : > { %15887 = vmatprep.subr.mxu0 %v16803_v0  ;;  %15846 = vmatmul.mubr.msk.f32.vlgmr.msra.gmra.mxu0 %vm8461_vm1, %v9245_v20  ;;  %v9884_v20 = vld [vmem:[#allocation3 + $0x59] ss:$2 sm:$0xff] }
 0x7a6   : > { %15873 = vmatmul.mubr.msk.f32.vlgmr.msra.gmra.mxu1 %vm8461_vm1, %v9372_v23  ;;  %15888 = vmatpush3.msra.mxu0 %v9514_v22  ;;  %v9757_v22 = vld [vmem:[#allocation3 + $0x58] ss:$2 sm:$0xff]  ;;  %v10141_v23 = vld [vmem:[#allocation14 + $0x278] sm:$0xff] }
 0x7a7   : > { %15848 = vmatprep.mubr.msk.f32.mxu0 %vm16804_vm4, %v16803_v0  ;;  %15875 = vmatprep.mubr.msk.f32.mxu1 %vm16804_vm4, %v16803_v0 }
 0x7a8   : > { %15889 = vmatprep.subr.mxu0 %v16803_v0  ;;  %15914 = vmatprep.subr.mxu1 %v16803_v0 }
 0x7a9   : > { %15849 = vmatmul.mubr.msk.f32.gmra.mxu0 %vm8461_vm1, %v9247_v43  ;;  %15915 = vmatpush3.msra.mxu1 %v9637_v48  ;;  %v10140_v48 = vld [vmem:[#allocation14 + $0x270] sm:$0xff] }
 0x7aa   : > { %15876 = vmatmul.mubr.msk.f32.gmra.mxu1 %vm8461_vm1, %v9374_v49  ;;  %15890 = vmatpush3.msra.mxu0 %v9513_v16  ;;  %v10268_v16 = vld [vmem:[#allocation14 + $0x2c8] sm:$0xff] }
 0x7ab   : > { %15891 = vmatprep.subr.mxu0 %v16803_v0  ;;  %15851 = vmatprep.mubr.msk.f32.mxu0 %vm16804_vm4, %v16803_v0  ;;  %v10003_v43 = vld [vmem:[#allocation3 + $0x1a] ss:$2 sm:$0xff]  ;;  %v10130_v49 = vld [vmem:[#allocation3 + $0x1b] ss:$2 sm:$0xff] }
 0x7ac   : > { %15878 = vmatprep.mubr.msk.f32.mxu1 %vm16804_vm4, %v16803_v0  ;;  %15892 = vmatpush3.msra.mxu0 %v9512_v61  ;;  %v10392_v61 = vld [vmem:[#allocation14 + $0x2f8] sm:$0xff] }
 0x7ad   : > { %15852 = vmatmul.mubr.msk.f32.gmra.mxu0 %vm8461_vm1, %v9249_v51  ;;  %15893 = vmatprep.subr.mxu0 %v16803_v0  ;;  %v10005_v51 = vld [vmem:[#allocation3 + $0x2a] ss:$2 sm:$0xff] }
 0x7ae   : > { %15879 = vmatmul.mubr.msk.f32.gmra.mxu1 %vm8461_vm1, %v9376_v52  ;;  %15894 = vmatpush3.msra.mxu0 %v9511_v36  ;;  %v10267_v36 = vld [vmem:[#allocation14 + $0x2c0] sm:$0xff] }
 0x7af   : > { %15916 = vmatprep.subr.mxu1 %v16803_v0  ;;  %15854 = vmatprep.mubr.msk.f32.mxu0 %vm16804_vm4, %v16803_v0  ;;  %v10132_v52 = vld [vmem:[#allocation3 + $0x2b] ss:$2 sm:$0xff] }
 0x7b0   : > { %15881 = vmatprep.mubr.msk.f32.mxu1 %vm16804_vm4, %v16803_v0  ;;  %15917 = vmatpush3.msra.mxu1 %v9636_v11  ;;  %v10266_v11 = vld [vmem:[#allocation14 + $0x2b8] sm:$0xff] }
 0x7b1   : > { %15855 = vmatmul.mubr.msk.f32.gmra.mxu0 %vm8461_vm1, %v9251_v12  ;;  %15918 = vmatprep.subr.mxu1 %v16803_v0  ;;  %v10265_v12 = vld [vmem:[#allocation14 + $0x2b0] sm:$0xff] }
 0x7b2   : > { %15882 = vmatmul.mubr.msk.f32.gmra.mxu1 %vm8461_vm1, %v9378_v54  ;;  %15895 = vmatprep.subr.mxu0 %v16803_v0  ;;  %v10391_v54 = vld [vmem:[#allocation14 + $0x2f0] sm:$0xff] }
 0x7b3   : > { %15919 = vmatpush3.msra.mxu1 %v9635_v32  ;;  %15896 = vmatpush3.msra.mxu0 %v9510_v14  ;;  %v10007_v32 = vld [vmem:[#allocation3 + $0x3a] ss:$2 sm:$0xff]  ;;  %v10134_v14 = vld [vmem:[#allocation3 + $0x3b] ss:$2 sm:$0xff] }
 0x7b4   : > { %15920 = vmatprep.subr.mxu1 %v16803_v0  ;;  %15857 = vmatprep.mubr.msk.f32.mxu0 %vm16804_vm4, %v16803_v0 }
 0x7b5   : > { %15884 = vmatprep.mubr.msk.f32.mxu1 %vm16804_vm4, %v16803_v0  ;;  %15921 = vmatpush3.msra.mxu1 %v9634_v26  ;;  %v10009_v26 = vld [vmem:[#allocation3 + $0x4a] ss:$2 sm:$0xff] }
 0x7b6   : > { %15858 = vmatmul.mubr.msk.f32.gmra.mxu0 %vm8461_vm1, %v9253_v2  ;;  %15885 = vmatmul.mubr.msk.f32.gmra.mxu1 %vm8461_vm1, %v9380_v29  ;;  %v10264_v2 = vld [vmem:[#allocation14 + $0x2a8] sm:$0xff]  ;;  %v10136_v29 = vld [vmem:[#allocation3 + $0x4b] ss:$2 sm:$0xff] }
 0x7b7   : > { %15897 = vmatprep.subr.mxu0 %v16803_v0  ;;  %15922 = vmatprep.subr.mxu1 %v16803_v0 }
 0x7b8   : > { %15898 = vmatpush3.msra.mxu0 %v9509_v38  ;;  %15923 = vmatpush3.msra.mxu1 %v9633_v41  ;;  %v10390_v38 = vld [vmem:[#allocation14 + $0x2e8] sm:$0xff]  ;;  %v10389_v41 = vld [vmem:[#allocation14 + $0x2e0] sm:$0xff] }
 0x7b9   : > { %15924 = vmatprep.subr.mxu1 %v16803_v0  ;;  %15899 = vmatprep.mubr.msk.f32.mxu0 %vm16804_vm4, %v16803_v0 }
 0x7ba   : > { %15925 = vmatpush3.msra.mxu1 %v9632_v34  ;;  %15926 = vmatprep.mubr.msk.f32.mxu1 %vm16804_vm4, %v16803_v0  ;;  %v10263_v34 = vld [vmem:[#allocation14 + $0x2a0] sm:$0xff] }
 0x7bb   : > { %15941 = vmatprep.subr.mxu0 %v16803_v0  ;;  %15900 = vmatmul.mubr.msk.f32.vlgmr.msra.gmra.mxu0 %vm8461_vm1, %v9499_v5  ;;  %v10138_v5 = vld [vmem:[#allocation3 + $0x5b] ss:$2 sm:$0xff] }
 0x7bc   : > { %15927 = vmatmul.mubr.msk.f32.vlgmr.msra.gmra.mxu1 %vm8461_vm1, %v9625_v9  ;;  %15942 = vmatpush3.msra.mxu0 %v9764_v31  ;;  %v10011_v31 = vld [vmem:[#allocation3 + $0x5a] ss:$2 sm:$0xff]  ;;  %v10388_v9 = vld [vmem:[#allocation14 + $0x2d8] sm:$0xff] }
 0x7bd   : > { %15902 = vmatprep.mubr.msk.f32.mxu0 %vm16804_vm4, %v16803_v0  ;;  %15929 = vmatprep.mubr.msk.f32.mxu1 %vm16804_vm4, %v16803_v0 }
 0x7be   : > { %15943 = vmatprep.subr.mxu0 %v16803_v0  ;;  %15968 = vmatprep.subr.mxu1 %v16803_v0 }
 0x7bf   : > { %15903 = vmatmul.mubr.msk.f32.gmra.mxu0 %vm8461_vm1, %v9501_v50  ;;  %15969 = vmatpush3.msra.mxu1 %v9891_v58  ;;  %v10387_v58 = vld [vmem:[#allocation14 + $0x2d0] sm:$0xff] }
 0x7c0   : > { %15930 = vmatmul.mubr.msk.f32.gmra.mxu1 %vm8461_vm1, %v9626_v39  ;;  %15944 = vmatpush3.msra.mxu0 %v9763_v7  ;;  %v10519_v7 = vld [vmem:[#allocation14 + $0x328] sm:$0xff]  ;;  %v10379_v39 = vld [vmem:[#allocation3 + $0x24] ss:$2 sm:$0xff] }
 0x7c1   : > { %15945 = vmatprep.subr.mxu0 %v16803_v0  ;;  %15905 = vmatprep.mubr.msk.f32.mxu0 %vm16804_vm4, %v16803_v0  ;;  %v10256_v50 = vld [vmem:[#allocation3 + $0x1c] ss:$2 sm:$0xff] }
 0x7c2   : > { %15932 = vmatprep.mubr.msk.f32.mxu1 %vm16804_vm4, %v16803_v0  ;;  %15946 = vmatpush3.msra.mxu0 %v9762_v62  ;;  %v10646_v62 = vld [vmem:[#allocation14 + $0x358] sm:$0xff] }
 0x7c3   : > { %15906 = vmatmul.mubr.msk.f32.gmra.mxu0 %vm8461_vm1, %v9503_v3  ;;  %15947 = vmatprep.subr.mxu0 %v16803_v0  ;;  %v10257_v3 = vld [vmem:[#allocation3 + $0x2c] ss:$2 sm:$0xff] }
 0x7c4   : > { %15933 = vmatmul.mubr.msk.f32.gmra.mxu1 %vm8461_vm1, %v9627_v63  ;;  %15948 = vmatpush3.msra.mxu0 %v9761_v59  ;;  %v10518_v59 = vld [vmem:[#allocation14 + $0x320] sm:$0xff] }
 0x7c5   : > { %15970 = vmatprep.subr.mxu1 %v16803_v0  ;;  %15908 = vmatprep.mubr.msk.f32.mxu0 %vm16804_vm4, %v16803_v0  ;;  %v10380_v63 = vld [vmem:[#allocation3 + $0x34] ss:$2 sm:$0xff] }
 0x7c6   : > { %15935 = vmatprep.mubr.msk.f32.mxu1 %vm16804_vm4, %v16803_v0  ;;  %15971 = vmatpush3.msra.mxu1 %v9890_v46  ;;  %v10517_v46 = vld [vmem:[#allocation14 + $0x318] sm:$0xff] }
 0x7c7   : > { %15909 = vmatmul.mubr.msk.f32.gmra.mxu0 %vm8461_vm1, %v9505_v35  ;;  %15972 = vmatprep.subr.mxu1 %v16803_v0  ;;  %v10516_v35 = vld [vmem:[#allocation14 + $0x310] sm:$0xff] }
 0x7c8   : > { %15936 = vmatmul.mubr.msk.f32.gmra.mxu1 %vm8461_vm1, %v9628_v8  ;;  %15949 = vmatprep.subr.mxu0 %v16803_v0  ;;  %v10645_v8 = vld [vmem:[#allocation14 + $0x350] sm:$0xff] }
 0x7c9   : > { %15973 = vmatpush3.msra.mxu1 %v9889_v40  ;;  %15950 = vmatpush3.msra.mxu0 %v9760_v28  ;;  %v10258_v40 = vld [vmem:[#allocation3 + $0x3c] ss:$2 sm:$0xff] }
 0x7ca   : > { %15974 = vmatprep.subr.mxu1 %v16803_v0  ;;  %15911 = vmatprep.mubr.msk.f32.mxu0 %vm16804_vm4, %v16803_v0  ;;  %v10381_v28 = vld [vmem:[#allocation3 + $0x44] ss:$2 sm:$0xff] }
 0x7cb   : > { %15938 = vmatprep.mubr.msk.f32.mxu1 %vm16804_vm4, %v16803_v0  ;;  %15975 = vmatpush3.msra.mxu1 %v9888_v4  ;;  %v10259_v4 = vld [vmem:[#allocation3 + $0x4c] ss:$2 sm:$0xff] }
 0x7cc   : > { %15912 = vmatmul.mubr.msk.f32.gmra.mxu0 %vm8461_vm1, %v9507_v57  ;;  %15939 = vmatmul.mubr.msk.f32.gmra.mxu1 %vm8461_vm1, %v9630_v25  ;;  %v10515_v57 = vld [vmem:[#allocation14 + $0x308] sm:$0xff] }
 0x7cd   : > { %15951 = vmatprep.subr.mxu0 %v16803_v0  ;;  %15976 = vmatprep.subr.mxu1 %v16803_v0  ;;  %v10383_v25 = vld [vmem:[#allocation3 + $0x54] ss:$2 sm:$0xff] }
 0x7ce   : > { %15952 = vmatpush3.msra.mxu0 %v9759_v44  ;;  %15977 = vmatpush3.msra.mxu1 %v9887_v33  ;;  %v10644_v44 = vld [vmem:[#allocation14 + $0x348] sm:$0xff]  ;;  %v10643_v33 = vld [vmem:[#allocation14 + $0x340] sm:$0xff] }
 0x7cf   : > { %15978 = vmatprep.subr.mxu1 %v16803_v0  ;;  %15953 = vmatprep.mubr.msk.f32.mxu0 %vm16804_vm4, %v16803_v0 }
 0x7d0   : > { %15979 = vmatpush3.msra.mxu1 %v9886_v6  ;;  %15980 = vmatprep.mubr.msk.f32.mxu1 %vm16804_vm4, %v16803_v0  ;;  %v10261_v6 = vld [vmem:[#allocation3 + $0x5c] ss:$2 sm:$0xff] }
 0x7d1   : > { %15995 = vmatprep.subr.mxu0 %v16803_v0  ;;  %15954 = vmatmul.mubr.msk.f32.vlgmr.msra.gmra.mxu0 %vm8461_vm1, %v9749_v42  ;;  %v10514_v42 = vld [vmem:[#allocation14 + $0x300] sm:$0xff] }
 0x7d2   : > { %15981 = vmatmul.mubr.msk.f32.vlgmr.msra.gmra.mxu1 %vm8461_vm1, %v9876_v21  ;;  %15996 = vmatpush3.msra.mxu0 %v10018_v53  ;;  %v10385_v53 = vld [vmem:[#allocation3 + $0x64] ss:$2 sm:$0xff] }
 0x7d3   : > { %15956 = vmatprep.mubr.msk.f32.mxu0 %vm16804_vm4, %v16803_v0  ;;  %15983 = vmatprep.mubr.msk.f32.mxu1 %vm16804_vm4, %v16803_v0  ;;  %v10642_v21 = vld [vmem:[#allocation14 + $0x338] sm:$0xff] }
 0x7d4   : > { %15997 = vmatprep.subr.mxu0 %v16803_v0  ;;  %16022 = vmatprep.subr.mxu1 %v16803_v0 }
 0x7d5   : > { %15957 = vmatmul.mubr.msk.f32.gmra.mxu0 %vm8461_vm1, %v9751_v17  ;;  %16023 = vmatpush3.msra.mxu1 %v10145_v1  ;;  %v10641_v17 = vld [vmem:[#allocation14 + $0x330] sm:$0xff] }
 0x7d6   : > { %15984 = vmatmul.mubr.msk.f32.gmra.mxu1 %vm8461_vm1, %v9878_v13  ;;  %15998 = vmatpush3.msra.mxu0 %v10017_v24 }
 0x7d7   : > { %15999 = vmatprep.subr.mxu0 %v16803_v0  ;;  %15959 = vmatprep.mubr.msk.f32.mxu0 %vm16804_vm4, %v16803_v0 }
 0x7d8   : > { %15986 = vmatprep.mubr.msk.f32.mxu1 %vm16804_vm4, %v16803_v0  ;;  %16000 = vmatpush3.msra.mxu0 %v10016_v19 }
 0x7d9   : > { %15960 = vmatmul.mubr.msk.f32.gmra.mxu0 %vm8461_vm1, %v9753_v27  ;;  %16001 = vmatprep.subr.mxu0 %v16803_v0  ;;  %v10773_v27 = vld [vmem:[#allocation14 + $0x388] sm:$0xff] }
 0x7da   : > { %15987 = vmatmul.mubr.msk.f32.gmra.mxu1 %vm8461_vm1, %v9880_v45  ;;  %16002 = vmatpush3.msra.mxu0 %v10015_v30  ;;  %v10504_v45 = vld [vmem:[#allocation3 + $0x25] ss:$2 sm:$0xff] }
 0x7db   : > { %16024 = vmatprep.subr.mxu1 %v16803_v0  ;;  %15962 = vmatprep.mubr.msk.f32.mxu0 %vm16804_vm4, %v16803_v0 }
 0x7dc   : > { %15989 = vmatprep.mubr.msk.f32.mxu1 %vm16804_vm4, %v16803_v0  ;;  %16025 = vmatpush3.msra.mxu1 %v10144_v37  ;;  %v10631_v37 = vld [vmem:[#allocation3 + $0x26] ss:$2 sm:$0xff] }
 0x7dd   : > { %15963 = vmatmul.mubr.msk.f32.gmra.mxu0 %vm8461_vm1, %v9755_v47  ;;  %16026 = vmatprep.subr.mxu1 %v16803_v0  ;;  %v10896_v47 = vld [vmem:[#allocation14 + $0x3b8] sm:$0xff] }
 0x7de   : > { %15990 = vmatmul.mubr.msk.f32.gmra.mxu1 %vm8461_vm1, %v9882_v60  ;;  %16003 = vmatprep.subr.mxu0 %v16803_v0  ;;  %v10633_v60 = vld [vmem:[#allocation3 + $0x36] ss:$2 sm:$0xff] }
 0x7df   : > { %16027 = vmatpush3.msra.mxu1 %v10143_v56  ;;  %16004 = vmatpush3.msra.mxu0 %v10014_v15  ;;  %v10772_v56 = vld [vmem:[#allocation14 + $0x380] sm:$0xff] }
 0x7e0   : > { %16028 = vmatprep.subr.mxu1 %v16803_v0  ;;  %15965 = vmatprep.mubr.msk.f32.mxu0 %vm16804_vm4, %v16803_v0  ;;  %v10506_v15 = vld [vmem:[#allocation3 + $0x35] ss:$2 sm:$0xff] }
 0x7e1   : > { %15992 = vmatprep.mubr.msk.f32.mxu1 %vm16804_vm4, %v16803_v0  ;;  %16029 = vmatpush3.msra.mxu1 %v10142_v55  ;;  %v10771_v55 = vld [vmem:[#allocation14 + $0x378] sm:$0xff] }
 0x7e2   : > { %15966 = vmatmul.mubr.msk.f32.gmra.mxu0 %vm8461_vm1, %v9757_v22  ;;  %15993 = vmatmul.mubr.msk.f32.gmra.mxu1 %vm8461_vm1, %v9884_v20  ;;  %v10508_v22 = vld [vmem:[#allocation3 + $0x45] ss:$2 sm:$0xff] }
 0x7e3   : > { %16005 = vmatprep.subr.mxu0 %v16803_v0  ;;  %16030 = vmatprep.subr.mxu1 %v16803_v0 }
 0x7e4   : > { %16006 = vmatpush3.msra.mxu0 %v10013_v18  ;;  %16031 = vmatpush3.msra.mxu1 %v10141_v23  ;;  %v10770_v18 = vld [vmem:[#allocation14 + $0x370] sm:$0xff] }
 0x7e5   : > { %16032 = vmatprep.subr.mxu1 %v16803_v0  ;;  %16007 = vmatprep.mubr.msk.f32.mxu0 %vm16804_vm4, %v16803_v0 }
 0x7e6   : > { %16033 = vmatpush3.msra.mxu1 %v10140_v48  ;;  %16034 = vmatprep.mubr.msk.f32.mxu1 %vm16804_vm4, %v16803_v0  ;;  %v10635_v48 = vld [vmem:[#allocation3 + $0x46] ss:$2 sm:$0xff] }
 0x7e7   : > { %16049 = vmatprep.subr.mxu0 %v16803_v0  ;;  %16008 = vmatmul.mubr.msk.f32.vlgmr.msra.gmra.mxu0 %vm8461_vm1, %v10003_v43 }
 0x7e8   : > { %16035 = vmatmul.mubr.msk.f32.vlgmr.msra.gmra.mxu1 %vm8461_vm1, %v10130_v49  ;;  %16050 = vmatpush3.msra.mxu0 %v10268_v16  ;;  %v10895_v16 = vld [vmem:[#allocation14 + $0x3b0] sm:$0xff] }
 0x7e9   : > { %16010 = vmatprep.mubr.msk.f32.mxu0 %vm16804_vm4, %v16803_v0  ;;  %16037 = vmatprep.mubr.msk.f32.mxu1 %vm16804_vm4, %v16803_v0 }
 0x7ea   : > { %16051 = vmatprep.subr.mxu0 %v16803_v0  ;;  %16076 = vmatprep.subr.mxu1 %v16803_v0 }
 0x7eb   : > { %16011 = vmatmul.mubr.msk.f32.gmra.mxu0 %vm8461_vm1, %v10005_v51  ;;  %16077 = vmatpush3.msra.mxu1 %v10392_v61  ;;  %v10894_v51 = vld [vmem:[#allocation14 + $0x3a8] sm:$0xff] }
 0x7ec   : > { %16038 = vmatmul.mubr.msk.f32.gmra.mxu1 %vm8461_vm1, %v10132_v52  ;;  %16052 = vmatpush3.msra.mxu0 %v10267_v36  ;;  %v10510_v36 = vld [vmem:[#allocation3 + $0x55] ss:$2 sm:$0xff] }
 0x7ed   : > { %16053 = vmatprep.subr.mxu0 %v16803_v0  ;;  %16013 = vmatprep.mubr.msk.f32.mxu0 %vm16804_vm4, %v16803_v0  ;;  %v10769_v52 = vld [vmem:[#allocation14 + $0x368] sm:$0xff] }
 0x7ee   : > { %16040 = vmatprep.mubr.msk.f32.mxu1 %vm16804_vm4, %v16803_v0  ;;  %16054 = vmatpush3.msra.mxu0 %v10266_v11  ;;  %v10637_v11 = vld [vmem:[#allocation3 + $0x56] ss:$2 sm:$0xff] }
 0x7ef   : > { %16014 = vmatmul.mubr.msk.f32.gmra.mxu0 %vm8461_vm1, %v10007_v32  ;;  %16055 = vmatprep.subr.mxu0 %v16803_v0  ;;  %v10512_v32 = vld [vmem:[#allocation3 + $0x65] ss:$2 sm:$0xff] }
 0x7f0   : > { %16041 = vmatmul.mubr.msk.f32.gmra.mxu1 %vm8461_vm1, %v10134_v14  ;;  %16056 = vmatpush3.msra.mxu0 %v10265_v12  ;;  %v10893_v12 = vld [vmem:[#allocation14 + $0x3a0] sm:$0xff] }
 0x7f1   : > { %16078 = vmatprep.subr.mxu1 %v16803_v0  ;;  %16016 = vmatprep.mubr.msk.f32.mxu0 %vm16804_vm4, %v16803_v0  ;;  %v10639_v14 = vld [vmem:[#allocation3 + $0x66] ss:$2 sm:$0xff] }
 0x7f2   : > { %16043 = vmatprep.mubr.msk.f32.mxu1 %vm16804_vm4, %v16803_v0  ;;  %16079 = vmatpush3.msra.mxu1 %v10391_v54  ;;  %v10768_v54 = vld [vmem:[#allocation14 + $0x360] sm:$0xff] }
 0x7f3   : > { %16017 = vmatmul.mubr.msk.f32.gmra.mxu0 %vm8461_vm1, %v10009_v26  ;;  %16080 = vmatprep.subr.mxu1 %v16803_v0  ;;  %v10892_v26 = vld [vmem:[#allocation14 + $0x398] sm:$0xff] }
 0x7f4   : > { %16044 = vmatmul.mubr.msk.f32.gmra.mxu1 %vm8461_vm1, %v10136_v29  ;;  %16057 = vmatprep.subr.mxu0 %v16803_v0  ;;  %v10758_v29 = vld [vmem:[#allocation3 + $0x27] ss:$2 sm:$0xff] }
 0x7f5   : > { %16081 = vmatpush3.msra.mxu1 %v10390_v38  ;;  %16058 = vmatpush3.msra.mxu0 %v10264_v2  ;;  %v10891_v38 = vld [vmem:[#allocation14 + $0x390] sm:$0xff]  ;;  %v11020_v2 = vld [vmem:[#allocation14 + $0x3e8] sm:$0xff] }
 0x7f6   : > { %16082 = vmatprep.subr.mxu1 %v16803_v0  ;;  %16019 = vmatprep.mubr.msk.f32.mxu0 %vm16804_vm4, %v16803_v0 }
 0x7f7   : > { %16046 = vmatprep.mubr.msk.f32.mxu1 %vm16804_vm4, %v16803_v0  ;;  %16083 = vmatpush3.msra.mxu1 %v10389_v41  ;;  %v10884_v41 = vld [vmem:[#allocation3 + $0x28] ss:$2 sm:$0xff] }
 0x7f8   : > { %16020 = vmatmul.mubr.msk.f32.gmra.mxu0 %vm8461_vm1, %v10011_v31  ;;  %16047 = vmatmul.mubr.msk.f32.gmra.mxu1 %vm8461_vm1, %v10138_v5 }
 0x7f9   : > { %16059 = vmatprep.subr.mxu0 %v16803_v0  ;;  %16084 = vmatprep.subr.mxu1 %v16803_v0 }
 0x7fa   : > { %16060 = vmatpush3.msra.mxu0 %v10263_v34  ;;  %16085 = vmatpush3.msra.mxu1 %v10388_v9  ;;  %v11145_v34 = vld [vmem:[#allocation14 + $0x418] sm:$0xff]  ;;  %v11019_v9 = vld [vmem:[#allocation14 + $0x3e0] sm:$0xff] }
 0x7fb   : > { %16086 = vmatprep.subr.mxu1 %v16803_v0  ;;  %16061 = vmatprep.mubr.msk.f32.mxu0 %vm16804_vm4, %v16803_v0 }
 0x7fc   : > { %16087 = vmatpush3.msra.mxu1 %v10387_v58  ;;  %16088 = vmatprep.mubr.msk.f32.mxu1 %vm16804_vm4, %v16803_v0 }
 0x7fd   : > { %16103 = vmatprep.subr.mxu0 %v16803_v0  ;;  %16062 = vmatmul.mubr.msk.f32.vlgmr.msra.gmra.mxu0 %vm8461_vm1, %v10256_v50 }
 0x7fe   : > { %16089 = vmatmul.mubr.msk.f32.vlgmr.msra.gmra.mxu1 %vm8461_vm1, %v10379_v39  ;;  %16104 = vmatpush3.msra.mxu0 %v10519_v7  ;;  %v10760_v7 = vld [vmem:[#allocation3 + $0x37] ss:$2 sm:$0xff] }
 0x7ff   : > { %16064 = vmatprep.mubr.msk.f32.mxu0 %vm16804_vm4, %v16803_v0  ;;  %16091 = vmatprep.mubr.msk.f32.mxu1 %vm16804_vm4, %v16803_v0 }
 0x800   : > { %16105 = vmatprep.subr.mxu0 %v16803_v0  ;;  %16130 = vmatprep.subr.mxu1 %v16803_v0 }
 0x801   : > { %16065 = vmatmul.mubr.msk.f32.gmra.mxu0 %vm8461_vm1, %v10257_v3  ;;  %16131 = vmatpush3.msra.mxu1 %v10646_v62  ;;  %v10885_v62 = vld [vmem:[#allocation3 + $0x38] ss:$2 sm:$0xff] }
 0x802   : > { %16092 = vmatmul.mubr.msk.f32.gmra.mxu1 %vm8461_vm1, %v10380_v63  ;;  %16106 = vmatpush3.msra.mxu0 %v10518_v59  ;;  %v11018_v59 = vld [vmem:[#allocation14 + $0x3d8] sm:$0xff]  ;;  %v11017_v3 = vld [vmem:[#allocation14 + $0x3d0] sm:$0xff] }
 0x803   : > { %16107 = vmatprep.subr.mxu0 %v16803_v0  ;;  %16067 = vmatprep.mubr.msk.f32.mxu0 %vm16804_vm4, %v16803_v0  ;;  %v10762_v63 = vld [vmem:[#allocation3 + $0x47] ss:$2 sm:$0xff] }
 0x804   : > { %16094 = vmatprep.mubr.msk.f32.mxu1 %vm16804_vm4, %v16803_v0  ;;  %16108 = vmatpush3.msra.mxu0 %v10517_v46  ;;  %v10886_v46 = vld [vmem:[#allocation3 + $0x48] ss:$2 sm:$0xff] }
 0x805   : > { %16068 = vmatmul.mubr.msk.f32.gmra.mxu0 %vm8461_vm1, %v10258_v40  ;;  %16109 = vmatprep.subr.mxu0 %v16803_v0  ;;  %v10764_v40 = vld [vmem:[#allocation3 + $0x57] ss:$2 sm:$0xff] }
 0x806   : > { %16095 = vmatmul.mubr.msk.f32.gmra.mxu1 %vm8461_vm1, %v10381_v28  ;;  %16110 = vmatpush3.msra.mxu0 %v10516_v35  ;;  %v11144_v35 = vld [vmem:[#allocation14 + $0x410] sm:$0xff]  ;;  %v11143_v28 = vld [vmem:[#allocation14 + $0x408] sm:$0xff] }
 0x807   : > { %16132 = vmatprep.subr.mxu1 %v16803_v0  ;;  %16070 = vmatprep.mubr.msk.f32.mxu0 %vm16804_vm4, %v16803_v0 }
 0x808   : > { %16097 = vmatprep.mubr.msk.f32.mxu1 %vm16804_vm4, %v16803_v0  ;;  %16133 = vmatpush3.msra.mxu1 %v10645_v8  ;;  %v11016_v8 = vld [vmem:[#allocation14 + $0x3c8] sm:$0xff] }
 0x809   : > { %16071 = vmatmul.mubr.msk.f32.gmra.mxu0 %vm8461_vm1, %v10259_v4  ;;  %16134 = vmatprep.subr.mxu1 %v16803_v0  ;;  %v10887_v4 = vld [vmem:[#allocation3 + $0x58] ss:$2 sm:$0xff] }
 0x80a   : > { %16098 = vmatmul.mubr.msk.f32.gmra.mxu1 %vm8461_vm1, %v10383_v25  ;;  %16111 = vmatprep.subr.mxu0 %v16803_v0 }
 0x80b   : > { %16135 = vmatpush3.msra.mxu1 %v10644_v44  ;;  %16112 = vmatpush3.msra.mxu0 %v10515_v57  ;;  %v11142_v44 = vld [vmem:[#allocation14 + $0x400] sm:$0xff] }
 0x80c   : > { %16136 = vmatprep.subr.mxu1 %v16803_v0  ;;  %16073 = vmatprep.mubr.msk.f32.mxu0 %vm16804_vm4, %v16803_v0 }
 0x80d   : > { %16100 = vmatprep.mubr.msk.f32.mxu1 %vm16804_vm4, %v16803_v0  ;;  %16137 = vmatpush3.msra.mxu1 %v10643_v33 }
 0x80e   : > { %16074 = vmatmul.mubr.msk.f32.gmra.mxu0 %vm8461_vm1, %v10261_v6  ;;  %16101 = vmatmul.mubr.msk.f32.gmra.mxu1 %vm8461_vm1, %v10385_v53  ;;  %v8612_v1 = vpop.f32.mrf.mxu0  ;;  %v8717_v24 = vpop.f32.mrf.mxu1  ;;  %v10766_v6 = vld [vmem:[#allocation3 + $0x67] ss:$2 sm:$0xff] }
 0x80f   : > { %16113 = vmatprep.subr.mxu0 %v16803_v0  ;;  %16138 = vmatprep.subr.mxu1 %v16803_v0  ;;  %v20254_v13 = vadd.f32 %v8717_v24, %v8612_v1  ;;  %v11015_v1 = vld [vmem:[#allocation14 + $0x3c0] sm:$0xff]  ;;  %v11141_v24 = vld [vmem:[#allocation14 + $0x3f8] sm:$0xff] }
 0x810   : > { %16114 = vmatpush3.msra.mxu0 %v10514_v42  ;;  %16139 = vmatpush3.msra.mxu1 %v10642_v21  ;;  %v15688_v19 = vpop.f32.mrf.mxu0  ;;  %v15715_v30 = vpop.f32.mrf.mxu1  ;;  %v10889_v21 = vld [vmem:[#allocation3 + $0x68] ss:$2 sm:$0xff] }
 0x811   : > { %16140 = vmatprep.subr.mxu1 %v16803_v0  ;;  %16115 = vmatprep.mubr.msk.f32.mxu0 %vm16804_vm4, %v16803_v0  ;;  %v11140_v30 = vld [vmem:[#allocation14 + $0x3f0] sm:$0xff] }
 0x812   : > { %16141 = vmatpush3.msra.mxu1 %v10641_v17  ;;  %16142 = vmatprep.mubr.msk.f32.mxu1 %vm16804_vm4, %v16803_v0 }
 0x813   : > { %16157 = vmatprep.subr.mxu0 %v16803_v0  ;;  %16116 = vmatmul.mubr.msk.f32.vlgmr.msra.gmra.mxu0 %vm8461_vm1, %v10504_v45 }
 0x814   : > { %16143 = vmatmul.mubr.msk.f32.vlgmr.msra.gmra.mxu1 %vm8461_vm1, %v10631_v37  ;;  %16158 = vmatpush3.msra.mxu0 %v10773_v27 }
 0x815   : > { %16118 = vmatprep.mubr.msk.f32.mxu0 %vm16804_vm4, %v16803_v0  ;;  %16145 = vmatprep.mubr.msk.f32.mxu1 %vm16804_vm4, %v16803_v0 }
 0x816   : > { %16159 = vmatprep.subr.mxu0 %v16803_v0  ;;  %16184 = vmatprep.subr.mxu1 %v16803_v0 }
 0x817   : > { %16119 = vmatmul.mubr.msk.f32.gmra.mxu0 %vm8461_vm1, %v10506_v15  ;;  %16185 = vmatpush3.msra.mxu1 %v10896_v47  ;;  %v11270_v47 = vld [vmem:[#allocation14 + $0x448] sm:$0xff] }
 0x818   : > { %16146 = vmatmul.mubr.msk.f32.gmra.mxu1 %vm8461_vm1, %v10633_v60  ;;  %16160 = vmatpush3.msra.mxu0 %v10772_v56  ;;  %v11007_v15 = vld [vmem:[#allocation3 + $0x30] ss:$2 sm:$0xff] }
 0x819   : > { %16161 = vmatprep.subr.mxu0 %v16803_v0  ;;  %16121 = vmatprep.mubr.msk.f32.mxu0 %vm16804_vm4, %v16803_v0 }
 0x81a   : > { %16148 = vmatprep.mubr.msk.f32.mxu1 %vm16804_vm4, %v16803_v0  ;;  %16162 = vmatpush3.msra.mxu0 %v10771_v55  ;;  %v8617_v20 = vpop.f32.mrf.mxu0  ;;  %v8722_v23 = vpop.f32.mrf.mxu1 }
 0x81b   : > { %16122 = vmatmul.mubr.msk.f32.gmra.mxu0 %vm8461_vm1, %v10508_v22  ;;  %16163 = vmatprep.subr.mxu0 %v16803_v0  ;;  %v20279_v43 = vadd.f32 %v8722_v23, %v8617_v20  ;;  %v11395_v22 = vld [vmem:[#allocation14 + $0x478] sm:$0xff] }
 0x81c   : > { %16149 = vmatmul.mubr.msk.f32.gmra.mxu1 %vm8461_vm1, %v10635_v48  ;;  %16164 = vmatpush3.msra.mxu0 %v10770_v18  ;;  %v15691_v49 = vpop.f32.mrf.mxu0  ;;  %v15718_v61 = vpop.f32.mrf.mxu1  ;;  %v11269_v48 = vld [vmem:[#allocation14 + $0x440] sm:$0xff] }
 0x81d   : > { %16186 = vmatprep.subr.mxu1 %v16803_v0  ;;  %16124 = vmatprep.mubr.msk.f32.mxu0 %vm16804_vm4, %v16803_v0  ;;  %v11008_v49 = vld [vmem:[#allocation3 + $0x40] ss:$2 sm:$0xff] }
 0x81e   : > { %16151 = vmatprep.mubr.msk.f32.mxu1 %vm16804_vm4, %v16803_v0  ;;  %16187 = vmatpush3.msra.mxu1 %v10895_v16 }
 0x81f   : > { %16125 = vmatmul.mubr.msk.f32.gmra.mxu0 %vm8461_vm1, %v10510_v36  ;;  %16188 = vmatprep.subr.mxu1 %v16803_v0  ;;  %v11132_v36 = vld [vmem:[#allocation3 + $0x41] ss:$2 sm:$0xff] }
 0x820   : > { %16152 = vmatmul.mubr.msk.f32.gmra.mxu1 %vm8461_vm1, %v10637_v11  ;;  %16165 = vmatprep.subr.mxu0 %v16803_v0 }
 0x821   : > { %16189 = vmatpush3.msra.mxu1 %v10894_v51  ;;  %16166 = vmatpush3.msra.mxu0 %v10769_v52  ;;  %v11268_v51 = vld [vmem:[#allocation14 + $0x438] sm:$0xff] }
 0x822   : > { %16190 = vmatprep.subr.mxu1 %v16803_v0  ;;  %16127 = vmatprep.mubr.msk.f32.mxu0 %vm16804_vm4, %v16803_v0 }
 0x823   : > { %16154 = vmatprep.mubr.msk.f32.mxu1 %vm16804_vm4, %v16803_v0  ;;  %16191 = vmatpush3.msra.mxu1 %v10893_v12 }
 0x824   : > { %16128 = vmatmul.mubr.msk.f32.gmra.mxu0 %vm8461_vm1, %v10512_v32  ;;  %16155 = vmatmul.mubr.msk.f32.gmra.mxu1 %vm8461_vm1, %v10639_v14  ;;  %v11267_v32 = vld [vmem:[#allocation14 + $0x430] sm:$0xff] }
 0x825   : > { %16167 = vmatprep.subr.mxu0 %v16803_v0  ;;  %16192 = vmatprep.subr.mxu1 %v16803_v0 }
 0x826   : > { %16168 = vmatpush3.msra.mxu0 %v10768_v54  ;;  %16193 = vmatpush3.msra.mxu1 %v10892_v26  ;;  %v11009_v54 = vld [vmem:[#allocation3 + $0x50] ss:$2 sm:$0xff] }
 0x827   : > { %16194 = vmatprep.subr.mxu1 %v16803_v0  ;;  %16169 = vmatprep.mubr.msk.f32.mxu0 %vm16804_vm4, %v16803_v0 }
 0x828   : > { %16195 = vmatpush3.msra.mxu1 %v10891_v38  ;;  %16196 = vmatprep.mubr.msk.f32.mxu1 %vm16804_vm4, %v16803_v0  ;;  %v11134_v38 = vld [vmem:[#allocation3 + $0x51] ss:$2 sm:$0xff] }
 0x829   : > { %16211 = vmatprep.subr.mxu0 %v16803_v0  ;;  %16170 = vmatmul.mubr.msk.f32.vlgmr.msra.gmra.mxu0 %vm8461_vm1, %v10758_v29 }
 0x82a   : > { %16197 = vmatmul.mubr.msk.f32.vlgmr.msra.gmra.mxu1 %vm8461_vm1, %v10884_v41  ;;  %16212 = vmatpush3.msra.mxu0 %v11020_v2  ;;  %v8622_v31 = vpop.f32.mrf.mxu0  ;;  %v8727_v5 = vpop.f32.mrf.mxu1  ;;  %v11394_v2 = vld [vmem:[#allocation14 + $0x470] sm:$0xff] }
 0x82b   : > { %16172 = vmatprep.mubr.msk.f32.mxu0 %vm16804_vm4, %v16803_v0  ;;  %16199 = vmatprep.mubr.msk.f32.mxu1 %vm16804_vm4, %v16803_v0  ;;  %v20312_v58 = vadd.f32 %v8727_v5, %v8622_v31  ;;  %v11011_v5 = vld [vmem:[#allocation3 + $0x60] ss:$2 sm:$0xff] }
 0x82c   : > { %16213 = vmatprep.subr.mxu0 %v16803_v0  ;;  %16238 = vmatprep.subr.mxu1 %v16803_v0  ;;  %v15694_v50 = vpop.f32.mrf.mxu0  ;;  %v15721_v39 = vpop.f32.mrf.mxu1 }
 0x82d   : > { %16173 = vmatmul.mubr.msk.f32.gmra.mxu0 %vm8461_vm1, %v10760_v7  ;;  %16239 = vmatpush3.msra.mxu1 %v11145_v34  ;;  %v11266_v7 = vld [vmem:[#allocation14 + $0x428] sm:$0xff] }
 0x82e   : > { %16200 = vmatmul.mubr.msk.f32.gmra.mxu1 %vm8461_vm1, %v10885_v62  ;;  %16214 = vmatpush3.msra.mxu0 %v11019_v9  ;;  %v11393_v9 = vld [vmem:[#allocation14 + $0x468] sm:$0xff] }
 0x82f   : > { %16215 = vmatprep.subr.mxu0 %v16803_v0  ;;  %16175 = vmatprep.mubr.msk.f32.mxu0 %vm16804_vm4, %v16803_v0  ;;  %v11136_v39 = vld [vmem:[#allocation3 + $0x61] ss:$2 sm:$0xff] }
 0x830   : > { %16202 = vmatprep.mubr.msk.f32.mxu1 %vm16804_vm4, %v16803_v0  ;;  %16216 = vmatpush3.msra.mxu0 %v11018_v59  ;;  %v11392_v59 = vld [vmem:[#allocation14 + $0x460] sm:$0xff] }
 0x831   : > { %16176 = vmatmul.mubr.msk.f32.gmra.mxu0 %vm8461_vm1, %v10762_v63  ;;  %16217 = vmatprep.subr.mxu0 %v16803_v0 }
 0x832   : > { %16203 = vmatmul.mubr.msk.f32.gmra.mxu1 %vm8461_vm1, %v10886_v46  ;;  %16218 = vmatpush3.msra.mxu0 %v11017_v3 }
 0x833   : > { %16240 = vmatprep.subr.mxu1 %v16803_v0  ;;  %16178 = vmatprep.mubr.msk.f32.mxu0 %vm16804_vm4, %v16803_v0 }
 0x834   : > { %16205 = vmatprep.mubr.msk.f32.mxu1 %vm16804_vm4, %v16803_v0  ;;  %16241 = vmatpush3.msra.mxu1 %v11144_v35  ;;  %v11013_v35 = vld [vmem:[#allocation3 + $0x70] ss:$2 sm:$0xff] }
 0x835   : > { %16179 = vmatmul.mubr.msk.f32.gmra.mxu0 %vm8461_vm1, %v10764_v40  ;;  %16242 = vmatprep.subr.mxu1 %v16803_v0  ;;  %v11138_v40 = vld [vmem:[#allocation3 + $0x71] ss:$2 sm:$0xff] }
 0x836   : > { %16206 = vmatmul.mubr.msk.f32.gmra.mxu1 %vm8461_vm1, %v10887_v4  ;;  %16219 = vmatprep.subr.mxu0 %v16803_v0  ;;  %v8627_v57 = vpop.f32.mrf.mxu0  ;;  %v8732_v25 = vpop.f32.mrf.mxu1 }
 0x837   : > { %16243 = vmatpush3.msra.mxu1 %v11143_v28  ;;  %16220 = vmatpush3.msra.mxu0 %v11016_v8  ;;  %v20335_v33 = vadd.f32 %v8732_v25, %v8627_v57  ;;  %v11265_v28 = vld [vmem:[#allocation14 + $0x420] sm:$0xff]  ;;  %v11391_v8 = vld [vmem:[#allocation14 + $0x458] sm:$0xff]  ;;  %v11390_v25 = vld [vmem:[#allocation14 + $0x450] sm:$0xff] }
 0x838   : > { %16244 = vmatprep.subr.mxu1 %v16803_v0  ;;  %16181 = vmatprep.mubr.msk.f32.mxu0 %vm16804_vm4, %v16803_v0  ;;  %v15697_v53 = vpop.f32.mrf.mxu0  ;;  %v15724_v42 = vpop.f32.mrf.mxu1 }
 0x839   : > { %16208 = vmatprep.mubr.msk.f32.mxu1 %vm16804_vm4, %v16803_v0  ;;  %16245 = vmatpush3.msra.mxu1 %v11142_v44  ;;  %v11518_v42 = vld [vmem:[#allocation14 + $0x4a8] sm:$0xff] }
 0x83a   : > { %16182 = vmatmul.mubr.msk.f32.gmra.mxu0 %vm8461_vm1, %v10766_v6  ;;  %16209 = vmatmul.mubr.msk.f32.gmra.mxu1 %vm8461_vm1, %v10889_v21  ;;  %v8834_v17 = vpop.f32.mrf.mxu0  ;;  %v8961_v19 = vpop.f32.mrf.mxu1 }
 0x83b   : > { %16221 = vmatprep.subr.mxu0 %v16803_v0  ;;  %16246 = vmatprep.subr.mxu1 %v16803_v0  ;;  %v8858_v27 = vadd.f32 %v8834_v17, %v20023_v10  ;;  %v11131_v10 = vld [vmem:[#allocation3 + $0x31] ss:$2 sm:$0xff] }
 0x83c   : > { %16222 = vmatpush3.msra.mxu0 %v11015_v1  ;;  %16247 = vmatpush3.msra.mxu1 %v11141_v24  ;;  %v15739_v45 = vpop.f32.mrf.mxu0  ;;  %v15766_v37 = vpop.f32.mrf.mxu1  ;;  %v11256_v1 = vld [vmem:[#allocation3 + $0x32] ss:$2 sm:$0xff] }
 0x83d   : > { %16248 = vmatprep.subr.mxu1 %v16803_v0  ;;  %16223 = vmatprep.mubr.msk.f32.mxu0 %vm16804_vm4, %v16803_v0  ;;  %v20350_v56 = vadd.f32 %v8961_v19, %v8858_v27  ;;  %v11381_v19 = vld [vmem:[#allocation3 + $0x33] ss:$2 sm:$0xff] }
 0x83e   : > { %16249 = vmatpush3.msra.mxu1 %v11140_v30  ;;  %16250 = vmatprep.mubr.msk.f32.mxu1 %vm16804_vm4, %v16803_v0  ;;  %v8839_v60 = vpop.f32.mrf.mxu0  ;;  %v8966_v55 = vpop.f32.mrf.mxu1  ;;  %v11517_v37 = vld [vmem:[#allocation14 + $0x4a0] sm:$0xff] }
 0x83f   : > { %16265 = vmatprep.subr.mxu0 %v16803_v0  ;;  %16224 = vmatmul.mubr.msk.f32.vlgmr.msra.gmra.mxu0 %vm8461_vm1, %v11007_v15  ;;  %v8859_v18 = vadd.f32 %v8839_v60, %v20254_v13 }
 0x840   : > { %16251 = vmatmul.mubr.msk.f32.vlgmr.msra.gmra.mxu1 %vm8461_vm1, %v11131_v10  ;;  %16266 = vmatpush3.msra.mxu0 %v11270_v47  ;;  %v15742_v20 = vpop.f32.mrf.mxu0  ;;  %v15769_v23 = vpop.f32.mrf.mxu1  ;;  %v11516_v10 = vld [vmem:[#allocation14 + $0x498] sm:$0xff] }
 0x841   : > { %16226 = vmatprep.mubr.msk.f32.mxu0 %vm16804_vm4, %v16803_v0  ;;  %16253 = vmatprep.mubr.msk.f32.mxu1 %vm16804_vm4, %v16803_v0  ;;  %v20362_v16 = vadd.f32 %v8966_v55, %v8859_v18  ;;  %v11382_v55 = vld [vmem:[#allocation3 + $0x43] ss:$2 sm:$0xff] }
 0x842   : > { %16267 = vmatprep.subr.mxu0 %v16803_v0  ;;  %16292 = vmatprep.subr.mxu1 %v16803_v0  ;;  %v8844_v13 = vpop.f32.mrf.mxu0  ;;  %v8971_v61 = vpop.f32.mrf.mxu1  ;;  %v11515_v23 = vld [vmem:[#allocation14 + $0x490] sm:$0xff] }
 0x843   : > { %16227 = vmatmul.mubr.msk.f32.gmra.mxu0 %vm8461_vm1, %v11008_v49  ;;  %16293 = vmatpush3.msra.mxu1 %v11395_v22  ;;  %v8860_v52 = vadd.f32 %v8844_v13, %v20279_v43 }
 0x844   : > { %16254 = vmatmul.mubr.msk.f32.gmra.mxu1 %vm8461_vm1, %v11132_v36  ;;  %16268 = vmatpush3.msra.mxu0 %v11269_v48  ;;  %v15745_v11 = vpop.f32.mrf.mxu0  ;;  %v15772_v12 = vpop.f32.mrf.mxu1 }
 0x845   : > { %16269 = vmatprep.subr.mxu0 %v16803_v0  ;;  %16229 = vmatprep.mubr.msk.f32.mxu0 %vm16804_vm4, %v16803_v0  ;;  %v20372_v14 = vadd.f32 %v8971_v61, %v8860_v52  ;;  %v11384_v61 = vld [vmem:[#allocation3 + $0x53] ss:$2 sm:$0xff]  ;;  %v11261_v12 = vld [vmem:[#allocation3 + $0x62] ss:$2 sm:$0xff] }
 0x846   : > { %16256 = vmatprep.mubr.msk.f32.mxu1 %vm16804_vm4, %v16803_v0  ;;  %16270 = vmatpush3.msra.mxu0 %v11268_v51  ;;  %v8849_v26 = vpop.f32.mrf.mxu0  ;;  %v8976_v43 = vpop.f32.mrf.mxu1  ;;  %v11514_v11 = vld [vmem:[#allocation14 + $0x488] sm:$0xff] }
 0x847   : > { %16230 = vmatmul.mubr.msk.f32.gmra.mxu0 %vm8461_vm1, %v11009_v54  ;;  %16271 = vmatprep.subr.mxu0 %v16803_v0  ;;  %v8861_v29 = vadd.f32 %v8849_v26, %v20312_v58  ;;  %v11386_v54 = vld [vmem:[#allocation3 + $0x63] ss:$2 sm:$0xff] }
 0x848   : > { %16257 = vmatmul.mubr.msk.f32.gmra.mxu1 %vm8461_vm1, %v11134_v38  ;;  %16272 = vmatpush3.msra.mxu0 %v11267_v32  ;;  %v15748_v41 = vpop.f32.mrf.mxu0  ;;  %v15775_v34 = vpop.f32.mrf.mxu1 }
 0x849   : > { %16294 = vmatprep.subr.mxu1 %v16803_v0  ;;  %16232 = vmatprep.mubr.msk.f32.mxu0 %vm16804_vm4, %v16803_v0  ;;  %v20383_v31 = vadd.f32 %v8976_v43, %v8861_v29  ;;  %v11263_v41 = vld [vmem:[#allocation3 + $0x72] ss:$2 sm:$0xff]  ;;  %v11388_v34 = vld [vmem:[#allocation3 + $0x73] ss:$2 sm:$0xff] }
 0x84a   : > { %16259 = vmatprep.mubr.msk.f32.mxu1 %vm16804_vm4, %v16803_v0  ;;  %16295 = vmatpush3.msra.mxu1 %v11394_v2  ;;  %v8854_v58 = vpop.f32.mrf.mxu0  ;;  %v8981_v50 = vpop.f32.mrf.mxu1  ;;  %v11513_v2 = vld [vmem:[#allocation14 + $0x480] sm:$0xff] }
 0x84b   : > { %16233 = vmatmul.mubr.msk.f32.gmra.mxu0 %vm8461_vm1, %v11011_v5  ;;  %16296 = vmatprep.subr.mxu1 %v16803_v0  ;;  %v8862_v62 = vadd.f32 %v8854_v58, %v20335_v33  ;;  %v11506_v58 = vld [vmem:[#allocation3 + $0x34] ss:$2 sm:$0xff] }
 0x84c   : > { %16260 = vmatmul.mubr.msk.f32.gmra.mxu1 %vm8461_vm1, %v11136_v39  ;;  %16273 = vmatprep.subr.mxu0 %v16803_v0  ;;  %v15751_v3 = vpop.f32.mrf.mxu0  ;;  %v15778_v63 = vpop.f32.mrf.mxu1 }
 0x84d   : > { %16297 = vmatpush3.msra.mxu1 %v11393_v9  ;;  %16274 = vmatpush3.msra.mxu0 %v11266_v7  ;;  %v20392_v46 = vadd.f32 %v8981_v50, %v8862_v62 }
 0x84e   : > { %16298 = vmatprep.subr.mxu1 %v16803_v0  ;;  %16235 = vmatprep.mubr.msk.f32.mxu0 %vm16804_vm4, %v16803_v0 }
 0x84f   : > { %16262 = vmatprep.mubr.msk.f32.mxu1 %vm16804_vm4, %v16803_v0  ;;  %16299 = vmatpush3.msra.mxu1 %v11392_v59  ;;  %v9088_v4 = vpop.f32.mrf.mxu0 }
 0x850   : > { %16236 = vmatmul.mubr.msk.f32.gmra.mxu0 %vm8461_vm1, %v11013_v35  ;;  %16263 = vmatmul.mubr.msk.f32.gmra.mxu1 %vm8461_vm1, %v11138_v40  ;;  %v9112_v44 = vadd.f32 %v9088_v4, %v20350_v56  ;;  %v9215_v57 = vpop.f32.mrf.mxu1  ;;  %v11257_v56 = vld [vmem:[#allocation3 + $0x42] ss:$2 sm:$0xff] }
 0x851   : > { %16275 = vmatprep.subr.mxu0 %v16803_v0  ;;  %16300 = vmatprep.subr.mxu1 %v16803_v0  ;;  %v15793_v33 = vpop.f32.mrf.mxu0 }
 0x852   : > { %16276 = vmatpush3.msra.mxu0 %v11265_v28  ;;  %16301 = vmatpush3.msra.mxu1 %v11391_v8  ;;  %v20404_v6 = vadd.f32 %v9215_v57, %v9112_v44  ;;  %v15820_v53 = vpop.f32.mrf.mxu1  ;;  %v11508_v57 = vld [vmem:[#allocation3 + $0x54] ss:$2 sm:$0xff] }
 0x853   : > { %16302 = vmatprep.subr.mxu1 %v16803_v0  ;;  %16277 = vmatprep.mubr.msk.f32.mxu0 %vm16804_vm4, %v16803_v0  ;;  %v9093_v21 = vpop.f32.mrf.mxu0 }
 0x854   : > { %16303 = vmatpush3.msra.mxu1 %v11390_v25  ;;  %16304 = vmatprep.mubr.msk.f32.mxu1 %vm16804_vm4, %v16803_v0  ;;  %v9113_v24 = vadd.f32 %v9093_v21, %v20362_v16  ;;  %v9220_v17 = vpop.f32.mrf.mxu1  ;;  %v11259_v16 = vld [vmem:[#allocation3 + $0x52] ss:$2 sm:$0xff] }
 0x855   : > { %16319 = vmatprep.subr.mxu0 %v16803_v0  ;;  %16278 = vmatmul.mubr.msk.f32.vlgmr.msra.gmra.mxu0 %vm8461_vm1, %v11256_v1  ;;  %v15796_v30 = vpop.f32.mrf.mxu0  ;;  %v11509_v1 = vld [vmem:[#allocation3 + $0x64] ss:$2 sm:$0xff] }
 0x856   : > { %16305 = vmatmul.mubr.msk.f32.vlgmr.msra.gmra.mxu1 %vm8461_vm1, %v11381_v19  ;;  %16320 = vmatpush3.msra.mxu0 %v11518_v42  ;;  %v20415_v27 = vadd.f32 %v9220_v17, %v9113_v24  ;;  %v15823_v45 = vpop.f32.mrf.mxu1 }
 0x857   : > { %16280 = vmatprep.mubr.msk.f32.mxu0 %vm16804_vm4, %v16803_v0  ;;  %16307 = vmatprep.mubr.msk.f32.mxu1 %vm16804_vm4, %v16803_v0  ;;  %v9098_v47 = vpop.f32.mrf.mxu0  ;;  %v11511_v45 = vld [vmem:[#allocation3 + $0x74] ss:$2 sm:$0xff] }
 0x858   : > { %16321 = vmatprep.subr.mxu0 %v16803_v0  ;;  %v9114_v15 = vadd.f32 %v9098_v47, %v20372_v14  ;;  %v9225_v60 = vpop.f32.mrf.mxu1  ;;  %16346 = vmatprep.subr.mxu1 %v16803_v0 }
 0x859   : > { %16281 = vmatmul.mubr.msk.f32.gmra.mxu0 %vm8461_vm1, %v11257_v56  ;;  %v15799_v18 = vpop.f32.mrf.mxu0 }
 0x85a   : > { %16308 = vmatmul.mubr.msk.f32.gmra.mxu1 %vm8461_vm1, %v11382_v55  ;;  %16322 = vmatpush3.msra.mxu0 %v11517_v37  ;;  %v20426_v22 = vadd.f32 %v9225_v60, %v9114_v15  ;;  %v15826_v20 = vpop.f32.mrf.mxu1 }
 0x85b   : > { %16323 = vmatprep.subr.mxu0 %v16803_v0  ;;  %16283 = vmatprep.mubr.msk.f32.mxu0 %vm16804_vm4, %v16803_v0  ;;  %v9103_v48 = vpop.f32.mrf.mxu0 }
 0x85c   : > { %16310 = vmatprep.mubr.msk.f32.mxu1 %vm16804_vm4, %v16803_v0  ;;  %16324 = vmatpush3.msra.mxu0 %v11516_v10  ;;  %v9115_v49 = vadd.f32 %v9103_v48, %v20383_v31  ;;  %v9230_v13 = vpop.f32.mrf.mxu1 }
 0x85d   : > { %16284 = vmatmul.mubr.msk.f32.gmra.mxu0 %vm8461_vm1, %v11259_v16  ;;  %16325 = vmatprep.subr.mxu0 %v16803_v0  ;;  %v15802_v36 = vpop.f32.mrf.mxu0 }
 0x85e   : > { %16311 = vmatmul.mubr.msk.f32.gmra.mxu1 %vm8461_vm1, %v11384_v61  ;;  %16326 = vmatpush3.msra.mxu0 %v11515_v23  ;;  %v9242_v51 = vadd.f32 %v9230_v13, %v9115_v49  ;;  %v15829_v52 = vpop.f32.mrf.mxu1 }
 0x85f   : > { %16286 = vmatprep.mubr.msk.f32.mxu0 %vm16804_vm4, %v16803_v0  ;;  %16313 = vmatprep.mubr.msk.f32.mxu1 %vm16804_vm4, %v16803_v0 }
 0x860   : > { %16327 = vmatprep.subr.mxu0 %v16803_v0  ;;  %v9108_v32 = vpop.f32.mrf.mxu0  ;;  %v9235_v14 = vpop.f32.mrf.mxu1 }
 0x861   : > { %16287 = vmatmul.mubr.msk.f32.gmra.mxu0 %vm8461_vm1, %v11261_v12  ;;  %v9116_v26 = vadd.f32 %v9108_v32, %v20392_v46  ;;  %v11507_v46 = vld [vmem:[#allocation3 + $0x44] ss:$2 sm:$0xff] }
 0x862   : > { %16314 = vmatmul.mubr.msk.f32.gmra.mxu1 %vm8461_vm1, %v11386_v54  ;;  %16328 = vmatpush3.msra.mxu0 %v11514_v11  ;;  %v15805_v43 = vpop.f32.mrf.mxu0  ;;  %v15832_v38 = vpop.f32.mrf.mxu1 }
 0x863   : > { %16289 = vmatprep.mubr.msk.f32.mxu0 %vm16804_vm4, %v16803_v0  ;;  %16316 = vmatprep.mubr.msk.f32.mxu1 %vm16804_vm4, %v16803_v0  ;;  %v9243_v29 = vadd.f32 %v9235_v14, %v9116_v26 }
 0x864   : > { %16329 = vmatprep.subr.mxu0 %v16803_v0 }
 0x865   : > { %16290 = vmatmul.mubr.msk.f32.gmra.mxu0 %vm8461_vm1, %v11263_v41  ;;  %v9342_v31 = vpop.f32.mrf.mxu0 }
 0x866   : > { %16317 = vmatmul.mubr.msk.f32.gmra.mxu1 %vm8461_vm1, %v11388_v34  ;;  %16330 = vmatpush3.msra.mxu0 %v11513_v2  ;;  %v9366_v5 = vadd.f32 %v9342_v31, %v20404_v6  ;;  %v9469_v9 = vpop.f32.mrf.mxu1 }
 0x867   : > { %16331 = vmatprep.mubr.msk.f32.mxu0 %vm16804_vm4, %v16803_v0  ;;  %v15847_v7 = vpop.f32.mrf.mxu0  ;;  %16358 = vmatprep.mubr.msk.f32.mxu1 %vm16804_vm4, %v16803_v0 }
 0x868   : > { %v9493_v50 = vadd.f32 %v9469_v9, %v9366_v5  ;;  %v15874_v39 = vpop.f32.mrf.mxu1 }
 0x869   : > { %16332 = vmatmul.mubr.msk.f32.vlgmr.msra.gmra.mxu0 %vm8461_vm1, %v11506_v58  ;;  %v9347_v62 = vpop.f32.mrf.mxu0 }
 0x86a   : > { %16334 = vmatprep.mubr.msk.f32.mxu0 %vm16804_vm4, %v16803_v0  ;;  %v9367_v59 = vadd.f32 %v9347_v62, %v20415_v27  ;;  %v9474_v3 = vpop.f32.mrf.mxu1 }
 0x86b   : > { %v15850_v63 = vpop.f32.mrf.mxu0 }
 0x86c   : > { %v9494_v35 = vadd.f32 %v9474_v3, %v9367_v59  ;;  %v15877_v40 = vpop.f32.mrf.mxu1 }
 0x86d   : > { %16335 = vmatmul.mubr.msk.f32.gmra.mxu0 %vm8461_vm1, %v11507_v46  ;;  %v9352_v28 = vpop.f32.mrf.mxu0 }
 0x86e   : > { %16337 = vmatprep.mubr.msk.f32.mxu0 %vm16804_vm4, %v16803_v0  ;;  %v9368_v8 = vadd.f32 %v9352_v28, %v20426_v22  ;;  %v9479_v4 = vpop.f32.mrf.mxu1 }
 0x86f   : > { %v15853_v44 = vpop.f32.mrf.mxu0 }
 0x870   : > { %v9495_v25 = vadd.f32 %v9479_v4, %v9368_v8  ;;  %v15880_v33 = vpop.f32.mrf.mxu1 }
 0x871   : > { %16338 = vmatmul.mubr.msk.f32.gmra.mxu0 %vm8461_vm1, %v11508_v57  ;;  %v9357_v6 = vpop.f32.mrf.mxu0 }
 0x872   : > { %16340 = vmatprep.mubr.msk.f32.mxu0 %vm16804_vm4, %v16803_v0  ;;  %v9369_v53 = vadd.f32 %v9357_v6, %v9242_v51  ;;  %v9484_v42 = vpop.f32.mrf.mxu1 }
 0x873   : > { %v15856_v21 = vpop.f32.mrf.mxu0 }
 0x874   : > { %v9496_v24 = vadd.f32 %v9484_v42, %v9369_v53  ;;  %v15883_v17 = vpop.f32.mrf.mxu1 }
 0x875   : > { %16341 = vmatmul.mubr.msk.f32.gmra.mxu0 %vm8461_vm1, %v11509_v1 }
 0x876   : > { %16343 = vmatprep.mubr.msk.f32.mxu0 %vm16804_vm4, %v16803_v0  ;;  %v9362_v19 = vpop.f32.mrf.mxu0  ;;  %v9489_v30 = vpop.f32.mrf.mxu1 }
 0x877   : > { %v9370_v27 = vadd.f32 %v9362_v19, %v9243_v29 }
 0x878   : > { %v15859_v37 = vpop.f32.mrf.mxu0  ;;  %v15886_v47 = vpop.f32.mrf.mxu1 }
 0x879   : > { %16344 = vmatmul.mubr.msk.f32.gmra.mxu0 %vm8461_vm1, %v11511_v45  ;;  %v9497_v56 = vadd.f32 %v9489_v30, %v9370_v27  ;;  %v11655_v37 = vld [vmem:[%s20623_s11 + $0x20] sm:$0xff] }
 0x87b   : > { %v9596_v15 = vpop.f32.mrf.mxu0 }
 0x87c   : > { %v9620_v60 = vadd.f32 %v9596_v15, %v9493_v50  ;;  %v9719_v55 = vpop.f32.mrf.mxu1 }
 0x87d   : > { %v15901_v10 = vpop.f32.mrf.mxu0 }
 0x87e   : > { %v9743_v18 = vadd.f32 %v9719_v55, %v9620_v60  ;;  %v15928_v22 = vpop.f32.mrf.mxu1  ;;  %v11654_v55 = vld [vmem:[%s20623_s11 + $0x18] sm:$0xff]  ;;  %v11653_v10 = vld [vmem:[%s20623_s11 + $0x10] sm:$0xff] }
 0x87f   : > { %v9601_v20 = vpop.f32.mrf.mxu0 }
 0x880   : > { %v9621_v23 = vadd.f32 %v9601_v20, %v9494_v35  ;;  %v9724_v48 = vpop.f32.mrf.mxu1 }
 0x881   : > { %v15904_v16 = vpop.f32.mrf.mxu0 }
 0x882   : > { %v9744_v49 = vadd.f32 %v9724_v48, %v9621_v23  ;;  %v15931_v13 = vpop.f32.mrf.mxu1 }
 0x883   : > { %v9606_v61 = vpop.f32.mrf.mxu0 }
 0x884   : > { %v9622_v36 = vadd.f32 %v9606_v61, %v9495_v25  ;;  %v9729_v51 = vpop.f32.mrf.mxu1 }
 0x885   : > { %v15907_v52 = vpop.f32.mrf.mxu0 }
 0x886   : > { %v9745_v11 = vadd.f32 %v9729_v51, %v9622_v36  ;;  %v15934_v12 = vpop.f32.mrf.mxu1 }
 0x887   : > { %v9611_v32 = vpop.f32.mrf.mxu0 }
 0x888   : > { %v9623_v14 = vadd.f32 %v9611_v32, %v9496_v24  ;;  %v9734_v54 = vpop.f32.mrf.mxu1  ;;  %v11656_v24 = vld [vmem:[%s20623_s11 + $0x28] sm:$0xff] }
 0x889   : > { %v15910_v26 = vpop.f32.mrf.mxu0  ;;  %16347 = vmatpush3.msra.mxu1 %v11656_v24 }
 0x88a   : > { %v9746_v43 = vadd.f32 %v9734_v54, %v9623_v14  ;;  %v15937_v38 = vpop.f32.mrf.mxu1  ;;  %16348 = vmatprep.subr.mxu1 %v16803_v0 }
 0x88b   : > { %16349 = vmatpush3.msra.mxu1 %v11655_v37  ;;  %v11651_v38 = vld [vmem:[%s20623_s11] sm:$0xff] }
 0x88c   : > { %v9616_v2 = vpop.f32.mrf.mxu0  ;;  %v9739_v29 = vpop.f32.mrf.mxu1  ;;  %16350 = vmatprep.subr.mxu1 %v16803_v0 }
 0x88d   : > { %v9624_v41 = vadd.f32 %v9616_v2, %v9497_v56  ;;  %16351 = vmatpush3.msra.mxu1 %v11654_v55 }
 0x88e   : > { %v15913_v34 = vpop.f32.mrf.mxu0  ;;  %v15940_v31 = vpop.f32.mrf.mxu1  ;;  %16352 = vmatprep.subr.mxu1 %v16803_v0 }
 0x88f   : > { %v9747_v5 = vadd.f32 %v9739_v29, %v9624_v41  ;;  %16353 = vmatpush3.msra.mxu1 %v11653_v10 }
 0x890   : > { %16354 = vmatprep.subr.mxu1 %v16803_v0 }
 0x891   : > { %v9846_v9 = vpop.f32.mrf.mxu0 }
 0x892   : > { %v9870_v7 = vadd.f32 %v9846_v9, %v9743_v18  ;;  %v9973_v58 = vpop.f32.mrf.mxu1 }
 0x893   : > { %v15955_v50 = vpop.f32.mrf.mxu0 }
 0x894   : > { %v9997_v39 = vadd.f32 %v9973_v58, %v9870_v7  ;;  %v15982_v62 = vpop.f32.mrf.mxu1 }
 0x895   : > { %v9851_v59 = vpop.f32.mrf.mxu0 }
 0x896   : > { %v9871_v3 = vadd.f32 %v9851_v59, %v9744_v49  ;;  %v9978_v63 = vpop.f32.mrf.mxu1 }
 0x897   : > { %v15958_v46 = vpop.f32.mrf.mxu0 }
 0x898   : > { %v9998_v35 = vadd.f32 %v9978_v63, %v9871_v3  ;;  %v15985_v40 = vpop.f32.mrf.mxu1 }
 0x899   : > { %v9856_v28 = vpop.f32.mrf.mxu0 }
 0x89a   : > { %v9872_v8 = vadd.f32 %v9856_v28, %v9745_v11  ;;  %v9983_v4 = vpop.f32.mrf.mxu1  ;;  %v11652_v11 = vld [vmem:[%s20623_s11 + $0x8] sm:$0xff] }
 0x89b   : > { %v15961_v44 = vpop.f32.mrf.mxu0  ;;  %16355 = vmatpush3.msra.mxu1 %v11652_v11 }
 0x89c   : > { %v9999_v57 = vadd.f32 %v9983_v4, %v9872_v8  ;;  %v15988_v25 = vpop.f32.mrf.mxu1  ;;  %16356 = vmatprep.subr.mxu1 %v16803_v0 }
 0x89d   : > { %v9861_v33 = vpop.f32.mrf.mxu0  ;;  %16357 = vmatpush3.msra.mxu1 %v11651_v38 }
 0x89e   : > { %v9873_v6 = vadd.f32 %v9861_v33, %v9746_v43  ;;  %v9988_v53 = vpop.f32.mrf.mxu1 }
 0x89f   : > { %v15964_v42 = vpop.f32.mrf.mxu0 }
 0x8a0   : > { %v10000_v21 = vadd.f32 %v9988_v53, %v9873_v6  ;;  %v15991_v1 = vpop.f32.mrf.mxu1 }
 0x8a2   : > { %v9866_v17 = vpop.f32.mrf.mxu0  ;;  %v9993_v19 = vpop.f32.mrf.mxu1 }
 0x8a3   : > { %v9874_v30 = vadd.f32 %v9866_v17, %v9747_v5 }
 0x8a4   : > { %v15967_v27 = vpop.f32.mrf.mxu0  ;;  %v15994_v45 = vpop.f32.mrf.mxu1 }
 0x8a5   : > { %v10001_v47 = vadd.f32 %v9993_v19, %v9874_v30 }
 0x8a7   : > { %v10100_v56 = vpop.f32.mrf.mxu0 }
 0x8a8   : > { %v10124_v15 = vadd.f32 %v10100_v56, %v9997_v39  ;;  %v10227_v60 = vpop.f32.mrf.mxu1 }
 0x8a9   : > { %v16009_v18 = vpop.f32.mrf.mxu0 }
 0x8aa   : > { %v10251_v22 = vadd.f32 %v10227_v60, %v10124_v15  ;;  %v16036_v20 = vpop.f32.mrf.mxu1 }
 0x8ab   : > { %v10105_v23 = vpop.f32.mrf.mxu0 }
 0x8ac   : > { %v10125_v48 = vadd.f32 %v10105_v23, %v9998_v35  ;;  %v10232_v16 = vpop.f32.mrf.mxu1 }
 0x8ad   : > { %v16012_v49 = vpop.f32.mrf.mxu0 }
 0x8ae   : > { %v10252_v13 = vadd.f32 %v10232_v16, %v10125_v48  ;;  %v16039_v61 = vpop.f32.mrf.mxu1 }
 0x8af   : > { %v10110_v36 = vpop.f32.mrf.mxu0 }
 0x8b0   : > { %v10126_v51 = vadd.f32 %v10110_v36, %v9999_v57  ;;  %v10237_v52 = vpop.f32.mrf.mxu1 }
 0x8b1   : > { %v16015_v12 = vpop.f32.mrf.mxu0 }
 0x8b2   : > { %v10253_v32 = vadd.f32 %v10237_v52, %v10126_v51  ;;  %v16042_v14 = vpop.f32.mrf.mxu1 }
 0x8b3   : > { %v10115_v54 = vpop.f32.mrf.mxu0 }
 0x8b4   : > { %v10127_v26 = vadd.f32 %v10115_v54, %v10000_v21  ;;  %v10242_v43 = vpop.f32.mrf.mxu1 }
 0x8b5   : > { %v16018_v2 = vpop.f32.mrf.mxu0 }
 0x8b6   : > { %v10254_v29 = vadd.f32 %v10242_v43, %v10127_v26  ;;  %v16045_v41 = vpop.f32.mrf.mxu1 }
 0x8b8   : > { %v10120_v34 = vpop.f32.mrf.mxu0  ;;  %v10247_v31 = vpop.f32.mrf.mxu1 }
 0x8b9   : > { %v10128_v5 = vadd.f32 %v10120_v34, %v10001_v47 }
 0x8ba   : > { %v16021_v9 = vpop.f32.mrf.mxu0  ;;  %v16048_v7 = vpop.f32.mrf.mxu1 }
 0x8bb   : > { %v10255_v58 = vadd.f32 %v10247_v31, %v10128_v5 }
 0x8bd   : > { %v10350_v50 = vpop.f32.mrf.mxu0 }
 0x8be   : > { %v10374_v39 = vadd.f32 %v10350_v50, %v10251_v22  ;;  %v10474_v62 = vpop.f32.mrf.mxu1 }
 0x8bf   : > { %v16063_v59 = vpop.f32.mrf.mxu0 }
 0x8c0   : > { %v10498_v3 = vadd.f32 %v10474_v62, %v10374_v39  ;;  %v16090_v63 = vpop.f32.mrf.mxu1 }
 0x8c1   : > { %v10355_v46 = vpop.f32.mrf.mxu0 }
 0x8c2   : > { %v10375_v35 = vadd.f32 %v10355_v46, %v10252_v13  ;;  %v10479_v40 = vpop.f32.mrf.mxu1 }
 0x8c3   : > { %v16066_v28 = vpop.f32.mrf.mxu0 }
 0x8c4   : > { %v10499_v8 = vadd.f32 %v10479_v40, %v10375_v35  ;;  %v16093_v4 = vpop.f32.mrf.mxu1 }
 0x8c5   : > { %v10360_v44 = vpop.f32.mrf.mxu0 }
 0x8c6   : > { %v10376_v57 = vadd.f32 %v10360_v44, %v10253_v32  ;;  %v10484_v25 = vpop.f32.mrf.mxu1 }
 0x8c7   : > { %v16069_v33 = vpop.f32.mrf.mxu0 }
 0x8c8   : > { %v10500_v6 = vadd.f32 %v10484_v25, %v10376_v57  ;;  %v16096_v53 = vpop.f32.mrf.mxu1 }
 0x8c9   : > { %v10365_v42 = vpop.f32.mrf.mxu0 }
 0x8ca   : > { %v10377_v21 = vadd.f32 %v10365_v42, %v10254_v29  ;;  %v10489_v1 = vpop.f32.mrf.mxu1 }
 0x8cb   : > { %v16072_v24 = vpop.f32.mrf.mxu0 }
 0x8cc   : > { %v10501_v17 = vadd.f32 %v10489_v1, %v10377_v21  ;;  %v16099_v19 = vpop.f32.mrf.mxu1 }
 0x8ce   : > { %v10370_v30 = vpop.f32.mrf.mxu0  ;;  %v10494_v27 = vpop.f32.mrf.mxu1 }
 0x8cf   : > { %v10378_v45 = vadd.f32 %v10370_v30, %v10255_v58 }
 0x8d0   : > { %v16075_v37 = vpop.f32.mrf.mxu0  ;;  %v16102_v47 = vpop.f32.mrf.mxu1 }
 0x8d1   : > { %v10502_v56 = vadd.f32 %v10494_v27, %v10378_v45 }
 0x8d3   : > { %v10601_v15 = vpop.f32.mrf.mxu0 }
 0x8d4   : > { %v10625_v60 = vadd.f32 %v10601_v15, %v10498_v3  ;;  %v10728_v55 = vpop.f32.mrf.mxu1 }
 0x8d5   : > { %v16117_v10 = vpop.f32.mrf.mxu0 }
 0x8d6   : > { %v20495_v18 = vadd.f32 %v10728_v55, %v10625_v60  ;;  %v16144_v22 = vpop.f32.mrf.mxu1 }
 0x8d7   : > { %v10606_v20 = vpop.f32.mrf.mxu0 }
 0x8d8   : > { %v10626_v23 = vadd.f32 %v10606_v20, %v10499_v8  ;;  %v10733_v48 = vpop.f32.mrf.mxu1 }
 0x8d9   : > { %v16120_v16 = vpop.f32.mrf.mxu0 }
 0x8da   : > { %v20497_v49 = vadd.f32 %v10733_v48, %v10626_v23  ;;  %v16147_v13 = vpop.f32.mrf.mxu1 }
 0x8db   : > { %v10611_v61 = vpop.f32.mrf.mxu0 }
 0x8dc   : > { %v10627_v36 = vadd.f32 %v10611_v61, %v10500_v6  ;;  %v10738_v51 = vpop.f32.mrf.mxu1 }
 0x8dd   : > { %v16123_v52 = vpop.f32.mrf.mxu0 }
 0x8de   : > { %v20499_v11 = vadd.f32 %v10738_v51, %v10627_v36  ;;  %v16150_v12 = vpop.f32.mrf.mxu1 }
 0x8df   : > { %v10616_v32 = vpop.f32.mrf.mxu0 }
 0x8e0   : > { %v10628_v14 = vadd.f32 %v10616_v32, %v10501_v17  ;;  %v10743_v54 = vpop.f32.mrf.mxu1 }
 0x8e1   : > { %v16126_v26 = vpop.f32.mrf.mxu0 }
 0x8e2   : > { %v20501_v43 = vadd.f32 %v10743_v54, %v10628_v14  ;;  %v16153_v38 = vpop.f32.mrf.mxu1 }
 0x8e4   : > { %v10621_v2 = vpop.f32.mrf.mxu0  ;;  %v10748_v29 = vpop.f32.mrf.mxu1 }
 0x8e5   : > { %v10629_v41 = vadd.f32 %v10621_v2, %v10502_v56 }
 0x8e6   : > { %v16129_v34 = vpop.f32.mrf.mxu0  ;;  %v16156_v31 = vpop.f32.mrf.mxu1 }
 0x8e7   : > { %v20503_v5 = vadd.f32 %v10748_v29, %v10629_v41 }
 0x8e9   : > { %v10855_v9 = vpop.f32.mrf.mxu0 }
 0x8ea   : > { %v10978_v7 = vpop.f32.mrf.mxu1  ;;  %v10879_v61 = vadd.f32 %v10855_v9, %v20495_v18 }
 0x8eb   : > { %v16171_v58 = vpop.f32.mrf.mxu0 }
 0x8ec   : > { %v16198_v50 = vpop.f32.mrf.mxu1  ;;  %v11002_v32 = vadd.f32 %v10978_v7, %v10879_v61 }
 0x8ed   : > { %v10860_v39 = vpop.f32.mrf.mxu0 }
 0x8ee   : > { %v10983_v62 = vpop.f32.mrf.mxu1  ;;  %v10880_v14 = vadd.f32 %v10860_v39, %v20497_v49 }
 0x8ef   : > { %v16174_v59 = vpop.f32.mrf.mxu0 }
 0x8f0   : > { %v16201_v3 = vpop.f32.mrf.mxu1  ;;  %v11003_v41 = vadd.f32 %v10983_v62, %v10880_v14 }
 0x8f1   : > { %v10865_v63 = vpop.f32.mrf.mxu0 }
 0x8f2   : > { %v10988_v46 = vpop.f32.mrf.mxu1  ;;  %v10881_v34 = vadd.f32 %v10865_v63, %v20499_v11 }
 0x8f3   : > { %v16177_v35 = vpop.f32.mrf.mxu0 }
 0x8f4   : > { %v16204_v40 = vpop.f32.mrf.mxu1  ;;  %v11004_v3 = vadd.f32 %v10988_v46, %v10881_v34 }
 0x8f5   : > { %v10870_v28 = vpop.f32.mrf.mxu0 }
 0x8f6   : > { %v10993_v8 = vpop.f32.mrf.mxu1  ;;  %v10882_v35 = vadd.f32 %v10870_v28, %v20501_v43 }
 0x8f7   : > { %v16180_v4 = vpop.f32.mrf.mxu0 }
 0x8f8   : > { %v16207_v44 = vpop.f32.mrf.mxu1 }
 0x8fa   : > { %v10875_v57 = vpop.f32.mrf.mxu0  ;;  %v20505_v25 = vpop.f32.mrf.mxu1 }
 0x8fb   : > { %v10883_v62 = vadd.f32 %v10875_v57, %v20503_v5 }
 0x8fc   : > { %v16183_v33 = vpop.f32.mrf.mxu0  ;;  %v16210_v6 = vpop.f32.mrf.mxu1 }
 0x8fd   : > { %v11005_v6 = vadd.f32 %v10993_v8, %v10882_v35  ;;  %v11006_v43 = vadd.f32 %v20505_v25, %v10883_v62 }
 0x8ff   : > { %v11102_v53 = vpop.f32.mrf.mxu0 }
 0x900   : > { %v11227_v42 = vpop.f32.mrf.mxu1  ;;  %v11126_v38 = vadd.f32 %v11102_v53, %v11002_v32 }
 0x901   : > { %v16225_v21 = vpop.f32.mrf.mxu0 }
 0x902   : > { %v16252_v1 = vpop.f32.mrf.mxu1  ;;  %v11251_v50 = vadd.f32 %v11227_v42, %v11126_v38  ;;  %v13003_v21 = vld [vmem:[#allocation15] ss:$0 sm:$0xff] }
 0x903   : > { %v11107_v24 = vpop.f32.mrf.mxu0 }
 0x904   : > { %v11232_v17 = vpop.f32.mrf.mxu1  ;;  %v11127_v59 = vadd.f32 %v11107_v24, %v11003_v41 }
 0x905   : > { %v16228_v19 = vpop.f32.mrf.mxu0 }
 0x906   : > { %v16255_v30 = vpop.f32.mrf.mxu1  ;;  %v11252_v39 = vadd.f32 %v11232_v17, %v11127_v59  ;;  %v20531_v59 = vld [vmem:[%s20624_s12] ss:$0 sm:$0xff] }
 0x907   : > { %v11112_v27 = vpop.f32.mrf.mxu0 }
 0x908   : > { %v11237_v45 = vpop.f32.mrf.mxu1  ;;  %v11128_v4 = vadd.f32 %v11112_v27, %v11004_v3 }
 0x909   : > { %v16231_v37 = vpop.f32.mrf.mxu0 }
 0x90a   : > { %v16258_v47 = vpop.f32.mrf.mxu1  ;;  %v11253_v1 = vadd.f32 %v11237_v45, %v11128_v4 }
 0x90b   : > { %v11117_v56 = vpop.f32.mrf.mxu0 }
 0x90c   : > { %v11242_v15 = vpop.f32.mrf.mxu1  ;;  %v11129_v24 = vadd.f32 %v11117_v56, %v11005_v6  ;;  %v16808_v6 = vmov 5  }
 0x90d   : > { %v16234_v60 = vpop.f32.mrf.mxu0 }
 0x90e   : > { %v16261_v55 = vpop.f32.mrf.mxu1  ;;  %v11254_v37 = vadd.f32 %v11242_v15, %v11129_v24  ;;  %v16811_v24 = vmov 6  }
 0x910   : > { %v11122_v10 = vpop.f32.mrf.mxu0  ;;  %v11247_v22 = vpop.f32.mrf.mxu1 }
 0x911   : > { %v11130_v47 = vadd.f32 %v11122_v10, %v11006_v43 }
 0x912   : > { %v16237_v20 = vpop.f32.mrf.mxu0  ;;  %v16264_v23 = vpop.f32.mrf.mxu1 }
 0x913   : > { %v11255_v45 = vadd.f32 %v11247_v22, %v11130_v47 }
 0x915   : > { %v11352_v48 = vpop.f32.mrf.mxu0 }
 0x916   : > { %v11477_v16 = vpop.f32.mrf.mxu1  ;;  %v11376_v7 = vadd.f32 %v11352_v48, %v11251_v50  ;;  %v16806_v50 = vmov 0  }
 0x917   : > { %v16279_v13 = vpop.f32.mrf.mxu0  ;;  %16490 = vset.pattern.permute.xlu0 %v16806_v50 }
 0x918   : > { %v16306_v36 = vpop.f32.mrf.mxu1  ;;  %v11501_v11 = vadd.f32 %v11477_v16, %v11376_v7 }
 0x919   : > { %v11357_v51 = vpop.f32.mrf.mxu0 }
 0x91a   : > { %v11482_v52 = vpop.f32.mrf.mxu1  ;;  %v11377_v63 = vadd.f32 %v11357_v51, %v11252_v39 }
 0x91b   : > { %v16282_v12 = vpop.f32.mrf.mxu0 }
 0x91c   : > { %v16309_v54 = vpop.f32.mrf.mxu1  ;;  %v11502_v28 = vadd.f32 %v11482_v52, %v11377_v63 }
 0x91d   : > { %v11362_v26 = vpop.f32.mrf.mxu0 }
 0x91e   : > { %v11487_v2 = vpop.f32.mrf.mxu1  ;;  %v11378_v30 = vadd.f32 %v11362_v26, %v11253_v1  ;;  %v16810_v1 = vmov 4  }
 0x91f   : > { %v16285_v29 = vpop.f32.mrf.mxu0 }
 0x920   : > { %v16312_v31 = vpop.f32.mrf.mxu1  ;;  %v11503_v57 = vadd.f32 %v11487_v2, %v11378_v30 }
 0x921   : > { %v11367_v58 = vpop.f32.mrf.mxu0 }
 0x922   : > { %v11492_v18 = vpop.f32.mrf.mxu1  ;;  %v11379_v55 = vadd.f32 %v11367_v58, %v11254_v37  ;;  %v16805_v58 = vmov 1  }
 0x923   : > { %v16288_v9 = vpop.f32.mrf.mxu0  ;;  %16491 = vset.pattern.permute.xlu1 %v16805_v58 }
 0x924   : > { %v16315_v40 = vpop.f32.mrf.mxu1  ;;  %v11504_v13 = vadd.f32 %v11492_v18, %v11379_v55 }
 0x925   : > { %v11372_v49 = vpop.f32.mrf.mxu0 }
 0x926   : > { %v11497_v44 = vpop.f32.mrf.mxu1  ;;  %v11380_v15 = vadd.f32 %v11372_v49, %v11255_v45 }
 0x927   : > { %v16291_v33 = vpop.f32.mrf.mxu0 }
 0x928   : > { %v16318_v53 = vpop.f32.mrf.mxu1  ;;  %v11505_v22 = vadd.f32 %v11497_v44, %v11380_v15  ;;  %v16807_v33 = vmov 2  }
 0x929   : > { %v11600_v42 = vpop.f32.mrf.mxu0  ;;  %v16809_v53 = vmov 3  }
 0x92a   : > { %v11624_v46 = vadd.f32 %v11600_v42, %v11501_v11 }
 0x92b   : > { %v16333_v19 = vpop.f32.mrf.mxu0 }
 0x92c   : > { %v11636_v17 = vadd.f32 %v13003_v21, %v11624_v46  ;;  %v16812_v46 = vmov 7  }
 0x92d   : > { %v11605_v27 = vpop.f32.mrf.mxu0 }
 0x92e   : > { %v11641_v8 = vmax.f32 %v11636_v17, 0.0  ;;  %v11625_v60 = vadd.f32 %v11605_v27, %v11502_v28 }
 0x92f   : > { %v16336_v5 = vpop.f32.mrf.mxu0 }
 0x930   : > { %v11646_v20 = vmin.f32 %v11641_v8, 6.0  ;;  %v11637_v23 = vadd.f32 %v13003_v21, %v11625_v60  ;;  %v11820_v60 = vld [vmem:[#allocation17 + $0x28] sm:$0xff]  ;;  %v11779_v5 = vld [vmem:[#allocation17] sm:$0xff] }
 0x931   : > { %v11610_v48 = vpop.f32.mrf.mxu0 }
 0x932   : > { %v11642_v56 = vmax.f32 %v11637_v23, 0.0  ;;  %v11626_v16 = vadd.f32 %v11610_v48, %v11503_v57  ;;  %16359 = vmatmul.mubr.msk.f32.vlgmr.msra.gmra.mxu1 %vm8461_vm1, %v11646_v20  ;;  %v11856_v48 = vld [vmem:[#allocation17 + $0x50] sm:$0xff] }
 0x933   : > { %v16339_v25 = vpop.f32.mrf.mxu0  ;;  %16361 = vmatprep.mubr.msk.f32.mxu1 %vm16804_vm4, %v16803_v0 }
 0x934   : > { %v11647_v10 = vmin.f32 %v11642_v56, 6.0  ;;  %v11638_v61 = vadd.f32 %v13003_v21, %v11626_v16 }
 0x935   : > { %v11615_v36 = vpop.f32.mrf.mxu0 }
 0x936   : > { %v11643_v51 = vmax.f32 %v11638_v61, 0.0  ;;  %v11627_v52 = vadd.f32 %v11615_v36, %v11504_v13  ;;  %16362 = vmatmul.mubr.msk.f32.gmra.mxu1 %vm8461_vm1, %v11647_v10  ;;  %v11892_v13 = vld [vmem:[#allocation17 + $0x78] sm:$0xff]  ;;  %v11928_v36 = vld [vmem:[#allocation17 + $0xa0] sm:$0xff] }
 0x937   : > { %v16342_v12 = vpop.f32.mrf.mxu0  ;;  %16364 = vmatprep.mubr.msk.f32.mxu1 %vm16804_vm4, %v16803_v0 }
 0x938   : > { %v11648_v32 = vmin.f32 %v11643_v51, 6.0  ;;  %v11639_v14 = vadd.f32 %v13003_v21, %v11627_v52  ;;  %v11964_v51 = vld [vmem:[#allocation17 + $0xc8] sm:$0xff] }
 0x939   : > { %v11620_v54 = vpop.f32.mrf.mxu0 }
 0x93a   : > { %v11644_v26 = vmax.f32 %v11639_v14, 0.0  ;;  %v11628_v38 = vadd.f32 %v11620_v54, %v11505_v22  ;;  %16365 = vmatmul.mubr.msk.f32.gmra.mxu1 %vm8461_vm1, %v11648_v32  ;;  %v12000_v54 = vld [vmem:[#allocation17 + $0xf0] sm:$0xff] }
 0x93b   : > { %v16345_v2 = vpop.f32.mrf.mxu0  ;;  %16367 = vmatprep.mubr.msk.f32.mxu1 %vm16804_vm4, %v16803_v0 }
 0x93c   : > { %v11649_v29 = vmin.f32 %v11644_v26, 6.0  ;;  %v11640_v41 = vadd.f32 %v13003_v21, %v11628_v38 }
 0x93e   : > { %v11645_v34 = vmax.f32 %v11640_v41, 0.0  ;;  %16368 = vmatmul.mubr.msk.f32.gmra.mxu1 %vm8461_vm1, %v11649_v29  ;;  %v12036_v41 = vld [vmem:[#allocation17 + $0x118] sm:$0xff] }
 0x93f   : > { %16370 = vmatprep.mubr.msk.f32.mxu1 %vm16804_vm4, %v16803_v0 }
 0x940   : > { %v11650_v31 = vmin.f32 %v11645_v34, 6.0 }
 0x942   : > { %16371 = vmatmul.mubr.msk.f32.gmra.mxu1 %vm8461_vm1, %v11650_v31 }
 0x9f2   : > { %v11745_v18 = vpop.f32.mrf.mxu1 }
 0x9f3   : > { %v11746_v9 = vadd.f32 %v20531_v59, %v11745_v18 }
 0x9f4   : > { %v16360_v3 = vpop.f32.mrf.mxu1 }
 0x9f5   : > { %v11769_v35 = vmax.f32 %v11746_v9, 0.0 }
 0x9f6   : > { %v11750_v0 = vpop.f32.mrf.mxu1 }
 0x9f7   : > { %v11774_v7 = vmin.f32 %v11769_v35, 6.0  ;;  %v11751_v49 = vadd.f32 %v20531_v59, %v11750_v0 }
 0x9f8   : > { %v16363_v40 = vpop.f32.mrf.mxu1 }
 0x9f9   : > { %11826 = vperm.xlu1 %16491, %v11774_v7   ;;  %11786 = vperm.xlu0 %16490, %v11774_v7   ;;  %v11770_v44 = vmax.f32 %v11751_v49, 0.0 }
 0x9fa   : > { %v11755_v39 = vpop.f32.mrf.mxu1 }
 0x9fb   : > { %v11775_v63 = vmin.f32 %v11770_v44, 6.0  ;;  %v11756_v19 = vadd.f32 %v20531_v59, %v11755_v39 }
 0x9fc   : > { %v16366_v4 = vpop.f32.mrf.mxu1 }
 0x9fd   : > { %16492 = vset.pattern.permute.xlu1 %v16807_v33  ;;  %16495 = vset.pattern.permute.xlu0 %v16808_v6  ;;  %v11771_v43 = vmax.f32 %v11756_v19, 0.0  ;;  %v11857_v19 = vld [vmem:[#allocation17 + $0x58] sm:$0xff] }
 0x9fe   : > { %11862 = vperm.xlu1 %16492, %v11774_v7   ;;  %11970 = vperm.xlu0 %16495, %v11774_v7   ;;  %v11760_v62 = vpop.f32.mrf.mxu1 }
 0x9ff   : > { %v11776_v28 = vmin.f32 %v11771_v43, 6.0  ;;  %v11761_v30 = vadd.f32 %v20531_v59, %v11760_v62 }
 0xa00   : > { %v16369_v11 = vpop.f32.mrf.mxu1 }
 0xa01   : > { %v11772_v17 = vmax.f32 %v11761_v30, 0.0  ;;  %v11823_v30 = vld [vmem:[#allocation17 + $0x40] sm:$0xff] }
 0xa02   : > { %16493 = vset.pattern.permute.xlu1 %v16809_v53  ;;  %16498 = vset.pattern.permute.xlu0 %v16806_v50  ;;  %v11765_v42 = vpop.f32.mrf.mxu1 }
 0xa03   : > { %11898 = vperm.xlu1 %16493, %v11774_v7   ;;  %11791 = vperm.xlu0 %16498, %v11775_v63   ;;  %v11766_v27 = vadd.f32 %v20531_v59, %v11765_v42  ;;  %v11777_v37 = vmin.f32 %v11772_v17, 6.0  ;;  %v11893_v17 = vld [vmem:[#allocation17 + $0x80] sm:$0xff] }
 0xa04   : > { %v16372_v21 = vpop.f32.mrf.mxu1 }
 0xa05   : > { %v11773_v47 = vmax.f32 %v11766_v27, 0.0  ;;  %v11781_v27 = vld [vmem:[#allocation17 + $0x10] sm:$0xff] }
 0xa07   : > { %16494 = vset.pattern.permute.xlu1 %v16810_v1  ;;  %16499 = vset.pattern.permute.xlu0 %v16805_v58  ;;  %v11778_v8 = vmin.f32 %v11773_v47, 6.0 }
 0xa08   : > { %11934 = vperm.xlu1 %16494, %v11774_v7   ;;  %11830 = vperm.xlu0 %16499, %v11775_v63  }
 0xa0c   : > { %16496 = vset.pattern.permute.xlu1 %v16811_v24  ;;  %16500 = vset.pattern.permute.xlu0 %v16807_v33 }
 0xa0d   : > { %12006 = vperm.xlu1 %16496, %v11774_v7   ;;  %11866 = vperm.xlu0 %16500, %v11775_v63  }
 0xa11   : > { %16497 = vset.pattern.permute.xlu1 %v16812_v46  ;;  %16501 = vset.pattern.permute.xlu0 %v16809_v53 }
 0xa12   : > { %12042 = vperm.xlu1 %16497, %v11774_v7   ;;  %11902 = vperm.xlu0 %16501, %v11775_v63  }
 0xa16   : > { %16503 = vset.pattern.permute.xlu1 %v16808_v6  ;;  %16502 = vset.pattern.permute.xlu0 %v16810_v1 }
 0xa17   : > { %11974 = vperm.xlu1 %16503, %v11775_v63   ;;  %11938 = vperm.xlu0 %16502, %v11775_v63  }
 0xa1b   : > { %16506 = vset.pattern.permute.xlu1 %v16806_v50  ;;  %16504 = vset.pattern.permute.xlu0 %v16811_v24 }
 0xa1c   : > { %12010 = vperm.xlu0 %16504, %v11775_v63   ;;  %11796 = vperm.xlu1 %16506, %v11776_v28  }
 0xa20   : > { %16505 = vset.pattern.permute.xlu0 %v16812_v46  ;;  %16507 = vset.pattern.permute.xlu1 %v16805_v58 }
 0xa21   : > { %12046 = vperm.xlu0 %16505, %v11775_v63   ;;  %11834 = vperm.xlu1 %16507, %v11776_v28  }
 0xa25   : > { %16512 = vset.pattern.permute.xlu0 %v16811_v24  ;;  %16508 = vset.pattern.permute.xlu1 %v16807_v33 }
 0xa26   : > { %12014 = vperm.xlu0 %16512, %v11776_v28   ;;  %11870 = vperm.xlu1 %16508, %v11776_v28  }
 0xa2a   : > { %16513 = vset.pattern.permute.xlu0 %v16812_v46  ;;  %16509 = vset.pattern.permute.xlu1 %v16809_v53 }
 0xa2b   : > { %12050 = vperm.xlu0 %16513, %v11776_v28   ;;  %11906 = vperm.xlu1 %16509, %v11776_v28  }
 0xa2f   : > { %16518 = vset.pattern.permute.xlu0 %v16810_v1  ;;  %16510 = vset.pattern.permute.xlu1 %v16810_v1 }
 0xa30   : > { %11942 = vperm.xlu1 %16510, %v11776_v28   ;;  %11946 = vperm.xlu0 %16518, %v11777_v37  }
 0xa34   : > { %16511 = vset.pattern.permute.xlu1 %v16808_v6  ;;  %16521 = vset.pattern.permute.xlu0 %v16806_v50 }
 0xa35   : > { %11978 = vperm.xlu1 %16511, %v11776_v28   ;;  %11806 = vperm.xlu0 %16521, %v11778_v8   ;;  %v11822_v28 = vld [vmem:[#allocation17 + $0x38] sm:$0xff] }
 0xa39   : > { %16514 = vset.pattern.permute.xlu1 %v16806_v50  ;;  %16522 = vset.pattern.permute.xlu0 %v16805_v58 }
 0xa3a   : > { %11801 = vperm.xlu1 %16514, %v11777_v37   ;;  %11842 = vperm.xlu0 %16522, %v11778_v8  }
 0xa3e   : > { %16515 = vset.pattern.permute.xlu1 %v16805_v58  ;;  %16523 = vset.pattern.permute.xlu0 %v16807_v33 }
 0xa3f   : > { %11838 = vperm.xlu1 %16515, %v11777_v37   ;;  %11878 = vperm.xlu0 %16523, %v11778_v8  }
 0xa43   : > { %16516 = vset.pattern.permute.xlu1 %v16807_v33  ;;  %16528 = vset.pattern.permute.xlu0 %v16812_v46 }
 0xa44   : > { %11874 = vperm.xlu1 %16516, %v11777_v37   ;;  %12054 = vperm.xlu0 %16528, %v11777_v37  }
 0xa48   : > { %16517 = vset.pattern.permute.xlu1 %v16809_v53 }
 0xa49   : > { %11910 = vperm.xlu1 %16517, %v11777_v37  }
 0xa4d   : > { %16519 = vset.pattern.permute.xlu1 %v16808_v6 }
 0xa4e   : > { %11982 = vperm.xlu1 %16519, %v11777_v37  }
 0xa52   : > { %16520 = vset.pattern.permute.xlu1 %v16811_v24 }
 0xa53   : > { %12018 = vperm.xlu1 %16520, %v11777_v37  }
 0xa57   : > { %16524 = vset.pattern.permute.xlu1 %v16809_v53 }
 0xa58   : > { %11914 = vperm.xlu1 %16524, %v11778_v8  }
 0xa5c   : > { %16525 = vset.pattern.permute.xlu1 %v16810_v1  ;;  %v11821_v1 = vld [vmem:[#allocation17 + $0x30] sm:$0xff] }
 0xa5d   : > { %11950 = vperm.xlu1 %16525, %v11778_v8  }
 0xa61   : > { %16526 = vset.pattern.permute.xlu1 %v16808_v6 }
 0xa62   : > { %11986 = vperm.xlu1 %16526, %v11778_v8  }
 0xa66   : > { %16527 = vset.pattern.permute.xlu1 %v16811_v24 }
 0xa67   : > { %12022 = vperm.xlu1 %16527, %v11778_v8  }
 0xa6b   : > { %16529 = vset.pattern.permute.xlu1 %v16812_v46  ;;  %v11780_v46 = vld [vmem:[#allocation17 + $0x8] sm:$0xff] }
 0xa6c   : > { %12058 = vperm.xlu1 %16529, %v11778_v8   ;;  %v11858_v8 = vld [vmem:[#allocation17 + $0x60] sm:$0xff] }
 0xa74   : > { %v11827_v57 = vpop.permute.xlu1 %11826  ;;  %v11787_v55 = vpop.permute.xlu0 %11786 }
 0xa75   : > { %v11845_v20 = vmul.f32 %v11827_v57, %v11820_v60  ;;  %v11809_v23 = vmul.f32 %v11787_v55, %v11779_v5  ;;  %v11782_v5 = vld [vmem:[#allocation17 + $0x18] sm:$0xff]  ;;  %v11859_v57 = vld [vmem:[#allocation17 + $0x68] sm:$0xff] }
 0xa76   : > { %v11929_v55 = vld [vmem:[#allocation17 + $0xa8] sm:$0xff] }
 0xa77   : > { %v11850_v56 = vadd.f32 %v11845_v20, %v11809_v23 }
 0xa79   : > { %v11863_v45 = vpop.permute.xlu1 %11862  ;;  %v11971_v52 = vpop.permute.xlu0 %11970 }
 0xa7a   : > { %v11881_v16 = vmul.f32 %v11863_v45, %v11856_v48  ;;  %v11989_v32 = vmul.f32 %v11971_v52, %v11964_v51  ;;  %v11930_v52 = vld [vmem:[#allocation17 + $0xb0] sm:$0xff] }
 0xa7c   : > { %v11886_v25 = vadd.f32 %v11881_v16, %v11850_v56  ;;  %v11894_v16 = vld [vmem:[#allocation17 + $0x88] sm:$0xff] }
 0xa7e   : > { %v11899_v15 = vpop.permute.xlu1 %11898  ;;  %v11792_v50 = vpop.permute.xlu0 %11791 }
 0xa7f   : > { %v11917_v10 = vmul.f32 %v11899_v15, %v11892_v13  ;;  %v11810_v37 = vmul.f32 %v11792_v50, %v11780_v46 }
 0xa81   : > { %v11922_v61 = vadd.f32 %v11917_v10, %v11886_v25  ;;  %v11895_v25 = vld [vmem:[#allocation17 + $0x90] sm:$0xff] }
 0xa83   : > { %v11935_v12 = vpop.permute.xlu1 %11934  ;;  %v11831_v18 = vpop.permute.xlu0 %11830 }
 0xa84   : > { %v11953_v22 = vmul.f32 %v11935_v12, %v11928_v36  ;;  %v11846_v43 = vmul.f32 %v11831_v18, %v11821_v1  ;;  %v11931_v18 = vld [vmem:[#allocation17 + $0xb8] sm:$0xff] }
 0xa86   : > { %v11958_v14 = vadd.f32 %v11953_v22, %v11922_v61  ;;  %v11851_v45 = vadd.f32 %v11846_v43, %v11810_v37  ;;  %v11860_v43 = vld [vmem:[#allocation17 + $0x70] sm:$0xff] }
 0xa88   : > { %v12007_v26 = vpop.permute.xlu1 %12006  ;;  %v11994_v38 = vadd.f32 %v11989_v32, %v11958_v14  ;;  %v11867_v35 = vpop.permute.xlu0 %11866 }
 0xa89   : > { %v12025_v2 = vmul.f32 %v12007_v26, %v12000_v54  ;;  %v11882_v47 = vmul.f32 %v11867_v35, %v11857_v19  ;;  %v11966_v26 = vld [vmem:[#allocation17 + $0xd8] sm:$0xff] }
 0xa8b   : > { %v12030_v29 = vadd.f32 %v12025_v2, %v11994_v38  ;;  %v11887_v36 = vadd.f32 %v11882_v47, %v11851_v45  ;;  %v11896_v47 = vld [vmem:[#allocation17 + $0x98] sm:$0xff] }
 0xa8d   : > { %v12043_v34 = vpop.permute.xlu1 %12042  ;;  %v11903_v7 = vpop.permute.xlu0 %11902 }
 0xa8e   : > { %v12061_v31 = vmul.f32 %v12043_v34, %v12036_v41  ;;  %v11918_v56 = vmul.f32 %v11903_v7, %v11893_v17 }
 0xa90   : > { %v20576_v58 = vadd.f32 %v12061_v31, %v12030_v29  ;;  %v11923_v54 = vadd.f32 %v11918_v56, %v11887_v36  ;;  %v11965_v29 = vld [vmem:[#allocation17 + $0xd0] sm:$0xff] }
 0xa92   : > { %v20578_v59 = vpop.permute.xlu1 %11974  ;;  %v11939_v49 = vpop.permute.xlu0 %11938 }
 0xa93   : > { %v11954_v51 = vmul.f32 %v11939_v49, %v11929_v55  ;;  %v11990_v7 = vmul.f32 %v20578_v59, %v11965_v29  ;;  %v11824_v49 = vld [vmem:[#allocation17 + $0x48] sm:$0xff] }
 0xa95   : > { %v11959_v50 = vadd.f32 %v11954_v51, %v11923_v54 }
 0xa97   : > { %v11797_v9 = vpop.permute.xlu1 %11796  ;;  %v20580_v4 = vpop.permute.xlu0 %12010  ;;  %v11995_v46 = vadd.f32 %v11990_v7, %v11959_v50 }
 0xa98   : > { %v11811_v13 = vmul.f32 %v11797_v9, %v11781_v27  ;;  %v12001_v9 = vld [vmem:[#allocation17 + $0xf8] sm:$0xff] }
 0xa99   : > { %v12026_v19 = vmul.f32 %v20580_v4, %v12001_v9  ;;  %v11932_v4 = vld [vmem:[#allocation17 + $0xc0] sm:$0xff] }
 0xa9b   : > { %v12031_v55 = vadd.f32 %v12026_v19, %v11995_v46 }
 0xa9c   : > { %v11835_v3 = vpop.permute.xlu1 %11834  ;;  %v20582_v33 = vpop.permute.xlu0 %12046 }
 0xa9d   : > { %v11847_v20 = vmul.f32 %v11835_v3, %v11822_v28 }
 0xa9f   : > { %v11852_v12 = vadd.f32 %v11847_v20, %v11811_v13  ;;  %v12038_v20 = vld [vmem:[#allocation17 + $0x128] sm:$0xff] }
 0xaa1   : > { %v11871_v0 = vpop.permute.xlu1 %11870  ;;  %v20584_v11 = vpop.permute.xlu0 %12014 }
 0xaa2   : > { %v11883_v15 = vmul.f32 %v11871_v0, %v11858_v8 }
 0xaa4   : > { %v11888_v41 = vadd.f32 %v11883_v15, %v11852_v12  ;;  %v12039_v15 = vld [vmem:[#allocation17 + $0x130] sm:$0xff] }
 0xaa6   : > { %v11907_v40 = vpop.permute.xlu1 %11906  ;;  %v20586_v53 = vpop.permute.xlu0 %12050 }
 0xaa7   : > { %v11919_v22 = vmul.f32 %v11907_v40, %v11894_v16  ;;  %v11967_v40 = vld [vmem:[#allocation17 + $0xe0] sm:$0xff] }
 0xaa9   : > { %v11924_v3 = vadd.f32 %v11919_v22, %v11888_v41 }
 0xaab   : > { %v11943_v39 = vpop.permute.xlu1 %11942  ;;  %v11947_v21 = vpop.permute.xlu0 %11946 }
 0xaac   : > { %v11955_v34 = vmul.f32 %v11943_v39, %v11930_v52  ;;  %v11783_v39 = vld [vmem:[#allocation17 + $0x20] sm:$0xff] }
 0xab0   : > { %v11979_v44 = vpop.permute.xlu1 %11978  ;;  %v11807_v60 = vpop.permute.xlu0 %11806 }
 0xab1   : > { %v11991_v35 = vmul.f32 %v11979_v44, %v11966_v26 }
 0xab5   : > { %v11802_v6 = vpop.permute.xlu1 %11801  ;;  %v11843_v38 = vpop.permute.xlu0 %11842 }
 0xab6   : > { %v11812_v10 = vmul.f32 %v11802_v6, %v11782_v5  ;;  %v12037_v6 = vld [vmem:[#allocation17 + $0x120] sm:$0xff]  ;;  %v11849_v27 = vmul.f32 %v11843_v38, %v11824_v49  ;;  %v11813_v5 = vmul.f32 %v11807_v60, %v11783_v39  ;;  %v12004_v60 = vld [vmem:[#allocation17 + $0x110] sm:$0xff]  ;;  %v12040_v38 = vld [vmem:[#allocation17 + $0x138] sm:$0xff] }
 0xab7   : > { %v12062_v59 = vmul.f32 %v20582_v33, %v12037_v6  ;;  %v12063_v33 = vmul.f32 %v20586_v53, %v12038_v20 }
 0xab8   : > { %v11854_v56 = vadd.f32 %v11849_v27, %v11813_v5 }
 0xab9   : > { %v12067_v13 = vadd.f32 %v12062_v59, %v12031_v55 }
 0xaba   : > { %v11839_v62 = vpop.permute.xlu1 %11838  ;;  %v11879_v28 = vpop.permute.xlu0 %11878 }
 0xabb   : > { %v11848_v23 = vmul.f32 %v11839_v62, %v11823_v30  ;;  %v12002_v62 = vld [vmem:[#allocation17 + $0x100] sm:$0xff]  ;;  %v12003_v30 = vld [vmem:[#allocation17 + $0x108] sm:$0xff] }
 0xabc   : > { %v12027_v8 = vmul.f32 %v20584_v11, %v12002_v62 }
 0xabd   : > { %v11853_v32 = vadd.f32 %v11848_v23, %v11812_v10 }
 0xabf   : > { %v11875_v63 = vpop.permute.xlu1 %11874  ;;  %v12055_v10 = vpop.permute.xlu0 %12054 }
 0xac0   : > { %v11884_v61 = vmul.f32 %v11875_v63, %v11859_v57  ;;  %v11960_v63 = vadd.f32 %v11955_v34, %v11924_v3 }
 0xac2   : > { %v11889_v31 = vadd.f32 %v11884_v61, %v11853_v32  ;;  %v11996_v17 = vadd.f32 %v11991_v35, %v11960_v63  ;;  %v12073_v32 = vsel %vm12071_vm8, %v12067_v13, 0.0 }
 0xac4   : > { %v11911_v42 = vpop.permute.xlu1 %11910  ;;  %v12032_v45 = vadd.f32 %v12027_v8, %v11996_v17 }
 0xac5   : > { %v11920_v14 = vmul.f32 %v11911_v42, %v11895_v25  ;;  %v11956_v42 = vmul.f32 %v11947_v21, %v11931_v18  ;;  %v11885_v21 = vmul.f32 %v11879_v28, %v11860_v43 }
 0xac6   : > { %v12068_v51 = vadd.f32 %v12063_v33, %v12032_v45 }
 0xac7   : > { %v11925_v0 = vadd.f32 %v11920_v14, %v11889_v31  ;;  %v11890_v61 = vadd.f32 %v11885_v21, %v11854_v56 }
 0xac8   : > { %v12075_v53 = vsel %vm12071_vm8, %v12068_v51, 0.0 }
 0xac9   : > { %v20588_v24 = vpop.permute.xlu1 %11982  ;;  %v11961_v44 = vadd.f32 %v11956_v42, %v11925_v0  ;;  %v12087_v42 = vld [vmem:[%s20626_s14] sm:$0x1] }
 0xaca   : > { %v11992_v37 = vmul.f32 %v20588_v24, %v11967_v40  ;;  %v11968_v24 = vld [vmem:[#allocation17 + $0xe8] sm:$0xff] }
 0xacc   : > { %v11997_v16 = vadd.f32 %v11992_v37, %v11961_v44 }
 0xace   : > { %v12019_v48 = vpop.permute.xlu1 %12018 }
 0xacf   : > { %v12028_v57 = vmul.f32 %v12019_v48, %v12003_v30  ;;  %v12064_v48 = vmul.f32 %v12055_v10, %v12039_v15 }
 0xad1   : > { %v12033_v36 = vadd.f32 %v12028_v57, %v11997_v16 }
 0xad3   : > { %v11915_v2 = vpop.permute.xlu1 %11914  ;;  %v12069_v14 = vadd.f32 %v12064_v48, %v12033_v36 }
 0xad4   : > { %v11921_v25 = vmul.f32 %v11915_v2, %v11896_v47  ;;  %v12072_v2 = vsel %vm12071_vm8, %v20576_v58, 0.0  ;;  %v12089_v58 = vlaneseq }
 0xad5   : > { %v12074_v41 = vadd.f32 %v12073_v32, %v12072_v2  ;;  %v12077_v31 = vsel %vm12071_vm8, %v12069_v14, 0.0 }
 0xad6   : > { %v11926_v52 = vadd.f32 %v11921_v25, %v11890_v61 }
 0xad7   : > { %v12076_v9 = vadd.f32 %v12075_v53, %v12074_v41 }
 0xad8   : > { %v11951_v1 = vpop.permute.xlu1 %11950 }
 0xad9   : > { %v11957_v11 = vmul.f32 %v11951_v1, %v11932_v4  ;;  %v12078_v35 = vadd.f32 %v12077_v31, %v12076_v9  ;;  %v12090_v1 = vand.u32 127, %v12089_v58 }
 0xadb   : > { %v11962_v54 = vadd.f32 %v11957_v11, %v11926_v52  ;;  %vm12091_vm9 = vcmp.ge.s32.totalorder %v12090_v1, 8 }
 0xadd   : > { %v11987_v23 = vpop.permute.xlu1 %11986 }
 0xade   : > { %v11993_v12 = vmul.f32 %v11987_v23, %v11968_v24 }
 0xae0   : > { %v11998_v29 = vadd.f32 %v11993_v12, %v11962_v54 }
 0xae2   : > { %v12023_v22 = vpop.permute.xlu1 %12022 }
 0xae3   : > { %v12029_v26 = vmul.f32 %v12023_v22, %v12004_v60 }
 0xae5   : > { %v12034_v50 = vadd.f32 %v12029_v26, %v11998_v29 }
 0xae7   : > { %v12059_v34 = vpop.permute.xlu1 %12058 }
 0xae8   : > { %v12065_v18 = vmul.f32 %v12059_v34, %v12040_v38 }
 0xaea   : > { %v12070_v3 = vadd.f32 %v12065_v18, %v12034_v50 }
 0xaec   : > { %v12079_v0 = vsel %vm12071_vm8, %v12070_v3, 0.0 }
 0xaed   : > { %v12080_v7 = vadd.f32 %v12079_v0, %v12078_v35 }
 0xaef   : > { %v12081_v49 = vrot.slane %v12080_v7, 4 }
 0xaf1   : > { %v12082_v40 = vadd.f32 %v12081_v49, %v12080_v7 }
 0xaf3   : > { %v12083_v6 = vrot.slane %v12082_v40, 2 }
 0xaf5   : > { %v12084_v62 = vadd.f32 %v12083_v6, %v12082_v40 }
 0xaf7   : > { %v12085_v63 = vrot.slane %v12084_v62, 1 }
 0xaf9   : > { %v12086_v46 = vadd.f32 %v12085_v63, %v12084_v62 }
 0xafb   : > { %v12088_v19 = vadd.f32 %v12087_v42, %v12086_v46 }
 0xafd   : > { %v12092_v39 = vmax.f32 %v12088_v19, 0.0 }
 0xaff   : > { %v12093_v43 = vsel %vm12091_vm9, %v12092_v39, %v12088_v19 }
 0xb00   : > { %12095 = vst.msk [vmem:[%s609_s19] sm:$0x1] %vm12094_vm10, %v12093_v43 }
 0xb01 PF: > { %s30_s18 = sadd.s32 1, %s16790_s18  }
 0xb02   : > { %p27_p13 = scmp.ge.s32.totalorder %s30_s18, 4  }
 0xb04   :  { %29 = sbr.rel (!%p27_p13) target bundleno = 7 (0x7), region = 628 }
 0xb09   :  { %12113 = vsyncpa [#allocation5], 1 }
 0xb0a   :  { %12115 = vsyncpa [#allocation5 + $0x1], 1 }
 0xb0b   :  { %12116 = vsyncpa [#allocation7], 1 }
 0xb0c   :  { %12117 = vsyncpa [#allocation10], 1 }
 0xb0d   :  { %12118 = vsyncpa [#allocation13], 1 }
 0xb0e   :  { %12119 = vsyncpa [#allocation16], 1 }

</bundles_post_ra>
